<compile_context>
chip_gen: v7x
topology: tpu7x:2x2x1
jax: 0.10.0
libtpu: 0.0.40
codegen_flags: <defaults>
</compile_context>

<pallas_src>
import functools
import math

import jax
import jax.numpy as jnp
from jax.experimental import pallas as pl
from jax.experimental.pallas import tpu as pltpu

_BN_EPS = 1e-5
_VMEM_LIMIT = 32 * 1024 * 1024        # safe on v5e/v6e/v7x (v7x: 64 MiB physical)
_TILE_BYTES = 4 * 1024 * 1024         # target bf16 bytes for the A-operand tile

_CP1 = pltpu.CompilerParams(dimension_semantics=("parallel",),
                            vmem_limit_bytes=_VMEM_LIMIT)
_CP2 = pltpu.CompilerParams(dimension_semantics=("parallel", "parallel"),
                            vmem_limit_bytes=_VMEM_LIMIT)


# ------------------------------ math helpers -------------------------------

def _mish_f32(x):
    # Mish(x) = x * tanh(softplus(x)); single-exp, sign-stable formulation.
    #   n = exp(-|x|)
    #   x >= 0: t = (1 + 2n) / (1 + 2n + 2n^2)
    #   x <  0: t = (2n + n^2) / (2 + 2n + n^2)
    n = jnp.exp(-jnp.abs(x))
    n2 = n * n
    pos = x >= 0.0
    num = jnp.where(pos, 1.0 + 2.0 * n, 2.0 * n + n2)
    den = jnp.where(pos, 1.0 + 2.0 * n + 2.0 * n2, 2.0 + 2.0 * n + n2)
    # den >= 1 everywhere, so the approx reciprocal (single EUP op) is safe.
    return x * num * pl.reciprocal(den, approx=True)


# ----------------------------- Pallas kernels ------------------------------

def _gemm_kernel(a_ref, w_ref, b_ref, o_ref):
    acc = jnp.dot(a_ref[...], w_ref[...], preferred_element_type=jnp.float32)
    o_ref[...] = _mish_f32(acc + b_ref[...]).astype(o_ref.dtype)


def _gemm2_kernel(a1_ref, w1_ref, a2_ref, w2_ref, b_ref, o_ref):
    # cat([a1, a2], -1) @ cat([w1; w2], 0)  ==  a1 @ w1 + a2 @ w2
    acc = jnp.dot(a1_ref[...], w1_ref[...], preferred_element_type=jnp.float32)
    acc = acc + jnp.dot(a2_ref[...], w2_ref[...],
                        preferred_element_type=jnp.float32)
    o_ref[...] = _mish_f32(acc + b_ref[...]).astype(o_ref.dtype)


def _conv3_kernel(x_ref, w_ref, b_ref, o_ref, *, taps, Ho, Wo, Cin):
    # In-kernel 9-tap K accumulation: the NHWC activation block is read once
    # from HBM; the 9x im2col duplication happens only inside VMEM.
    ct = o_ref.shape[-1]
    acc = jnp.zeros((Ho * Wo, ct), jnp.float32)
    for t, (ro, co) in enumerate(taps):
        a = x_ref[0, ro:ro + Ho, co:co + Wo, :].reshape(Ho * Wo, Cin)
        acc = acc + jnp.dot(a, w_ref[t * Cin:(t + 1) * Cin, :],
                            preferred_element_type=jnp.float32)
    o_ref[0] = _mish_f32(acc + b_ref[...]).astype(o_ref.dtype)


def _bottleneck_kernel(x_ref, w1_ref, b1_ref, w2_ref, b2_ref, o_ref, pad_ref,
                       *, H, W, Cmid, shortcut):
    # Fused cv1(1x1) + zero-pad + cv2(3x3, 9-tap) + residual per image; the
    # cv1 intermediate lives only in VMEM.
    x2d = x_ref[0]                                            # (H*W, Cin) bf16
    y1 = jnp.dot(x2d, w1_ref[...], preferred_element_type=jnp.float32)
    y1 = _mish_f32(y1 + b1_ref[...])
    pad_ref[...] = jnp.zeros_like(pad_ref)
    pad_ref[1:H + 1, 1:W + 1, :] = y1.reshape(H, W, Cmid).astype(pad_ref.dtype)
    ct = o_ref.shape[-1]
    acc = jnp.zeros((H * W, ct), jnp.float32)
    for t in range(9):
        kh, kw = t // 3, t % 3
        a = pad_ref[kh:kh + H, kw:kw + W, :].reshape(H * W, Cmid)
        acc = acc + jnp.dot(a, w2_ref[t * Cmid:(t + 1) * Cmid, :],
                            preferred_element_type=jnp.float32)
    y = _mish_f32(acc + b2_ref[...])
    if shortcut:
        y = y + x2d.astype(jnp.float32)
    o_ref[0] = y.astype(o_ref.dtype)


# ----------------------------- tiling helpers ------------------------------

def _round_up(a, b):
    return -(-a // b) * b


def _pick_tile_m(M, K):
    """256-aligned M tiles, >=2 (large M: >=4) grid steps, ~_TILE_BYTES/tile."""
    if M <= 256:
        return M, M
    cap = (_TILE_BYTES // max(2 * K, 1)) // 256 * 256
    cap = min(max(cap, 256), 2048)
    steps = 4 if M >= 2048 else 2
    want = _round_up((M + steps - 1) // steps, 256)
    tile = min(cap, max(256, want))
    t = tile
    while t >= 256:                      # prefer an exact 256-granular divisor
        if M % t == 0:
            return t, M
        t -= 256
    if M % 128 == 0:
        return 128, M
    return tile, _round_up(M, tile)      # pad fallback (never hit here)


def _pick_tile_n(cout, M):
    """Tile Cout: keeps big weights out of full-resident VMEM and gives the
    tiny-M late layers >=2 grid steps."""
    if cout >= 512 and cout % 256 == 0:
        return 256
    if cout >= 256 and cout % 128 == 0 and M <= 256:
        return 128
    return cout


# ------------------------------ GEMM wrappers -------------------------------

def fused_conv_gemm(a, w, bias):
    """out[m,c] = mish(sum_k a[m,k]*w[k,c] + bias[c]) (BN scale folded in w)."""
    M, K = a.shape
    Kw, Cout = w.shape
    assert K == Kw, (K, Kw)
    tile_m, Mp = _pick_tile_m(M, K)
    tile_n = _pick_tile_n(Cout, M)
    if Mp != M:
        a = jnp.pad(a, ((0, Mp - M), (0, 0)))
    grid = (Mp // tile_m, Cout // tile_n)
    bias2 = bias.reshape(1, Cout).astype(jnp.float32)
    out = pl.pallas_call(
        _gemm_kernel,
        out_shape=jax.ShapeDtypeStruct((Mp, Cout), jnp.bfloat16),
        grid=grid,
        in_specs=[pl.BlockSpec((tile_m, K), lambda i, j: (i, 0)),
                  pl.BlockSpec((K, tile_n), lambda i, j: (0, j)),
                  pl.BlockSpec((1, tile_n), lambda i, j: (0, j))],
        out_specs=pl.BlockSpec((tile_m, tile_n), lambda i, j: (i, j)),
        compiler_params=_CP2,
    )(a.astype(jnp.bfloat16), w, bias2)
    return out[:M] if Mp != M else out


def fused_cat_gemm(a1, w1, a2, w2, bias):
    """mish(cat([a1,a2],-1) @ cat([w1;w2],0) + bias) without the concat."""
    M, K1 = a1.shape
    M2, K2 = a2.shape
    assert M == M2
    Cout = w1.shape[1]
    tile_m, Mp = _pick_tile_m(M, K1 + K2)
    tile_n = _pick_tile_n(Cout, M)
    if Mp != M:
        a1 = jnp.pad(a1, ((0, Mp - M), (0, 0)))
        a2 = jnp.pad(a2, ((0, Mp - M), (0, 0)))
    grid = (Mp // tile_m, Cout // tile_n)
    bias2 = bias.reshape(1, Cout).astype(jnp.float32)
    out = pl.pallas_call(
        _gemm2_kernel,
        out_shape=jax.ShapeDtypeStruct((Mp, Cout), jnp.bfloat16),
        grid=grid,
        in_specs=[pl.BlockSpec((tile_m, K1), lambda i, j: (i, 0)),
                  pl.BlockSpec((K1, tile_n), lambda i, j: (0, j)),
                  pl.BlockSpec((tile_m, K2), lambda i, j: (i, 0)),
                  pl.BlockSpec((K2, tile_n), lambda i, j: (0, j)),
                  pl.BlockSpec((1, tile_n), lambda i, j: (0, j))],
        out_specs=pl.BlockSpec((tile_m, tile_n), lambda i, j: (i, j)),
        compiler_params=_CP2,
    )(a1.astype(jnp.bfloat16), w1, a2.astype(jnp.bfloat16), w2, bias2)
    return out[:M] if Mp != M else out


def _conv3_pallas(xin, w, bias, taps, Ho, Wo, Cin):
    N, HqP, Wq, _ = xin.shape
    K, Cout = w.shape
    tile_n = _pick_tile_n(Cout, Ho * Wo)
    gn = Cout // tile_n
    bias2 = bias.reshape(1, Cout).astype(jnp.float32)
    kernel = functools.partial(_conv3_kernel, taps=tuple(taps),
                               Ho=Ho, Wo=Wo, Cin=Cin)
    # Weight-major grid order for weight-heavy layers: the big W tile is then
    # DMA'd once per Cout tile instead of once per image.
    weight_major = (K * Cout > N * HqP * Wq * Cin) and gn > 1
    if weight_major:
        grid = (gn, N)
        xm = lambda j, n: (n, 0, 0, 0)
        wm = lambda j, n: (0, j)
        om = lambda j, n: (n, 0, j)
    else:
        grid = (N, gn)
        xm = lambda n, j: (n, 0, 0, 0)
        wm = lambda n, j: (0, j)
        om = lambda n, j: (n, 0, j)
    out = pl.pallas_call(
        kernel,
        out_shape=jax.ShapeDtypeStruct((N, Ho * Wo, Cout), jnp.bfloat16),
        grid=grid,
        in_specs=[pl.BlockSpec((1, HqP, Wq, Cin), xm),
                  pl.BlockSpec((K, tile_n), wm),
                  pl.BlockSpec((1, tile_n), wm)],
        out_specs=pl.BlockSpec((1, Ho * Wo, tile_n), om),
        compiler_params=_CP2,
    )(xin.astype(jnp.bfloat16), w, bias2)
    return out


# ------------------------------ JAX glue -----------------------------------

def _im2col(x, k, stride, pad):
    # Fallback for the Cin=3 stem layer only (K = 27, negligible duplication).
    N, H, W, C = x.shape
    x = jnp.pad(x, ((0, 0), (pad, pad), (pad, pad), (0, 0)))
    Ho = (H + 2 * pad - k) // stride + 1
    Wo = (W + 2 * pad - k) // stride + 1
    cols = [x[:, i:i + stride * Ho:stride, j:j + stride * Wo:stride, :]
            for i in range(k) for j in range(k)]
    patches = jnp.concatenate(cols, axis=-1)
    return patches.reshape(N * Ho * Wo, k * k * C), (N, Ho, Wo)


def run_conv3(x, w, bias, stride):
    """3x3 conv + folded BN + Mish, NHWC activations, stride in {1, 2}."""
    N, H, W, C = x.shape
    if C < 8:
        patches, (N, Ho, Wo) = _im2col(x, 3, stride, 1)
        return fused_conv_gemm(patches, w, bias).reshape(N, Ho, Wo, -1)
    xp = jnp.pad(x, ((0, 0), (1, 1), (1, 1), (0, 0)))
    if stride == 1:
        Ho, Wo = H, W
        taps = [(kh, kw) for kh in range(3) for kw in range(3)]
        xin = xp
    else:
        assert stride == 2 and H % 2 == 0 and W % 2 == 0
        Ho, Wo = H // 2, W // 2
        Hq, Wq = Ho + 1, Wo + 1
        # Space-to-depth phase split (one cheap XLA relayout): every 3x3/s2
        # tap becomes a contiguous (unstrided) shifted slice of one phase.
        xin = (xp.reshape(N, Hq, 2, Wq, 2, C)
                 .transpose(0, 2, 4, 1, 3, 5)
                 .reshape(N, 4 * Hq, Wq, C))
        taps = [(((kh % 2) * 2 + (kw % 2)) * Hq + kh // 2, kw // 2)
                for kh in range(3) for kw in range(3)]
    out = _conv3_pallas(xin, w, bias, taps, Ho, Wo, C)
    return out.reshape(N, Ho, Wo, -1)


def bottleneck_fused(x, p):
    """Fused BottleNeck: mish(cv2_3x3(mish(cv1_1x1(x)))) [+ x]."""
    N, H, W, C = x.shape
    cv1, cv2 = p["cv1"], p["cv2"]
    Cmid = cv1["w"].shape[1]
    Cout = cv2["w"].shape[1]
    kernel = functools.partial(_bottleneck_kernel, H=H, W=W, Cmid=Cmid,
                               shortcut=p["shortcut"])
    out = pl.pallas_call(
        kernel,
        out_shape=jax.ShapeDtypeStruct((N, H * W, Cout), jnp.bfloat16),
        grid=(N,),
        in_specs=[pl.BlockSpec((1, H * W, C), lambda n: (n, 0, 0)),
                  pl.BlockSpec((C, Cmid), lambda n: (0, 0)),
                  pl.BlockSpec((1, Cmid), lambda n: (0, 0)),
                  pl.BlockSpec((9 * Cmid, Cout), lambda n: (0, 0)),
                  pl.BlockSpec((1, Cout), lambda n: (0, 0))],
        out_specs=pl.BlockSpec((1, H * W, Cout), lambda n: (n, 0, 0)),
        scratch_shapes=[pltpu.VMEM((H + 2, W + 2, Cmid), jnp.bfloat16)],
        compiler_params=_CP1,
    )(x.reshape(N, H * W, C).astype(jnp.bfloat16),
      cv1["w"], cv1["bias"].reshape(1, Cmid).astype(jnp.float32),
      cv2["w"], cv2["bias"].reshape(1, Cout).astype(jnp.float32))
    return out.reshape(N, H, W, Cout)


# ------------------------- parameter construction --------------------------

def width_grow(channel, multiple):
    return int(math.ceil(channel * multiple / 8) * 8)


def depth_grow(n, multiple):
    return max(round(n * multiple), 1)


def _fold_bn(gamma, beta, mean, var):
    scale = gamma / jnp.sqrt(var + _BN_EPS)
    bias = beta - mean * scale
    return scale, bias


def make_cbr(key, cin, cout, k):
    kw, kg, kb = jax.random.split(key, 3)
    w = jax.random.normal(kw, (k, k, cin, cout), jnp.float32) / math.sqrt(k * k * cin)
    gamma = 1.0 + 0.1 * jax.random.normal(kg, (cout,), jnp.float32)
    beta = 0.1 * jax.random.normal(kb, (cout,), jnp.float32)
    scale, bias = _fold_bn(gamma, beta, jnp.zeros((cout,), jnp.float32),
                           jnp.ones((cout,), jnp.float32))
    # fold BN scale directly into the weight columns; (kh, kw, cin) row order
    w_folded = (w.reshape(k * k * cin, cout) * scale[None, :]).astype(jnp.bfloat16)
    return {"w": w_folded, "k": k, "bias": bias}


def make_bottleneck(key, c1, c2, e=0.5, shortcut=True):
    c_ = int(c2 * e)
    k1, k2 = jax.random.split(key)
    return {"cv1": make_cbr(k1, c1, c_, 1),
            "cv2": make_cbr(k2, c_, c2, 3),
            "shortcut": bool(shortcut and c1 == c2)}


def make_csp(key, c1, c2, n):
    c_ = int(c2 * 0.5)
    keys = jax.random.split(key, 6 + n)
    w2 = jax.random.normal(keys[1], (c1, c_), jnp.float32) / math.sqrt(c1)
    w3 = jax.random.normal(keys[2], (c_, c_), jnp.float32) / math.sqrt(c_)
    bn_gamma = 1.0 + 0.1 * jax.random.normal(keys[4], (2 * c_,), jnp.float32)
    bn_beta = 0.1 * jax.random.normal(keys[5], (2 * c_,), jnp.float32)
    bn_scale, bn_bias = _fold_bn(bn_gamma, bn_beta,
                                 jnp.zeros((2 * c_,), jnp.float32),
                                 jnp.ones((2 * c_,), jnp.float32))
    # BN over cat([y1, y2]) is per-channel -> its slices (and Mish) fold into
    # the cv3 / cv2 plain-conv GEMMs.
    cv3 = {"w": (w3 * bn_scale[None, :c_]).astype(jnp.bfloat16), "k": 1,
           "bias": bn_bias[:c_]}
    cv2 = {"w": (w2 * bn_scale[None, c_:]).astype(jnp.bfloat16), "k": 1,
           "bias": bn_bias[c_:]}
    cv4 = make_cbr(keys[3], 2 * c_, c2, 1)
    return {"c_": c_,
            "cv1": make_cbr(keys[0], c1, c_, 1),
            "cv2": cv2, "cv3": cv3, "cv4": cv4,
            "cv4_w1": cv4["w"][:c_], "cv4_w2": cv4["w"][c_:],
            "m": [make_bottleneck(keys[6 + i], c_, c_, e=1.0) for i in range(n)]}


def make_backbone(key, in_channel=3, depth_multiples=0.33, width_multiples=0.5):
    c32 = width_grow(32, width_multiples)
    c64 = width_grow(64, width_multiples)
    c128 = width_grow(128, width_multiples)
    c256 = width_grow(256, width_multiples)
    c512 = width_grow(512, width_multiples)
    c1024 = width_grow(1024, width_multiples)
    ks = jax.random.split(key, 11)
    return {
        "l1_c1": make_cbr(ks[0], in_channel, c32, 3),
        "l1_c2": make_cbr(ks[1], c32, c64, 3),
        "l1_b": make_bottleneck(ks[2], c64, c64, e=0.5),
        "l2_c": make_cbr(ks[3], c64, c128, 3),
        "l2_csp": make_csp(ks[4], c128, c128, depth_grow(2, depth_multiples)),
        "l3_c": make_cbr(ks[5], c128, c256, 3),
        "l3_csp": make_csp(ks[6], c256, c256, depth_grow(8, depth_multiples)),
        "l4_c": make_cbr(ks[7], c256, c512, 3),
        "l4_csp": make_csp(ks[8], c512, c512, depth_grow(8, depth_multiples)),
        "l5_c": make_cbr(ks[9], c512, c1024, 3),
        "l5_csp": make_csp(ks[10], c1024, c1024, depth_grow(4, depth_multiples)),
    }


# ------------------------------ forward pass -------------------------------

def cbr_fwd(x, p, stride=1):
    if p["k"] == 1:
        N, H, W, C = x.shape
        out = fused_conv_gemm(x.reshape(N * H * W, C), p["w"], p["bias"])
        return out.reshape(N, H, W, -1)
    return run_conv3(x, p["w"], p["bias"], stride)


def csp_fwd(x, p):
    y = cbr_fwd(x, p["cv1"])
    for bp in p["m"]:
        y = bottleneck_fused(y, bp)
    y1 = cbr_fwd(y, p["cv3"])    # plain conv + folded BN slice + Mish
    y2 = cbr_fwd(x, p["cv2"])    # plain conv + folded BN slice + Mish
    N, H, W, _ = y1.shape
    out = fused_cat_gemm(y1.reshape(N * H * W, -1), p["cv4_w1"],
                         y2.reshape(N * H * W, -1), p["cv4_w2"],
                         p["cv4"]["bias"])
    return out.reshape(N, H, W, -1)


def backbone_fwd(params, x_nchw):
    x = jnp.transpose(x_nchw, (0, 2, 3, 1)).astype(jnp.bfloat16)  # NCHW->NHWC
    x = cbr_fwd(x, params["l1_c1"], 1)
    x = cbr_fwd(x, params["l1_c2"], 2)
    x = bottleneck_fused(x, params["l1_b"])
    x = cbr_fwd(x, params["l2_c"], 2)
    x = csp_fwd(x, params["l2_csp"])
    c3 = csp_fwd(cbr_fwd(x, params["l3_c"], 2), params["l3_csp"])
    c4 = csp_fwd(cbr_fwd(c3, params["l4_c"], 2), params["l4_csp"])
    c5 = csp_fwd(cbr_fwd(c4, params["l5_c"], 2), params["l5_csp"])
    to_nchw = lambda t: jnp.transpose(t, (0, 3, 1, 2)).astype(jnp.float32)
    return [to_nchw(c3), to_nchw(c4), to_nchw(c5)]


# --------------------------------- main -------------------------------------

if __name__ == "__main__":
    key = jax.random.PRNGKey(0)
    pkey, xkey = jax.random.split(key)
    params = make_backbone(pkey)
    x = jax.random.normal(xkey, (2, 3, 64, 64), jnp.float32)  # NCHW like PyTorch

    outs = backbone_fwd(params, x)
    outs = [jax.block_until_ready(o) for o in outs]

    expected = [(2, 128, 8, 8), (2, 256, 4, 4), (2, 512, 2, 2)]
    got = [tuple(o.shape) for o in outs]
    assert got == expected, (got, expected)
    assert all(bool(jnp.all(jnp.isfinite(o))) for o in outs)
    print("KERNEL_OK")
</pallas_src>

<mosaic_0001>
module attributes {stable_mosaic.version = 11 : i64} {
  func.func @_gemm_kernel(%arg0: i32, %arg1: i32, %arg2: memref<2048x27xbf16, #tpu.memory_space<vmem>>, %arg3: memref<27x16xbf16, #tpu.memory_space<vmem>>, %arg4: memref<1x16xf32, #tpu.memory_space<vmem>>, %arg5: memref<2048x16xbf16, #tpu.memory_space<vmem>>) attributes {dimension_semantics = [#tpu.dimension_semantics<parallel>, #tpu.dimension_semantics<parallel>], iteration_bounds = array<i64: 4, 1>, scalar_prefetch = 0 : i64, scratch_operands = 0 : i64, tpu.core_type = #tpu.core_type<tc>, window_params = [{transform_indices = @transform_0, window_bounds = array<i64: 2048, 27>}, {transform_indices = @transform_1, window_bounds = array<i64: 27, 16>}, {transform_indices = @transform_2, window_bounds = array<i64: 1, 16>}, {transform_indices = @transform_3, window_bounds = array<i64: 2048, 16>}]} {
    %c0 = arith.constant 0 : index
    %c0_0 = arith.constant 0 : index
    %0 = vector.load %arg2[%c0, %c0_0] : memref<2048x27xbf16, #tpu.memory_space<vmem>>, vector<2048x27xbf16>
    %c0_1 = arith.constant 0 : index
    %c0_2 = arith.constant 0 : index
    %1 = vector.load %arg3[%c0_1, %c0_2] : memref<27x16xbf16, #tpu.memory_space<vmem>>, vector<27x16xbf16>
    %cst = arith.constant dense<0.000000e+00> : vector<2048x16xf32>
    %2 = tpu.matmul %0, %1, %cst {dimension_numbers = #tpu.dot_dimension_numbers<[1], [0], [0], [1], [0, 0, 1, 1], [], []>} : vector<2048x27xbf16>, vector<27x16xbf16>, vector<2048x16xf32> -> vector<2048x16xf32>
    %c0_3 = arith.constant 0 : index
    %c0_4 = arith.constant 0 : index
    %3 = vector.load %arg4[%c0_3, %c0_4] : memref<1x16xf32, #tpu.memory_space<vmem>>, vector<1x16xf32>
    %4 = vector.broadcast %3 : vector<1x16xf32> to vector<2048x16xf32>
    %5 = arith.addf %2, %4 : vector<2048x16xf32>
    %6 = math.absf %5 : vector<2048x16xf32>
    %cst_5 = arith.constant 0.000000e+00 : f32
    %7 = vector.broadcast %cst_5 : f32 to vector<2048x16xf32>
    %8 = arith.subf %7, %6 : vector<2048x16xf32>
    %9 = math.exp %8 : vector<2048x16xf32>
    %10 = arith.mulf %9, %9 : vector<2048x16xf32>
    %cst_6 = arith.constant 0.000000e+00 : f32
    %11 = vector.broadcast %cst_6 : f32 to vector<2048x16xf32>
    %12 = arith.cmpf oge, %5, %11 : vector<2048x16xf32>
    %cst_7 = arith.constant 2.000000e+00 : f32
    %13 = vector.broadcast %cst_7 : f32 to vector<2048x16xf32>
    %14 = arith.mulf %13, %9 : vector<2048x16xf32>
    %cst_8 = arith.constant 1.000000e+00 : f32
    %15 = vector.broadcast %cst_8 : f32 to vector<2048x16xf32>
    %16 = arith.addf %15, %14 : vector<2048x16xf32>
    %cst_9 = arith.constant 2.000000e+00 : f32
    %17 = vector.broadcast %cst_9 : f32 to vector<2048x16xf32>
    %18 = arith.mulf %17, %9 : vector<2048x16xf32>
    %19 = arith.addf %18, %10 : vector<2048x16xf32>
    %20 = arith.select %12, %16, %19 : vector<2048x16xi1>, vector<2048x16xf32>
    %cst_10 = arith.constant 2.000000e+00 : f32
    %21 = vector.broadcast %cst_10 : f32 to vector<2048x16xf32>
    %22 = arith.mulf %21, %9 : vector<2048x16xf32>
    %cst_11 = arith.constant 1.000000e+00 : f32
    %23 = vector.broadcast %cst_11 : f32 to vector<2048x16xf32>
    %24 = arith.addf %23, %22 : vector<2048x16xf32>
    %cst_12 = arith.constant 2.000000e+00 : f32
    %25 = vector.broadcast %cst_12 : f32 to vector<2048x16xf32>
    %26 = arith.mulf %25, %10 : vector<2048x16xf32>
    %27 = arith.addf %24, %26 : vector<2048x16xf32>
    %cst_13 = arith.constant 2.000000e+00 : f32
    %28 = vector.broadcast %cst_13 : f32 to vector<2048x16xf32>
    %29 = arith.mulf %28, %9 : vector<2048x16xf32>
    %cst_14 = arith.constant 2.000000e+00 : f32
    %30 = vector.broadcast %cst_14 : f32 to vector<2048x16xf32>
    %31 = arith.addf %30, %29 : vector<2048x16xf32>
    %32 = arith.addf %31, %10 : vector<2048x16xf32>
    %33 = arith.select %12, %27, %32 : vector<2048x16xi1>, vector<2048x16xf32>
    %34 = arith.mulf %5, %20 : vector<2048x16xf32>
    %35 = tpu.reciprocal %33 {approx = true} : vector<2048x16xf32> -> vector<2048x16xf32>
    %36 = arith.mulf %34, %35 : vector<2048x16xf32>
    %37 = arith.truncf %36 : vector<2048x16xf32> to vector<2048x16xbf16>
    %c0_15 = arith.constant 0 : index
    %c0_16 = arith.constant 0 : index
    %38 = vector.load %arg5[%c0_15, %c0_16] : memref<2048x16xbf16, #tpu.memory_space<vmem>>, vector<2048x16xbf16>
    tpu.vector_store %arg5[%c0_15, %c0_16], %37 {strides = array<i32>} : memref<2048x16xbf16, #tpu.memory_space<vmem>>, vector<2048x16xbf16>,
    return
  }
  func.func @transform_0(%arg0: i32, %arg1: i32) -> (i32, i32) {
    %c0_i32 = arith.constant 0 : i32
    %c0_i32_0 = arith.constant 0 : i32
    return %arg0, %c0_i32 : i32, i32
  }
  func.func @transform_1(%arg0: i32, %arg1: i32) -> (i32, i32) {
    %c0_i32 = arith.constant 0 : i32
    %c0_i32_0 = arith.constant 0 : i32
    return %c0_i32, %arg1 : i32, i32
  }
  func.func @transform_2(%arg0: i32, %arg1: i32) -> (i32, i32) {
    %c0_i32 = arith.constant 0 : i32
    %c0_i32_0 = arith.constant 0 : i32
    return %c0_i32, %arg1 : i32, i32
  }
  func.func @transform_3(%arg0: i32, %arg1: i32) -> (i32, i32) {
    %c0_i32 = arith.constant 0 : i32
    return %arg0, %arg1 : i32, i32
  }
}

</mosaic_0001>

<bundles_post_ra>
// kernel: tpu_custom_call.1
= control target key start
LH: loop header
LB: loop body
LE: loop exit
PB: predicated region body
PF: predicated region fallthrough
CT: control target
= control target key end

     0   :  { %s10997_s12 = smov 0   ;;  %s10999_s13 = smov 0   ;;  %s15168_s0 = inlined_call_operand.vmem [shape: bf16[8192,27], index: 0, kind: input, shape index: {}]   ;;  %s15169_s1 = inlined_call_operand.vmem [shape: bf16[27,16], index: 1, kind: input, shape index: {}]   ;;  %s15170_s2 = inlined_call_operand.vmem [shape: f32[1,16], index: 2, kind: input, shape index: {}]   ;;  %s15171_s3 = inlined_call_operand.vmem [shape: bf16[8192,16], index: 3, kind: output, shape index: {}]  }
   0x1   :  { %s11001_s14 = smov 0  }
   0x2 LB: > { %s25_s15 = sadd.s32 1, %s10970_s13  ;;  %p8590_p0 = scmp.ge.s32.totalorder %s10974_s14, 1  ;;  %s10974_s14 = sphi %s11001_s14, %s13_s14   ;;  %s10970_s13 = sphi %s10999_s13, %s15225_s13   ;;  %s10966_s12 = sphi %s10997_s12, %s15224_s12  }
   0x3   : > { %p27_p1 = scmp.ge.s32.totalorder %s25_s15, 4  ;;  %p169_p2 = scmp.lt.s32.totalorder %s10974_s14, 5 }
   0x5   : > { %s15227_s15 = smov (%p27_p1, %s25_s15), 0  ;;  %p170_p3 = pnand %p8590_p0, %p169_p2 }
   0x7   : > { %173 = sbr.rel (%p170_p3) target bundleno = 1541 (0x605), region = 32 }
   0xe   : > { %v9787_v0 = vld [vmem:[%s15169_s1] sm:$0xff]   ;;  %vm1529_vm0 = vcmask 1044480   ;;  %v9788_v1 = vld [vmem:[%s15169_s1 + $0x8] sm:$0x3f]   ;;  %vm1530_vm1 = vcmask 1045504   ;;  %s8591_s20 = sshll.u32 %s10966_s12, 8 }
   0xf   : > { %9498 = vmatprep.subr.bf16.mxu0 %v9787_v0  ;;  %9758 = vmatprep.subr.bf16.mxu1 %v9787_v0  ;;  %v10976_v2 = vmov 65535   ;;  %p204_p4 = scmp.lt.s32.totalorder %s8591_s20, 1023  ;;  %vm1144_vm2 = vcmask 220160   ;;  %vm8225_vm9 = vcmask 125952  }
  0x10   : > { %9499 = vmatpush3.bf16.msra.mxu0 %v9787_v0  ;;  %9760 = vmatpush3.bf16.msra.mxu1 %v9787_v0  ;;  %v1531_v3 = vsel %vm1529_vm0, 4294967295, %v10976_v2 }
  0x11   : > { %v1532_v4 = vsel %vm1530_vm1, %v1531_v3, 0  ;;  %s15229_s20 = smov (!%p204_p4, %s8591_s20), 1023 }
  0x12   : > { %v1534_v5 = vand.u32 %v9788_v1, %v1532_v4  ;;  %s8592_s21 = sshll.u32 %s15229_s20, 2 }
  0x13   : > { %s11029_s24 = scalar_lea.vmem %s15168_s0, %s8592_s21  ;;  %s11437_s29 = scalar_lea.vmem %s15171_s3, %s8592_s21 }
  0x14   : > { %9500 = vmatprep.subr.bf16.mxu0 %v1534_v5  ;;  %9759 = vmatprep.subr.bf16.mxu1 %v1534_v5  ;;  %v9789_v6 = vld [vmem:[%s11029_s24] sm:$0xff]   ;;  %v9791_v8 = vld [vmem:[%s11029_s24 + $0x8] sm:$0xff]   ;;  %v9793_v10 = vld [vmem:[%s11029_s24 + $0x10] sm:$0xff]  }
  0x15   : > { %9501 = vmatpush3.bf16.msra.mxu0 %v1534_v5  ;;  %9761 = vmatpush3.bf16.msra.mxu1 %v1534_v5  ;;  %v9790_v7 = vld [vmem:[%s11029_s24 + $0x200] sm:$0xff]   ;;  %v9792_v9 = vld [vmem:[%s11029_s24 + $0x208] sm:$0xff]   ;;  %v9794_v11 = vld [vmem:[%s11029_s24 + $0x210] sm:$0xff]  }
  0x16   : > { %9502 = vmatprep.mubr.msk.bf16.mxu0 %vm1144_vm2, %v9789_v6  ;;  %9630 = vmatprep.mubr.msk.bf16.mxu1 %vm1144_vm2, %v9790_v7  ;;  %v9795_v12 = vld [vmem:[%s11029_s24 + $0x18] sm:$0xff]   ;;  %v9797_v14 = vld [vmem:[%s11029_s24 + $0x20] sm:$0xff]   ;;  %v9799_v16 = vld [vmem:[%s11029_s24 + $0x28] sm:$0xff]  }
  0x17   : > { %v9796_v13 = vld [vmem:[%s11029_s24 + $0x218] sm:$0xff]   ;;  %v9798_v15 = vld [vmem:[%s11029_s24 + $0x220] sm:$0xff]   ;;  %v9800_v17 = vld [vmem:[%s11029_s24 + $0x228] sm:$0xff]  }
  0x18   : > { %9503 = vmatmul.mubr.msk.bf16.vlgmr.msra.gmra.mrb[0].mxu0 %vm1144_vm2, %v9791_v8  ;;  %9631 = vmatmul.mubr.msk.bf16.vlgmr.msra.gmra.mrb[0].mxu1 %vm1144_vm2, %v9792_v9  ;;  %v9801_v18 = vld [vmem:[%s11029_s24 + $0x30] sm:$0xff]   ;;  %v9803_v20 = vld [vmem:[%s11029_s24 + $0x38] sm:$0xff]   ;;  %v9805_v22 = vld [vmem:[%s11029_s24 + $0x40] sm:$0xff]  }
  0x19   : > { %9506 = vmatprep.mubr.msk.bf16.mxu0 %vm1144_vm2, %v9793_v10  ;;  %9634 = vmatprep.mubr.msk.bf16.mxu1 %vm1144_vm2, %v9794_v11  ;;  %v9802_v19 = vld [vmem:[%s11029_s24 + $0x230] sm:$0xff]   ;;  %v9804_v21 = vld [vmem:[%s11029_s24 + $0x238] sm:$0xff]   ;;  %v9806_v23 = vld [vmem:[%s11029_s24 + $0x240] sm:$0xff]  }
  0x1a   : > { %v9807_v24 = vld [vmem:[%s11029_s24 + $0x48] sm:$0xff]   ;;  %v9809_v26 = vld [vmem:[%s11029_s24 + $0x50] sm:$0xff]   ;;  %v9811_v28 = vld [vmem:[%s11029_s24 + $0x58] sm:$0xff]  }
  0x1b   : > { %v9808_v25 = vld [vmem:[%s11029_s24 + $0x248] sm:$0xff]   ;;  %v9810_v27 = vld [vmem:[%s11029_s24 + $0x250] sm:$0xff]   ;;  %v9812_v29 = vld [vmem:[%s11029_s24 + $0x258] sm:$0xff]  }
  0x1c   : > { %v9813_v30 = vld [vmem:[%s11029_s24 + $0x60] sm:$0xff]   ;;  %v9815_v32 = vld [vmem:[%s11029_s24 + $0x68] sm:$0xff]   ;;  %v9817_v34 = vld [vmem:[%s11029_s24 + $0x70] sm:$0xff]  }
  0x1d   : > { %v9814_v31 = vld [vmem:[%s11029_s24 + $0x260] sm:$0xff]   ;;  %v9816_v33 = vld [vmem:[%s11029_s24 + $0x268] sm:$0xff]   ;;  %v9818_v35 = vld [vmem:[%s11029_s24 + $0x270] sm:$0xff]  }
  0x1e   : > { %v9819_v36 = vld [vmem:[%s11029_s24 + $0x78] sm:$0xff]   ;;  %v9821_v38 = vld [vmem:[%s11029_s24 + $0x80] sm:$0xff]   ;;  %v9823_v40 = vld [vmem:[%s11029_s24 + $0x88] sm:$0xff]  }
  0x1f   : > { %v9820_v37 = vld [vmem:[%s11029_s24 + $0x278] sm:$0xff]   ;;  %v9822_v39 = vld [vmem:[%s11029_s24 + $0x280] sm:$0xff]   ;;  %v9824_v41 = vld [vmem:[%s11029_s24 + $0x288] sm:$0xff]  }
  0x20   : > { %9507 = vmatmul.mubr.msk.bf16.gmra.mrb[4].mxu0 %vm1144_vm2, %v9795_v12  ;;  %9635 = vmatmul.mubr.msk.bf16.gmra.mrb[4].mxu1 %vm1144_vm2, %v9796_v13  ;;  %v9825_v42 = vld [vmem:[%s11029_s24 + $0x90] sm:$0xff]   ;;  %v9827_v44 = vld [vmem:[%s11029_s24 + $0x98] sm:$0xff]   ;;  %v9829_v46 = vld [vmem:[%s11029_s24 + $0xa0] sm:$0xff]  }
  0x21   : > { %9510 = vmatprep.mubr.msk.bf16.mxu0 %vm1144_vm2, %v9797_v14  ;;  %9638 = vmatprep.mubr.msk.bf16.mxu1 %vm1144_vm2, %v9798_v15  ;;  %v9826_v43 = vld [vmem:[%s11029_s24 + $0x290] sm:$0xff]   ;;  %v9828_v45 = vld [vmem:[%s11029_s24 + $0x298] sm:$0xff]   ;;  %v9830_v47 = vld [vmem:[%s11029_s24 + $0x2a0] sm:$0xff]  }
  0x22   : > { %v9831_v48 = vld [vmem:[%s11029_s24 + $0xa8] sm:$0xff]   ;;  %v9833_v50 = vld [vmem:[%s11029_s24 + $0xb0] sm:$0xff]   ;;  %v9835_v52 = vld [vmem:[%s11029_s24 + $0xb8] sm:$0xff]  }
  0x23   : > { %v9832_v49 = vld [vmem:[%s11029_s24 + $0x2a8] sm:$0xff]   ;;  %v9834_v51 = vld [vmem:[%s11029_s24 + $0x2b0] sm:$0xff]   ;;  %v9836_v53 = vld [vmem:[%s11029_s24 + $0x2b8] sm:$0xff]  }
  0x24   : > { %v9837_v54 = vld [vmem:[%s11029_s24 + $0xc0] sm:$0xff]   ;;  %v9839_v56 = vld [vmem:[%s11029_s24 + $0xc8] sm:$0xff]   ;;  %v9841_v58 = vld [vmem:[%s11029_s24 + $0xd0] sm:$0xff]  }
  0x25   : > { %v9838_v55 = vld [vmem:[%s11029_s24 + $0x2c0] sm:$0xff]   ;;  %v9840_v57 = vld [vmem:[%s11029_s24 + $0x2c8] sm:$0xff]   ;;  %v9842_v59 = vld [vmem:[%s11029_s24 + $0x2d0] sm:$0xff]  }
  0x26   : > { %v9843_v60 = vld [vmem:[%s11029_s24 + $0xd8] sm:$0xff]   ;;  %v9845_v62 = vld [vmem:[%s11029_s24 + $0xe0] sm:$0xff]   ;;  %v9847_v0 = vld [vmem:[%s11029_s24 + $0xe8] sm:$0xff]  }
  0x27   : > { %v9844_v61 = vld [vmem:[%s11029_s24 + $0x2d8] sm:$0xff]   ;;  %v9846_v63 = vld [vmem:[%s11029_s24 + $0x2e0] sm:$0xff]   ;;  %v9848_v1 = vld [vmem:[%s11029_s24 + $0x2e8] sm:$0xff]  }
  0x28   : > { %9511 = vmatmul.mubr.msk.bf16.gmra.mrb[8].mxu0 %vm1144_vm2, %v9799_v16  ;;  %9639 = vmatmul.mubr.msk.bf16.gmra.mrb[8].mxu1 %vm1144_vm2, %v9800_v17  ;;  %v9849_v2 = vld [vmem:[%s11029_s24 + $0xf0] sm:$0xff]   ;;  %v9851_v4 = vld [vmem:[%s11029_s24 + $0xf8] sm:$0xff]   ;;  %v9853_v6 = vld [vmem:[%s11029_s24 + $0x100] sm:$0xff]  }
  0x29   : > { %9514 = vmatprep.mubr.msk.bf16.mxu0 %vm1144_vm2, %v9801_v18  ;;  %9642 = vmatprep.mubr.msk.bf16.mxu1 %vm1144_vm2, %v9802_v19  ;;  %v9850_v3 = vld [vmem:[%s11029_s24 + $0x2f0] sm:$0xff]   ;;  %v9852_v5 = vld [vmem:[%s11029_s24 + $0x2f8] sm:$0xff]   ;;  %v9854_v7 = vld [vmem:[%s11029_s24 + $0x300] sm:$0xff]  }
  0x2a   : > { %v9855_v8 = vld [vmem:[%s11029_s24 + $0x108] sm:$0xff]   ;;  %v9857_v10 = vld [vmem:[%s11029_s24 + $0x110] sm:$0xff]   ;;  %v9859_v12 = vld [vmem:[%s11029_s24 + $0x118] sm:$0xff]  }
  0x2b   : > { %v9856_v9 = vld [vmem:[%s11029_s24 + $0x308] sm:$0xff]   ;;  %v9858_v11 = vld [vmem:[%s11029_s24 + $0x310] sm:$0xff]   ;;  %v9860_v13 = vld [vmem:[%s11029_s24 + $0x318] sm:$0xff]  }
  0x2c   : > { %v9861_v14 = vld [vmem:[%s11029_s24 + $0x120] sm:$0xff]   ;;  %v9863_v16 = vld [vmem:[%s11029_s24 + $0x128] sm:$0xff]   ;;  %v9865_v18 = vld [vmem:[%s11029_s24 + $0x130] sm:$0xff]  }
  0x2d   : > { %v9862_v15 = vld [vmem:[%s11029_s24 + $0x320] sm:$0xff]   ;;  %v9864_v17 = vld [vmem:[%s11029_s24 + $0x328] sm:$0xff]   ;;  %v9866_v19 = vld [vmem:[%s11029_s24 + $0x330] sm:$0xff]  }
  0x30   : > { %9515 = vmatmul.mubr.msk.bf16.gmra.mrb[12].mxu0 %vm1144_vm2, %v9803_v20  ;;  %9643 = vmatmul.mubr.msk.bf16.gmra.mrb[12].mxu1 %vm1144_vm2, %v9804_v21  ;;  %v9867_v20 = vld [vmem:[%s11029_s24 + $0x138] sm:$0xff]  }
  0x31   : > { %9518 = vmatprep.mubr.msk.bf16.mxu0 %vm1144_vm2, %v9805_v22  ;;  %9646 = vmatprep.mubr.msk.bf16.mxu1 %vm1144_vm2, %v9806_v23  ;;  %v9868_v21 = vld [vmem:[%s11029_s24 + $0x338] sm:$0xff]   ;;  %v9869_v22 = vld [vmem:[%s11029_s24 + $0x140] sm:$0xff]  }
  0x32   : > { %v9870_v23 = vld [vmem:[%s11029_s24 + $0x340] sm:$0xff]  }
  0x38   : > { %9519 = vmatmul.mubr.msk.bf16.gmra.mrb[16].mxu0 %vm1144_vm2, %v9807_v24  ;;  %9647 = vmatmul.mubr.msk.bf16.gmra.mrb[16].mxu1 %vm1144_vm2, %v9808_v25  ;;  %v9871_v24 = vld [vmem:[%s11029_s24 + $0x148] sm:$0xff]  }
  0x39   : > { %9522 = vmatprep.mubr.msk.bf16.mxu0 %vm1144_vm2, %v9809_v26  ;;  %9650 = vmatprep.mubr.msk.bf16.mxu1 %vm1144_vm2, %v9810_v27  ;;  %v9872_v25 = vld [vmem:[%s11029_s24 + $0x348] sm:$0xff]   ;;  %v9873_v26 = vld [vmem:[%s11029_s24 + $0x150] sm:$0xff]  }
  0x3a   : > { %v9874_v27 = vld [vmem:[%s11029_s24 + $0x350] sm:$0xff]  }
  0x40   : > { %9523 = vmatmul.mubr.msk.bf16.gmra.mrb[20].mxu0 %vm1144_vm2, %v9811_v28  ;;  %9651 = vmatmul.mubr.msk.bf16.gmra.mrb[20].mxu1 %vm1144_vm2, %v9812_v29  ;;  %v9875_v28 = vld [vmem:[%s11029_s24 + $0x158] sm:$0xff]  }
  0x41   : > { %9526 = vmatprep.mubr.msk.bf16.mxu0 %vm1144_vm2, %v9813_v30  ;;  %9654 = vmatprep.mubr.msk.bf16.mxu1 %vm1144_vm2, %v9814_v31  ;;  %v9876_v29 = vld [vmem:[%s11029_s24 + $0x358] sm:$0xff]   ;;  %v9877_v30 = vld [vmem:[%s11029_s24 + $0x160] sm:$0xff]  }
  0x42   : > { %v9878_v31 = vld [vmem:[%s11029_s24 + $0x360] sm:$0xff]  }
  0x48   : > { %9527 = vmatmul.mubr.msk.bf16.gmra.mrb[24].mxu0 %vm1144_vm2, %v9815_v32  ;;  %9655 = vmatmul.mubr.msk.bf16.gmra.mrb[24].mxu1 %vm1144_vm2, %v9816_v33  ;;  %v9879_v32 = vld [vmem:[%s11029_s24 + $0x168] sm:$0xff]  }
  0x49   : > { %9530 = vmatprep.mubr.msk.bf16.mxu0 %vm1144_vm2, %v9817_v34  ;;  %9658 = vmatprep.mubr.msk.bf16.mxu1 %vm1144_vm2, %v9818_v35  ;;  %v9880_v33 = vld [vmem:[%s11029_s24 + $0x368] sm:$0xff]   ;;  %v9881_v34 = vld [vmem:[%s11029_s24 + $0x170] sm:$0xff]  }
  0x4a   : > { %v9882_v35 = vld [vmem:[%s11029_s24 + $0x370] sm:$0xff]  }
  0x50   : > { %9531 = vmatmul.mubr.msk.bf16.gmra.mrb[28].mxu0 %vm1144_vm2, %v9819_v36  ;;  %9659 = vmatmul.mubr.msk.bf16.gmra.mrb[28].mxu1 %vm1144_vm2, %v9820_v37  ;;  %v9883_v36 = vld [vmem:[%s11029_s24 + $0x178] sm:$0xff]  }
  0x51   : > { %9534 = vmatprep.mubr.msk.bf16.mxu0 %vm1144_vm2, %v9821_v38  ;;  %9662 = vmatprep.mubr.msk.bf16.mxu1 %vm1144_vm2, %v9822_v39  ;;  %v9884_v37 = vld [vmem:[%s11029_s24 + $0x378] sm:$0xff]   ;;  %v9885_v38 = vld [vmem:[%s11029_s24 + $0x180] sm:$0xff]  }
  0x52   : > { %v9886_v39 = vld [vmem:[%s11029_s24 + $0x380] sm:$0xff]  }
  0x58   : > { %9535 = vmatmul.mubr.msk.bf16.gmra.mrb[32].mxu0 %vm1144_vm2, %v9823_v40  ;;  %9663 = vmatmul.mubr.msk.bf16.gmra.mrb[32].mxu1 %vm1144_vm2, %v9824_v41  ;;  %v9887_v40 = vld [vmem:[%s11029_s24 + $0x188] sm:$0xff]  }
  0x59   : > { %9538 = vmatprep.mubr.msk.bf16.mxu0 %vm1144_vm2, %v9825_v42  ;;  %9666 = vmatprep.mubr.msk.bf16.mxu1 %vm1144_vm2, %v9826_v43  ;;  %v9888_v41 = vld [vmem:[%s11029_s24 + $0x388] sm:$0xff]   ;;  %v9889_v42 = vld [vmem:[%s11029_s24 + $0x190] sm:$0xff]  }
  0x5a   : > { %v9890_v43 = vld [vmem:[%s11029_s24 + $0x390] sm:$0xff]  }
  0x60   : > { %9539 = vmatmul.mubr.msk.bf16.gmra.mrb[36].mxu0 %vm1144_vm2, %v9827_v44  ;;  %9667 = vmatmul.mubr.msk.bf16.gmra.mrb[36].mxu1 %vm1144_vm2, %v9828_v45  ;;  %v9891_v44 = vld [vmem:[%s11029_s24 + $0x198] sm:$0xff]  }
  0x61   : > { %9542 = vmatprep.mubr.msk.bf16.mxu0 %vm1144_vm2, %v9829_v46  ;;  %9670 = vmatprep.mubr.msk.bf16.mxu1 %vm1144_vm2, %v9830_v47  ;;  %v9892_v45 = vld [vmem:[%s11029_s24 + $0x398] sm:$0xff]   ;;  %v9893_v46 = vld [vmem:[%s11029_s24 + $0x1a0] sm:$0xff]  }
  0x62   : > { %v9894_v47 = vld [vmem:[%s11029_s24 + $0x3a0] sm:$0xff]  }
  0x68   : > { %9543 = vmatmul.mubr.msk.bf16.gmra.mrb[40].mxu0 %vm1144_vm2, %v9831_v48  ;;  %9671 = vmatmul.mubr.msk.bf16.gmra.mrb[40].mxu1 %vm1144_vm2, %v9832_v49  ;;  %v9895_v48 = vld [vmem:[%s11029_s24 + $0x1a8] sm:$0xff]  }
  0x69   : > { %9546 = vmatprep.mubr.msk.bf16.mxu0 %vm1144_vm2, %v9833_v50  ;;  %9674 = vmatprep.mubr.msk.bf16.mxu1 %vm1144_vm2, %v9834_v51  ;;  %v9896_v49 = vld [vmem:[%s11029_s24 + $0x3a8] sm:$0xff]   ;;  %v9897_v50 = vld [vmem:[%s11029_s24 + $0x1b0] sm:$0xff]  }
  0x6a   : > { %v9898_v51 = vld [vmem:[%s11029_s24 + $0x3b0] sm:$0xff]  }
  0x70   : > { %9547 = vmatmul.mubr.msk.bf16.gmra.mrb[44].mxu0 %vm1144_vm2, %v9835_v52  ;;  %9675 = vmatmul.mubr.msk.bf16.gmra.mrb[44].mxu1 %vm1144_vm2, %v9836_v53  ;;  %v11252_v52 = vld [vmem:[%s15170_s2] ss:$0 sm:$0xff] }
  0x71   : > { %9550 = vmatprep.mubr.msk.bf16.mxu0 %vm1144_vm2, %v9837_v54  ;;  %9678 = vmatprep.mubr.msk.bf16.mxu1 %vm1144_vm2, %v9838_v55 }
  0x78   : > { %9551 = vmatmul.mubr.msk.bf16.gmra.mrb[48].mxu0 %vm1144_vm2, %v9839_v56  ;;  %9679 = vmatmul.mubr.msk.bf16.gmra.mrb[48].mxu1 %vm1144_vm2, %v9840_v57  ;;  %v9899_v57 = vld [vmem:[%s11029_s24 + $0x1b8] sm:$0xff]  }
  0x79   : > { %9554 = vmatprep.mubr.msk.bf16.mxu0 %vm1144_vm2, %v9841_v58  ;;  %9682 = vmatprep.mubr.msk.bf16.mxu1 %vm1144_vm2, %v9842_v59 }
  0x80   : > { %9555 = vmatmul.mubr.msk.bf16.gmra.mrb[52].mxu0 %vm1144_vm2, %v9843_v60  ;;  %9683 = vmatmul.mubr.msk.bf16.gmra.mrb[52].mxu1 %vm1144_vm2, %v9844_v61 }
  0x81   : > { %9558 = vmatprep.mubr.msk.bf16.mxu0 %vm1144_vm2, %v9845_v62  ;;  %9686 = vmatprep.mubr.msk.bf16.mxu1 %vm1144_vm2, %v9846_v63  ;;  %v9900_v62 = vld [vmem:[%s11029_s24 + $0x3b8] sm:$0xff]   ;;  %v9901_v63 = vld [vmem:[%s11029_s24 + $0x1c0] sm:$0xff]  }
  0x88   : > { %9559 = vmatmul.mubr.msk.bf16.gmra.mrb[56].mxu0 %vm1144_vm2, %v9847_v0  ;;  %9687 = vmatmul.mubr.msk.bf16.gmra.mrb[56].mxu1 %vm1144_vm2, %v9848_v1 }
  0x89   : > { %9562 = vmatprep.mubr.msk.bf16.mxu0 %vm1144_vm2, %v9849_v2  ;;  %9690 = vmatprep.mubr.msk.bf16.mxu1 %vm1144_vm2, %v9850_v3 }
  0x90   : > { %9563 = vmatmul.mubr.msk.bf16.gmra.mrb[60].mxu0 %vm1144_vm2, %v9851_v4  ;;  %9691 = vmatmul.mubr.msk.bf16.gmra.mrb[60].mxu1 %vm1144_vm2, %v9852_v5  ;;  %v9902_v5 = vld [vmem:[%s11029_s24 + $0x3c0] sm:$0xff]  }
  0x91   : > { %9566 = vmatprep.mubr.msk.bf16.mxu0 %vm1144_vm2, %v9853_v6  ;;  %9694 = vmatprep.mubr.msk.bf16.mxu1 %vm1144_vm2, %v9854_v7 }
  0x98   : > { %9567 = vmatmul.mubr.msk.bf16.gmra.mrb[64].mxu0 %vm1144_vm2, %v9855_v8  ;;  %9695 = vmatmul.mubr.msk.bf16.gmra.mrb[64].mxu1 %vm1144_vm2, %v9856_v9 }
  0x99   : > { %9570 = vmatprep.mubr.msk.bf16.mxu0 %vm1144_vm2, %v9857_v10  ;;  %9698 = vmatprep.mubr.msk.bf16.mxu1 %vm1144_vm2, %v9858_v11 }
  0xa0   : > { %9571 = vmatmul.mubr.msk.bf16.gmra.mrb[68].mxu0 %vm1144_vm2, %v9859_v12  ;;  %9699 = vmatmul.mubr.msk.bf16.gmra.mrb[68].mxu1 %vm1144_vm2, %v9860_v13 }
  0xa1   : > { %9574 = vmatprep.mubr.msk.bf16.mxu0 %vm1144_vm2, %v9861_v14  ;;  %9702 = vmatprep.mubr.msk.bf16.mxu1 %vm1144_vm2, %v9862_v15 }
  0xa8   : > { %9575 = vmatmul.mubr.msk.bf16.gmra.mrb[72].mxu0 %vm1144_vm2, %v9863_v16  ;;  %9703 = vmatmul.mubr.msk.bf16.gmra.mrb[72].mxu1 %vm1144_vm2, %v9864_v17 }
  0xa9   : > { %9578 = vmatprep.mubr.msk.bf16.mxu0 %vm1144_vm2, %v9865_v18  ;;  %9706 = vmatprep.mubr.msk.bf16.mxu1 %vm1144_vm2, %v9866_v19 }
  0xb0   : > { %9579 = vmatmul.mubr.msk.bf16.gmra.mrb[76].mxu0 %vm1144_vm2, %v9867_v20  ;;  %9707 = vmatmul.mubr.msk.bf16.gmra.mrb[76].mxu1 %vm1144_vm2, %v9868_v21 }
  0xb1   : > { %9582 = vmatprep.mubr.msk.bf16.mxu0 %vm1144_vm2, %v9869_v22  ;;  %9710 = vmatprep.mubr.msk.bf16.mxu1 %vm1144_vm2, %v9870_v23 }
  0xb8   : > { %9583 = vmatmul.mubr.msk.bf16.gmra.mrb[80].mxu0 %vm1144_vm2, %v9871_v24  ;;  %9711 = vmatmul.mubr.msk.bf16.gmra.mrb[80].mxu1 %vm1144_vm2, %v9872_v25  ;;  %v9903_v25 = vld [vmem:[%s11029_s24 + $0x1c8] sm:$0xff]  }
  0xb9   : > { %9586 = vmatprep.mubr.msk.bf16.mxu0 %vm1144_vm2, %v9873_v26  ;;  %9714 = vmatprep.mubr.msk.bf16.mxu1 %vm1144_vm2, %v9874_v27  ;;  %v9904_v26 = vld [vmem:[%s11029_s24 + $0x3c8] sm:$0xff]  }
  0xc0   : > { %9587 = vmatmul.mubr.msk.bf16.gmra.mrb[84].mxu0 %vm1144_vm2, %v9875_v28  ;;  %9715 = vmatmul.mubr.msk.bf16.gmra.mrb[84].mxu1 %vm1144_vm2, %v9876_v29 }
  0xc1   : > { %9590 = vmatprep.mubr.msk.bf16.mxu0 %vm1144_vm2, %v9877_v30  ;;  %9718 = vmatprep.mubr.msk.bf16.mxu1 %vm1144_vm2, %v9878_v31  ;;  %v9905_v31 = vld [vmem:[%s11029_s24 + $0x1d0] sm:$0xff]  }
  0xc8   : > { %9591 = vmatmul.mubr.msk.bf16.gmra.mrb[88].mxu0 %vm1144_vm2, %v9879_v32  ;;  %9719 = vmatmul.mubr.msk.bf16.gmra.mrb[88].mxu1 %vm1144_vm2, %v9880_v33 }
  0xc9   : > { %9594 = vmatprep.mubr.msk.bf16.mxu0 %vm1144_vm2, %v9881_v34  ;;  %9722 = vmatprep.mubr.msk.bf16.mxu1 %vm1144_vm2, %v9882_v35 }
  0xd0   : > { %9595 = vmatmul.mubr.msk.bf16.gmra.mrb[92].mxu0 %vm1144_vm2, %v9883_v36  ;;  %9723 = vmatmul.mubr.msk.bf16.gmra.mrb[92].mxu1 %vm1144_vm2, %v9884_v37  ;;  %v9906_v36 = vld [vmem:[%s11029_s24 + $0x3d0] sm:$0xff]  }
  0xd1   : > { %9598 = vmatprep.mubr.msk.bf16.mxu0 %vm1144_vm2, %v9885_v38  ;;  %9726 = vmatprep.mubr.msk.bf16.mxu1 %vm1144_vm2, %v9886_v39 }
  0xd8   : > { %9599 = vmatmul.mubr.msk.bf16.gmra.mrb[96].mxu0 %vm1144_vm2, %v9887_v40  ;;  %9727 = vmatmul.mubr.msk.bf16.gmra.mrb[96].mxu1 %vm1144_vm2, %v9888_v41 }
  0xd9   : > { %9602 = vmatprep.mubr.msk.bf16.mxu0 %vm1144_vm2, %v9889_v42  ;;  %9730 = vmatprep.mubr.msk.bf16.mxu1 %vm1144_vm2, %v9890_v43 }
  0xe0   : > { %9603 = vmatmul.mubr.msk.bf16.gmra.mrb[100].mxu0 %vm1144_vm2, %v9891_v44  ;;  %9731 = vmatmul.mubr.msk.bf16.gmra.mrb[100].mxu1 %vm1144_vm2, %v9892_v45 }
  0xe1   : > { %9606 = vmatprep.mubr.msk.bf16.mxu0 %vm1144_vm2, %v9893_v46  ;;  %9734 = vmatprep.mubr.msk.bf16.mxu1 %vm1144_vm2, %v9894_v47 }
  0xe8   : > { %9607 = vmatmul.mubr.msk.bf16.gmra.mrb[104].mxu0 %vm1144_vm2, %v9895_v48  ;;  %9735 = vmatmul.mubr.msk.bf16.gmra.mrb[104].mxu1 %vm1144_vm2, %v9896_v49 }
  0xe9   : > { %9610 = vmatprep.mubr.msk.bf16.mxu0 %vm1144_vm2, %v9897_v50  ;;  %9738 = vmatprep.mubr.msk.bf16.mxu1 %vm1144_vm2, %v9898_v51 }
  0xeb   : > { %v9504_v53 = vpop.f32.mrb[0].mxu0  ;;  %v9632_v55 = vpop.f32.mrb[0].mxu1 }
  0xec   : > { %v11257_v54 = vadd.f32 %v9504_v53, %v11252_v52  ;;  %v1570_v56 = vpop.f32.mrb[1].mxu0  ;;  %v11261_v58 = vadd.f32 %v9632_v55, %v11252_v52  ;;  %v2082_v60 = vpop.f32.mrb[1].mxu1 }
  0xed   : > { %v11264_v59 = vadd.f32 %v11252_v52, %v1570_v56  ;;  %v9505_v61 = vpop.f32.mrb[2].mxu0  ;;  %v11270_v1 = vadd.f32 %v11252_v52, %v2082_v60  ;;  %v9633_v3 = vpop.f32.mrb[2].mxu1 }
  0xee   : > { %v2595_v0 = vand.u32 2147483647, %v11257_v54  ;;  %v11273_v2 = vadd.f32 %v9505_v61, %v11252_v52  ;;  %v1573_v4 = vpop.f32.mrb[3].mxu0  ;;  %v2723_v6 = vand.u32 2147483647, %v11261_v58  ;;  %v11282_v13 = vadd.f32 %v9633_v3, %v11252_v52  ;;  %v2085_v14 = vpop.f32.mrb[3].mxu1 }
  0xef   : > { %v2593_v7 = vand.u32 2147483647, %v11264_v59  ;;  %v2721_v9 = vand.u32 2147483647, %v11270_v1  ;;  %v11287_v17 = vadd.f32 %v11252_v52, %v1573_v4  ;;  %v11292_v21 = vadd.f32 %v11252_v52, %v2085_v14  ;;  %v9907_v61 = vld [vmem:[%s11029_s24 + $0x1d8] sm:$0xff]  }
  0xf0   : > { %v2851_v8 = vsub.f32 0.0, %v2595_v0  ;;  %v2596_v10 = vand.u32 2147483647, %v11273_v2  ;;  %9611 = vmatmul.mubr.msk.bf16.gmra.mrb[108].mxu0 %vm1144_vm2, %v9899_v57  ;;  %v2979_v11 = vsub.f32 0.0, %v2723_v6  ;;  %9739 = vmatmul.mubr.msk.bf16.gmra.mrb[108].mxu1 %vm1144_vm2, %v9900_v62  ;;  %v2724_v20 = vand.u32 2147483647, %v11282_v13 }
  0xf1   : > { %v2849_v12 = vsub.f32 0.0, %v2593_v7  ;;  %9614 = vmatprep.mubr.msk.bf16.mxu0 %vm1144_vm2, %v9901_v63  ;;  %v2977_v16 = vsub.f32 0.0, %v2721_v9  ;;  %9742 = vmatprep.mubr.msk.bf16.mxu1 %vm1144_vm2, %v9902_v5  ;;  %v2594_v28 = vand.u32 2147483647, %v11287_v17  ;;  %v2722_v32 = vand.u32 2147483647, %v11292_v21 }
  0xf2   : > { %v3109_v15 = vmul.f32 1.442695, %v2851_v8  ;;  %v3365_v18 = vmul.f32 1.442695, %v2979_v11  ;;  %v2852_v23 = vsub.f32 0.0, %v2596_v10  ;;  %v2980_v27 = vsub.f32 0.0, %v2724_v20 }
  0xf3   : > { %v3105_v19 = vmul.f32 1.442695, %v2849_v12  ;;  %v3361_v22 = vmul.f32 1.442695, %v2977_v16  ;;  %v9508_v24 = vpop.f32.mrb[4].mxu0  ;;  %v9636_v29 = vpop.f32.mrb[4].mxu1 }
  0xf4   : > { %9917 = vpow2.f32 %v3109_v15  ;;  %v1586_v30 = vpop.f32.mrb[5].mxu0  ;;  %v11300_v33 = vadd.f32 %v9508_v24, %v11252_v52  ;;  %v2098_v34 = vpop.f32.mrb[5].mxu1  ;;  %v2850_v37 = vsub.f32 0.0, %v2594_v28  ;;  %v11304_v38 = vadd.f32 %v9636_v29, %v11252_v52  ;;  %v9908_v63 = vld [vmem:[%s11029_s24 + $0x3d8] sm:$0xff]   ;;  %v9909_v0 = vld [vmem:[%s11029_s24 + $0x1e0] sm:$0xff]  }
  0xf5   : > { %9919 = vpow2.f32 %v3365_v18  ;;  %v9509_v35 = vpop.f32.mrb[6].mxu0  ;;  %v9637_v39 = vpop.f32.mrb[6].mxu1  ;;  %v3111_v41 = vmul.f32 1.442695, %v2852_v23  ;;  %v2978_v42 = vsub.f32 0.0, %v2722_v32  ;;  %v11316_v49 = vadd.f32 %v11252_v52, %v1586_v30  ;;  %v9910_v7 = vld [vmem:[%s11029_s24 + $0x3e0] sm:$0xff]  }
  0xf6   : > { %9921 = vpow2.f32 %v3105_v19  ;;  %v11306_v40 = vpop.f32.mrb[7].mxu0  ;;  %v2599_v43 = vand.u32 2147483647, %v11300_v33  ;;  %v11309_v44 = vpop.f32.mrb[7].mxu1  ;;  %v3367_v45 = vmul.f32 1.442695, %v2980_v27  ;;  %v11320_v53 = vadd.f32 %v11252_v52, %v2098_v34 }
  0xf7   : > { %9923 = vpow2.f32 %v3361_v22  ;;  %v2727_v46 = vand.u32 2147483647, %v11304_v38  ;;  %v3107_v47 = vmul.f32 1.442695, %v2850_v37  ;;  %v3363_v50 = vmul.f32 1.442695, %v2978_v42 }
  0xf8   : > { %9615 = vmatmul.mubr.msk.bf16.gmra.mrb[112].mxu0 %vm1144_vm2, %v9903_v25  ;;  %9743 = vmatmul.mubr.msk.bf16.gmra.mrb[112].mxu1 %vm1144_vm2, %v9904_v26  ;;  %v2855_v48 = vsub.f32 0.0, %v2599_v43  ;;  %9925 = vpow2.f32 %v3111_v41  ;;  %v2597_v57 = vand.u32 2147483647, %v11316_v49  ;;  %vm3875_vm3 = vcmp.ge.f32.partialorder %v11257_v54, 0.0 }
  0xf9   : > { %9618 = vmatprep.mubr.msk.bf16.mxu0 %vm1144_vm2, %v9905_v31  ;;  %9746 = vmatprep.mubr.msk.bf16.mxu1 %vm1144_vm2, %v9906_v36  ;;  %v2983_v51 = vsub.f32 0.0, %v2727_v46  ;;  %9927 = vpow2.f32 %v3367_v45  ;;  %v11330_v62 = vadd.f32 %v9509_v35, %v11252_v52  ;;  %vm4003_vm4 = vcmp.ge.f32.partialorder %v11261_v58, 0.0 }
  0xfa   : > { %v3117_v56 = vmul.f32 1.442695, %v2855_v48  ;;  %9929 = vpow2.f32 %v3107_v47  ;;  %v11336_v5 = vadd.f32 %v9637_v39, %v11252_v52  ;;  %v2725_v11 = vand.u32 2147483647, %v11320_v53  ;;  %v9911_v47 = vld [vmem:[%s11029_s24 + $0x1e8] sm:$0xff]  }
  0xfb   : > { %v11322_v55 = vpop.f32.mrb[8].mxu0  ;;  %v11325_v60 = vpop.f32.mrb[8].mxu1  ;;  %v3373_v4 = vmul.f32 1.442695, %v2983_v51  ;;  %9931 = vpow2.f32 %v3363_v50  ;;  %v2853_v19 = vsub.f32 0.0, %v2597_v57  ;;  %vm3873_vm5 = vcmp.ge.f32.partialorder %v11264_v59, 0.0 }
  0xfc   : > { %v11338_v6 = vpop.f32.mrb[9].mxu0  ;;  %v11342_v12 = vpop.f32.mrb[9].mxu1  ;;  %9933 = vpow2.f32 %v3117_v56  ;;  %v2600_v26 = vand.u32 2147483647, %v11330_v62  ;;  %vm4001_vm6 = vcmp.ge.f32.partialorder %v11270_v1, 0.0  ;;  %v11365_v43 = vsub.f32 0.0, %v2725_v11 }
  0xfd   : > { %v11344_v14 = vpop.f32.mrb[10].mxu0  ;;  %v11346_v20 = vpop.f32.mrb[10].mxu1  ;;  %9935 = vpow2.f32 %v3373_v4  ;;  %vm3876_vm7 = vcmp.ge.f32.partialorder %v11273_v2, 0.0  ;;  %vm4004_vm8 = vcmp.ge.f32.partialorder %v11282_v13, 0.0  ;;  %vm3874_vm10 = vcmp.ge.f32.partialorder %v11287_v17, 0.0 }
  0xfe   : > { %v9918_v3 = vpop.eup %9917  ;;  %v11348_v22 = vpop.f32.mrb[11].mxu0  ;;  %vm4002_vm11 = vcmp.ge.f32.partialorder %v11292_v21, 0.0  ;;  %vm3879_vm12 = vcmp.ge.f32.partialorder %v11300_v33, 0.0  ;;  %vm4007_vm13 = vcmp.ge.f32.partialorder %v11304_v38, 0.0  ;;  %vm3877_vm14 = vcmp.ge.f32.partialorder %v11316_v49, 0.0 }
  0xff   : > { %v9920_v8 = vpop.eup %9919  ;;  %v3619_v9 = vmul.f32 %v9918_v3, %v9918_v3  ;;  %v4131_v10 = vmul.f32 2.0, %v9918_v3  ;;  %v11354_v27 = vpop.f32.mrb[11].mxu1  ;;  %vm4005_vm15 = vcmp.ge.f32.partialorder %v11320_v53, 0.0  ;;  %vm3880_vm0 = vcmp.ge.f32.partialorder %v11330_v62, 0.0 }
 0x100   : > { %v9922_v15 = vpop.eup %9921  ;;  %v3747_v16 = vmul.f32 %v9920_v8, %v9920_v8  ;;  %v4259_v18 = vmul.f32 2.0, %v9920_v8  ;;  %9619 = vmatmul.mubr.msk.bf16.gmra.mrb[116].mxu0 %vm1144_vm2, %v9907_v61  ;;  %9747 = vmatmul.mubr.msk.bf16.gmra.mrb[116].mxu1 %vm1144_vm2, %v9908_v63  ;;  %v9912_v63 = vld [vmem:[%s11029_s24 + $0x3e8] sm:$0xff]   ;;  %vm4008_vm1 = vcmp.ge.f32.partialorder %v11336_v5, 0.0 }
 0x101   : > { %v11351_v23 = vadd.f32 1.0, %v4131_v10  ;;  %v5155_v24 = vmul.f32 2.0, %v3619_v9  ;;  %v5667_v25 = vadd.f32 2.0, %v4131_v10  ;;  %9622 = vmatprep.mubr.msk.bf16.mxu0 %vm1144_vm2, %v9909_v0  ;;  %9750 = vmatprep.mubr.msk.bf16.mxu1 %vm1144_vm2, %v9910_v7  ;;  %v9924_v32 = vpop.eup %9923  ;;  %v3617_v36 = vmul.f32 %v9922_v15, %v9922_v15 }
 0x102   : > { %v4515_v28 = vadd.f32 1.0, %v4259_v18  ;;  %v5283_v29 = vmul.f32 2.0, %v3747_v16  ;;  %v5795_v30 = vadd.f32 2.0, %v4259_v18  ;;  %v4643_v39 = vadd.f32 %v4131_v10, %v3619_v9  ;;  %v9926_v0 = vpop.eup %9925 }
 0x103   : > { %v5411_v34 = vadd.f32 %v5155_v24, %v11351_v23  ;;  %v5923_v35 = vadd.f32 %v5667_v25, %v3619_v9  ;;  %v11363_v37 = vpop.f32.mrb[12].mxu0  ;;  %v11367_v45 = vpop.f32.mrb[12].mxu1  ;;  %v4771_v50 = vadd.f32 %v4259_v18, %v3747_v16  ;;  %v4129_v51 = vmul.f32 2.0, %v9922_v15 }
 0x104   : > { %v5539_v41 = vadd.f32 %v5283_v29, %v4515_v28  ;;  %v6051_v42 = vadd.f32 %v5795_v30, %v3747_v16  ;;  %v11369_v46 = vpop.f32.mrb[13].mxu0  ;;  %v5153_v56 = vmul.f32 2.0, %v3617_v36  ;;  %v11374_v57 = vpop.f32.mrb[13].mxu1  ;;  %v3745_v4 = vmul.f32 %v9924_v32, %v9924_v32 }
 0x105   : > { %v6179_v48 = vsel %vm3875_vm3, %v5411_v34, %v5923_v35  ;;  %v11376_v61 = vpop.f32.mrb[14].mxu0  ;;  %v4257_v7 = vmul.f32 2.0, %v9924_v32  ;;  %v11381_v8 = vpop.f32.mrb[14].mxu1  ;;  %v4385_v11 = vadd.f32 1.0, %v4129_v51  ;;  %v5665_v15 = vadd.f32 2.0, %v4129_v51 }
 0x106   : > { %9937 = vrcp.f32 %v6179_v48  ;;  %v6307_v3 = vsel %vm4003_vm4, %v5539_v41, %v6051_v42  ;;  %15172 = vst [vmem:[#allocation2_spill] sm:$0xff] %v11381_v8  ;;  %v11383_v9 = vpop.f32.mrb[15].mxu0  ;;  %v9928_v10 = vpop.eup %9927  ;;  %v11385_v16 = vmul.f32 1.442695, %v2853_v19  ;;  %v5281_v29 = vmul.f32 2.0, %v3745_v4 }
 0x107   : > { %15173 = vst [vmem:[#allocation3_spill] sm:$0xff] %v11383_v9  ;;  %9939 = vrcp.f32 %v6307_v3  ;;  %v11387_v18 = vpop.f32.mrb[15].mxu1  ;;  %v9930_v24 = vpop.eup %9929  ;;  %v4513_v25 = vadd.f32 1.0, %v4257_v7  ;;  %v5793_v30 = vadd.f32 2.0, %v4257_v7  ;;  %v11390_v34 = vsub.f32 0.0, %v2600_v26 }
 0x108   : > { %15174 = vst [vmem:[#allocation4_spill] sm:$0xff] %v11387_v18  ;;  %9623 = vmatmul.mubr.msk.bf16.gmra.mrb[120].mxu0 %vm1144_vm2, %v9911_v47  ;;  %v11393_v32 = vpop.eup %9931  ;;  %v4641_v35 = vadd.f32 %v4129_v51, %v3617_v36  ;;  %v5409_v41 = vadd.f32 %v5153_v56, %v4385_v11  ;;  %v5921_v42 = vadd.f32 %v5665_v15, %v3617_v36  ;;  %v4132_v56 = vmul.f32 2.0, %v9926_v0 }
 0x109   : > { %v3620_v48 = vmul.f32 %v9926_v0, %v9926_v0  ;;  %9751 = vmatmul.mubr.msk.bf16.gmra.mrb[120].mxu1 %vm1144_vm2, %v9912_v63  ;;  %v11397_v19 = vpop.eup %9933  ;;  %v4899_v3 = vsel %vm3875_vm3, %v11351_v23, %v4643_v39  ;;  %v5027_v26 = vsel %vm4003_vm4, %v4515_v28, %v4771_v50  ;;  %v5537_v47 = vadd.f32 %v5281_v29, %v4513_v25 }
 0x10a   : > { %v6049_v31 = vadd.f32 %v5793_v30, %v3745_v4  ;;  %v6177_v36 = vsel %vm3873_vm5, %v5409_v41, %v5921_v42  ;;  %v4769_v51 = vadd.f32 %v4257_v7, %v3745_v4  ;;  %v3748_v9 = vmul.f32 %v9928_v10, %v9928_v10  ;;  %v11414_v28 = vpop.eup %9935 }
 0x10b   : > { %v5156_v15 = vmul.f32 2.0, %v3620_v48  ;;  %v11406_v18 = vpop.f32.mrb[16].mxu0  ;;  %9941 = vrcp.f32 %v6177_v36  ;;  %v4260_v23 = vmul.f32 2.0, %v9928_v10  ;;  %v11410_v39 = vpop.f32.mrb[16].mxu1  ;;  %v4897_v50 = vsel %vm3873_vm5, %v4385_v11, %v4641_v35 }
 0x10c   : > { %15175 = vst [vmem:[#allocation5_spill] sm:$0xff] %v11406_v18  ;;  %v6305_v63 = vsel %vm4001_vm6, %v5537_v47, %v6049_v31  ;;  %15176 = vst [vmem:[#allocation6_spill] sm:$0xff] %v11410_v39  ;;  %v11412_v8 = vpop.f32.mrb[17].mxu0  ;;  %v4388_v0 = vadd.f32 1.0, %v4132_v56  ;;  %v5668_v4 = vadd.f32 2.0, %v4132_v56  ;;  %v11418_v7 = vpop.f32.mrb[17].mxu1  ;;  %v6435_v31 = vmul.f32 %v4899_v3, %v11257_v54 }
 0x10d   : > { %15177 = vst [vmem:[#allocation7_spill] sm:$0xff] %v11412_v8  ;;  %9943 = vrcp.f32 %v6305_v63  ;;  %15178 = vst [vmem:[#allocation8_spill] sm:$0xff] %v11418_v7  ;;  %v11420_v29 = vpop.f32.mrb[18].mxu0  ;;  %v4516_v30 = vadd.f32 1.0, %v4260_v23  ;;  %v5284_v10 = vmul.f32 2.0, %v3748_v9  ;;  %v5796_v41 = vadd.f32 2.0, %v4260_v23 }
 0x10e   : > { %15179 = vst [vmem:[#allocation9_spill] sm:$0xff] %v11420_v29  ;;  %v6563_v42 = vmul.f32 %v5027_v26, %v11261_v58  ;;  %v5412_v47 = vadd.f32 %v5156_v15, %v4388_v0  ;;  %v5924_v36 = vadd.f32 %v5668_v4, %v3620_v48  ;;  %v3618_v8 = vmul.f32 %v9930_v24, %v9930_v24  ;;  %v11428_v54 = vpop.f32.mrb[18].mxu1 }
 0x10f   : > { %v6433_v35 = vmul.f32 %v4897_v50, %v11264_v59  ;;  %v5025_v63 = vsel %vm4001_vm6, %v4513_v25, %v4769_v51  ;;  %v5540_v29 = vadd.f32 %v5284_v10, %v4516_v30  ;;  %v6052_v7 = vadd.f32 %v5796_v41, %v3748_v9 }
 0x110   : > { %v9938_v11 = vpop.eup %9937  ;;  %v4644_v18 = vadd.f32 %v4132_v56, %v3620_v48  ;;  %v6180_v58 = vsel %vm3876_vm7, %v5412_v47, %v5924_v36  ;;  %v4130_v26 = vmul.f32 2.0, %v9930_v24  ;;  %v5154_v51 = vmul.f32 2.0, %v3618_v8 }
 0x111   : > { %v9940_v3 = vpop.eup %9939  ;;  %v6947_v39 = vmul.f32 %v9938_v11, %v6435_v31  ;;  %9945 = vrcp.f32 %v6180_v58  ;;  %v6308_v25 = vsel %vm4004_vm8, %v5540_v29, %v6052_v7  ;;  %v4772_v56 = vadd.f32 %v4260_v23, %v3748_v9  ;;  %v11463_v58 = vpop.f32.mrb[19].mxu0 }
 0x112   : > { %v7075_v59 = vmul.f32 %v9940_v3, %v6563_v42  ;;  %9947 = vrcp.f32 %v6308_v25  ;;  %v4386_v24 = vadd.f32 1.0, %v4130_v26  ;;  %v5666_v50 = vadd.f32 2.0, %v4130_v26 }
 0x113   : > { %v9114_v48 = vpack.c.bf16 %v6947_v39, %v6947_v39  ;;  %v3746_v4 = vmul.f32 %v11393_v32, %v11393_v32  ;;  %v4258_v31 = vmul.f32 2.0, %v11393_v32  ;;  %v6561_v10 = vmul.f32 %v5025_v63, %v11270_v1 }
 0x114   : > { %v9242_v15 = vpack.c.bf16 %v7075_v59, %v7075_v59  ;;  %v4900_v7 = vsel %vm3876_vm7, %v4388_v0, %v4644_v18  ;;  %v5410_v29 = vadd.f32 %v5154_v51, %v4386_v24  ;;  %v4135_v39 = vmul.f32 2.0, %v11397_v19 }
 0x115   : > { %8228 = vst.msk [vmem:[%s11437_s29 + $0x8] sm:$0xf] %vm8225_vm9, %v9114_v48  ;;  %v9942_v9 = vpop.eup %9941  ;;  %v4642_v23 = vadd.f32 %v4130_v26, %v3618_v8  ;;  %v5922_v41 = vadd.f32 %v5666_v50, %v3618_v8  ;;  %v4514_v42 = vadd.f32 1.0, %v4258_v31  ;;  %v3623_v47 = vmul.f32 %v11397_v19, %v11397_v19 }
 0x116   : > { %8356 = vst.msk [vmem:[%s11437_s29 + $0x208] sm:$0xf] %vm8225_vm9, %v9242_v15  ;;  %v6945_v36 = vmul.f32 %v9942_v9, %v6433_v35  ;;  %v5028_v1 = vsel %vm4004_vm8, %v4516_v30, %v4772_v56  ;;  %v5282_v18 = vmul.f32 2.0, %v3746_v4  ;;  %v5794_v0 = vadd.f32 2.0, %v4258_v31 }
 0x117   : > { %v9944_v32 = vpop.eup %9943  ;;  %v6436_v63 = vmul.f32 %v4900_v7, %v11273_v2  ;;  %v6178_v8 = vsel %vm3874_vm10, %v5410_v29, %v5922_v41  ;;  %v11461_v3 = vadd.f32 1.0, %v4135_v39  ;;  %v6564_v30 = vmul.f32 %v5028_v1, %v11282_v13 }
 0x118   : > { %v7073_v11 = vmul.f32 %v9944_v32, %v6561_v10  ;;  %v9112_v19 = vpack.c.bf16 %v6945_v36, %v6945_v36  ;;  %9949 = vrcp.f32 %v6178_v8  ;;  %v5538_v35 = vadd.f32 %v5282_v18, %v4514_v42 }
 0x119   : > { %v6050_v26 = vadd.f32 %v5794_v0, %v3746_v4  ;;  %v4898_v25 = vsel %vm3874_vm10, %v4386_v24, %v4642_v23  ;;  %v5159_v51 = vmul.f32 2.0, %v3623_v47  ;;  %v4770_v2 = vadd.f32 %v4258_v31, %v3746_v4  ;;  %v11487_v0 = vpop.f32.mrb[19].mxu1 }
 0x11a   : > { %v9240_v59 = vpack.c.bf16 %v7073_v11, %v7073_v11  ;;  %8226 = vst.msk [vmem:[%s11437_s29] sm:$0xf] %vm8225_vm9, %v9112_v19  ;;  %v5671_v56 = vadd.f32 2.0, %v4135_v39  ;;  %v3751_v15 = vmul.f32 %v11414_v28, %v11414_v28  ;;  %v4263_v24 = vmul.f32 2.0, %v11414_v28 }
 0x11b   : > { %v6306_v48 = vsel %vm4002_vm11, %v5538_v35, %v6050_v26  ;;  %v9946_v50 = vpop.eup %9945  ;;  %v5415_v13 = vadd.f32 %v5159_v51, %v11461_v3  ;;  %v3369_v10 = vmul.f32 1.442695, %v11365_v43  ;;  %v6434_v23 = vmul.f32 %v4898_v25, %v11287_v17  ;;  %v9914_v35 = vld [vmem:[%s11029_s24 + $0x3f0] sm:$0xff]   ;;  %v9916_v51 = vld [vmem:[%s11029_s24 + $0x3f8] sm:$0xff]  }
 0x11c   : > { %8354 = vst.msk [vmem:[%s11437_s29 + $0x200] sm:$0xf] %vm8225_vm9, %v9240_v59  ;;  %9951 = vrcp.f32 %v6306_v48  ;;  %v9948_v7 = vpop.eup %9947  ;;  %v6948_v29 = vmul.f32 %v9946_v50, %v6436_v63  ;;  %v5927_v4 = vadd.f32 %v5671_v56, %v3623_v47  ;;  %v5287_v31 = vmul.f32 2.0, %v3751_v15  ;;  %9754 = vmatprep.mubr.msk.bf16.mxu1 %vm1144_vm2, %v9914_v35 }
 0x11d   : > { %9953 = vpow2.f32 %v11385_v16  ;;  %v7076_v9 = vmul.f32 %v9948_v7, %v6564_v30  ;;  %v4519_v41 = vadd.f32 1.0, %v4263_v24  ;;  %v5799_v32 = vadd.f32 2.0, %v4263_v24  ;;  %9755 = vmatmul.mubr.msk.bf16.gmra.mrb[124].mxu1 %vm1144_vm2, %v9916_v51 }
 0x11e   : > { %v9115_v36 = vpack.c.bf16 %v6948_v29, %v6948_v29  ;;  %v6183_v1 = vsel %vm3879_vm12, %v5415_v13, %v5927_v4  ;;  %9955 = vpow2.f32 %v3369_v10  ;;  %v3119_v43 = vmul.f32 1.442695, %v11390_v34 }
 0x11f   : > { %v9243_v28 = vpack.c.bf16 %v7076_v9, %v7076_v9  ;;  %v5026_v18 = vsel %vm4002_vm11, %v4514_v42, %v4770_v2  ;;  %9957 = vrcp.f32 %v6183_v1  ;;  %v5543_v16 = vadd.f32 %v5287_v31, %v4519_v41  ;;  %v11535_v9 = vpop.f32.mrb[20].mxu0 }
 0x120   : > { %8229 = vst.msk [vmem:[%s11437_s29 + $0xc] sm:$0xf] %vm8225_vm9, %v9115_v36  ;;  %v4647_v17 = vadd.f32 %v4135_v39, %v3623_v47  ;;  %v6055_v11 = vadd.f32 %v5799_v32, %v3751_v15  ;;  %9959 = vpow2.f32 %v3119_v43  ;;  %v15180_v63 = vand.u32 2147483647, %v11336_v5  ;;  %v9913_v47 = vld [vmem:[%s11029_s24 + $0x1f0] sm:$0xff]  }
 0x121   : > { %8357 = vst.msk [vmem:[%s11437_s29 + $0x20c] sm:$0xf] %vm8225_vm9, %v9243_v28  ;;  %v4775_v8 = vadd.f32 %v4263_v24, %v3751_v15  ;;  %v11497_v42 = vadd.f32 %v11252_v52, %v11306_v40  ;;  %v11501_v19 = vadd.f32 %v11252_v52, %v11309_v44  ;;  %v11505_v39 = vadd.f32 %v11322_v55, %v11252_v52  ;;  %v9915_v40 = vld [vmem:[%s11029_s24 + $0x1f8] sm:$0xff]  }
 0x122   : > { %v2984_v34 = vsub.f32 0.0, %v15180_v63  ;;  %v9950_v26 = vpop.eup %9949  ;;  %v6311_v59 = vsel %vm4007_vm13, %v5543_v16, %v6055_v11  ;;  %v11513_v25 = vadd.f32 %v11325_v60, %v11252_v52  ;;  %9626 = vmatprep.mubr.msk.bf16.mxu0 %vm1144_vm2, %v9913_v47  ;;  %v6562_v55 = vmul.f32 %v5026_v18, %v11292_v21 }
 0x123   : > { %v6946_v2 = vmul.f32 %v9950_v26, %v6434_v23  ;;  %9961 = vrcp.f32 %v6311_v59  ;;  %v2598_v44 = vand.u32 2147483647, %v11497_v42  ;;  %v4903_v48 = vsel %vm3879_vm12, %v11461_v3, %v4647_v17  ;;  %9627 = vmatmul.mubr.msk.bf16.gmra.mrb[124].mxu0 %vm1144_vm2, %v9915_v40  ;;  %v11537_v23 = vpop.f32.mrb[20].mxu1  ;;  %v11548_v26 = vpop.f32.mrb[21].mxu0 }
 0x124   : > { %v3375_v30 = vmul.f32 1.442695, %v2984_v34  ;;  %v2726_v60 = vand.u32 2147483647, %v11501_v19  ;;  %v5031_v50 = vsel %vm4007_vm13, %v4519_v41, %v4775_v8  ;;  %v2603_v24 = vand.u32 2147483647, %v11505_v39 }
 0x125   : > { %v9113_v15 = vpack.c.bf16 %v6946_v2, %v6946_v2  ;;  %v2854_v13 = vsub.f32 0.0, %v2598_v44  ;;  %v2731_v3 = vand.u32 2147483647, %v11513_v25  ;;  %v6439_v7 = vmul.f32 %v4903_v48, %v11300_v33 }
 0x126   : > { %9963 = vpow2.f32 %v3375_v30  ;;  %v9952_v56 = vpop.eup %9951  ;;  %v6567_v36 = vmul.f32 %v5031_v50, %v11304_v38  ;;  %v2982_v1 = vsub.f32 0.0, %v2726_v60  ;;  %v11543_v43 = vadd.f32 %v11252_v52, %v11338_v6 }
 0x127   : > { %v9954_v21 = vpop.eup %9953  ;;  %v7074_v10 = vmul.f32 %v9952_v56, %v6562_v55  ;;  %8227 = vst.msk [vmem:[%s11437_s29 + $0x4] sm:$0xf] %vm8225_vm9, %v9113_v15  ;;  %v3115_v31 = vmul.f32 1.442695, %v2854_v13  ;;  %v2859_v17 = vsub.f32 0.0, %v2603_v24  ;;  %v2987_v6 = vsub.f32 0.0, %v2731_v3 }
 0x128   : > { %v3621_v29 = vmul.f32 %v9954_v21, %v9954_v21  ;;  %v4133_v4 = vmul.f32 2.0, %v9954_v21  ;;  %v9956_v41 = vpop.eup %9955  ;;  %v3371_v51 = vmul.f32 1.442695, %v2982_v1  ;;  %v11554_v24 = vpop.f32.mrb[21].mxu1  ;;  %vm3878_vm2 = vcmp.ge.f32.partialorder %v11497_v42, 0.0 }
 0x129   : > { %v9241_v32 = vpack.c.bf16 %v7074_v10, %v7074_v10  ;;  %v9958_v33 = vpop.eup %9957  ;;  %v3749_v34 = vmul.f32 %v9956_v41, %v9956_v41  ;;  %v4261_v8 = vmul.f32 2.0, %v9956_v41  ;;  %9965 = vpow2.f32 %v3115_v31 }
 0x12a   : > { %v4389_v28 = vadd.f32 1.0, %v4133_v4  ;;  %v5157_v18 = vmul.f32 2.0, %v3621_v29  ;;  %v5669_v16 = vadd.f32 2.0, %v4133_v4  ;;  %v9960_v11 = vpop.eup %9959  ;;  %v6951_v63 = vmul.f32 %v9958_v33, %v6439_v7 }
 0x12b   : > { %8355 = vst.msk [vmem:[%s11437_s29 + $0x204] sm:$0xf] %vm8225_vm9, %v9241_v32  ;;  %v3624_v35 = vmul.f32 %v9960_v11, %v9960_v11  ;;  %v4645_v30 = vadd.f32 %v4133_v4, %v3621_v29  ;;  %v4517_v40 = vadd.f32 1.0, %v4261_v8  ;;  %v5285_v55 = vmul.f32 2.0, %v3749_v34 }
 0x12c   : > { %v5413_v38 = vadd.f32 %v5157_v18, %v4389_v28  ;;  %v5925_v47 = vadd.f32 %v5669_v16, %v3621_v29  ;;  %v9118_v59 = vpack.c.bf16 %v6951_v63, %v6951_v63  ;;  %v5797_v48 = vadd.f32 2.0, %v4261_v8 }
 0x12d   : > { %v9962_v2 = vpop.eup %9961  ;;  %v4136_v60 = vmul.f32 2.0, %v9960_v11  ;;  %v5160_v50 = vmul.f32 2.0, %v3624_v35  ;;  %v3125_v13 = vmul.f32 1.442695, %v2859_v17  ;;  %v5541_v21 = vadd.f32 %v5285_v55, %v4517_v40 }
 0x12e   : > { %v6181_v44 = vsel %vm3877_vm14, %v5413_v38, %v5925_v47  ;;  %8232 = vst.msk [vmem:[%s11437_s29 + $0x18] sm:$0xf] %vm8225_vm9, %v9118_v59  ;;  %v7079_v15 = vmul.f32 %v9962_v2, %v6567_v36  ;;  %v6053_v10 = vadd.f32 %v5797_v48, %v3749_v34  ;;  %v2601_v7 = vand.u32 2147483647, %v11543_v43 }
 0x12f   : > { %9967 = vrcp.f32 %v6181_v44  ;;  %v4392_v3 = vadd.f32 1.0, %v4136_v60  ;;  %v4901_v4 = vsel %vm3877_vm14, %v4389_v28, %v4645_v30  ;;  %v5672_v31 = vadd.f32 2.0, %v4136_v60  ;;  %v11564_v28 = vpop.f32.mrb[22].mxu0 }
 0x130   : > { %v9964_v56 = vpop.eup %9963  ;;  %v9246_v29 = vpack.c.bf16 %v7079_v15, %v7079_v15  ;;  %v6309_v32 = vsel %vm4005_vm15, %v5541_v21, %v6053_v10  ;;  %9969 = vpow2.f32 %v3371_v51  ;;  %v4773_v33 = vadd.f32 %v4261_v8, %v3749_v34 }
 0x131   : > { %v3752_v41 = vmul.f32 %v9964_v56, %v9964_v56  ;;  %v5416_v36 = vadd.f32 %v5160_v50, %v4392_v3  ;;  %v4264_v1 = vmul.f32 2.0, %v9964_v56  ;;  %9971 = vrcp.f32 %v6309_v32 }
 0x132   : > { %8360 = vst.msk [vmem:[%s11437_s29 + $0x218] sm:$0xf] %vm8225_vm9, %v9246_v29  ;;  %v5928_v18 = vadd.f32 %v5672_v31, %v3624_v35  ;;  %v4648_v17 = vadd.f32 %v4136_v60, %v3624_v35  ;;  %9973 = vpow2.f32 %v3125_v13  ;;  %v3381_v59 = vmul.f32 1.442695, %v2987_v6 }
 0x133   : > { %v5288_v16 = vmul.f32 2.0, %v3752_v41  ;;  %v4520_v11 = vadd.f32 1.0, %v4264_v1  ;;  %v5800_v63 = vadd.f32 2.0, %v4264_v1  ;;  %v9966_v38 = vpop.eup %9965  ;;  %v2857_v30 = vsub.f32 0.0, %v2601_v7 }
 0x134   : > { %v6184_v47 = vsel %vm3880_vm0, %v5416_v36, %v5928_v18  ;;  %v6437_v51 = vmul.f32 %v4901_v4, %v11316_v49  ;;  %v5029_v35 = vsel %vm4005_vm15, %v4517_v40, %v4773_v33  ;;  %v3622_v2 = vmul.f32 %v9966_v38, %v9966_v38  ;;  %v11579_v49 = vpop.f32.mrb[22].mxu1 }
 0x135   : > { %9975 = vrcp.f32 %v6184_v47  ;;  %v5544_v34 = vadd.f32 %v5288_v16, %v4520_v11  ;;  %v6056_v8 = vadd.f32 %v5800_v63, %v3752_v41  ;;  %v4134_v44 = vmul.f32 2.0, %v9966_v38 }
 0x136   : > { %9977 = vpow2.f32 %v3381_v59  ;;  %v4904_v55 = vsel %vm3880_vm0, %v4392_v3, %v4648_v17  ;;  %v3121_v60 = vmul.f32 1.442695, %v2857_v30  ;;  %v11577_v6 = vadd.f32 %v11252_v52, %v11342_v12  ;;  %v11599_v59 = vpop.f32.mrb[23].mxu0 }
 0x137   : > { %v6312_v48 = vsel %vm4008_vm1, %v5544_v34, %v6056_v8  ;;  %v4776_v15 = vadd.f32 %v4264_v1, %v3752_v41  ;;  %v4390_v40 = vadd.f32 1.0, %v4134_v44  ;;  %v5158_v50 = vmul.f32 2.0, %v3622_v2 }
 0x138   : > { %9979 = vrcp.f32 %v6312_v48  ;;  %v5670_v21 = vadd.f32 2.0, %v4134_v44  ;;  %v2729_v10 = vand.u32 2147483647, %v11577_v6  ;;  %v4646_v3 = vadd.f32 %v4134_v44, %v3622_v2 }
 0x139   : > { %v9968_v56 = vpop.eup %9967  ;;  %9981 = vpow2.f32 %v3121_v60  ;;  %v5414_v7 = vadd.f32 %v5158_v50, %v4390_v40  ;;  %vm4006_vm3 = vcmp.ge.f32.partialorder %v11501_v19, 0.0  ;;  %v6565_v4 = vmul.f32 %v5029_v35, %v11320_v53 }
 0x13a   : > { %v6949_v13 = vmul.f32 %v9968_v56, %v6437_v51  ;;  %v9970_v12 = vpop.eup %9969  ;;  %v5926_v31 = vadd.f32 %v5670_v21, %v3622_v2  ;;  %v2985_v41 = vsub.f32 0.0, %v2729_v10  ;;  %v6440_v36 = vmul.f32 %v4904_v55, %v11330_v62 }
 0x13b   : > { %v9972_v32 = vpop.eup %9971  ;;  %v5032_v1 = vsel %vm4008_vm1, %v4520_v11, %v4776_v15  ;;  %v3750_v33 = vmul.f32 %v9970_v12, %v9970_v12  ;;  %v4262_v18 = vmul.f32 2.0, %v9970_v12  ;;  %vm3883_vm4 = vcmp.ge.f32.partialorder %v11505_v39, 0.0 }
 0x13c   : > { %v9116_v29 = vpack.c.bf16 %v6949_v13, %v6949_v13  ;;  %v7077_v16 = vmul.f32 %v9972_v32, %v6565_v4  ;;  %v6182_v17 = vsel %vm3878_vm2, %v5414_v7, %v5926_v31  ;;  %v3377_v63 = vmul.f32 1.442695, %v2985_v41  ;;  %v9974_v38 = vpop.eup %9973 }
 0x13d   : > { %v11595_v53 = vadd.f32 %v11344_v14, %v11252_v52  ;;  %v4902_v62 = vsel %vm3878_vm2, %v4390_v40, %v4646_v3  ;;  %9983 = vrcp.f32 %v6182_v17  ;;  %v4518_v11 = vadd.f32 1.0, %v4262_v18 }
 0x13e   : > { %8230 = vst.msk [vmem:[%s11437_s29 + $0x10] sm:$0xf] %vm8225_vm9, %v9116_v29  ;;  %v5286_v47 = vmul.f32 2.0, %v3750_v33  ;;  %v9244_v51 = vpack.c.bf16 %v7077_v16, %v7077_v16  ;;  %v5798_v34 = vadd.f32 2.0, %v4262_v18  ;;  %v3627_v8 = vmul.f32 %v9974_v38, %v9974_v38  ;;  %v11615_v16 = vpop.f32.mrb[23].mxu1 }
 0x13f   : > { %v9976_v30 = vpop.eup %9975  ;;  %v4139_v35 = vmul.f32 2.0, %v9974_v38  ;;  %v6568_v14 = vmul.f32 %v5032_v1, %v11336_v5  ;;  %9985 = vpow2.f32 %v3377_v63  ;;  %v6438_v48 = vmul.f32 %v4902_v62, %v11497_v42 }
 0x140   : > { %v9978_v2 = vpop.eup %9977  ;;  %v6952_v44 = vmul.f32 %v9976_v30, %v6440_v36  ;;  %v5542_v55 = vadd.f32 %v5286_v47, %v4518_v11  ;;  %8358 = vst.msk [vmem:[%s11437_s29 + $0x210] sm:$0xf] %vm8225_vm9, %v9244_v51  ;;  %v6054_v60 = vadd.f32 %v5798_v34, %v3750_v33  ;;  %vm4011_vm5 = vcmp.ge.f32.partialorder %v11513_v25, 0.0 }
 0x141   : > { %v4395_v56 = vadd.f32 1.0, %v4139_v35  ;;  %v2604_v15 = vand.u32 2147483647, %v11595_v53  ;;  %v5163_v13 = vmul.f32 2.0, %v3627_v8  ;;  %v5675_v21 = vadd.f32 2.0, %v4139_v35 }
 0x142   : > { %v9980_v40 = vpop.eup %9979  ;;  %v9119_v50 = vpack.c.bf16 %v6952_v44, %v6952_v44  ;;  %v3755_v10 = vmul.f32 %v9978_v2, %v9978_v2  ;;  %v4774_v7 = vadd.f32 %v4262_v18, %v3750_v33  ;;  %v6310_v12 = vsel %vm4006_vm3, %v5542_v55, %v6054_v60 }
 0x143   : > { %v9982_v3 = vpop.eup %9981  ;;  %v7080_v5 = vmul.f32 %v9980_v40, %v6568_v14  ;;  %v4267_v29 = vmul.f32 2.0, %v9978_v2  ;;  %9987 = vrcp.f32 %v6310_v12  ;;  %v5419_v42 = vadd.f32 %v5163_v13, %v4395_v56 }
 0x144   : > { %8233 = vst.msk [vmem:[%s11437_s29 + $0x1c] sm:$0xf] %vm8225_vm9, %v9119_v50  ;;  %v5931_v4 = vadd.f32 %v5675_v21, %v3627_v8  ;;  %v11613_v31 = vadd.f32 %v11346_v20, %v11252_v52  ;;  %v4651_v32 = vadd.f32 %v4139_v35, %v3627_v8  ;;  %v5291_v1 = vmul.f32 2.0, %v3755_v10 }
 0x145   : > { %v9247_v41 = vpack.c.bf16 %v7080_v5, %v7080_v5  ;;  %v4523_v36 = vadd.f32 1.0, %v4267_v29  ;;  %v5803_v18 = vadd.f32 2.0, %v4267_v29  ;;  %v3625_v17 = vmul.f32 %v9982_v3, %v9982_v3 }
 0x146   : > { %v6187_v33 = vsel %vm3883_vm4, %v5419_v42, %v5931_v4  ;;  %v4137_v63 = vmul.f32 2.0, %v9982_v3  ;;  %v5030_v38 = vsel %vm4006_vm3, %v4518_v11, %v4774_v7  ;;  %v2860_v20 = vsub.f32 0.0, %v2604_v15  ;;  %v11649_v4 = vpop.f32.mrb[24].mxu0 }
 0x147   : > { %8361 = vst.msk [vmem:[%s11437_s29 + $0x21c] sm:$0xf] %vm8225_vm9, %v9247_v41  ;;  %9989 = vrcp.f32 %v6187_v33  ;;  %v5547_v52 = vadd.f32 %v5291_v1, %v4523_v36  ;;  %v9984_v62 = vpop.eup %9983  ;;  %v4779_v47 = vadd.f32 %v4267_v29, %v3755_v10  ;;  %v6059_v30 = vadd.f32 %v5803_v18, %v3755_v10  ;;  %v11639_v10 = vld [vmem:[%s15170_s2] ss:$0 sm:$0xff]  ;;  %v11651_v41 = vpop.f32.mrb[24].mxu1 }
 0x148   : > { %vm3881_vm6 = vcmp.ge.f32.partialorder %v11543_v43, 0.0  ;;  %v4393_v51 = vadd.f32 1.0, %v4137_v63  ;;  %v6950_v34 = vmul.f32 %v9984_v62, %v6438_v48  ;;  %v5161_v8 = vmul.f32 2.0, %v3625_v17 }
 0x149   : > { %v5673_v35 = vadd.f32 2.0, %v4137_v63  ;;  %v3127_v2 = vmul.f32 1.442695, %v2860_v20  ;;  %v9986_v44 = vpop.eup %9985  ;;  %v6566_v14 = vmul.f32 %v5030_v38, %v11501_v19  ;;  %v4907_v11 = vsel %vm3883_vm4, %v4395_v56, %v4651_v32 }
 0x14a   : > { %v6315_v55 = vsel %vm4011_vm5, %v5547_v52, %v6059_v30  ;;  %v2732_v60 = vand.u32 2147483647, %v11613_v31  ;;  %v9117_v15 = vpack.c.bf16 %v6950_v34, %v6950_v34  ;;  %v5417_v40 = vadd.f32 %v5161_v8, %v4393_v51  ;;  %v11660_v34 = vpop.f32.mrb[25].mxu0 }
 0x14b   : > { %9991 = vrcp.f32 %v6315_v55  ;;  %v5929_v50 = vadd.f32 %v5673_v35, %v3625_v17  ;;  %v5035_v48 = vsel %vm4011_vm5, %v4523_v36, %v4779_v47  ;;  %v3753_v13 = vmul.f32 %v9986_v44, %v9986_v44 }
 0x14c   : > { %v4265_v21 = vmul.f32 2.0, %v9986_v44  ;;  %9993 = vpow2.f32 %v3127_v2  ;;  %8231 = vst.msk [vmem:[%s11437_s29 + $0x14] sm:$0xf] %vm8225_vm9, %v9117_v15  ;;  %v2988_v56 = vsub.f32 0.0, %v2732_v60  ;;  %v11643_v3 = vadd.f32 %v11639_v10, %v11348_v22 }
 0x14d   : > { %v6185_v19 = vsel %vm3881_vm6, %v5417_v40, %v5929_v50  ;;  %v11647_v5 = vadd.f32 %v11639_v10, %v11354_v27  ;;  %v9988_v7 = vpop.eup %9987  ;;  %v4649_v12 = vadd.f32 %v4137_v63, %v3625_v17  ;;  %v5289_v42 = vmul.f32 2.0, %v3753_v13 }
 0x14e   : > { %9995 = vrcp.f32 %v6185_v19  ;;  %v4521_v29 = vadd.f32 1.0, %v4265_v21  ;;  %v7078_v32 = vmul.f32 %v9988_v7, %v6566_v14  ;;  %v5801_v36 = vadd.f32 2.0, %v4265_v21  ;;  %v11678_v14 = vpop.f32.mrb[25].mxu1 }
 0x14f   : > { %v3383_v1 = vmul.f32 1.442695, %v2988_v56  ;;  %v2602_v22 = vand.u32 2147483647, %v11643_v3  ;;  %v6443_v33 = vmul.f32 %v4907_v11, %v11505_v39  ;;  %vm4009_vm7 = vcmp.ge.f32.partialorder %v11577_v6, 0.0 }
 0x150   : > { %v5545_v27 = vadd.f32 %v5289_v42, %v4521_v29  ;;  %v2730_v18 = vand.u32 2147483647, %v11647_v5  ;;  %v9245_v63 = vpack.c.bf16 %v7078_v32, %v7078_v32  ;;  %v6571_v38 = vmul.f32 %v5035_v48, %v11513_v25 }
 0x151   : > { %v9990_v17 = vpop.eup %9989  ;;  %v6057_v52 = vadd.f32 %v5801_v36, %v3753_v13  ;;  %9997 = vpow2.f32 %v3383_v1  ;;  %v4905_v62 = vsel %vm3881_vm6, %v4393_v51, %v4649_v12  ;;  %v2858_v47 = vsub.f32 0.0, %v2602_v22 }
 0x152   : > { %v6955_v20 = vmul.f32 %v9990_v17, %v6443_v33  ;;  %v2986_v30 = vsub.f32 0.0, %v2730_v18  ;;  %8359 = vst.msk [vmem:[%s11437_s29 + $0x214] sm:$0xf] %vm8225_vm9, %v9245_v63  ;;  %v11668_v8 = vadd.f32 %v11639_v10, %v11363_v37  ;;  %v11672_v25 = vadd.f32 %v11639_v10, %v11367_v45  ;;  %v11696_v63 = vpop.f32.mrb[26].mxu0 }
 0x153   : > { %v6313_v39 = vsel %vm4009_vm7, %v5545_v27, %v6057_v52  ;;  %v11676_v51 = vadd.f32 %v11639_v10, %v11369_v46  ;;  %v3123_v2 = vmul.f32 1.442695, %v2858_v47  ;;  %v6441_v55 = vmul.f32 %v4905_v62, %v11543_v43 }
 0x154   : > { %v9122_v35 = vpack.c.bf16 %v6955_v20, %v6955_v20  ;;  %9999 = vrcp.f32 %v6313_v39  ;;  %v3379_v44 = vmul.f32 1.442695, %v2986_v30  ;;  %v2607_v37 = vand.u32 2147483647, %v11668_v8 }
 0x155   : > { %v9992_v11 = vpop.eup %9991  ;;  %v2735_v60 = vand.u32 2147483647, %v11672_v25  ;;  %v4777_v46 = vadd.f32 %v4265_v21, %v3753_v13  ;;  %10001 = vpow2.f32 %v3123_v2  ;;  %v2605_v40 = vand.u32 2147483647, %v11676_v51 }
 0x156   : > { %v9994_v15 = vpop.eup %9993  ;;  %8236 = vst.msk [vmem:[%s11437_s29 + $0x28] sm:$0xf] %vm8225_vm9, %v9122_v35  ;;  %v7083_v45 = vmul.f32 %v9992_v11, %v6571_v38  ;;  %10003 = vpow2.f32 %v3379_v44  ;;  %v2863_v19 = vsub.f32 0.0, %v2607_v37  ;;  %vm3884_vm8 = vcmp.ge.f32.partialorder %v11595_v53, 0.0 }
 0x157   : > { %v3628_v50 = vmul.f32 %v9994_v15, %v9994_v15  ;;  %v4140_v48 = vmul.f32 2.0, %v9994_v15  ;;  %v2991_v43 = vsub.f32 0.0, %v2735_v60  ;;  %v11689_v36 = vadd.f32 %v11639_v10, %v11374_v57 }
 0x158   : > { %v9996_v56 = vpop.eup %9995  ;;  %v9250_v7 = vpack.c.bf16 %v7083_v45, %v7083_v45  ;;  %v5033_v13 = vsel %vm4009_vm7, %v4521_v29, %v4777_v46  ;;  %v3133_v1 = vmul.f32 1.442695, %v2863_v19  ;;  %v2861_v22 = vsub.f32 0.0, %v2605_v40 }
 0x159   : > { %v6953_v12 = vmul.f32 %v9996_v56, %v6441_v55  ;;  %v4396_v42 = vadd.f32 1.0, %v4140_v48  ;;  %v5164_v32 = vmul.f32 2.0, %v3628_v50  ;;  %v5676_v21 = vadd.f32 2.0, %v4140_v48 }
 0x15a   : > { %8364 = vst.msk [vmem:[%s11437_s29 + $0x228] sm:$0xf] %vm8225_vm9, %v9250_v7  ;;  %v4652_v18 = vadd.f32 %v4140_v48, %v3628_v50  ;;  %vm4012_vm10 = vcmp.ge.f32.partialorder %v11613_v31, 0.0  ;;  %v3389_v20 = vmul.f32 1.442695, %v2991_v43  ;;  %v6569_v62 = vmul.f32 %v5033_v13, %v11577_v6  ;;  %v11712_v7 = vpop.f32.mrb[26].mxu1 }
 0x15b   : > { %v9998_v33 = vpop.eup %9997  ;;  %v9120_v27 = vpack.c.bf16 %v6953_v12, %v6953_v12  ;;  %v5420_v17 = vadd.f32 %v5164_v32, %v4396_v42  ;;  %v5932_v38 = vadd.f32 %v5676_v21, %v3628_v50  ;;  %10005 = vpow2.f32 %v3133_v1 }
 0x15c   : > { %v3756_v57 = vmul.f32 %v9998_v33, %v9998_v33  ;;  %v4268_v52 = vmul.f32 2.0, %v9998_v33  ;;  %v2733_v29 = vand.u32 2147483647, %v11689_v36  ;;  %v11704_v47 = vadd.f32 %v11639_v10, %v11376_v61 }
 0x15d   : > { %8234 = vst.msk [vmem:[%s11437_s29 + $0x20] sm:$0xf] %vm8225_vm9, %v9120_v27  ;;  %v6188_v39 = vsel %vm3884_vm8, %v5420_v17, %v5932_v38  ;;  %v3129_v44 = vmul.f32 1.442695, %v2861_v22  ;;  %v4908_v60 = vsel %vm3884_vm8, %v4396_v42, %v4652_v18  ;;  %vm3882_vm11 = vcmp.ge.f32.partialorder %v11643_v3, 0.0 }
 0x15e   : > { %v10000_v30 = vpop.eup %9999  ;;  %v4524_v35 = vadd.f32 1.0, %v4268_v52  ;;  %v5292_v2 = vmul.f32 2.0, %v3756_v57  ;;  %10007 = vrcp.f32 %v6188_v39  ;;  %v5804_v55 = vadd.f32 2.0, %v4268_v52 }
 0x15f   : > { %v7081_v11 = vmul.f32 %v10000_v30, %v6569_v62  ;;  %v2989_v37 = vsub.f32 0.0, %v2733_v29  ;;  %v10002_v6 = vpop.eup %10001  ;;  %10009 = vpow2.f32 %v3389_v20  ;;  %v2608_v50 = vand.u32 2147483647, %v11704_v47  ;;  %v15181_v29 = vld [vmem:[#allocation2_spill] sm:$0xff] }
 0x160   : > { %v5548_v15 = vadd.f32 %v5292_v2, %v4524_v35  ;;  %v10004_v61 = vpop.eup %10003  ;;  %v6060_v46 = vadd.f32 %v5804_v55, %v3756_v57  ;;  %v3626_v40 = vmul.f32 %v10002_v6, %v10002_v6  ;;  %v4138_v48 = vmul.f32 2.0, %v10002_v6  ;;  %v11732_v6 = vpop.f32.mrb[27].mxu0 }
 0x161   : > { %v9248_v45 = vpack.c.bf16 %v7081_v11, %v7081_v11  ;;  %v3754_v19 = vmul.f32 %v10004_v61, %v10004_v61  ;;  %v4266_v56 = vmul.f32 2.0, %v10004_v61  ;;  %10011 = vpow2.f32 %v3129_v44 }
 0x162   : > { %v4780_v43 = vadd.f32 %v4268_v52, %v3756_v57  ;;  %v6316_v12 = vsel %vm4012_vm10, %v5548_v15, %v6060_v46  ;;  %v5162_v42 = vmul.f32 2.0, %v3626_v40  ;;  %v3385_v32 = vmul.f32 1.442695, %v2989_v37 }
 0x163   : > { %8362 = vst.msk [vmem:[%s11437_s29 + $0x220] sm:$0xf] %vm8225_vm9, %v9248_v45  ;;  %10013 = vrcp.f32 %v6316_v12  ;;  %v4394_v13 = vadd.f32 1.0, %v4138_v48  ;;  %v5674_v21 = vadd.f32 2.0, %v4138_v48  ;;  %vm4010_vm12 = vcmp.ge.f32.partialorder %v11647_v5, 0.0 }
 0x164   : > { %v4522_v1 = vadd.f32 1.0, %v4266_v56  ;;  %v5290_v22 = vmul.f32 2.0, %v3754_v19  ;;  %v5802_v33 = vadd.f32 2.0, %v4266_v56  ;;  %v2864_v27 = vsub.f32 0.0, %v2608_v50 }
 0x165   : > { %v6444_v18 = vmul.f32 %v4908_v60, %v11595_v53  ;;  %v5418_v17 = vadd.f32 %v5162_v42, %v4394_v13  ;;  %v5930_v38 = vadd.f32 %v5674_v21, %v3626_v40  ;;  %vm3887_vm13 = vcmp.ge.f32.partialorder %v11668_v8, 0.0  ;;  %v10006_v57 = vpop.eup %10005 }
 0x166   : > { %10015 = vpow2.f32 %v3385_v32  ;;  %v5036_v52 = vsel %vm4012_vm10, %v4524_v35, %v4780_v43  ;;  %v5546_v20 = vadd.f32 %v5290_v22, %v4522_v1  ;;  %v6058_v62 = vadd.f32 %v5802_v33, %v3754_v19 }
 0x167   : > { %v11725_v30 = vadd.f32 %v11639_v10, %v15181_v29  ;;  %v4650_v39 = vadd.f32 %v4138_v48, %v3626_v40  ;;  %v6186_v2 = vsel %vm3882_vm11, %v5418_v17, %v5930_v38  ;;  %v3631_v53 = vmul.f32 %v10006_v57, %v10006_v57 }
 0x168   : > { %v4143_v44 = vmul.f32 2.0, %v10006_v57  ;;  %v10008_v11 = vpop.eup %10007  ;;  %10017 = vrcp.f32 %v6186_v2  ;;  %v4778_v55 = vadd.f32 %v4266_v56, %v3754_v19  ;;  %v6314_v37 = vsel %vm4010_vm12, %v5546_v20, %v6058_v62  ;;  %v11735_v19 = vpop.f32.mrb[27].mxu1 }
 0x169   : > { %vm4015_vm14 = vcmp.ge.f32.partialorder %v11672_v25, 0.0  ;;  %v3135_v35 = vmul.f32 1.442695, %v2864_v27  ;;  %v10010_v60 = vpop.eup %10009  ;;  %v6956_v15 = vmul.f32 %v10008_v11, %v6444_v18  ;;  %v6572_v61 = vmul.f32 %v5036_v52, %v11613_v31 }
 0x16a   : > { %10019 = vrcp.f32 %v6314_v37  ;;  %v4399_v45 = vadd.f32 1.0, %v4143_v44  ;;  %v5167_v46 = vmul.f32 2.0, %v3631_v53  ;;  %v5679_v40 = vadd.f32 2.0, %v4143_v44 }
 0x16b   : > { %v3759_v50 = vmul.f32 %v10010_v60, %v10010_v60  ;;  %v4271_v48 = vmul.f32 2.0, %v10010_v60  ;;  %v10012_v56 = vpop.eup %10011  ;;  %v9123_v43 = vpack.c.bf16 %v6956_v15, %v6956_v15  ;;  %v4906_v12 = vsel %vm3882_vm11, %v4394_v13, %v4650_v39 }
 0x16c   : > { %10021 = vpow2.f32 %v3135_v35  ;;  %v2736_v42 = vand.u32 2147483647, %v11725_v30  ;;  %v5034_v31 = vsel %vm4010_vm12, %v4522_v1, %v4778_v55  ;;  %v5423_v32 = vadd.f32 %v5167_v46, %v4399_v45 }
 0x16d   : > { %v5935_v21 = vadd.f32 %v5679_v40, %v3631_v53  ;;  %v4527_v22 = vadd.f32 1.0, %v4271_v48  ;;  %v10014_v33 = vpop.eup %10013  ;;  %8237 = vst.msk [vmem:[%s11437_s29 + $0x2c] sm:$0xf] %vm8225_vm9, %v9123_v43  ;;  %v4655_v27 = vadd.f32 %v4143_v44, %v3631_v53  ;;  %v5295_v18 = vmul.f32 2.0, %v3759_v50 }
 0x16e   : > { %v5807_v17 = vadd.f32 2.0, %v4271_v48  ;;  %v3629_v38 = vmul.f32 %v10012_v56, %v10012_v56  ;;  %v7084_v57 = vmul.f32 %v10014_v33, %v6572_v61  ;;  %v4141_v52 = vmul.f32 2.0, %v10012_v56 }
 0x16f   : > { %v6191_v13 = vsel %vm3887_vm13, %v5423_v32, %v5935_v21  ;;  %v2992_v20 = vsub.f32 0.0, %v2736_v42  ;;  %v5551_v1 = vadd.f32 %v5295_v18, %v4527_v22  ;;  %vm3885_vm15 = vcmp.ge.f32.partialorder %v11676_v51, 0.0 }
 0x170   : > { %v10016_v62 = vpop.eup %10015  ;;  %10023 = vrcp.f32 %v6191_v13  ;;  %v6063_v29 = vadd.f32 %v5807_v17, %v3759_v50  ;;  %v9251_v39 = vpack.c.bf16 %v7084_v57, %v7084_v57  ;;  %v6442_v2 = vmul.f32 %v4906_v12, %v11643_v3 }
 0x171   : > { %v6570_v53 = vmul.f32 %v5034_v31, %v11647_v5  ;;  %v4397_v44 = vadd.f32 1.0, %v4141_v52  ;;  %vm4013_vm0 = vcmp.ge.f32.partialorder %v11689_v36, 0.0  ;;  %v5165_v55 = vmul.f32 2.0, %v3629_v38 }
 0x172   : > { %v6319_v11 = vsel %vm4015_vm14, %v5551_v1, %v6063_v29  ;;  %v5677_v37 = vadd.f32 2.0, %v4141_v52  ;;  %v3757_v35 = vmul.f32 %v10016_v62, %v10016_v62  ;;  %v10018_v60 = vpop.eup %10017  ;;  %8365 = vst.msk [vmem:[%s11437_s29 + $0x22c] sm:$0xf] %vm8225_vm9, %v9251_v39  ;;  %v4911_v15 = vsel %vm3887_vm13, %v4399_v45, %v4655_v27  ;;  %v15182_v1 = vld [vmem:[#allocation3_spill] sm:$0xff]  ;;  %v15183_v39 = vld [vmem:[#allocation4_spill] sm:$0xff] }
 0x173   : > { %10025 = vrcp.f32 %v6319_v11  ;;  %v4269_v61 = vmul.f32 2.0, %v10016_v62  ;;  %v3391_v3 = vmul.f32 1.442695, %v2992_v20  ;;  %v6954_v5 = vmul.f32 %v10018_v60, %v6442_v2  ;;  %v11765_v20 = vpop.f32.mrb[28].mxu1 }
 0x174   : > { %v10020_v46 = vpop.eup %10019  ;;  %v4783_v40 = vadd.f32 %v4271_v48, %v3759_v50  ;;  %v5421_v56 = vadd.f32 %v5165_v55, %v4397_v44  ;;  %v5933_v43 = vadd.f32 %v5677_v37, %v3629_v38  ;;  %v4653_v42 = vadd.f32 %v4141_v52, %v3629_v38  ;;  %v11763_v52 = vpop.f32.mrb[28].mxu0  ;;  %v15184_v37 = vld [vmem:[#allocation5_spill] sm:$0xff] }
 0x175   : > { %v7082_v12 = vmul.f32 %v10020_v46, %v6570_v53  ;;  %v4525_v31 = vadd.f32 1.0, %v4269_v61  ;;  %v5293_v32 = vmul.f32 2.0, %v3757_v35  ;;  %v9121_v33 = vpack.c.bf16 %v6954_v5, %v6954_v5 }
 0x176   : > { %v10022_v21 = vpop.eup %10021  ;;  %v6189_v18 = vsel %vm3885_vm15, %v5421_v56, %v5933_v43  ;;  %v5805_v45 = vadd.f32 2.0, %v4269_v61  ;;  %10027 = vpow2.f32 %v3391_v3  ;;  %v6447_v17 = vmul.f32 %v4911_v15, %v11668_v8 }
 0x177   : > { %v9249_v27 = vpack.c.bf16 %v7082_v12, %v7082_v12  ;;  %10029 = vrcp.f32 %v6189_v18  ;;  %v5549_v50 = vadd.f32 %v5293_v32, %v4525_v31  ;;  %8235 = vst.msk [vmem:[%s11437_s29 + $0x24] sm:$0xf] %vm8225_vm9, %v9121_v33  ;;  %v5039_v48 = vsel %vm4015_vm14, %v4527_v22, %v4783_v40 }
 0x178   : > { %v6061_v38 = vadd.f32 %v5805_v45, %v3757_v35  ;;  %v3632_v57 = vmul.f32 %v10022_v21, %v10022_v21  ;;  %v4144_v13 = vmul.f32 2.0, %v10022_v21  ;;  %v4909_v62 = vsel %vm3885_vm15, %v4397_v44, %v4653_v42 }
 0x179   : > { %8363 = vst.msk [vmem:[%s11437_s29 + $0x224] sm:$0xf] %vm8225_vm9, %v9249_v27  ;;  %v4781_v8 = vadd.f32 %v4269_v61, %v3757_v35  ;;  %v11773_v29 = vadd.f32 %v11639_v10, %v15182_v1  ;;  %v11777_v22 = vadd.f32 %v11639_v10, %v15183_v39  ;;  %v11783_v60 = vadd.f32 %v11639_v10, %v15184_v37  ;;  %v11786_v61 = vpop.f32.mrb[29].mxu0  ;;  %v15185_v27 = vld [vmem:[#allocation6_spill] sm:$0xff] }
 0x17a   : > { %v10024_v2 = vpop.eup %10023  ;;  %v6317_v53 = vsel %vm4013_vm0, %v5549_v50, %v6061_v38  ;;  %v4400_v11 = vadd.f32 1.0, %v4144_v13  ;;  %v5168_v55 = vmul.f32 2.0, %v3632_v57  ;;  %v5680_v35 = vadd.f32 2.0, %v4144_v13  ;;  %v11803_v50 = vpop.f32.mrb[29].mxu1 }
 0x17b   : > { %v6959_v44 = vmul.f32 %v10024_v2, %v6447_v17  ;;  %10031 = vrcp.f32 %v6317_v53  ;;  %v2606_v15 = vand.u32 2147483647, %v11773_v29  ;;  %v6575_v3 = vmul.f32 %v5039_v48, %v11672_v25 }
 0x17c   : > { %v5424_v46 = vadd.f32 %v5168_v55, %v4400_v11  ;;  %v2734_v5 = vand.u32 2147483647, %v11777_v22  ;;  %vm3888_vm1 = vcmp.ge.f32.partialorder %v11704_v47, 0.0  ;;  %v5936_v43 = vadd.f32 %v5680_v35, %v3632_v57 }
 0x17d   : > { %v10026_v40 = vpop.eup %10025  ;;  %v9126_v56 = vpack.c.bf16 %v6959_v44, %v6959_v44  ;;  %v2862_v12 = vsub.f32 0.0, %v2606_v15  ;;  %v6445_v32 = vmul.f32 %v4909_v62, %v11676_v51  ;;  %v2611_v33 = vand.u32 2147483647, %v11783_v60 }
 0x17e   : > { %v7087_v42 = vmul.f32 %v10026_v40, %v6575_v3  ;;  %v2990_v21 = vsub.f32 0.0, %v2734_v5  ;;  %v5037_v25 = vsel %vm4013_vm0, %v4525_v31, %v4781_v8  ;;  %v6192_v18 = vsel %vm3888_vm1, %v5424_v46, %v5936_v43  ;;  %v11806_v8 = vpop.f32.mrb[30].mxu0  ;;  %v15186_v40 = vld [vmem:[#allocation7_spill] sm:$0xff] }
 0x17f   : > { %8240 = vst.msk [vmem:[%s11437_s29 + $0x38] sm:$0xf] %vm8225_vm9, %v9126_v56  ;;  %v3131_v45 = vmul.f32 1.442695, %v2862_v12  ;;  %v11801_v17 = vadd.f32 %v11639_v10, %v15185_v27  ;;  %10033 = vrcp.f32 %v6192_v18  ;;  %v2867_v62 = vsub.f32 0.0, %v2611_v33  ;;  %v11828_v27 = vpop.f32.mrb[30].mxu1 }
 0x180   : > { %v10028_v51 = vpop.eup %10027  ;;  %v9254_v48 = vpack.c.bf16 %v7087_v42, %v7087_v42  ;;  %v3387_v38 = vmul.f32 1.442695, %v2990_v21  ;;  %v4656_v55 = vadd.f32 %v4144_v13, %v3632_v57  ;;  %v6573_v44 = vmul.f32 %v5037_v25, %v11689_v36  ;;  %v15187_v13 = vld [vmem:[#allocation8_spill] sm:$0xff] }
 0x181   : > { %v10030_v1 = vpop.eup %10029  ;;  %v3760_v39 = vmul.f32 %v10028_v51, %v10028_v51  ;;  %v4272_v2 = vmul.f32 2.0, %v10028_v51  ;;  %10035 = vpow2.f32 %v3131_v45  ;;  %v2739_v31 = vand.u32 2147483647, %v11801_v17 }
 0x182   : > { %8368 = vst.msk [vmem:[%s11437_s29 + $0x238] sm:$0xf] %vm8225_vm9, %v9254_v48  ;;  %v6957_v53 = vmul.f32 %v10030_v1, %v6445_v32  ;;  %10037 = vpow2.f32 %v3387_v38  ;;  %v3141_v37 = vmul.f32 1.442695, %v2867_v62  ;;  %v11813_v56 = vadd.f32 %v11639_v10, %v15186_v40  ;;  %v15188_v38 = vld [vmem:[#allocation9_spill] sm:$0xff] }
 0x183   : > { %v4528_v35 = vadd.f32 1.0, %v4272_v2  ;;  %v5296_v15 = vmul.f32 2.0, %v3760_v39  ;;  %v5808_v3 = vadd.f32 2.0, %v4272_v2  ;;  %v2995_v5 = vsub.f32 0.0, %v2739_v31 }
 0x184   : > { %v9124_v46 = vpack.c.bf16 %v6957_v53, %v6957_v53  ;;  %10039 = vpow2.f32 %v3141_v37  ;;  %vm4016_vm2 = vcmp.ge.f32.partialorder %v11725_v30, 0.0  ;;  %v11818_v42 = vadd.f32 %v11639_v10, %v15187_v13 }
 0x185   : > { %v10032_v43 = vpop.eup %10031  ;;  %v5552_v12 = vadd.f32 %v5296_v15, %v4528_v35  ;;  %v6064_v57 = vadd.f32 %v5808_v3, %v3760_v39  ;;  %v4912_v32 = vsel %vm3888_vm1, %v4400_v11, %v4656_v55  ;;  %v3397_v21 = vmul.f32 1.442695, %v2995_v5 }
 0x186   : > { %8238 = vst.msk [vmem:[%s11437_s29 + $0x30] sm:$0xf] %vm8225_vm9, %v9124_v46  ;;  %v7085_v36 = vmul.f32 %v10032_v43, %v6573_v44  ;;  %v2609_v33 = vand.u32 2147483647, %v11813_v56  ;;  %v4784_v25 = vadd.f32 %v4272_v2, %v3760_v39  ;;  %v2737_v45 = vand.u32 2147483647, %v11818_v42 }
 0x187   : > { %v6320_v18 = vsel %vm4016_vm2, %v5552_v12, %v6064_v57  ;;  %v11832_v62 = vadd.f32 %v11639_v10, %v15188_v38  ;;  %v6448_v11 = vmul.f32 %v4912_v32, %v11704_v47  ;;  %vm3886_vm3 = vcmp.ge.f32.partialorder %v11773_v29, 0.0 }
 0x188   : > { %v9252_v51 = vpack.c.bf16 %v7085_v36, %v7085_v36  ;;  %10041 = vrcp.f32 %v6320_v18  ;;  %v2865_v48 = vsub.f32 0.0, %v2609_v33  ;;  %v2993_v1 = vsub.f32 0.0, %v2737_v45  ;;  %v11846_v36 = vpop.f32.mrb[31].mxu0 }
 0x189   : > { %10043 = vpow2.f32 %v3397_v21  ;;  %v10034_v31 = vpop.eup %10033  ;;  %v5040_v55 = vsel %vm4016_vm2, %v4528_v35, %v4784_v25  ;;  %v2612_v44 = vand.u32 2147483647, %v11832_v62  ;;  %v11843_v46 = vadd.f32 %v11639_v10, %v11428_v54 }
 0x18a   : > { %8366 = vst.msk [vmem:[%s11437_s29 + $0x230] sm:$0xf] %vm8225_vm9, %v9252_v51  ;;  %v3137_v39 = vmul.f32 1.442695, %v2865_v48  ;;  %v6960_v53 = vmul.f32 %v10034_v31, %v6448_v11  ;;  %v3393_v37 = vmul.f32 1.442695, %v2993_v1  ;;  %v6576_v25 = vmul.f32 %v5040_v55, %v11725_v30 }
 0x18b   : > { %v10036_v2 = vpop.eup %10035  ;;  %vm4014_vm4 = vcmp.ge.f32.partialorder %v11777_v22, 0.0  ;;  %vm3891_vm5 = vcmp.ge.f32.partialorder %v11783_v60, 0.0  ;;  %v2868_v54 = vsub.f32 0.0, %v2612_v44  ;;  %v2740_v1 = vand.u32 2147483647, %v11843_v46  ;;  %v11853_v31 = vpop.f32.mrb[31].mxu1 }
 0x18c   : > { %v10038_v15 = vpop.eup %10037  ;;  %v3630_v3 = vmul.f32 %v10036_v2, %v10036_v2  ;;  %v4142_v47 = vmul.f32 2.0, %v10036_v2  ;;  %10045 = vpow2.f32 %v3137_v39  ;;  %v9127_v5 = vpack.c.bf16 %v6960_v53, %v6960_v53 }
 0x18d   : > { %v3758_v40 = vmul.f32 %v10038_v15, %v10038_v15  ;;  %v4270_v43 = vmul.f32 2.0, %v10038_v15  ;;  %10047 = vpow2.f32 %v3393_v37  ;;  %vm4019_vm6 = vcmp.ge.f32.partialorder %v11801_v17, 0.0 }
 0x18e   : > { %v10040_v12 = vpop.eup %10039  ;;  %v4398_v57 = vadd.f32 1.0, %v4142_v47  ;;  %v5166_v13 = vmul.f32 2.0, %v3630_v3  ;;  %v5678_v35 = vadd.f32 2.0, %v4142_v47  ;;  %8241 = vst.msk [vmem:[%s11437_s29 + $0x3c] sm:$0xf] %vm8225_vm9, %v9127_v5  ;;  %v4654_v48 = vadd.f32 %v4142_v47, %v3630_v3 }
 0x18f   : > { %v4526_v32 = vadd.f32 1.0, %v4270_v43  ;;  %v5294_v21 = vmul.f32 2.0, %v3758_v40  ;;  %v5806_v33 = vadd.f32 2.0, %v4270_v43  ;;  %v3635_v51 = vmul.f32 %v10040_v12, %v10040_v12 }
 0x190   : > { %v5422_v18 = vadd.f32 %v5166_v13, %v4398_v57  ;;  %v5934_v45 = vadd.f32 %v5678_v35, %v3630_v3  ;;  %v4782_v53 = vadd.f32 %v4270_v43, %v3758_v40  ;;  %v4147_v37 = vmul.f32 2.0, %v10040_v12 }
 0x191   : > { %v5550_v38 = vadd.f32 %v5294_v21, %v4526_v32  ;;  %v6062_v11 = vadd.f32 %v5806_v33, %v3758_v40  ;;  %v5171_v15 = vmul.f32 2.0, %v3635_v51  ;;  %v3143_v55 = vmul.f32 1.442695, %v2868_v54 }
 0x192   : > { %v10042_v39 = vpop.eup %10041  ;;  %v6190_v2 = vsel %vm3886_vm3, %v5422_v18, %v5934_v45  ;;  %v4403_v3 = vadd.f32 1.0, %v4147_v37  ;;  %v5683_v47 = vadd.f32 2.0, %v4147_v37  ;;  %v11862_v13 = vadd.f32 %v11639_v10, %v11463_v58 }
 0x193   : > { %v10044_v44 = vpop.eup %10043  ;;  %v7088_v5 = vmul.f32 %v10042_v39, %v6576_v25  ;;  %10049 = vrcp.f32 %v6190_v2  ;;  %v6318_v30 = vsel %vm4014_vm4, %v5550_v38, %v6062_v11  ;;  %v4910_v21 = vsel %vm3886_vm3, %v4398_v57, %v4654_v48 }
 0x194   : > { %10051 = vrcp.f32 %v6318_v30  ;;  %v3763_v43 = vmul.f32 %v10044_v44, %v10044_v44  ;;  %v4275_v12 = vmul.f32 2.0, %v10044_v44  ;;  %v5038_v33 = vsel %vm4014_vm4, %v4526_v32, %v4782_v53 }
 0x195   : > { %v9255_v40 = vpack.c.bf16 %v7088_v5, %v7088_v5  ;;  %10053 = vpow2.f32 %v3143_v55  ;;  %v5427_v54 = vadd.f32 %v5171_v15, %v4403_v3  ;;  %v5939_v25 = vadd.f32 %v5683_v47, %v3635_v51 }
 0x196   : > { %v10046_v35 = vpop.eup %10045  ;;  %vm3889_vm7 = vcmp.ge.f32.partialorder %v11813_v56, 0.0  ;;  %v4659_v58 = vadd.f32 %v4147_v37, %v3635_v51  ;;  %v4531_v45 = vadd.f32 1.0, %v4275_v12  ;;  %v5299_v38 = vmul.f32 2.0, %v3763_v43 }
 0x197   : > { %v10048_v18 = vpop.eup %10047  ;;  %8369 = vst.msk [vmem:[%s11437_s29 + $0x23c] sm:$0xf] %vm8225_vm9, %v9255_v40  ;;  %v2996_v11 = vsub.f32 0.0, %v2740_v1  ;;  %v6195_v39 = vsel %vm3891_vm5, %v5427_v54, %v5939_v25  ;;  %v5811_v2 = vadd.f32 2.0, %v4275_v12  ;;  %v3633_v44 = vmul.f32 %v10046_v35, %v10046_v35 }
 0x198   : > { %v4145_v57 = vmul.f32 2.0, %v10046_v35  ;;  %10055 = vrcp.f32 %v6195_v39  ;;  %v5555_v48 = vadd.f32 %v5299_v38, %v4531_v45  ;;  %v3761_v32 = vmul.f32 %v10048_v18, %v10048_v18 }
 0x199   : > { %v11875_v53 = vadd.f32 %v11639_v10, %v11487_v0  ;;  %v6446_v15 = vmul.f32 %v4910_v21, %v11773_v29  ;;  %v6574_v51 = vmul.f32 %v5038_v33, %v11777_v22  ;;  %v6067_v37 = vadd.f32 %v5811_v2, %v3763_v43 }
 0x19a   : > { %v4401_v5 = vadd.f32 1.0, %v4145_v57  ;;  %v4915_v1 = vsel %vm3891_vm5, %v4403_v3, %v4659_v58  ;;  %v5169_v30 = vmul.f32 2.0, %v3633_v44  ;;  %v5681_v55 = vadd.f32 2.0, %v4145_v57  ;;  %v11884_v58 = vpop.f32.mrb[32].mxu0 }
 0x19b   : > { %v4273_v47 = vmul.f32 2.0, %v10048_v18  ;;  %v6323_v40 = vsel %vm4019_vm6, %v5555_v48, %v6067_v37  ;;  %v5297_v35 = vmul.f32 2.0, %v3761_v32  ;;  %v3399_v54 = vmul.f32 1.442695, %v2996_v11  ;;  %v11886_v18 = vpop.f32.mrb[32].mxu1 }
 0x19c   : > { %v2610_v0 = vand.u32 2147483647, %v11862_v13  ;;  %v4787_v38 = vadd.f32 %v4275_v12, %v3763_v43  ;;  %10057 = vrcp.f32 %v6323_v40  ;;  %v5425_v29 = vadd.f32 %v5169_v30, %v4401_v5  ;;  %v11892_v40 = vpop.f32.mrb[33].mxu0 }
 0x19d   : > { %v10050_v25 = vpop.eup %10049  ;;  %v5937_v22 = vadd.f32 %v5681_v55, %v3633_v44  ;;  %v4657_v39 = vadd.f32 %v4145_v57, %v3633_v44  ;;  %v4529_v2 = vadd.f32 1.0, %v4273_v47  ;;  %v5809_v3 = vadd.f32 2.0, %v4273_v47 }
 0x19e   : > { %v10052_v21 = vpop.eup %10051  ;;  %v6958_v33 = vmul.f32 %v10050_v25, %v6446_v15  ;;  %10059 = vpow2.f32 %v3399_v54  ;;  %v2866_v43 = vsub.f32 0.0, %v2610_v0  ;;  %vm4017_vm8 = vcmp.ge.f32.partialorder %v11818_v42, 0.0 }
 0x19f   : > { %v10054_v48 = vpop.eup %10053  ;;  %v7086_v37 = vmul.f32 %v10052_v21, %v6574_v51  ;;  %v6193_v11 = vsel %vm3889_vm7, %v5425_v29, %v5937_v22  ;;  %v5553_v44 = vadd.f32 %v5297_v35, %v4529_v2  ;;  %v6451_v15 = vmul.f32 %v4915_v1, %v11783_v60 }
 0x1a0   : > { %v9125_v12 = vpack.c.bf16 %v6958_v33, %v6958_v33  ;;  %10061 = vrcp.f32 %v6193_v11  ;;  %v6065_v30 = vadd.f32 %v5809_v3, %v3761_v32  ;;  %v3636_v55 = vmul.f32 %v10054_v48, %v10054_v48 }
 0x1a1   : > { %v9253_v57 = vpack.c.bf16 %v7086_v37, %v7086_v37  ;;  %v5043_v51 = vsel %vm4019_vm6, %v4531_v45, %v4787_v38  ;;  %v4148_v54 = vmul.f32 2.0, %v10054_v48  ;;  %v3139_v0 = vmul.f32 1.442695, %v2866_v43 }
 0x1a2   : > { %8239 = vst.msk [vmem:[%s11437_s29 + $0x34] sm:$0xf] %vm8225_vm9, %v9125_v12  ;;  %v2738_v25 = vand.u32 2147483647, %v11875_v53  ;;  %v10056_v29 = vpop.eup %10055  ;;  %v4913_v35 = vsel %vm3889_vm7, %v4401_v5, %v4657_v39  ;;  %v6321_v60 = vsel %vm4017_vm8, %v5553_v44, %v6065_v30  ;;  %v5172_v1 = vmul.f32 2.0, %v3636_v55 }
 0x1a3   : > { %8367 = vst.msk [vmem:[%s11437_s29 + $0x234] sm:$0xf] %vm8225_vm9, %v9253_v57  ;;  %v11907_v22 = vadd.f32 %v11639_v10, %v11535_v9  ;;  %v6963_v21 = vmul.f32 %v10056_v29, %v6451_v15  ;;  %v4785_v45 = vadd.f32 %v4273_v47, %v3761_v32  ;;  %10063 = vrcp.f32 %v6321_v60 }
 0x1a4   : > { %v4404_v38 = vadd.f32 1.0, %v4148_v54  ;;  %v5684_v33 = vadd.f32 2.0, %v4148_v54  ;;  %10065 = vpow2.f32 %v3139_v0  ;;  %v2994_v3 = vsub.f32 0.0, %v2738_v25 }
 0x1a5   : > { %v2615_v48 = vand.u32 2147483647, %v11907_v22  ;;  %v9130_v37 = vpack.c.bf16 %v6963_v21, %v6963_v21  ;;  %v6579_v5 = vmul.f32 %v5043_v51, %v11801_v17  ;;  %vm3892_vm10 = vcmp.ge.f32.partialorder %v11832_v62, 0.0 }
 0x1a6   : > { %v5428_v39 = vadd.f32 %v5172_v1, %v4404_v38  ;;  %v10058_v11 = vpop.eup %10057  ;;  %v6449_v9 = vmul.f32 %v4913_v35, %v11813_v56  ;;  %v5940_v43 = vadd.f32 %v5684_v33, %v3636_v55  ;;  %v3395_v12 = vmul.f32 1.442695, %v2994_v3 }
 0x1a7   : > { %v2871_v32 = vsub.f32 0.0, %v2615_v48  ;;  %8244 = vst.msk [vmem:[%s11437_s29 + $0x48] sm:$0xf] %vm8225_vm9, %v9130_v37  ;;  %v7091_v47 = vmul.f32 %v10058_v11, %v6579_v5  ;;  %v5041_v44 = vsel %vm4017_vm8, %v4529_v2, %v4785_v45  ;;  %v11919_v57 = vadd.f32 %v11639_v10, %v11537_v23  ;;  %v11934_v45 = vpop.f32.mrb[33].mxu1 }
 0x1a8   : > { %v11923_v17 = vadd.f32 %v11639_v10, %v11548_v26  ;;  %v10060_v15 = vpop.eup %10059  ;;  %v6196_v56 = vsel %vm3892_vm10, %v5428_v39, %v5940_v43  ;;  %10067 = vpow2.f32 %v3395_v12  ;;  %v11929_v51 = vadd.f32 %v11639_v10, %v11554_v24 }
 0x1a9   : > { %v3149_v30 = vmul.f32 1.442695, %v2871_v32  ;;  %v9258_v0 = vpack.c.bf16 %v7091_v47, %v7091_v47  ;;  %10069 = vrcp.f32 %v6196_v56  ;;  %v3764_v25 = vmul.f32 %v10060_v15, %v10060_v15 }
 0x1aa   : > { %v10062_v2 = vpop.eup %10061  ;;  %v4276_v23 = vmul.f32 2.0, %v10060_v15  ;;  %v2743_v26 = vand.u32 2147483647, %v11919_v57  ;;  %v4660_v35 = vadd.f32 %v4148_v54, %v3636_v55  ;;  %v6577_v33 = vmul.f32 %v5041_v44, %v11818_v42 }
 0x1ab   : > { %v6961_v29 = vmul.f32 %v10062_v2, %v6449_v9  ;;  %10071 = vpow2.f32 %v3149_v30  ;;  %8372 = vst.msk [vmem:[%s11437_s29 + $0x248] sm:$0xf] %vm8225_vm9, %v9258_v0  ;;  %v5300_v1 = vmul.f32 2.0, %v3764_v25  ;;  %v2613_v48 = vand.u32 2147483647, %v11923_v17  ;;  %v11946_v2 = vpop.f32.mrb[34].mxu0 }
 0x1ac   : > { %v4532_v60 = vadd.f32 1.0, %v4276_v23  ;;  %v5812_v21 = vadd.f32 2.0, %v4276_v23  ;;  %v2999_v3 = vsub.f32 0.0, %v2743_v26  ;;  %vm4020_vm11 = vcmp.ge.f32.partialorder %v11843_v46, 0.0 }
 0x1ad   : > { %v9128_v24 = vpack.c.bf16 %v6961_v29, %v6961_v29  ;;  %v10064_v37 = vpop.eup %10063  ;;  %v2741_v11 = vand.u32 2147483647, %v11929_v51  ;;  %v4788_v54 = vadd.f32 %v4276_v23, %v3764_v25  ;;  %v2869_v12 = vsub.f32 0.0, %v2613_v48 }
 0x1ae   : > { %v5556_v5 = vadd.f32 %v5300_v1, %v4532_v60  ;;  %v6068_v39 = vadd.f32 %v5812_v21, %v3764_v25  ;;  %v10066_v9 = vpop.eup %10065  ;;  %v7089_v55 = vmul.f32 %v10064_v37, %v6577_v33  ;;  %v3405_v43 = vmul.f32 1.442695, %v2999_v3  ;;  %v11958_v1 = vpop.f32.mrb[34].mxu1 }
 0x1af   : > { %8242 = vst.msk [vmem:[%s11437_s29 + $0x40] sm:$0xf] %vm8225_vm9, %v9128_v24  ;;  %v4916_v42 = vsel %vm3892_vm10, %v4404_v38, %v4660_v35  ;;  %v3634_v47 = vmul.f32 %v10066_v9, %v10066_v9  ;;  %v4146_v44 = vmul.f32 2.0, %v10066_v9  ;;  %v3145_v56 = vmul.f32 1.442695, %v2869_v12 }
 0x1b0   : > { %v6324_v32 = vsel %vm4020_vm11, %v5556_v5, %v6068_v39  ;;  %v9256_v15 = vpack.c.bf16 %v7089_v55, %v7089_v55  ;;  %v2997_v30 = vsub.f32 0.0, %v2741_v11  ;;  %vm3890_vm12 = vcmp.ge.f32.partialorder %v11862_v13, 0.0 }
 0x1b1   : > { %10073 = vrcp.f32 %v6324_v32  ;;  %v4402_v0 = vadd.f32 1.0, %v4146_v44  ;;  %v5170_v25 = vmul.f32 2.0, %v3634_v47  ;;  %v5682_v23 = vadd.f32 2.0, %v4146_v44  ;;  %v11964_v32 = vpop.f32.mrb[35].mxu0 }
 0x1b2   : > { %v10068_v29 = vpop.eup %10067  ;;  %8370 = vst.msk [vmem:[%s11437_s29 + $0x240] sm:$0xf] %vm8225_vm9, %v9256_v15  ;;  %v6452_v38 = vmul.f32 %v4916_v42, %v11832_v62  ;;  %v5044_v26 = vsel %vm4020_vm11, %v4532_v60, %v4788_v54  ;;  %10075 = vpow2.f32 %v3405_v43  ;;  %v11956_v35 = vadd.f32 %v11639_v10, %v11564_v28 }
 0x1b3   : > { %v10070_v21 = vpop.eup %10069  ;;  %v4658_v24 = vadd.f32 %v4146_v44, %v3634_v47  ;;  %v5426_v33 = vadd.f32 %v5170_v25, %v4402_v0  ;;  %v5938_v3 = vadd.f32 %v5682_v23, %v3634_v47  ;;  %v3762_v48 = vmul.f32 %v10068_v29, %v10068_v29  ;;  %v11972_v23 = vpop.f32.mrb[35].mxu1 }
 0x1b4   : > { %v6964_v5 = vmul.f32 %v10070_v21, %v6452_v38  ;;  %v4274_v39 = vmul.f32 2.0, %v10068_v29  ;;  %10077 = vpow2.f32 %v3145_v56  ;;  %v3401_v62 = vmul.f32 1.442695, %v2997_v30 }
 0x1b5   : > { %v10072_v37 = vpop.eup %10071  ;;  %v6194_v60 = vsel %vm3890_vm12, %v5426_v33, %v5938_v3  ;;  %v5298_v11 = vmul.f32 2.0, %v3762_v48  ;;  %v2616_v54 = vand.u32 2147483647, %v11956_v35  ;;  %vm4018_vm13 = vcmp.ge.f32.partialorder %v11875_v53, 0.0  ;;  %v11978_v3 = vld [vmem:[%s15170_s2] ss:$0 sm:$0xff] }
 0x1b6   : > { %v3639_v9 = vmul.f32 %v10072_v37, %v10072_v37  ;;  %v4151_v28 = vmul.f32 2.0, %v10072_v37  ;;  %v9131_v10 = vpack.c.bf16 %v6964_v5, %v6964_v5  ;;  %10079 = vrcp.f32 %v6194_v60 }
 0x1b7   : > { %v4530_v55 = vadd.f32 1.0, %v4274_v39  ;;  %v5810_v43 = vadd.f32 2.0, %v4274_v39  ;;  %vm3895_vm14 = vcmp.ge.f32.partialorder %v11907_v22, 0.0  ;;  %10081 = vpow2.f32 %v3401_v62 }
 0x1b8   : > { %v4407_v12 = vadd.f32 1.0, %v4151_v28  ;;  %v5175_v42 = vmul.f32 2.0, %v3639_v9  ;;  %8245 = vst.msk [vmem:[%s11437_s29 + $0x4c] sm:$0xf] %vm8225_vm9, %v9131_v10  ;;  %v5687_v44 = vadd.f32 2.0, %v4151_v28  ;;  %v6580_v15 = vmul.f32 %v5044_v26, %v11843_v46 }
 0x1b9   : > { %v5554_v47 = vadd.f32 %v5298_v11, %v4530_v55  ;;  %v4914_v56 = vsel %vm3890_vm12, %v4402_v0, %v4658_v24  ;;  %v6066_v30 = vadd.f32 %v5810_v43, %v3762_v48  ;;  %v4786_v38 = vadd.f32 %v4274_v39, %v3762_v48 }
 0x1ba   : > { %v5431_v25 = vadd.f32 %v5175_v42, %v4407_v12  ;;  %v5943_v21 = vadd.f32 %v5687_v44, %v3639_v9  ;;  %vm4023_vm15 = vcmp.ge.f32.partialorder %v11919_v57, 0.0  ;;  %v2872_v33 = vsub.f32 0.0, %v2616_v54 }
 0x1bb   : > { %v10074_v29 = vpop.eup %10073  ;;  %v11982_v46 = vadd.f32 %v11978_v3, %v11579_v49  ;;  %v6322_v26 = vsel %vm4018_vm13, %v5554_v47, %v6066_v30  ;;  %v4663_v24 = vadd.f32 %v4151_v28, %v3639_v9  ;;  %v11988_v48 = vadd.f32 %v11978_v3, %v11599_v59 }
 0x1bc   : > { %v7092_v0 = vmul.f32 %v10074_v29, %v6580_v15  ;;  %v10076_v37 = vpop.eup %10075  ;;  %10083 = vrcp.f32 %v6322_v26  ;;  %v6199_v5 = vsel %vm3895_vm14, %v5431_v25, %v5943_v21  ;;  %v3151_v39 = vmul.f32 1.442695, %v2872_v33  ;;  %v12002_v26 = vpop.f32.mrb[36].mxu0 }
 0x1bd   : > { %v2744_v62 = vand.u32 2147483647, %v11982_v46  ;;  %10085 = vrcp.f32 %v6199_v5  ;;  %v3767_v60 = vmul.f32 %v10076_v37, %v10076_v37  ;;  %v4279_v11 = vmul.f32 2.0, %v10076_v37  ;;  %15189 = vst [vmem:[#allocation2_spill] sm:$0xff] %v12002_v26 }
 0x1be   : > { %v9259_v49 = vpack.c.bf16 %v7092_v0, %v7092_v0  ;;  %v10078_v10 = vpop.eup %10077  ;;  %vm3893_vm0 = vcmp.ge.f32.partialorder %v11923_v17, 0.0  ;;  %10087 = vpow2.f32 %v3151_v39  ;;  %v2614_v59 = vand.u32 2147483647, %v11988_v48 }
 0x1bf   : > { %v3000_v9 = vsub.f32 0.0, %v2744_v62  ;;  %v6450_v28 = vmul.f32 %v4914_v56, %v11862_v13  ;;  %v4535_v54 = vadd.f32 1.0, %v4279_v11  ;;  %v5303_v43 = vmul.f32 2.0, %v3767_v60 }
 0x1c0   : > { %8373 = vst.msk [vmem:[%s11437_s29 + $0x24c] sm:$0xf] %vm8225_vm9, %v9259_v49  ;;  %v5815_v42 = vadd.f32 2.0, %v4279_v11  ;;  %v10080_v47 = vpop.eup %10079  ;;  %v5042_v44 = vsel %vm4018_vm13, %v4530_v55, %v4786_v38  ;;  %v4919_v15 = vsel %vm3895_vm14, %v4407_v12, %v4663_v24  ;;  %v3637_v30 = vmul.f32 %v10078_v10, %v10078_v10  ;;  %v12009_v12 = vpop.f32.mrb[36].mxu1 }
 0x1c1   : > { %v4149_v25 = vmul.f32 2.0, %v10078_v10  ;;  %v6962_v29 = vmul.f32 %v10080_v47, %v6450_v28  ;;  %v5559_v21 = vadd.f32 %v5303_v43, %v4535_v54  ;;  %v3407_v0 = vmul.f32 1.442695, %v3000_v9  ;;  %v10082_v13 = vpop.eup %10081  ;;  %15190 = vst [vmem:[#allocation3_spill] sm:$0xff] %v12009_v12 }
 0x1c2   : > { %v6071_v33 = vadd.f32 %v5815_v42, %v3767_v60  ;;  %v5173_v37 = vmul.f32 2.0, %v3637_v30  ;;  %vm4021_vm1 = vcmp.ge.f32.partialorder %v11929_v51, 0.0  ;;  %v2870_v5 = vsub.f32 0.0, %v2614_v59 }
 0x1c3   : > { %v4405_v56 = vadd.f32 1.0, %v4149_v25  ;;  %v12007_v55 = vadd.f32 %v11978_v3, %v11615_v16  ;;  %v9129_v38 = vpack.c.bf16 %v6962_v29, %v6962_v29  ;;  %v5685_v39 = vadd.f32 2.0, %v4149_v25 }
 0x1c4   : > { %v6327_v24 = vsel %vm4023_vm15, %v5559_v21, %v6071_v33  ;;  %v3765_v62 = vmul.f32 %v10082_v13, %v10082_v13  ;;  %v6578_v49 = vmul.f32 %v5042_v44, %v11875_v53  ;;  %v4277_v9 = vmul.f32 2.0, %v10082_v13 }
 0x1c5   : > { %10089 = vrcp.f32 %v6327_v24  ;;  %v5429_v10 = vadd.f32 %v5173_v37, %v4405_v56  ;;  %8243 = vst.msk [vmem:[%s11437_s29 + $0x44] sm:$0xf] %vm8225_vm9, %v9129_v38  ;;  %v4791_v59 = vadd.f32 %v4279_v11, %v3767_v60  ;;  %v5941_v28 = vadd.f32 %v5685_v39, %v3637_v30 }
 0x1c6   : > { %v5301_v43 = vmul.f32 2.0, %v3765_v62  ;;  %10091 = vpow2.f32 %v3407_v0  ;;  %v10084_v16 = vpop.eup %10083  ;;  %v6455_v42 = vmul.f32 %v4919_v15, %v11907_v22  ;;  %v4533_v47 = vadd.f32 1.0, %v4277_v9 }
 0x1c7   : > { %v5813_v29 = vadd.f32 2.0, %v4277_v9  ;;  %v3147_v12 = vmul.f32 1.442695, %v2870_v5  ;;  %v10086_v21 = vpop.eup %10085  ;;  %v7090_v33 = vmul.f32 %v10084_v16, %v6578_v49  ;;  %v4661_v26 = vadd.f32 %v4149_v25, %v3637_v30  ;;  %v12023_v30 = vpop.f32.mrb[37].mxu0 }
 0x1c8   : > { %v6197_v53 = vsel %vm3893_vm0, %v5429_v10, %v5941_v28  ;;  %v2742_v44 = vand.u32 2147483647, %v12007_v55  ;;  %v10088_v13 = vpop.eup %10087  ;;  %v6967_v60 = vmul.f32 %v10086_v21, %v6455_v42  ;;  %v5557_v11 = vadd.f32 %v5301_v43, %v4533_v47  ;;  %v12035_v10 = vpop.f32.mrb[37].mxu1 }
 0x1c9   : > { %10093 = vrcp.f32 %v6197_v53  ;;  %vm3896_vm2 = vcmp.ge.f32.partialorder %v11956_v35, 0.0  ;;  %v9257_v22 = vpack.c.bf16 %v7090_v33, %v7090_v33  ;;  %v5047_v15 = vsel %vm4023_vm15, %v4535_v54, %v4791_v59 }
 0x1ca   : > { %v6069_v0 = vadd.f32 %v5813_v29, %v3765_v62  ;;  %v3640_v37 = vmul.f32 %v10088_v13, %v10088_v13  ;;  %v9134_v25 = vpack.c.bf16 %v6967_v60, %v6967_v60  ;;  %v4152_v5 = vmul.f32 2.0, %v10088_v13 }
 0x1cb   : > { %10095 = vpow2.f32 %v3147_v12  ;;  %v2998_v38 = vsub.f32 0.0, %v2742_v44  ;;  %8371 = vst.msk [vmem:[%s11437_s29 + $0x244] sm:$0xf] %vm8225_vm9, %v9257_v22  ;;  %v4917_v24 = vsel %vm3893_vm0, %v4405_v56, %v4661_v26  ;;  %v12033_v54 = vadd.f32 %v11978_v3, %v11649_v4 }
 0x1cc   : > { %v6325_v39 = vsel %vm4021_vm1, %v5557_v11, %v6069_v0  ;;  %v5176_v49 = vmul.f32 2.0, %v3640_v37  ;;  %8248 = vst.msk [vmem:[%s11437_s29 + $0x58] sm:$0xf] %vm8225_vm9, %v9134_v25  ;;  %v6583_v12 = vmul.f32 %v5047_v15, %v11919_v57  ;;  %v4408_v59 = vadd.f32 1.0, %v4152_v5 }
 0x1cd   : > { %10097 = vrcp.f32 %v6325_v39  ;;  %v5688_v28 = vadd.f32 2.0, %v4152_v5  ;;  %v4789_v43 = vadd.f32 %v4277_v9, %v3765_v62  ;;  %v3403_v16 = vmul.f32 1.442695, %v2998_v38 }
 0x1ce   : > { %v2619_v26 = vand.u32 2147483647, %v12033_v54  ;;  %v12043_v56 = vadd.f32 %v11978_v3, %v11651_v41  ;;  %v6453_v4 = vmul.f32 %v4917_v24, %v11923_v17  ;;  %v4664_v29 = vadd.f32 %v4152_v5, %v3640_v37 }
 0x1cf   : > { %v10090_v42 = vpop.eup %10089  ;;  %v5432_v21 = vadd.f32 %v5176_v49, %v4408_v59  ;;  %v5944_v33 = vadd.f32 %v5688_v28, %v3640_v37  ;;  %10099 = vpow2.f32 %v3403_v16  ;;  %v12048_v62 = vadd.f32 %v11978_v3, %v11660_v34  ;;  %v12062_v28 = vpop.f32.mrb[38].mxu0 }
 0x1d0   : > { %v10092_v53 = vpop.eup %10091  ;;  %v7095_v44 = vmul.f32 %v10090_v42, %v6583_v12  ;;  %v2875_v57 = vsub.f32 0.0, %v2619_v26  ;;  %v2747_v60 = vand.u32 2147483647, %v12043_v56  ;;  %v5045_v11 = vsel %vm4021_vm1, %v4533_v47, %v4789_v43 }
 0x1d1   : > { %v6200_v9 = vsel %vm3896_vm2, %v5432_v21, %v5944_v33  ;;  %v3768_v41 = vmul.f32 %v10092_v53, %v10092_v53  ;;  %v4280_v13 = vmul.f32 2.0, %v10092_v53  ;;  %vm4024_vm3 = vcmp.ge.f32.partialorder %v11982_v46, 0.0 }
 0x1d2   : > { %v9262_v17 = vpack.c.bf16 %v7095_v44, %v7095_v44  ;;  %10101 = vrcp.f32 %v6200_v9  ;;  %v3157_v22 = vmul.f32 1.442695, %v2875_v57  ;;  %v3003_v5 = vsub.f32 0.0, %v2747_v60 }
 0x1d3   : > { %v10094_v15 = vpop.eup %10093  ;;  %v4536_v0 = vadd.f32 1.0, %v4280_v13  ;;  %v5304_v37 = vmul.f32 2.0, %v3768_v41  ;;  %v5816_v34 = vadd.f32 2.0, %v4280_v13  ;;  %v2617_v38 = vand.u32 2147483647, %v12048_v62 }
 0x1d4   : > { %8376 = vst.msk [vmem:[%s11437_s29 + $0x258] sm:$0xf] %vm8225_vm9, %v9262_v17  ;;  %v6965_v25 = vmul.f32 %v10094_v15, %v6453_v4  ;;  %10103 = vpow2.f32 %v3157_v22  ;;  %v6581_v39 = vmul.f32 %v5045_v11, %v11929_v51  ;;  %v4920_v47 = vsel %vm3896_vm2, %v4408_v59, %v4664_v29 }
 0x1d5   : > { %v10096_v24 = vpop.eup %10095  ;;  %v5560_v49 = vadd.f32 %v5304_v37, %v4536_v0  ;;  %v6072_v12 = vadd.f32 %v5816_v34, %v3768_v41  ;;  %v4792_v16 = vadd.f32 %v4280_v13, %v3768_v41  ;;  %v3413_v33 = vmul.f32 1.442695, %v3003_v5 }
 0x1d6   : > { %v9132_v43 = vpack.c.bf16 %v6965_v25, %v6965_v25  ;;  %v3638_v26 = vmul.f32 %v10096_v24, %v10096_v24  ;;  %v4150_v42 = vmul.f32 2.0, %v10096_v24  ;;  %v2873_v53 = vsub.f32 0.0, %v2617_v38 }
 0x1d7   : > { %v10098_v4 = vpop.eup %10097  ;;  %v6328_v21 = vsel %vm4024_vm3, %v5560_v49, %v6072_v12  ;;  %v12068_v51 = vadd.f32 %v11978_v3, %v11678_v14  ;;  %v6456_v60 = vmul.f32 %v4920_v47, %v11956_v35  ;;  %vm3894_vm4 = vcmp.ge.f32.partialorder %v11988_v48, 0.0  ;;  %v12075_v14 = vpop.f32.mrb[38].mxu1 }
 0x1d8   : > { %8246 = vst.msk [vmem:[%s11437_s29 + $0x50] sm:$0xf] %vm8225_vm9, %v9132_v43  ;;  %v7093_v59 = vmul.f32 %v10098_v4, %v6581_v39  ;;  %10105 = vrcp.f32 %v6328_v21  ;;  %v4406_v29 = vadd.f32 1.0, %v4150_v42  ;;  %v5174_v44 = vmul.f32 2.0, %v3638_v26 }
 0x1d9   : > { %v5686_v57 = vadd.f32 2.0, %v4150_v42  ;;  %10107 = vpow2.f32 %v3413_v33  ;;  %v3153_v9 = vmul.f32 1.442695, %v2873_v53  ;;  %v10100_v41 = vpop.eup %10099  ;;  %v2745_v17 = vand.u32 2147483647, %v12068_v51 }
 0x1da   : > { %v9260_v13 = vpack.c.bf16 %v7093_v59, %v7093_v59  ;;  %v5048_v11 = vsel %vm4024_vm3, %v4536_v0, %v4792_v16  ;;  %v5430_v22 = vadd.f32 %v5174_v44, %v4406_v29  ;;  %v3766_v37 = vmul.f32 %v10100_v41, %v10100_v41 }
 0x1db   : > { %v5942_v15 = vadd.f32 %v5686_v57, %v3638_v26  ;;  %v4278_v25 = vmul.f32 2.0, %v10100_v41  ;;  %10109 = vpow2.f32 %v3153_v9  ;;  %v3001_v5 = vsub.f32 0.0, %v2745_v17  ;;  %v12098_v9 = vpop.f32.mrb[39].mxu0 }
 0x1dc   : > { %v10102_v34 = vpop.eup %10101  ;;  %8374 = vst.msk [vmem:[%s11437_s29 + $0x250] sm:$0xf] %vm8225_vm9, %v9260_v13  ;;  %v12083_v35 = vadd.f32 %v11978_v3, %v11696_v63  ;;  %v4662_v24 = vadd.f32 %v4150_v42, %v3638_v26  ;;  %v5302_v0 = vmul.f32 2.0, %v3766_v37  ;;  %vm4022_vm5 = vcmp.ge.f32.partialorder %v12007_v55, 0.0 }
 0x1dd   : > { %v6968_v38 = vmul.f32 %v10102_v34, %v6456_v60  ;;  %v6198_v39 = vsel %vm3894_vm4, %v5430_v22, %v5942_v15  ;;  %v4534_v49 = vadd.f32 1.0, %v4278_v25  ;;  %v5814_v12 = vadd.f32 2.0, %v4278_v25 }
 0x1de   : > { %v10104_v47 = vpop.eup %10103  ;;  %10111 = vrcp.f32 %v6198_v39  ;;  %v3409_v21 = vmul.f32 1.442695, %v3001_v5  ;;  %v6584_v63 = vmul.f32 %v5048_v11, %v11982_v46  ;;  %v2620_v26 = vand.u32 2147483647, %v12083_v35 }
 0x1df   : > { %v9135_v43 = vpack.c.bf16 %v6968_v38, %v6968_v38  ;;  %v3643_v16 = vmul.f32 %v10104_v47, %v10104_v47  ;;  %v4155_v4 = vmul.f32 2.0, %v10104_v47  ;;  %v5558_v33 = vadd.f32 %v5302_v0, %v4534_v49 }
 0x1e0   : > { %v6070_v53 = vadd.f32 %v5814_v12, %v3766_v37  ;;  %v4918_v42 = vsel %vm3894_vm4, %v4406_v29, %v4662_v24  ;;  %v12096_v57 = vadd.f32 %v11978_v3, %v11712_v7  ;;  %10113 = vpow2.f32 %v3409_v21 }
 0x1e1   : > { %8249 = vst.msk [vmem:[%s11437_s29 + $0x5c] sm:$0xf] %vm8225_vm9, %v9135_v43  ;;  %v4411_v59 = vadd.f32 1.0, %v4155_v4  ;;  %v5179_v44 = vmul.f32 2.0, %v3643_v16  ;;  %v5691_v13 = vadd.f32 2.0, %v4155_v4  ;;  %v2876_v60 = vsub.f32 0.0, %v2620_v26 }
 0x1e2   : > { %v10106_v41 = vpop.eup %10105  ;;  %v6326_v46 = vsel %vm4022_vm5, %v5558_v33, %v6070_v53  ;;  %vm3899_vm6 = vcmp.ge.f32.partialorder %v12033_v54, 0.0  ;;  %v6454_v22 = vmul.f32 %v4918_v42, %v11988_v48  ;;  %v4790_v38 = vadd.f32 %v4278_v25, %v3766_v37 }
 0x1e3   : > { %v10108_v17 = vpop.eup %10107  ;;  %v7096_v11 = vmul.f32 %v10106_v41, %v6584_v63  ;;  %10115 = vrcp.f32 %v6326_v46  ;;  %v5435_v29 = vadd.f32 %v5179_v44, %v4411_v59  ;;  %v5947_v7 = vadd.f32 %v5691_v13, %v3643_v16  ;;  %v12107_v63 = vpop.f32.mrb[39].mxu1 }
 0x1e4   : > { %v3771_v15 = vmul.f32 %v10108_v17, %v10108_v17  ;;  %v4283_v34 = vmul.f32 2.0, %v10108_v17  ;;  %v3159_v24 = vmul.f32 1.442695, %v2876_v60  ;;  %v2748_v39 = vand.u32 2147483647, %v12096_v57 }
 0x1e5   : > { %v9263_v5 = vpack.c.bf16 %v7096_v11, %v7096_v11  ;;  %v10110_v0 = vpop.eup %10109  ;;  %v4667_v47 = vadd.f32 %v4155_v4, %v3643_v16  ;;  %v6203_v12 = vsel %vm3899_vm6, %v5435_v29, %v5947_v7  ;;  %vm4027_vm7 = vcmp.ge.f32.partialorder %v12043_v56, 0.0 }
 0x1e6   : > { %v4539_v43 = vadd.f32 1.0, %v4283_v34  ;;  %v5307_v21 = vmul.f32 2.0, %v3771_v15  ;;  %10117 = vrcp.f32 %v6203_v12  ;;  %v5819_v48 = vadd.f32 2.0, %v4283_v34 }
 0x1e7   : > { %8377 = vst.msk [vmem:[%s11437_s29 + $0x25c] sm:$0xf] %vm8225_vm9, %v9263_v5  ;;  %v3641_v33 = vmul.f32 %v10110_v0, %v10110_v0  ;;  %v4153_v53 = vmul.f32 2.0, %v10110_v0  ;;  %10119 = vpow2.f32 %v3159_v24  ;;  %v3004_v25 = vsub.f32 0.0, %v2748_v39 }
 0x1e8   : > { %v10112_v26 = vpop.eup %10111  ;;  %v5563_v37 = vadd.f32 %v5307_v21, %v4539_v43  ;;  %v5046_v4 = vsel %vm4022_vm5, %v4534_v49, %v4790_v38  ;;  %v6075_v42 = vadd.f32 %v5819_v48, %v3771_v15  ;;  %v4923_v41 = vsel %vm3899_vm6, %v4411_v59, %v4667_v47  ;;  %v12132_v47 = vpop.f32.mrb[40].mxu1 }
 0x1e9   : > { %v6966_v16 = vmul.f32 %v10112_v26, %v6454_v22  ;;  %v4409_v44 = vadd.f32 1.0, %v4153_v53  ;;  %v5177_v46 = vmul.f32 2.0, %v3641_v33  ;;  %v5689_v13 = vadd.f32 2.0, %v4153_v53 }
 0x1ea   : > { %v3415_v60 = vmul.f32 1.442695, %v3004_v25  ;;  %v4795_v11 = vadd.f32 %v4283_v34, %v3771_v15  ;;  %v6331_v29 = vsel %vm4027_vm7, %v5563_v37, %v6075_v42  ;;  %v12120_v22 = vadd.f32 %v11978_v3, %v11732_v6  ;;  %v10114_v7 = vpop.eup %10113 }
 0x1eb   : > { %v9133_v17 = vpack.c.bf16 %v6966_v16, %v6966_v16  ;;  %v6582_v49 = vmul.f32 %v5046_v4, %v12007_v55  ;;  %10121 = vrcp.f32 %v6331_v29  ;;  %v5433_v5 = vadd.f32 %v5177_v46, %v4409_v44  ;;  %v12130_v55 = vpop.f32.mrb[40].mxu0 }
 0x1ec   : > { %v5945_v38 = vadd.f32 %v5689_v13, %v3641_v33  ;;  %vm3897_vm8 = vcmp.ge.f32.partialorder %v12048_v62, 0.0  ;;  %v3769_v59 = vmul.f32 %v10114_v7, %v10114_v7  ;;  %v4281_v15 = vmul.f32 2.0, %v10114_v7 }
 0x1ed   : > { %v10116_v24 = vpop.eup %10115  ;;  %8247 = vst.msk [vmem:[%s11437_s29 + $0x54] sm:$0xf] %vm8225_vm9, %v9133_v17  ;;  %10123 = vpow2.f32 %v3415_v60  ;;  %v6459_v39 = vmul.f32 %v4923_v41, %v12033_v54  ;;  %v2618_v0 = vand.u32 2147483647, %v12120_v22  ;;  %v5051_v12 = vsel %vm4027_vm7, %v4539_v43, %v4795_v11  ;;  %v12145_v43 = vpop.f32.mrb[41].mxu0 }
 0x1ee   : > { %v7094_v34 = vmul.f32 %v10116_v24, %v6582_v49  ;;  %v6201_v6 = vsel %vm3897_vm8, %v5433_v5, %v5945_v38  ;;  %v4537_v21 = vadd.f32 1.0, %v4281_v15  ;;  %v5305_v48 = vmul.f32 2.0, %v3769_v59 }
 0x1ef   : > { %10125 = vrcp.f32 %v6201_v6  ;;  %v5817_v37 = vadd.f32 2.0, %v4281_v15  ;;  %v2874_v25 = vsub.f32 0.0, %v2618_v0  ;;  %v12138_v54 = vadd.f32 %v11978_v3, %v11735_v19 }
 0x1f0   : > { %v9261_v26 = vpack.c.bf16 %v7094_v34, %v7094_v34  ;;  %v10118_v16 = vpop.eup %10117  ;;  %v4665_v4 = vadd.f32 %v4153_v53, %v3641_v33  ;;  %vm4025_vm10 = vcmp.ge.f32.partialorder %v12068_v51, 0.0  ;;  %v5561_v42 = vadd.f32 %v5305_v48, %v4537_v21 }
 0x1f1   : > { %v12143_v41 = vadd.f32 %v11978_v3, %v11763_v52  ;;  %v10120_v46 = vpop.eup %10119  ;;  %v6971_v13 = vmul.f32 %v10118_v16, %v6459_v39  ;;  %v6587_v60 = vmul.f32 %v5051_v12, %v12043_v56  ;;  %v6073_v17 = vadd.f32 %v5817_v37, %v3769_v59  ;;  %v12155_v52 = vpop.f32.mrb[41].mxu1 }
 0x1f2   : > { %8375 = vst.msk [vmem:[%s11437_s29 + $0x254] sm:$0xf] %vm8225_vm9, %v9261_v26  ;;  %v3155_v19 = vmul.f32 1.442695, %v2874_v25  ;;  %v3644_v11 = vmul.f32 %v10120_v46, %v10120_v46  ;;  %v4156_v33 = vmul.f32 2.0, %v10120_v46  ;;  %v12153_v29 = vadd.f32 %v11978_v3, %v11765_v20 }
 0x1f3   : > { %v2746_v53 = vand.u32 2147483647, %v12138_v54  ;;  %v9138_v7 = vpack.c.bf16 %v6971_v13, %v6971_v13  ;;  %v6329_v49 = vsel %vm4025_vm10, %v5561_v42, %v6073_v17  ;;  %v2623_v56 = vand.u32 2147483647, %v12143_v41 }
 0x1f4   : > { %10127 = vpow2.f32 %v3155_v19  ;;  %v4921_v5 = vsel %vm3897_vm8, %v4409_v44, %v4665_v4  ;;  %v4412_v38 = vadd.f32 1.0, %v4156_v33  ;;  %v5180_v24 = vmul.f32 2.0, %v3644_v11 }
 0x1f5   : > { %10129 = vrcp.f32 %v6329_v49  ;;  %v10122_v34 = vpop.eup %10121  ;;  %8252 = vst.msk [vmem:[%s11437_s29 + $0x68] sm:$0xf] %vm8225_vm9, %v9138_v7  ;;  %v4793_v20 = vadd.f32 %v4281_v15, %v3769_v59  ;;  %v5692_v39 = vadd.f32 2.0, %v4156_v33  ;;  %v3002_v6 = vsub.f32 0.0, %v2746_v53  ;;  %v12171_v7 = vpop.f32.mrb[42].mxu0 }
 0x1f6   : > { %v2879_v0 = vsub.f32 0.0, %v2623_v56  ;;  %v7099_v48 = vmul.f32 %v10122_v34, %v6587_v60  ;;  %vm3900_vm11 = vcmp.ge.f32.partialorder %v12083_v35, 0.0  ;;  %v5436_v26 = vadd.f32 %v5180_v24, %v4412_v38 }
 0x1f7   : > { %v10124_v12 = vpop.eup %10123  ;;  %v2751_v37 = vand.u32 2147483647, %v12153_v29  ;;  %v6457_v44 = vmul.f32 %v4921_v5, %v12048_v62  ;;  %v5948_v25 = vadd.f32 %v5692_v39, %v3644_v11  ;;  %v3411_v13 = vmul.f32 1.442695, %v3002_v6 }
 0x1f8   : > { %v3772_v16 = vmul.f32 %v10124_v12, %v10124_v12  ;;  %v4284_v4 = vmul.f32 2.0, %v10124_v12  ;;  %v9266_v46 = vpack.c.bf16 %v7099_v48, %v7099_v48  ;;  %v3165_v59 = vmul.f32 1.442695, %v2879_v0 }
 0x1f9   : > { %v10126_v42 = vpop.eup %10125  ;;  %v3007_v15 = vsub.f32 0.0, %v2751_v37  ;;  %v5049_v60 = vsel %vm4025_vm10, %v4537_v21, %v4793_v20  ;;  %v6204_v19 = vsel %vm3900_vm11, %v5436_v26, %v5948_v25  ;;  %v4668_v24 = vadd.f32 %v4156_v33, %v3644_v11 }
 0x1fa   : > { %v6969_v17 = vmul.f32 %v10126_v42, %v6457_v44  ;;  %v4540_v53 = vadd.f32 1.0, %v4284_v4  ;;  %8380 = vst.msk [vmem:[%s11437_s29 + $0x268] sm:$0xf] %vm8225_vm9, %v9266_v46  ;;  %10131 = vrcp.f32 %v6204_v19  ;;  %v5308_v62 = vmul.f32 2.0, %v3772_v16  ;;  %v12196_v46 = vpop.f32.mrb[42].mxu1 }
 0x1fb   : > { %v5820_v49 = vadd.f32 2.0, %v4284_v4  ;;  %v3421_v56 = vmul.f32 1.442695, %v3007_v15  ;;  %10133 = vpow2.f32 %v3411_v13  ;;  %vm4028_vm12 = vcmp.ge.f32.partialorder %v12096_v57, 0.0 }
 0x1fc   : > { %v9136_v5 = vpack.c.bf16 %v6969_v17, %v6969_v17  ;;  %v5564_v34 = vadd.f32 %v5308_v62, %v4540_v53  ;;  %10135 = vpow2.f32 %v3165_v59  ;;  %v6585_v39 = vmul.f32 %v5049_v60, %v12068_v51 }
 0x1fd   : > { %v6076_v21 = vadd.f32 %v5820_v49, %v3772_v16  ;;  %10137 = vpow2.f32 %v3421_v56  ;;  %v12181_v6 = vadd.f32 %v11978_v3, %v11786_v61  ;;  %v12185_v0 = vadd.f32 %v11978_v3, %v11803_v50 }
 0x1fe   : > { %v10128_v20 = vpop.eup %10127  ;;  %8250 = vst.msk [vmem:[%s11437_s29 + $0x60] sm:$0xf] %vm8225_vm9, %v9136_v5  ;;  %v12191_v26 = vadd.f32 %v11978_v3, %v11806_v8  ;;  %v4924_v61 = vsel %vm3900_vm11, %v4412_v38, %v4668_v24  ;;  %v4796_v50 = vadd.f32 %v4284_v4, %v3772_v16  ;;  %vm3898_vm13 = vcmp.ge.f32.partialorder %v12120_v22, 0.0 }
 0x1ff   : > { %v10130_v11 = vpop.eup %10129  ;;  %v6332_v33 = vsel %vm4028_vm12, %v5564_v34, %v6076_v21  ;;  %v3642_v12 = vmul.f32 %v10128_v20, %v10128_v20  ;;  %v4154_v48 = vmul.f32 2.0, %v10128_v20  ;;  %v2621_v37 = vand.u32 2147483647, %v12181_v6 }
 0x200   : > { %v7097_v51 = vmul.f32 %v10130_v11, %v6585_v39  ;;  %10139 = vrcp.f32 %v6332_v33  ;;  %v2749_v15 = vand.u32 2147483647, %v12185_v0  ;;  %v2624_v60 = vand.u32 2147483647, %v12191_v26 }
 0x201   : > { %v4410_v44 = vadd.f32 1.0, %v4154_v48  ;;  %v5178_v25 = vmul.f32 2.0, %v3642_v12  ;;  %v5690_v42 = vadd.f32 2.0, %v4154_v48  ;;  %v2877_v59 = vsub.f32 0.0, %v2621_v37  ;;  %v12214_v37 = vpop.f32.mrb[43].mxu0 }
 0x202   : > { %v9264_v13 = vpack.c.bf16 %v7097_v51, %v7097_v51  ;;  %v6460_v38 = vmul.f32 %v4924_v61, %v12083_v35  ;;  %vm4026_vm14 = vcmp.ge.f32.partialorder %v12138_v54, 0.0  ;;  %v3005_v4 = vsub.f32 0.0, %v2749_v15 }
 0x203   : > { %v5434_v8 = vadd.f32 %v5178_v25, %v4410_v44  ;;  %v5946_v17 = vadd.f32 %v5690_v42, %v3642_v12  ;;  %v3161_v16 = vmul.f32 1.442695, %v2877_v59  ;;  %v5052_v62 = vsel %vm4028_vm12, %v4540_v53, %v4796_v50 }
 0x204   : > { %8378 = vst.msk [vmem:[%s11437_s29 + $0x260] sm:$0xf] %vm8225_vm9, %v9264_v13  ;;  %v10132_v19 = vpop.eup %10131  ;;  %vm3903_vm15 = vcmp.ge.f32.partialorder %v12143_v41, 0.0  ;;  %v12212_v56 = vadd.f32 %v11978_v3, %v11828_v27  ;;  %v4666_v35 = vadd.f32 %v4154_v48, %v3642_v12  ;;  %v3417_v34 = vmul.f32 1.442695, %v3005_v4 }
 0x205   : > { %v6202_v49 = vsel %vm3898_vm13, %v5434_v8, %v5946_v17  ;;  %v10134_v5 = vpop.eup %10133  ;;  %v6972_v24 = vmul.f32 %v10132_v19, %v6460_v38  ;;  %v2880_v53 = vsub.f32 0.0, %v2624_v60  ;;  %v6588_v27 = vmul.f32 %v5052_v62, %v12096_v57 }
 0x206   : > { %10141 = vrcp.f32 %v6202_v49  ;;  %v10136_v21 = vpop.eup %10135  ;;  %v3770_v20 = vmul.f32 %v10134_v5, %v10134_v5  ;;  %v4282_v39 = vmul.f32 2.0, %v10134_v5  ;;  %v2752_v15 = vand.u32 2147483647, %v12212_v56 }
 0x207   : > { %10143 = vpow2.f32 %v3161_v16  ;;  %v10138_v11 = vpop.eup %10137  ;;  %v9139_v33 = vpack.c.bf16 %v6972_v24, %v6972_v24  ;;  %v3647_v51 = vmul.f32 %v10136_v21, %v10136_v21  ;;  %v4159_v61 = vmul.f32 2.0, %v10136_v21 }
 0x208   : > { %10145 = vpow2.f32 %v3417_v34  ;;  %v4538_v50 = vadd.f32 1.0, %v4282_v39  ;;  %v5306_v25 = vmul.f32 2.0, %v3770_v20  ;;  %v5818_v12 = vadd.f32 2.0, %v4282_v39  ;;  %v12229_v34 = vpop.f32.mrb[43].mxu1 }
 0x209   : > { %8253 = vst.msk [vmem:[%s11437_s29 + $0x6c] sm:$0xf] %vm8225_vm9, %v9139_v33  ;;  %v4415_v42 = vadd.f32 1.0, %v4159_v61  ;;  %v5183_v13 = vmul.f32 2.0, %v3647_v51  ;;  %v5695_v59 = vadd.f32 2.0, %v4159_v61  ;;  %vm4031_vm0 = vcmp.ge.f32.partialorder %v12153_v29, 0.0 }
 0x20a   : > { %v10140_v48 = vpop.eup %10139  ;;  %v5562_v17 = vadd.f32 %v5306_v25, %v4538_v50  ;;  %v6074_v60 = vadd.f32 %v5818_v12, %v3770_v20  ;;  %v12223_v57 = vadd.f32 %v11978_v3, %v11846_v36  ;;  %v4922_v38 = vsel %vm3898_vm13, %v4410_v44, %v4666_v35 }
 0x20b   : > { %v7100_v8 = vmul.f32 %v10140_v48, %v6588_v27  ;;  %v5439_v16 = vadd.f32 %v5183_v13, %v4415_v42  ;;  %v5951_v4 = vadd.f32 %v5695_v59, %v3647_v51  ;;  %v3167_v19 = vmul.f32 1.442695, %v2880_v53 }
 0x20c   : > { %v4794_v49 = vadd.f32 %v4282_v39, %v3770_v20  ;;  %v6330_v5 = vsel %vm4026_vm14, %v5562_v17, %v6074_v60  ;;  %v3775_v24 = vmul.f32 %v10138_v11, %v10138_v11  ;;  %v4287_v36 = vmul.f32 2.0, %v10138_v11 }
 0x20d   : > { %v9267_v62 = vpack.c.bf16 %v7100_v8, %v7100_v8  ;;  %10147 = vrcp.f32 %v6330_v5  ;;  %v6207_v21 = vsel %vm3903_vm15, %v5439_v16, %v5951_v4  ;;  %v3008_v33 = vsub.f32 0.0, %v2752_v15 }
 0x20e   : > { %v6458_v44 = vmul.f32 %v4922_v38, %v12120_v22  ;;  %10149 = vrcp.f32 %v6207_v21  ;;  %v5311_v35 = vmul.f32 2.0, %v3775_v24  ;;  %v2622_v20 = vand.u32 2147483647, %v12223_v57 }
 0x20f   : > { %8381 = vst.msk [vmem:[%s11437_s29 + $0x26c] sm:$0xf] %vm8225_vm9, %v9267_v62  ;;  %v4543_v53 = vadd.f32 1.0, %v4287_v36  ;;  %v5823_v27 = vadd.f32 2.0, %v4287_v36  ;;  %vm3901_vm1 = vcmp.ge.f32.partialorder %v12181_v6, 0.0  ;;  %10151 = vpow2.f32 %v3167_v19 }
 0x210   : > { %v10142_v39 = vpop.eup %10141  ;;  %v5050_v11 = vsel %vm4026_vm14, %v4538_v50, %v4794_v49  ;;  %v4671_v48 = vadd.f32 %v4159_v61, %v3647_v51  ;;  %vm4029_vm2 = vcmp.ge.f32.partialorder %v12185_v0, 0.0  ;;  %v3423_v22 = vmul.f32 1.442695, %v3008_v33  ;;  %v12251_v33 = vpop.f32.mrb[44].mxu0 }
 0x211   : > { %v10144_v25 = vpop.eup %10143  ;;  %v6970_v12 = vmul.f32 %v10142_v39, %v6458_v44  ;;  %v4799_v59 = vadd.f32 %v4287_v36, %v3775_v24  ;;  %v5567_v15 = vadd.f32 %v5311_v35, %v4543_v53  ;;  %v6079_v8 = vadd.f32 %v5823_v27, %v3775_v24  ;;  %v12253_v44 = vpop.f32.mrb[44].mxu1 }
 0x212   : > { %v10146_v13 = vpop.eup %10145  ;;  %v3645_v17 = vmul.f32 %v10144_v25, %v10144_v25  ;;  %v4157_v38 = vmul.f32 2.0, %v10144_v25  ;;  %v2878_v4 = vsub.f32 0.0, %v2622_v20  ;;  %10153 = vpow2.f32 %v3423_v22 }
 0x213   : > { %v9137_v60 = vpack.c.bf16 %v6970_v12, %v6970_v12  ;;  %v3773_v16 = vmul.f32 %v10146_v13, %v10146_v13  ;;  %v6335_v19 = vsel %vm4031_vm0, %v5567_v15, %v6079_v8  ;;  %v4285_v5 = vmul.f32 2.0, %v10146_v13 }
 0x214   : > { %v5181_v62 = vmul.f32 2.0, %v3645_v17  ;;  %v4927_v51 = vsel %vm3903_vm15, %v4415_v42, %v4671_v48  ;;  %10155 = vrcp.f32 %v6335_v19  ;;  %v4413_v61 = vadd.f32 1.0, %v4157_v38 }
 0x215   : > { %8251 = vst.msk [vmem:[%s11437_s29 + $0x64] sm:$0xf] %vm8225_vm9, %v9137_v60  ;;  %v5693_v50 = vadd.f32 2.0, %v4157_v38  ;;  %v4541_v49 = vadd.f32 1.0, %v4285_v5  ;;  %v5309_v24 = vmul.f32 2.0, %v3773_v16  ;;  %v5821_v21 = vadd.f32 2.0, %v4285_v5 }
 0x216   : > { %v12249_v36 = vadd.f32 %v11978_v3, %v11853_v31  ;;  %v6586_v35 = vmul.f32 %v5050_v11, %v12138_v54  ;;  %v5437_v20 = vadd.f32 %v5181_v62, %v4413_v61  ;;  %v3163_v27 = vmul.f32 1.442695, %v2878_v4  ;;  %v12261_v54 = vpop.f32.mrb[45].mxu0 }
 0x217   : > { %v5949_v39 = vadd.f32 %v5693_v50, %v3645_v17  ;;  %v10148_v42 = vpop.eup %10147  ;;  %v6463_v25 = vmul.f32 %v4927_v51, %v12143_v41  ;;  %v5055_v12 = vsel %vm4031_vm0, %v4543_v53, %v4799_v59  ;;  %v5565_v48 = vadd.f32 %v5309_v24, %v4541_v49 }
 0x218   : > { %v6077_v22 = vadd.f32 %v5821_v21, %v3773_v16  ;;  %v10150_v13 = vpop.eup %10149  ;;  %v7098_v31 = vmul.f32 %v10148_v42, %v6586_v35  ;;  %v4669_v15 = vadd.f32 %v4157_v38, %v3645_v17  ;;  %10157 = vpow2.f32 %v3163_v27  ;;  %v12273_v35 = vpop.f32.mrb[45].mxu1 }
 0x219   : > { %v6205_v8 = vsel %vm3901_vm1, %v5437_v20, %v5949_v39  ;;  %v10152_v11 = vpop.eup %10151  ;;  %v6975_v60 = vmul.f32 %v10150_v13, %v6463_v25  ;;  %v2750_v53 = vand.u32 2147483647, %v12249_v36  ;;  %v4797_v19 = vadd.f32 %v4285_v5, %v3773_v16 }
 0x21a   : > { %10159 = vrcp.f32 %v6205_v8  ;;  %v6333_v41 = vsel %vm4029_vm2, %v5565_v48, %v6077_v22  ;;  %v9265_v59 = vpack.c.bf16 %v7098_v31, %v7098_v31  ;;  %v3648_v4 = vmul.f32 %v10152_v11, %v10152_v11 }
 0x21b   : > { %10161 = vrcp.f32 %v6333_v41  ;;  %v4160_v17 = vmul.f32 2.0, %v10152_v11  ;;  %v9142_v38 = vpack.c.bf16 %v6975_v60, %v6975_v60  ;;  %v3006_v62 = vsub.f32 0.0, %v2750_v53 }
 0x21c   : > { %v12268_v51 = vadd.f32 %v11978_v3, %v11884_v58  ;;  %8379 = vst.msk [vmem:[%s11437_s29 + $0x264] sm:$0xf] %vm8225_vm9, %v9265_v59  ;;  %vm3904_vm3 = vcmp.ge.f32.partialorder %v12191_v26, 0.0  ;;  %v5184_v24 = vmul.f32 2.0, %v3648_v4  ;;  %v10154_v20 = vpop.eup %10153  ;;  %v6591_v39 = vmul.f32 %v5055_v12, %v12153_v29 }
 0x21d   : > { %v4416_v50 = vadd.f32 1.0, %v4160_v17  ;;  %v5696_v21 = vadd.f32 2.0, %v4160_v17  ;;  %8256 = vst.msk [vmem:[%s11437_s29 + $0x78] sm:$0xf] %vm8225_vm9, %v9142_v38  ;;  %v3419_v16 = vmul.f32 1.442695, %v3006_v62  ;;  %v12281_v58 = vadd.f32 %v11978_v3, %v11886_v18 }
 0x21e   : > { %v2627_v5 = vand.u32 2147483647, %v12268_v51  ;;  %v10156_v27 = vpop.eup %10155  ;;  %v4925_v42 = vsel %vm3901_vm1, %v4413_v61, %v4669_v15  ;;  %v3776_v22 = vmul.f32 %v10154_v20, %v10154_v20  ;;  %v5053_v31 = vsel %vm4029_vm2, %v4541_v49, %v4797_v19 }
 0x21f   : > { %v5440_v25 = vadd.f32 %v5184_v24, %v4416_v50  ;;  %v5952_v48 = vadd.f32 %v5696_v21, %v3648_v4  ;;  %v7103_v13 = vmul.f32 %v10156_v27, %v6591_v39  ;;  %v4288_v8 = vmul.f32 2.0, %v10154_v20  ;;  %v12294_v20 = vpop.f32.mrb[46].mxu0 }
 0x220   : > { %10163 = vpow2.f32 %v3419_v16  ;;  %v5312_v12 = vmul.f32 2.0, %v3776_v22  ;;  %v2883_v18 = vsub.f32 0.0, %v2627_v5  ;;  %v2755_v3 = vand.u32 2147483647, %v12281_v58 }
 0x221   : > { %v6208_v29 = vsel %vm3904_vm3, %v5440_v25, %v5952_v48  ;;  %v9270_v11 = vpack.c.bf16 %v7103_v13, %v7103_v13  ;;  %v4672_v60 = vadd.f32 %v4160_v17, %v3648_v4  ;;  %v4544_v61 = vadd.f32 1.0, %v4288_v8 }
 0x222   : > { %10165 = vrcp.f32 %v6208_v29  ;;  %v10158_v15 = vpop.eup %10157  ;;  %v6461_v41 = vmul.f32 %v4925_v42, %v12181_v6  ;;  %v5824_v53 = vadd.f32 2.0, %v4288_v8  ;;  %v3173_v59 = vmul.f32 1.442695, %v2883_v18  ;;  %v12299_v42 = vpop.f32.mrb[46].mxu1  ;;  %v12309_v18 = vld [vmem:[%s15170_s2] ss:$0 sm:$0xff] }
 0x223   : > { %v3011_v49 = vsub.f32 0.0, %v2755_v3  ;;  %8384 = vst.msk [vmem:[%s11437_s29 + $0x278] sm:$0xf] %vm8225_vm9, %v9270_v11  ;;  %v6589_v19 = vmul.f32 %v5053_v31, %v12185_v0  ;;  %v5568_v62 = vadd.f32 %v5312_v12, %v4544_v61  ;;  %v3646_v24 = vmul.f32 %v10158_v15, %v10158_v15 }
 0x224   : > { %v10160_v38 = vpop.eup %10159  ;;  %v4158_v21 = vmul.f32 2.0, %v10158_v15  ;;  %vm4032_vm4 = vcmp.ge.f32.partialorder %v12212_v56, 0.0  ;;  %v6080_v17 = vadd.f32 %v5824_v53, %v3776_v22  ;;  %10167 = vpow2.f32 %v3173_v59 }
 0x225   : > { %v10162_v39 = vpop.eup %10161  ;;  %v6973_v4 = vmul.f32 %v10160_v38, %v6461_v41  ;;  %v4928_v16 = vsel %vm3904_vm3, %v4416_v50, %v4672_v60  ;;  %v5182_v27 = vmul.f32 2.0, %v3646_v24  ;;  %v3429_v13 = vmul.f32 1.442695, %v3011_v49 }
 0x226   : > { %v7101_v6 = vmul.f32 %v10162_v39, %v6589_v19  ;;  %v4414_v5 = vadd.f32 1.0, %v4158_v21  ;;  %v6336_v25 = vsel %vm4032_vm4, %v5568_v62, %v6080_v17  ;;  %v5694_v48 = vadd.f32 2.0, %v4158_v21 }
 0x227   : > { %v9140_v0 = vpack.c.bf16 %v6973_v4, %v6973_v4  ;;  %10169 = vrcp.f32 %v6336_v25  ;;  %vm3902_vm5 = vcmp.ge.f32.partialorder %v12223_v57, 0.0  ;;  %v4800_v12 = vadd.f32 %v4288_v8, %v3776_v22 }
 0x228   : > { %v9268_v31 = vpack.c.bf16 %v7101_v6, %v7101_v6  ;;  %v5438_v29 = vadd.f32 %v5182_v27, %v4414_v5  ;;  %v5950_v50 = vadd.f32 %v5694_v48, %v3646_v24  ;;  %10171 = vpow2.f32 %v3429_v13  ;;  %v12336_v27 = vpop.f32.mrb[47].mxu0 }
 0x229   : > { %8254 = vst.msk [vmem:[%s11437_s29 + $0x70] sm:$0xf] %vm8225_vm9, %v9140_v0  ;;  %v12313_v3 = vadd.f32 %v12309_v18, %v11892_v40  ;;  %v6464_v60 = vmul.f32 %v4928_v16, %v12191_v26  ;;  %v4670_v15 = vadd.f32 %v4158_v21, %v3646_v24  ;;  %v12320_v22 = vadd.f32 %v12309_v18, %v11934_v45 }
 0x22a   : > { %v10164_v11 = vpop.eup %10163  ;;  %8382 = vst.msk [vmem:[%s11437_s29 + $0x270] sm:$0xf] %vm8225_vm9, %v9268_v31  ;;  %v12324_v8 = vadd.f32 %v12309_v18, %v11946_v2  ;;  %v6206_v41 = vsel %vm3902_vm5, %v5438_v29, %v5950_v50  ;;  %v5056_v45 = vsel %vm4032_vm4, %v4544_v61, %v4800_v12  ;;  %vm4030_vm6 = vcmp.ge.f32.partialorder %v12249_v36, 0.0 }
 0x22b   : > { %v3774_v53 = vmul.f32 %v10164_v11, %v10164_v11  ;;  %v4286_v40 = vmul.f32 2.0, %v10164_v11  ;;  %v2625_v59 = vand.u32 2147483647, %v12313_v3  ;;  %10173 = vrcp.f32 %v6206_v41 }
 0x22c   : > { %v10166_v49 = vpop.eup %10165  ;;  %v2753_v26 = vand.u32 2147483647, %v12320_v22  ;;  %v4926_v2 = vsel %vm3902_vm5, %v4414_v5, %v4670_v15  ;;  %v2628_v39 = vand.u32 2147483647, %v12324_v8  ;;  %vm3907_vm7 = vcmp.ge.f32.partialorder %v12268_v51, 0.0 }
 0x22d   : > { %v6976_v38 = vmul.f32 %v10166_v49, %v6464_v60  ;;  %v4542_v19 = vadd.f32 1.0, %v4286_v40  ;;  %v5310_v62 = vmul.f32 2.0, %v3774_v53  ;;  %v5822_v24 = vadd.f32 2.0, %v4286_v40 }
 0x22e   : > { %v2881_v21 = vsub.f32 0.0, %v2625_v59  ;;  %v10168_v4 = vpop.eup %10167  ;;  %v3009_v16 = vsub.f32 0.0, %v2753_v26  ;;  %v6592_v5 = vmul.f32 %v5056_v45, %v12212_v56  ;;  %v6462_v48 = vmul.f32 %v4926_v2, %v12223_v57  ;;  %v12350_v45 = vpop.f32.mrb[47].mxu1 }
 0x22f   : > { %v9143_v17 = vpack.c.bf16 %v6976_v38, %v6976_v38  ;;  %v5566_v6 = vadd.f32 %v5310_v62, %v4542_v19  ;;  %v6078_v0 = vadd.f32 %v5822_v24, %v3774_v53  ;;  %v3651_v61 = vmul.f32 %v10168_v4, %v10168_v4 }
 0x230   : > { %v4163_v25 = vmul.f32 2.0, %v10168_v4  ;;  %vm4035_vm8 = vcmp.ge.f32.partialorder %v12281_v58, 0.0  ;;  %v3169_v13 = vmul.f32 1.442695, %v2881_v21  ;;  %v2884_v31 = vsub.f32 0.0, %v2628_v39 }
 0x231   : > { %8257 = vst.msk [vmem:[%s11437_s29 + $0x7c] sm:$0xf] %vm8225_vm9, %v9143_v17  ;;  %v10170_v29 = vpop.eup %10169  ;;  %v6334_v12 = vsel %vm4030_vm6, %v5566_v6, %v6078_v0  ;;  %v5187_v11 = vmul.f32 2.0, %v3651_v61  ;;  %v12348_v60 = vadd.f32 %v12309_v18, %v11958_v1  ;;  %v3425_v57 = vmul.f32 1.442695, %v3009_v16 }
 0x232   : > { %v4419_v50 = vadd.f32 1.0, %v4163_v25  ;;  %v10172_v15 = vpop.eup %10171  ;;  %v7104_v41 = vmul.f32 %v10170_v29, %v6592_v5  ;;  %10175 = vrcp.f32 %v6334_v12  ;;  %v5699_v56 = vadd.f32 2.0, %v4163_v25 }
 0x233   : > { %v4798_v59 = vadd.f32 %v4286_v40, %v3774_v53  ;;  %v3779_v26 = vmul.f32 %v10172_v15, %v10172_v15  ;;  %v4291_v38 = vmul.f32 2.0, %v10172_v15  ;;  %10177 = vpow2.f32 %v3169_v13  ;;  %v15191_v15 = vld [vmem:[#allocation2_spill] sm:$0xff] }
 0x234   : > { %v5443_v49 = vadd.f32 %v5187_v11, %v4419_v50  ;;  %v9271_v62 = vpack.c.bf16 %v7104_v41, %v7104_v41  ;;  %v5955_v2 = vadd.f32 %v5699_v56, %v3651_v61  ;;  %v3175_v24 = vmul.f32 1.442695, %v2884_v31 }
 0x235   : > { %v10174_v21 = vpop.eup %10173  ;;  %v4547_v39 = vadd.f32 1.0, %v4291_v38  ;;  %v5315_v1 = vmul.f32 2.0, %v3779_v26  ;;  %v5827_v4 = vadd.f32 2.0, %v4291_v38  ;;  %v12354_v17 = vadd.f32 %v12309_v18, %v11964_v32 }
 0x236   : > { %8385 = vst.msk [vmem:[%s11437_s29 + $0x27c] sm:$0xf] %vm8225_vm9, %v9271_v62  ;;  %v6974_v53 = vmul.f32 %v10174_v21, %v6462_v48  ;;  %v6211_v40 = vsel %vm3907_vm7, %v5443_v49, %v5955_v2  ;;  %10179 = vpow2.f32 %v3425_v57  ;;  %v2756_v6 = vand.u32 2147483647, %v12348_v60 }
 0x237   : > { %v5054_v16 = vsel %vm4030_vm6, %v4542_v19, %v4798_v59  ;;  %10181 = vrcp.f32 %v6211_v40  ;;  %v5571_v0 = vadd.f32 %v5315_v1, %v4547_v39  ;;  %v6083_v5 = vadd.f32 %v5827_v4, %v3779_v26  ;;  %v12389_v1 = vpop.f32.mrb[48].mxu0  ;;  %v12391_v40 = vpop.f32.mrb[48].mxu1 }
 0x238   : > { %v9141_v13 = vpack.c.bf16 %v6974_v53, %v6974_v53  ;;  %v4675_v31 = vadd.f32 %v4163_v25, %v3651_v61  ;;  %10183 = vpow2.f32 %v3175_v24  ;;  %v3012_v32 = vsub.f32 0.0, %v2756_v6  ;;  %v15192_v61 = vld [vmem:[#allocation3_spill] sm:$0xff] }
 0x239   : > { %v4803_v29 = vadd.f32 %v4291_v38, %v3779_v26  ;;  %v6339_v48 = vsel %vm4035_vm8, %v5571_v0, %v6083_v5  ;;  %v2626_v12 = vand.u32 2147483647, %v12354_v17  ;;  %v12368_v11 = vadd.f32 %v12309_v18, %v11972_v23 }
 0x23a   : > { %8255 = vst.msk [vmem:[%s11437_s29 + $0x74] sm:$0xf] %vm8225_vm9, %v9141_v13  ;;  %10185 = vrcp.f32 %v6339_v48  ;;  %v3431_v19 = vmul.f32 1.442695, %v3012_v32  ;;  %v12374_v41 = vadd.f32 %v12309_v18, %v15191_v15  ;;  %v12378_v25 = vadd.f32 %v12309_v18, %v15192_v61 }
 0x23b   : > { %v6590_v56 = vmul.f32 %v5054_v16, %v12249_v36  ;;  %v2882_v57 = vsub.f32 0.0, %v2626_v12  ;;  %v2754_v59 = vand.u32 2147483647, %v12368_v11  ;;  %v4931_v23 = vsel %vm3907_vm7, %v4419_v50, %v4675_v31 }
 0x23c   : > { %v10176_v49 = vpop.eup %10175  ;;  %10187 = vpow2.f32 %v3431_v19  ;;  %v2631_v26 = vand.u32 2147483647, %v12374_v41  ;;  %v5059_v62 = vsel %vm4035_vm8, %v4547_v39, %v4803_v29  ;;  %vm3905_vm10 = vcmp.ge.f32.partialorder %v12313_v3, 0.0 }
 0x23d   : > { %v7102_v38 = vmul.f32 %v10176_v49, %v6590_v56  ;;  %v3171_v2 = vmul.f32 1.442695, %v2882_v57  ;;  %v3010_v24 = vsub.f32 0.0, %v2754_v59  ;;  %v10178_v21 = vpop.eup %10177  ;;  %v2759_v36 = vand.u32 2147483647, %v12378_v25  ;;  %v12403_v59 = vpop.f32.mrb[49].mxu0 }
 0x23e   : > { %v3649_v53 = vmul.f32 %v10178_v21, %v10178_v21  ;;  %v4161_v50 = vmul.f32 2.0, %v10178_v21  ;;  %v6467_v16 = vmul.f32 %v4931_v23, %v12268_v51  ;;  %v6595_v39 = vmul.f32 %v5059_v62, %v12281_v58  ;;  %v12405_v49 = vpop.f32.mrb[49].mxu1 }
 0x23f   : > { %v9269_v4 = vpack.c.bf16 %v7102_v38, %v7102_v38  ;;  %10189 = vpow2.f32 %v3171_v2  ;;  %vm4033_vm11 = vcmp.ge.f32.partialorder %v12320_v22, 0.0  ;;  %v3427_v0 = vmul.f32 1.442695, %v3010_v24 }
 0x240   : > { %v10180_v6 = vpop.eup %10179  ;;  %v2887_v5 = vsub.f32 0.0, %v2631_v26  ;;  %v4417_v31 = vadd.f32 1.0, %v4161_v50  ;;  %v5185_v32 = vmul.f32 2.0, %v3649_v53  ;;  %v5697_v29 = vadd.f32 2.0, %v4161_v50 }
 0x241   : > { %v10182_v13 = vpop.eup %10181  ;;  %8383 = vst.msk [vmem:[%s11437_s29 + $0x274] sm:$0xf] %vm8225_vm9, %v9269_v4  ;;  %v12400_v48 = vadd.f32 %v12309_v18, %v12023_v30  ;;  %v3777_v15 = vmul.f32 %v10180_v6, %v10180_v6  ;;  %v4289_v51 = vmul.f32 2.0, %v10180_v6  ;;  %10191 = vpow2.f32 %v3427_v0 }
 0x242   : > { %v10184_v12 = vpop.eup %10183  ;;  %v6979_v19 = vmul.f32 %v10182_v13, %v6467_v16  ;;  %v5441_v58 = vadd.f32 %v5185_v32, %v4417_v31  ;;  %v5953_v61 = vadd.f32 %v5697_v29, %v3649_v53  ;;  %vm3908_vm12 = vcmp.ge.f32.partialorder %v12324_v8, 0.0 }
 0x243   : > { %v3652_v56 = vmul.f32 %v10184_v12, %v10184_v12  ;;  %v3015_v57 = vsub.f32 0.0, %v2759_v36  ;;  %v4673_v30 = vadd.f32 %v4161_v50, %v3649_v53  ;;  %v4545_v38 = vadd.f32 1.0, %v4289_v51 }
 0x244   : > { %v10186_v23 = vpop.eup %10185  ;;  %v9146_v26 = vpack.c.bf16 %v6979_v19, %v6979_v19  ;;  %v3181_v62 = vmul.f32 1.442695, %v2887_v5  ;;  %v6209_v24 = vsel %vm3905_vm10, %v5441_v58, %v5953_v61  ;;  %v5313_v21 = vmul.f32 2.0, %v3777_v15 }
 0x245   : > { %v7107_v2 = vmul.f32 %v10186_v23, %v6595_v39  ;;  %v5825_v4 = vadd.f32 2.0, %v4289_v51  ;;  %10193 = vrcp.f32 %v6209_v24  ;;  %v4164_v36 = vmul.f32 2.0, %v10184_v12 }
 0x246   : > { %v10188_v6 = vpop.eup %10187  ;;  %8260 = vst.msk [vmem:[%s11437_s29 + $0x88] sm:$0xf] %vm8225_vm9, %v9146_v26  ;;  %v5188_v16 = vmul.f32 2.0, %v3652_v56  ;;  %v2629_v0 = vand.u32 2147483647, %v12400_v48  ;;  %v5569_v32 = vadd.f32 %v5313_v21, %v4545_v38  ;;  %vm4036_vm13 = vcmp.ge.f32.partialorder %v12348_v60, 0.0 }
 0x247   : > { %v9274_v13 = vpack.c.bf16 %v7107_v2, %v7107_v2  ;;  %v6081_v53 = vadd.f32 %v5825_v4, %v3777_v15  ;;  %v3437_v50 = vmul.f32 1.442695, %v3015_v57  ;;  %v4929_v39 = vsel %vm3905_vm10, %v4417_v31, %v4673_v30  ;;  %v12419_v26 = vpop.f32.mrb[50].mxu0 }
 0x248   : > { %v4420_v5 = vadd.f32 1.0, %v4164_v36  ;;  %v5700_v29 = vadd.f32 2.0, %v4164_v36  ;;  %v3780_v19 = vmul.f32 %v10188_v6, %v10188_v6  ;;  %v4801_v61 = vadd.f32 %v4289_v51, %v3777_v15  ;;  %15193 = vst [vmem:[#allocation4_spill] sm:$0xff] %v12419_v26 }
 0x249   : > { %v10190_v58 = vpop.eup %10189  ;;  %8388 = vst.msk [vmem:[%s11437_s29 + $0x288] sm:$0xf] %vm8225_vm9, %v9274_v13  ;;  %v6337_v12 = vsel %vm4033_vm11, %v5569_v32, %v6081_v53  ;;  %v4292_v23 = vmul.f32 2.0, %v10188_v6  ;;  %10195 = vpow2.f32 %v3181_v62  ;;  %v4676_v2 = vadd.f32 %v4164_v36, %v3652_v56  ;;  %v12428_v32 = vpop.f32.mrb[50].mxu1 }
 0x24a   : > { %10197 = vrcp.f32 %v6337_v12  ;;  %v5444_v57 = vadd.f32 %v5188_v16, %v4420_v5  ;;  %v5956_v24 = vadd.f32 %v5700_v29, %v3652_v56  ;;  %vm3906_vm14 = vcmp.ge.f32.partialorder %v12354_v17, 0.0  ;;  %15194 = vst [vmem:[#allocation5_spill] sm:$0xff] %v12428_v32 }
 0x24b   : > { %v4548_v31 = vadd.f32 1.0, %v4292_v23  ;;  %v5316_v30 = vmul.f32 2.0, %v3780_v19  ;;  %v2885_v21 = vsub.f32 0.0, %v2629_v0  ;;  %v12424_v4 = vadd.f32 %v12309_v18, %v12035_v10  ;;  %v10192_v15 = vpop.eup %10191 }
 0x24c   : > { %v6212_v51 = vsel %vm3908_vm12, %v5444_v57, %v5956_v24  ;;  %v5828_v62 = vadd.f32 2.0, %v4292_v23  ;;  %v3650_v6 = vmul.f32 %v10190_v58, %v10190_v58  ;;  %v4162_v13 = vmul.f32 2.0, %v10190_v58 }
 0x24d   : > { %v6465_v56 = vmul.f32 %v4929_v39, %v12313_v3  ;;  %10199 = vrcp.f32 %v6212_v51  ;;  %v5572_v36 = vadd.f32 %v5316_v30, %v4548_v31  ;;  %v3778_v16 = vmul.f32 %v10192_v15, %v10192_v15 }
 0x24e   : > { %vm4034_vm15 = vcmp.ge.f32.partialorder %v12368_v11, 0.0  ;;  %v5057_v10 = vsel %vm4033_vm11, %v4545_v38, %v4801_v61  ;;  %v4932_v0 = vsel %vm3908_vm12, %v4420_v5, %v4676_v2  ;;  %v6084_v53 = vadd.f32 %v5828_v62, %v3780_v19 }
 0x24f   : > { %v4418_v29 = vadd.f32 1.0, %v4162_v13  ;;  %v4804_v12 = vadd.f32 %v4292_v23, %v3780_v19  ;;  %v5186_v57 = vmul.f32 2.0, %v3650_v6  ;;  %v5698_v58 = vadd.f32 2.0, %v4162_v13  ;;  %v10194_v32 = vpop.eup %10193 }
 0x250   : > { %v4290_v24 = vmul.f32 2.0, %v10192_v15  ;;  %v6340_v3 = vsel %vm4036_vm13, %v5572_v36, %v6084_v53  ;;  %v5314_v39 = vmul.f32 2.0, %v3778_v16  ;;  %10201 = vpow2.f32 %v3437_v50  ;;  %v12447_v53 = vpop.f32.mrb[51].mxu0 }
 0x251   : > { %v3177_v30 = vmul.f32 1.442695, %v2885_v21  ;;  %v6977_v51 = vmul.f32 %v10194_v32, %v6465_v56  ;;  %10203 = vrcp.f32 %v6340_v3  ;;  %v5442_v26 = vadd.f32 %v5186_v57, %v4418_v29 }
 0x252   : > { %v5954_v38 = vadd.f32 %v5698_v58, %v3650_v6  ;;  %v6593_v5 = vmul.f32 %v5057_v10, %v12320_v22  ;;  %v4674_v61 = vadd.f32 %v4162_v13, %v3650_v6  ;;  %v4546_v2 = vadd.f32 1.0, %v4290_v24 }
 0x253   : > { %v5826_v19 = vadd.f32 2.0, %v4290_v24  ;;  %v10196_v23 = vpop.eup %10195  ;;  %v9144_v62 = vpack.c.bf16 %v6977_v51, %v6977_v51  ;;  %10205 = vpow2.f32 %v3177_v30  ;;  %v2757_v36 = vand.u32 2147483647, %v12424_v4 }
 0x254   : > { %v6210_v15 = vsel %vm3906_vm14, %v5442_v26, %v5954_v38  ;;  %v10198_v50 = vpop.eup %10197  ;;  %v6468_v21 = vmul.f32 %v4932_v0, %v12324_v8  ;;  %v5570_v32 = vadd.f32 %v5314_v39, %v4546_v2  ;;  %v5060_v6 = vsel %vm4036_vm13, %v4548_v31, %v4804_v12 }
 0x255   : > { %10207 = vrcp.f32 %v6210_v15  ;;  %v6082_v56 = vadd.f32 %v5826_v19, %v3778_v16  ;;  %8258 = vst.msk [vmem:[%s11437_s29 + $0x80] sm:$0xf] %vm8225_vm9, %v9144_v62  ;;  %v7105_v22 = vmul.f32 %v10198_v50, %v6593_v5  ;;  %v3655_v13 = vmul.f32 %v10196_v23, %v10196_v23 }
 0x256   : > { %v4167_v10 = vmul.f32 2.0, %v10196_v23  ;;  %v4930_v26 = vsel %vm3906_vm14, %v4418_v29, %v4674_v61  ;;  %v3013_v0 = vsub.f32 0.0, %v2757_v36  ;;  %v12455_v57 = vadd.f32 %v12309_v18, %v12062_v28 }
 0x257   : > { %v6338_v8 = vsel %vm4034_vm15, %v5570_v32, %v6082_v56  ;;  %v10200_v58 = vpop.eup %10199  ;;  %v9272_v3 = vpack.c.bf16 %v7105_v22, %v7105_v22  ;;  %v4802_v39 = vadd.f32 %v4290_v24, %v3778_v16  ;;  %v5191_v30 = vmul.f32 2.0, %v3655_v13 }
 0x258   : > { %10209 = vrcp.f32 %v6338_v8  ;;  %v4423_v31 = vadd.f32 1.0, %v4167_v10  ;;  %v6980_v12 = vmul.f32 %v10200_v58, %v6468_v21  ;;  %v5703_v51 = vadd.f32 2.0, %v4167_v10 }
 0x259   : > { %v3433_v38 = vmul.f32 1.442695, %v3013_v0  ;;  %8386 = vst.msk [vmem:[%s11437_s29 + $0x280] sm:$0xf] %vm8225_vm9, %v9272_v3  ;;  %v6596_v29 = vmul.f32 %v5060_v6, %v12348_v60  ;;  %vm3911_vm0 = vcmp.ge.f32.partialorder %v12374_v41, 0.0  ;;  %v12464_v28 = vadd.f32 %v12309_v18, %v12075_v14 }
 0x25a   : > { %v2632_v5 = vand.u32 2147483647, %v12455_v57  ;;  %v10202_v16 = vpop.eup %10201  ;;  %v9147_v24 = vpack.c.bf16 %v6980_v12, %v6980_v12  ;;  %v6466_v61 = vmul.f32 %v4930_v26, %v12354_v17  ;;  %v5447_v19 = vadd.f32 %v5191_v30, %v4423_v31  ;;  %v12474_v26 = vpop.f32.mrb[51].mxu1 }
 0x25b   : > { %v5959_v23 = vadd.f32 %v5703_v51, %v3655_v13  ;;  %v10204_v62 = vpop.eup %10203  ;;  %v3783_v15 = vmul.f32 %v10202_v16, %v10202_v16  ;;  %v4295_v36 = vmul.f32 2.0, %v10202_v16  ;;  %10211 = vpow2.f32 %v3433_v38 }
 0x25c   : > { %v2888_v50 = vsub.f32 0.0, %v2632_v5  ;;  %8261 = vst.msk [vmem:[%s11437_s29 + $0x8c] sm:$0xf] %vm8225_vm9, %v9147_v24  ;;  %v7108_v60 = vmul.f32 %v10204_v62, %v6596_v29  ;;  %v5058_v21 = vsel %vm4034_vm15, %v4546_v2, %v4802_v39  ;;  %v4679_v32 = vadd.f32 %v4167_v10, %v3655_v13 }
 0x25d   : > { %v6215_v14 = vsel %vm3911_vm0, %v5447_v19, %v5959_v23  ;;  %v10206_v56 = vpop.eup %10205  ;;  %v4551_v17 = vadd.f32 1.0, %v4295_v36  ;;  %v5319_v22 = vmul.f32 2.0, %v3783_v15  ;;  %v2760_v6 = vand.u32 2147483647, %v12464_v28 }
 0x25e   : > { %10213 = vrcp.f32 %v6215_v14  ;;  %v9275_v0 = vpack.c.bf16 %v7108_v60, %v7108_v60  ;;  %v5831_v58 = vadd.f32 2.0, %v4295_v36  ;;  %v3653_v3 = vmul.f32 %v10206_v56, %v10206_v56 }
 0x25f   : > { %v10208_v8 = vpop.eup %10207  ;;  %v4165_v12 = vmul.f32 2.0, %v10206_v56  ;;  %vm4039_vm1 = vcmp.ge.f32.partialorder %v12378_v25, 0.0  ;;  %v5575_v2 = vadd.f32 %v5319_v22, %v4551_v17  ;;  %v3183_v13 = vmul.f32 1.442695, %v2888_v50 }
 0x260   : > { %v6978_v30 = vmul.f32 %v10208_v8, %v6466_v61  ;;  %8389 = vst.msk [vmem:[%s11437_s29 + $0x28c] sm:$0xf] %vm8225_vm9, %v9275_v0  ;;  %v6594_v10 = vmul.f32 %v5058_v21, %v12368_v11  ;;  %v4807_v39 = vadd.f32 %v4295_v36, %v3783_v15  ;;  %v6087_v51 = vadd.f32 %v5831_v58, %v3783_v15 }
 0x261   : > { %v4421_v38 = vadd.f32 1.0, %v4165_v12  ;;  %v5189_v16 = vmul.f32 2.0, %v3653_v3  ;;  %v5701_v24 = vadd.f32 2.0, %v4165_v12  ;;  %10215 = vpow2.f32 %v3183_v13  ;;  %v12516_v13 = vpop.f32.mrb[52].mxu0 }
 0x262   : > { %v10210_v29 = vpop.eup %10209  ;;  %v9145_v5 = vpack.c.bf16 %v6978_v30, %v6978_v30  ;;  %v4935_v61 = vsel %vm3911_vm0, %v4423_v31, %v4679_v32  ;;  %v6343_v23 = vsel %vm4039_vm1, %v5575_v2, %v6087_v51  ;;  %v3016_v62 = vsub.f32 0.0, %v2760_v6 }
 0x263   : > { %v7106_v19 = vmul.f32 %v10210_v29, %v6594_v10  ;;  %10217 = vrcp.f32 %v6343_v23  ;;  %vm3909_vm2 = vcmp.ge.f32.partialorder %v12400_v48, 0.0  ;;  %v5445_v11 = vadd.f32 %v5189_v16, %v4421_v38  ;;  %v12518_v10 = vpop.f32.mrb[52].mxu1  ;;  %v12525_v23 = vpop.f32.mrb[53].mxu0 }
 0x264   : > { %8259 = vst.msk [vmem:[%s11437_s29 + $0x84] sm:$0xf] %vm8225_vm9, %v9145_v5  ;;  %v5957_v15 = vadd.f32 %v5701_v24, %v3653_v3  ;;  %v3439_v50 = vmul.f32 1.442695, %v3016_v62  ;;  %v12489_v60 = vadd.f32 %v12309_v18, %v12098_v9  ;;  %v12493_v31 = vadd.f32 %v12309_v18, %v12107_v63 }
 0x265   : > { %v9273_v36 = vpack.c.bf16 %v7106_v19, %v7106_v19  ;;  %v10212_v21 = vpop.eup %10211  ;;  %v6471_v32 = vmul.f32 %v4935_v61, %v12374_v41  ;;  %v5063_v14 = vsel %vm4039_vm1, %v4551_v17, %v4807_v39  ;;  %v12502_v22 = vadd.f32 %v12309_v18, %v12130_v55 }
 0x266   : > { %v6213_v56 = vsel %vm3909_vm2, %v5445_v11, %v5957_v15  ;;  %v3781_v9 = vmul.f32 %v10212_v21, %v10212_v21  ;;  %v4293_v6 = vmul.f32 2.0, %v10212_v21  ;;  %v2630_v63 = vand.u32 2147483647, %v12489_v60 }
 0x267   : > { %8387 = vst.msk [vmem:[%s11437_s29 + $0x284] sm:$0xf] %vm8225_vm9, %v9273_v36  ;;  %10219 = vrcp.f32 %v6213_v56  ;;  %v4677_v0 = vadd.f32 %v4165_v12, %v3653_v3  ;;  %v2758_v41 = vand.u32 2147483647, %v12493_v31  ;;  %v12510_v17 = vadd.f32 %v12309_v18, %v12132_v47 }
 0x268   : > { %v10214_v8 = vpop.eup %10213  ;;  %10221 = vpow2.f32 %v3439_v50  ;;  %v4549_v30 = vadd.f32 1.0, %v4293_v6  ;;  %v5317_v55 = vmul.f32 2.0, %v3781_v9  ;;  %v12514_v2 = vadd.f32 %v12309_v18, %v12145_v43 }
 0x269   : > { %v6983_v58 = vmul.f32 %v10214_v8, %v6471_v32  ;;  %v5829_v3 = vadd.f32 2.0, %v4293_v6  ;;  %v2886_v12 = vsub.f32 0.0, %v2630_v63  ;;  %v3014_v39 = vsub.f32 0.0, %v2758_v41  ;;  %v12534_v63 = vpop.f32.mrb[53].mxu1 }
 0x26a   : > { %v2635_v51 = vand.u32 2147483647, %v12502_v22  ;;  %v6599_v47 = vmul.f32 %v5063_v14, %v12378_v25  ;;  %vm4037_vm3 = vcmp.ge.f32.partialorder %v12424_v4, 0.0  ;;  %v5573_v5 = vadd.f32 %v5317_v55, %v4549_v30 }
 0x26b   : > { %v9150_v29 = vpack.c.bf16 %v6983_v58, %v6983_v58  ;;  %v10216_v16 = vpop.eup %10215  ;;  %v4933_v43 = vsel %vm3909_vm2, %v4421_v38, %v4677_v0  ;;  %v6085_v24 = vadd.f32 %v5829_v3, %v3781_v9  ;;  %v3179_v19 = vmul.f32 1.442695, %v2886_v12 }
 0x26c   : > { %v3435_v61 = vmul.f32 1.442695, %v3014_v39  ;;  %v3656_v62 = vmul.f32 %v10216_v16, %v10216_v16  ;;  %v4168_v11 = vmul.f32 2.0, %v10216_v16  ;;  %v2891_v15 = vsub.f32 0.0, %v2635_v51  ;;  %v12541_v16 = vpop.f32.mrb[54].mxu0 }
 0x26d   : > { %8264 = vst.msk [vmem:[%s11437_s29 + $0x98] sm:$0xf] %vm8225_vm9, %v9150_v29  ;;  %v2763_v36 = vand.u32 2147483647, %v12510_v17  ;;  %v10218_v25 = vpop.eup %10217  ;;  %v4805_v50 = vadd.f32 %v4293_v6, %v3781_v9  ;;  %v6341_v21 = vsel %vm4037_vm3, %v5573_v5, %v6085_v24  ;;  %10223 = vpow2.f32 %v3179_v19 }
 0x26e   : > { %v2633_v38 = vand.u32 2147483647, %v12514_v2  ;;  %v7111_v32 = vmul.f32 %v10218_v25, %v6599_v47  ;;  %v6469_v14 = vmul.f32 %v4933_v43, %v12400_v48  ;;  %10225 = vrcp.f32 %v6341_v21  ;;  %v12545_v25 = vpop.f32.mrb[54].mxu1 }
 0x26f   : > { %v4424_v56 = vadd.f32 1.0, %v4168_v11  ;;  %v5192_v8 = vmul.f32 2.0, %v3656_v62  ;;  %v5704_v0 = vadd.f32 2.0, %v4168_v11  ;;  %10227 = vpow2.f32 %v3435_v61 }
 0x270   : > { %v3189_v41 = vmul.f32 1.442695, %v2891_v15  ;;  %v9278_v9 = vpack.c.bf16 %v7111_v32, %v7111_v32  ;;  %vm3912_vm4 = vcmp.ge.f32.partialorder %v12455_v57, 0.0  ;;  %v3019_v6 = vsub.f32 0.0, %v2763_v36 }
 0x271   : > { %v10220_v58 = vpop.eup %10219  ;;  %v2889_v55 = vsub.f32 0.0, %v2633_v38  ;;  %v5061_v48 = vsel %vm4037_vm3, %v4549_v30, %v4805_v50  ;;  %v5448_v39 = vadd.f32 %v5192_v8, %v4424_v56  ;;  %v5960_v51 = vadd.f32 %v5704_v0, %v3656_v62 }
 0x272   : > { %v10222_v3 = vpop.eup %10221  ;;  %v6981_v12 = vmul.f32 %v10220_v58, %v6469_v14  ;;  %8392 = vst.msk [vmem:[%s11437_s29 + $0x298] sm:$0xf] %vm8225_vm9, %v9278_v9  ;;  %10229 = vpow2.f32 %v3189_v41  ;;  %v3445_v5 = vmul.f32 1.442695, %v3019_v6  ;;  %v4680_v24 = vadd.f32 %v4168_v11, %v3656_v62 }
 0x273   : > { %v3784_v29 = vmul.f32 %v10222_v3, %v10222_v3  ;;  %v4296_v47 = vmul.f32 2.0, %v10222_v3  ;;  %v6216_v19 = vsel %vm3912_vm4, %v5448_v39, %v5960_v51  ;;  %v3185_v61 = vmul.f32 1.442695, %v2889_v55 }
 0x274   : > { %v9148_v43 = vpack.c.bf16 %v6981_v12, %v6981_v12  ;;  %10231 = vrcp.f32 %v6216_v19  ;;  %v12551_v21 = vadd.f32 %v12309_v18, %v12155_v52  ;;  %vm4040_vm5 = vcmp.ge.f32.partialorder %v12464_v28, 0.0 }
 0x275   : > { %v4552_v15 = vadd.f32 1.0, %v4296_v47  ;;  %v4808_v30 = vadd.f32 %v4296_v47, %v3784_v29  ;;  %v5320_v36 = vmul.f32 2.0, %v3784_v29  ;;  %v5832_v50 = vadd.f32 2.0, %v4296_v47 }
 0x276   : > { %8262 = vst.msk [vmem:[%s11437_s29 + $0x90] sm:$0xf] %vm8225_vm9, %v9148_v43  ;;  %10233 = vpow2.f32 %v3445_v5  ;;  %vm3910_vm6 = vcmp.ge.f32.partialorder %v12489_v60, 0.0  ;;  %v6597_v38 = vmul.f32 %v5061_v48, %v12424_v4  ;;  %v4936_v32 = vsel %vm3912_vm4, %v4424_v56, %v4680_v24 }
 0x277   : > { %v5576_v62 = vadd.f32 %v5320_v36, %v4552_v15  ;;  %10235 = vpow2.f32 %v3185_v61  ;;  %v10224_v11 = vpop.eup %10223  ;;  %v6088_v14 = vadd.f32 %v5832_v50, %v3784_v29  ;;  %v2761_v8 = vand.u32 2147483647, %v12551_v21 }
 0x278   : > { %v10226_v0 = vpop.eup %10225  ;;  %v5064_v52 = vsel %vm4040_vm5, %v4552_v15, %v4808_v30  ;;  %v3654_v41 = vmul.f32 %v10224_v11, %v10224_v11  ;;  %v4166_v58 = vmul.f32 2.0, %v10224_v11  ;;  %v12563_v9 = vadd.f32 %v12309_v18, %v12171_v7 }
 0x279   : > { %v10228_v6 = vpop.eup %10227  ;;  %v7109_v55 = vmul.f32 %v10226_v0, %v6597_v38  ;;  %v6344_v4 = vsel %vm4040_vm5, %v5576_v62, %v6088_v14  ;;  %v3017_v56 = vsub.f32 0.0, %v2761_v8  ;;  %v12569_v3 = vadd.f32 %v12309_v18, %v12196_v46 }
 0x27a   : > { %10237 = vrcp.f32 %v6344_v4  ;;  %v4422_v12 = vadd.f32 1.0, %v4166_v58  ;;  %v5190_v48 = vmul.f32 2.0, %v3654_v41  ;;  %vm4038_vm7 = vcmp.ge.f32.partialorder %v12493_v31, 0.0 }
 0x27b   : > { %v9276_v39 = vpack.c.bf16 %v7109_v55, %v7109_v55  ;;  %v5702_v51 = vadd.f32 2.0, %v4166_v58  ;;  %v3782_v7 = vmul.f32 %v10228_v6, %v10228_v6  ;;  %v4294_v29 = vmul.f32 2.0, %v10228_v6  ;;  %v12582_v55 = vpop.f32.mrb[55].mxu0 }
 0x27c   : > { %v10230_v47 = vpop.eup %10229  ;;  %v6472_v5 = vmul.f32 %v4936_v32, %v12455_v57  ;;  %v6600_v43 = vmul.f32 %v5064_v52, %v12464_v28  ;;  %v5446_v24 = vadd.f32 %v5190_v48, %v4422_v12  ;;  %v3441_v19 = vmul.f32 1.442695, %v3017_v56 }
 0x27d   : > { %8390 = vst.msk [vmem:[%s11437_s29 + $0x290] sm:$0xf] %vm8225_vm9, %v9276_v39  ;;  %v5958_v46 = vadd.f32 %v5702_v51, %v3654_v41  ;;  %v4550_v61 = vadd.f32 1.0, %v4294_v29  ;;  %vm3915_vm8 = vcmp.ge.f32.partialorder %v12502_v22, 0.0  ;;  %v2636_v15 = vand.u32 2147483647, %v12563_v9 }
 0x27e   : > { %v2764_v30 = vand.u32 2147483647, %v12569_v3  ;;  %v10232_v36 = vpop.eup %10231  ;;  %v5318_v50 = vmul.f32 2.0, %v3782_v7  ;;  %v5830_v62 = vadd.f32 2.0, %v4294_v29  ;;  %v3659_v11 = vmul.f32 %v10230_v47, %v10230_v47 }
 0x27f   : > { %v4171_v38 = vmul.f32 2.0, %v10230_v47  ;;  %v6984_v32 = vmul.f32 %v10232_v36, %v6472_v5  ;;  %v4678_v28 = vadd.f32 %v4166_v58, %v3654_v41  ;;  %v6214_v14 = vsel %vm3910_vm6, %v5446_v24, %v5958_v46 }
 0x280   : > { %v10234_v57 = vpop.eup %10233  ;;  %10239 = vpow2.f32 %v3441_v19  ;;  %v4806_v0 = vadd.f32 %v4294_v29, %v3782_v7  ;;  %v5574_v52 = vadd.f32 %v5318_v50, %v4550_v61  ;;  %v6086_v6 = vadd.f32 %v5830_v62, %v3782_v7 }
 0x281   : > { %v10236_v8 = vpop.eup %10235  ;;  %10241 = vrcp.f32 %v6214_v14  ;;  %vm4043_vm10 = vcmp.ge.f32.partialorder %v12510_v17, 0.0  ;;  %v9151_v4 = vpack.c.bf16 %v6984_v32, %v6984_v32  ;;  %v4427_v56 = vadd.f32 1.0, %v4171_v38  ;;  %v12592_v14 = vpop.f32.mrb[55].mxu1 }
 0x282   : > { %v5195_v48 = vmul.f32 2.0, %v3659_v11  ;;  %v2892_v39 = vsub.f32 0.0, %v2636_v15  ;;  %v6342_v41 = vsel %vm4038_vm7, %v5574_v52, %v6086_v6  ;;  %v5707_v58 = vadd.f32 2.0, %v4171_v38 }
 0x283   : > { %v3787_v51 = vmul.f32 %v10234_v57, %v10234_v57  ;;  %v4299_v47 = vmul.f32 2.0, %v10234_v57  ;;  %8265 = vst.msk [vmem:[%s11437_s29 + $0x9c] sm:$0xf] %vm8225_vm9, %v9151_v4  ;;  %v4934_v29 = vsel %vm3910_vm6, %v4422_v12, %v4678_v28  ;;  %10243 = vrcp.f32 %v6342_v41 }
 0x284   : > { %v5451_v7 = vadd.f32 %v5195_v48, %v4427_v56  ;;  %v3657_v5 = vmul.f32 %v10236_v8, %v10236_v8  ;;  %v10238_v24 = vpop.eup %10237  ;;  %v5062_v19 = vsel %vm4038_vm7, %v4550_v61, %v4806_v0  ;;  %v4683_v46 = vadd.f32 %v4171_v38, %v3659_v11 }
 0x285   : > { %v5963_v15 = vadd.f32 %v5707_v58, %v3659_v11  ;;  %v4555_v36 = vadd.f32 1.0, %v4299_v47  ;;  %v7112_v50 = vmul.f32 %v10238_v24, %v6600_v43  ;;  %v5323_v62 = vmul.f32 2.0, %v3787_v51 }
 0x286   : > { %v5835_v32 = vadd.f32 2.0, %v4299_v47  ;;  %v4169_v57 = vmul.f32 2.0, %v10236_v8  ;;  %v4811_v28 = vadd.f32 %v4299_v47, %v3787_v51  ;;  %v5193_v52 = vmul.f32 2.0, %v3657_v5 }
 0x287   : > { %v6219_v12 = vsel %vm3915_vm8, %v5451_v7, %v5963_v15  ;;  %v3191_v6 = vmul.f32 1.442695, %v2892_v39  ;;  %v9279_v4 = vpack.c.bf16 %v7112_v50, %v7112_v50  ;;  %v5579_v48 = vadd.f32 %v5323_v62, %v4555_v36 }
 0x288   : > { %10245 = vrcp.f32 %v6219_v12  ;;  %v6091_v61 = vadd.f32 %v5835_v32, %v3787_v51  ;;  %v6470_v11 = vmul.f32 %v4934_v29, %v12489_v60  ;;  %vm3913_vm11 = vcmp.ge.f32.partialorder %v12514_v2, 0.0  ;;  %v12617_v32 = vpop.f32.mrb[56].mxu0 }
 0x289   : > { %v4425_v43 = vadd.f32 1.0, %v4169_v57  ;;  %v5705_v38 = vadd.f32 2.0, %v4169_v57  ;;  %8393 = vst.msk [vmem:[%s11437_s29 + $0x29c] sm:$0xf] %vm8225_vm9, %v9279_v4  ;;  %v6598_v8 = vmul.f32 %v5062_v19, %v12493_v31  ;;  %10247 = vpow2.f32 %v3191_v6  ;;  %v12619_v6 = vpop.f32.mrb[56].mxu1 }
 0x28a   : > { %v10240_v0 = vpop.eup %10239  ;;  %v6347_v41 = vsel %vm4043_vm10, %v5579_v48, %v6091_v61  ;;  %v3020_v39 = vsub.f32 0.0, %v2764_v30  ;;  %v4939_v51 = vsel %vm3915_vm8, %v4427_v56, %v4683_v46  ;;  %v5067_v7 = vsel %vm4043_vm10, %v4555_v36, %v4811_v28  ;;  %v12627_v61 = vpop.f32.mrb[57].mxu0 }
 0x28b   : > { %v10242_v58 = vpop.eup %10241  ;;  %10249 = vrcp.f32 %v6347_v41  ;;  %v5449_v60 = vadd.f32 %v5193_v52, %v4425_v43  ;;  %v5961_v47 = vadd.f32 %v5705_v38, %v3657_v5  ;;  %v3785_v24 = vmul.f32 %v10240_v0, %v10240_v0 }
 0x28c   : > { %v6982_v29 = vmul.f32 %v10242_v58, %v6470_v11  ;;  %v4297_v15 = vmul.f32 2.0, %v10240_v0  ;;  %v3447_v19 = vmul.f32 1.442695, %v3020_v39  ;;  %v12611_v30 = vadd.f32 %v12309_v18, %v12214_v37 }
 0x28d   : > { %v6217_v31 = vsel %vm3913_vm11, %v5449_v60, %v5961_v47  ;;  %v12615_v56 = vadd.f32 %v12309_v18, %v12229_v34  ;;  %v10244_v46 = vpop.eup %10243  ;;  %v4681_v62 = vadd.f32 %v4169_v57, %v3657_v5  ;;  %v5321_v28 = vmul.f32 2.0, %v3785_v24 }
 0x28e   : > { %v9149_v50 = vpack.c.bf16 %v6982_v29, %v6982_v29  ;;  %10251 = vrcp.f32 %v6217_v31  ;;  %v4553_v36 = vadd.f32 1.0, %v4297_v15  ;;  %v7110_v12 = vmul.f32 %v10244_v46, %v6598_v8 }
 0x28f   : > { %v5833_v52 = vadd.f32 2.0, %v4297_v15  ;;  %10253 = vpow2.f32 %v3447_v19  ;;  %vm4041_vm12 = vcmp.ge.f32.partialorder %v12551_v21, 0.0  ;;  %v2634_v37 = vand.u32 2147483647, %v12611_v30 }
 0x290   : > { %8263 = vst.msk [vmem:[%s11437_s29 + $0x94] sm:$0xf] %vm8225_vm9, %v9149_v50  ;;  %v2762_v34 = vand.u32 2147483647, %v12615_v56  ;;  %v9277_v5 = vpack.c.bf16 %v7110_v12, %v7110_v12  ;;  %v6475_v57 = vmul.f32 %v4939_v51, %v12502_v22  ;;  %v5577_v4 = vadd.f32 %v5321_v28, %v4553_v36 }
 0x291   : > { %v6089_v48 = vadd.f32 %v5833_v52, %v3785_v24  ;;  %v6603_v38 = vmul.f32 %v5067_v7, %v12510_v17  ;;  %vm3916_vm13 = vcmp.ge.f32.partialorder %v12563_v9, 0.0  ;;  %v2890_v0 = vsub.f32 0.0, %v2634_v37 }
 0x292   : > { %v10246_v11 = vpop.eup %10245  ;;  %v3018_v8 = vsub.f32 0.0, %v2762_v34  ;;  %v12633_v41 = vadd.f32 %v12309_v18, %v12251_v33  ;;  %8391 = vst.msk [vmem:[%s11437_s29 + $0x294] sm:$0xf] %vm8225_vm9, %v9277_v5  ;;  %v4937_v22 = vsel %vm3913_vm11, %v4425_v43, %v4681_v62  ;;  %v12643_v17 = vadd.f32 %v12309_v18, %v12253_v44  ;;  %v12646_v43 = vpop.f32.mrb[57].mxu1 }
 0x293   : > { %v6987_v39 = vmul.f32 %v10246_v11, %v6475_v57  ;;  %v6345_v58 = vsel %vm4041_vm12, %v5577_v4, %v6089_v48  ;;  %v10248_v51 = vpop.eup %10247  ;;  %v3187_v60 = vmul.f32 1.442695, %v2890_v0  ;;  %v4809_v31 = vadd.f32 %v4297_v15, %v3785_v24  ;;  %v12652_v5 = vpop.f32.mrb[58].mxu0 }
 0x294   : > { %10255 = vrcp.f32 %v6345_v58  ;;  %v3443_v47 = vmul.f32 1.442695, %v3018_v8  ;;  %v2639_v33 = vand.u32 2147483647, %v12633_v41  ;;  %v3660_v19 = vmul.f32 %v10248_v51, %v10248_v51 }
 0x295   : > { %v10250_v29 = vpop.eup %10249  ;;  %v9154_v7 = vpack.c.bf16 %v6987_v39, %v6987_v39  ;;  %v4172_v46 = vmul.f32 2.0, %v10248_v51  ;;  %10257 = vpow2.f32 %v3187_v60  ;;  %v2767_v44 = vand.u32 2147483647, %v12643_v17 }
 0x296   : > { %v7115_v50 = vmul.f32 %v10250_v29, %v6603_v38  ;;  %v2895_v62 = vsub.f32 0.0, %v2639_v33  ;;  %v6473_v18 = vmul.f32 %v4937_v22, %v12514_v2  ;;  %v5196_v28 = vmul.f32 2.0, %v3660_v19  ;;  %v12657_v2 = vld [vmem:[%s15170_s2] ss:$0 sm:$0xff] }
 0x297   : > { %8268 = vst.msk [vmem:[%s11437_s29 + $0xa8] sm:$0xf] %vm8225_vm9, %v9154_v7  ;;  %v4428_v12 = vadd.f32 1.0, %v4172_v46  ;;  %v5708_v52 = vadd.f32 2.0, %v4172_v46  ;;  %10259 = vpow2.f32 %v3443_v47  ;;  %v3023_v15 = vsub.f32 0.0, %v2767_v44 }
 0x298   : > { %v10252_v37 = vpop.eup %10251  ;;  %v9282_v34 = vpack.c.bf16 %v7115_v50, %v7115_v50  ;;  %v3197_v24 = vmul.f32 1.442695, %v2895_v62  ;;  %v12661_v38 = vadd.f32 %v12657_v2, %v12261_v54  ;;  %v5065_v0 = vsel %vm4041_vm12, %v4553_v36, %v4809_v31 }
 0x299   : > { %v10254_v57 = vpop.eup %10253  ;;  %v6985_v4 = vmul.f32 %v10252_v37, %v6473_v18  ;;  %v5452_v48 = vadd.f32 %v5196_v28, %v4428_v12  ;;  %v5964_v11 = vadd.f32 %v5708_v52, %v3660_v19  ;;  %v3453_v51 = vmul.f32 1.442695, %v3023_v15 }
 0x29a   : > { %8396 = vst.msk [vmem:[%s11437_s29 + $0x2a8] sm:$0xf] %vm8225_vm9, %v9282_v34  ;;  %v3788_v8 = vmul.f32 %v10254_v57, %v10254_v57  ;;  %v4300_v39 = vmul.f32 2.0, %v10254_v57  ;;  %10261 = vpow2.f32 %v3197_v24  ;;  %v4684_v60 = vadd.f32 %v4172_v46, %v3660_v19 }
 0x29b   : > { %v9152_v22 = vpack.c.bf16 %v6985_v4, %v6985_v4  ;;  %v6220_v58 = vsel %vm3916_vm13, %v5452_v48, %v5964_v11  ;;  %v6601_v54 = vmul.f32 %v5065_v0, %v12551_v21  ;;  %v2637_v36 = vand.u32 2147483647, %v12661_v38 }
 0x29c   : > { %10263 = vrcp.f32 %v6220_v58  ;;  %v4556_v47 = vadd.f32 1.0, %v4300_v39  ;;  %v5324_v33 = vmul.f32 2.0, %v3788_v8  ;;  %v5836_v29 = vadd.f32 2.0, %v4300_v39 }
 0x29d   : > { %8266 = vst.msk [vmem:[%s11437_s29 + $0xa0] sm:$0xf] %vm8225_vm9, %v9152_v22  ;;  %10265 = vpow2.f32 %v3453_v51  ;;  %v12675_v50 = vadd.f32 %v12657_v2, %v12273_v35  ;;  %v12679_v19 = vadd.f32 %v12657_v2, %v12294_v20  ;;  %vm4044_vm14 = vcmp.ge.f32.partialorder %v12569_v3, 0.0 }
 0x29e   : > { %v10256_v7 = vpop.eup %10255  ;;  %v5580_v31 = vadd.f32 %v5324_v33, %v4556_v47  ;;  %v6092_v62 = vadd.f32 %v5836_v29, %v3788_v8  ;;  %v2893_v21 = vsub.f32 0.0, %v2637_v36  ;;  %v4940_v18 = vsel %vm3916_vm13, %v4428_v12, %v4684_v60 }
 0x29f   : > { %v7113_v46 = vmul.f32 %v10256_v7, %v6601_v54  ;;  %v10258_v44 = vpop.eup %10257  ;;  %v4812_v28 = vadd.f32 %v4300_v39, %v3788_v8  ;;  %vm3914_vm15 = vcmp.ge.f32.partialorder %v12611_v30, 0.0  ;;  %v2765_v35 = vand.u32 2147483647, %v12675_v50 }
 0x2a0   : > { %v6348_v20 = vsel %vm4044_vm14, %v5580_v31, %v6092_v62  ;;  %v3658_v37 = vmul.f32 %v10258_v44, %v10258_v44  ;;  %v4170_v34 = vmul.f32 2.0, %v10258_v44  ;;  %v3193_v15 = vmul.f32 1.442695, %v2893_v21 }
 0x2a1   : > { %v9280_v52 = vpack.c.bf16 %v7113_v46, %v7113_v46  ;;  %v10260_v24 = vpop.eup %10259  ;;  %10267 = vrcp.f32 %v6348_v20  ;;  %v3021_v57 = vsub.f32 0.0, %v2765_v35  ;;  %v2640_v4 = vand.u32 2147483647, %v12679_v19  ;;  %v12698_v35 = vpop.f32.mrb[58].mxu1 }
 0x2a2   : > { %v4426_v12 = vadd.f32 1.0, %v4170_v34  ;;  %v5194_v48 = vmul.f32 2.0, %v3658_v37  ;;  %v5706_v11 = vadd.f32 2.0, %v4170_v34  ;;  %vm4042_vm0 = vcmp.ge.f32.partialorder %v12615_v56, 0.0 }
 0x2a3   : > { %8394 = vst.msk [vmem:[%s11437_s29 + $0x2a0] sm:$0xf] %vm8225_vm9, %v9280_v52  ;;  %v6476_v8 = vmul.f32 %v4940_v18, %v12563_v9  ;;  %v3786_v39 = vmul.f32 %v10260_v24, %v10260_v24  ;;  %v4298_v22 = vmul.f32 2.0, %v10260_v24  ;;  %10269 = vpow2.f32 %v3193_v15 }
 0x2a4   : > { %v10262_v0 = vpop.eup %10261  ;;  %v5068_v58 = vsel %vm4044_vm14, %v4556_v47, %v4812_v28  ;;  %v5450_v51 = vadd.f32 %v5194_v48, %v4426_v12  ;;  %v5962_v60 = vadd.f32 %v5706_v11, %v3658_v37  ;;  %vm3919_vm1 = vcmp.ge.f32.partialorder %v12633_v41, 0.0 }
 0x2a5   : > { %v3663_v33 = vmul.f32 %v10262_v0, %v10262_v0  ;;  %v4554_v29 = vadd.f32 1.0, %v4298_v22  ;;  %v5322_v36 = vmul.f32 2.0, %v3786_v39  ;;  %v3449_v7 = vmul.f32 1.442695, %v3021_v57 }
 0x2a6   : > { %v10264_v54 = vpop.eup %10263  ;;  %v2896_v31 = vsub.f32 0.0, %v2640_v4  ;;  %v6218_v9 = vsel %vm3914_vm15, %v5450_v51, %v5962_v60  ;;  %v5834_v21 = vadd.f32 2.0, %v4298_v22  ;;  %v4175_v44 = vmul.f32 2.0, %v10262_v0 }
 0x2a7   : > { %v10266_v46 = vpop.eup %10265  ;;  %v6988_v62 = vmul.f32 %v10264_v54, %v6476_v8  ;;  %v4682_v18 = vadd.f32 %v4170_v34, %v3658_v37  ;;  %10271 = vrcp.f32 %v6218_v9  ;;  %v5578_v47 = vadd.f32 %v5322_v36, %v4554_v29 }
 0x2a8   : > { %v5199_v28 = vmul.f32 2.0, %v3663_v33  ;;  %v6090_v20 = vadd.f32 %v5834_v21, %v3786_v39  ;;  %v4431_v24 = vadd.f32 1.0, %v4175_v44  ;;  %vm4047_vm2 = vcmp.ge.f32.partialorder %v12643_v17, 0.0 }
 0x2a9   : > { %v9155_v52 = vpack.c.bf16 %v6988_v62, %v6988_v62  ;;  %v6604_v15 = vmul.f32 %v5068_v58, %v12569_v3  ;;  %v5711_v57 = vadd.f32 2.0, %v4175_v44  ;;  %v3791_v4 = vmul.f32 %v10266_v46, %v10266_v46 }
 0x2aa   : > { %v4303_v48 = vmul.f32 2.0, %v10266_v46  ;;  %v6346_v37 = vsel %vm4042_vm0, %v5578_v47, %v6090_v20  ;;  %v5455_v34 = vadd.f32 %v5199_v28, %v4431_v24  ;;  %10273 = vpow2.f32 %v3449_v7  ;;  %v12708_v46 = vpop.f32.mrb[59].mxu0 }
 0x2ab   : > { %8269 = vst.msk [vmem:[%s11437_s29 + $0xac] sm:$0xf] %vm8225_vm9, %v9155_v52  ;;  %v3199_v11 = vmul.f32 1.442695, %v2896_v31  ;;  %v10268_v0 = vpop.eup %10267  ;;  %v4938_v8 = vsel %vm3914_vm15, %v4426_v12, %v4682_v18  ;;  %10275 = vrcp.f32 %v6346_v37  ;;  %v5967_v51 = vadd.f32 %v5711_v57, %v3663_v33 }
 0x2ac   : > { %v4559_v60 = vadd.f32 1.0, %v4303_v48  ;;  %v7116_v54 = vmul.f32 %v10268_v0, %v6604_v15  ;;  %v4810_v3 = vadd.f32 %v4298_v22, %v3786_v39  ;;  %v4687_v58 = vadd.f32 %v4175_v44, %v3663_v33  ;;  %v12717_v39 = vpop.f32.mrb[59].mxu1 }
 0x2ad   : > { %v5327_v36 = vmul.f32 2.0, %v3791_v4  ;;  %v10270_v62 = vpop.eup %10269  ;;  %v6223_v9 = vsel %vm3919_vm1, %v5455_v34, %v5967_v51  ;;  %v5839_v7 = vadd.f32 2.0, %v4303_v48  ;;  %10277 = vpow2.f32 %v3199_v11 }
 0x2ae   : > { %v12714_v31 = vadd.f32 %v12657_v2, %v12299_v42  ;;  %v9283_v12 = vpack.c.bf16 %v7116_v54, %v7116_v54  ;;  %10279 = vrcp.f32 %v6223_v9  ;;  %vm3917_vm3 = vcmp.ge.f32.partialorder %v12661_v38, 0.0 }
 0x2af   : > { %v5583_v21 = vadd.f32 %v5327_v36, %v4559_v60  ;;  %v6474_v22 = vmul.f32 %v4938_v8, %v12611_v30  ;;  %v6095_v33 = vadd.f32 %v5839_v7, %v3791_v4  ;;  %v3661_v44 = vmul.f32 %v10270_v62, %v10270_v62 }
 0x2b0   : > { %v4173_v18 = vmul.f32 2.0, %v10270_v62  ;;  %8397 = vst.msk [vmem:[%s11437_s29 + $0x2ac] sm:$0xf] %vm8225_vm9, %v9283_v12  ;;  %v5066_v47 = vsel %vm4042_vm0, %v4554_v29, %v4810_v3  ;;  %v4943_v42 = vsel %vm3919_vm1, %v4431_v24, %v4687_v58  ;;  %v2768_v28 = vand.u32 2147483647, %v12714_v31 }
 0x2b1   : > { %v12729_v52 = vadd.f32 %v12657_v2, %v12336_v27  ;;  %v10272_v20 = vpop.eup %10271  ;;  %v4815_v15 = vadd.f32 %v4303_v48, %v3791_v4  ;;  %v6351_v30 = vsel %vm4047_vm2, %v5583_v21, %v6095_v33  ;;  %v5197_v37 = vmul.f32 2.0, %v3661_v44  ;;  %v12746_v21 = vpop.f32.mrb[60].mxu0 }
 0x2b2   : > { %v4429_v57 = vadd.f32 1.0, %v4173_v18  ;;  %v6986_v34 = vmul.f32 %v10272_v20, %v6474_v22  ;;  %10281 = vrcp.f32 %v6351_v30  ;;  %v5709_v11 = vadd.f32 2.0, %v4173_v18 }
 0x2b3   : > { %v3024_v29 = vsub.f32 0.0, %v2768_v28  ;;  %v6602_v24 = vmul.f32 %v5066_v47, %v12615_v56  ;;  %v2638_v8 = vand.u32 2147483647, %v12729_v52  ;;  %v12737_v27 = vadd.f32 %v12657_v2, %v12350_v45 }
 0x2b4   : > { %v5453_v0 = vadd.f32 %v5197_v37, %v4429_v57  ;;  %v10274_v4 = vpop.eup %10273  ;;  %v9153_v48 = vpack.c.bf16 %v6986_v34, %v6986_v34  ;;  %v6479_v51 = vmul.f32 %v4943_v42, %v12633_v41  ;;  %v5965_v54 = vadd.f32 %v5709_v11, %v3661_v44  ;;  %v12748_v41 = vpop.f32.mrb[60].mxu1 }
 0x2b5   : > { %v3455_v3 = vmul.f32 1.442695, %v3024_v29  ;;  %v10276_v58 = vpop.eup %10275  ;;  %v5071_v36 = vsel %vm4047_vm2, %v4559_v60, %v4815_v15  ;;  %v3789_v62 = vmul.f32 %v10274_v4, %v10274_v4  ;;  %v4301_v9 = vmul.f32 2.0, %v10274_v4  ;;  %v12752_v34 = vpop.f32.mrb[61].mxu0 }
 0x2b6   : > { %v2894_v56 = vsub.f32 0.0, %v2638_v8  ;;  %8267 = vst.msk [vmem:[%s11437_s29 + $0xa4] sm:$0xf] %vm8225_vm9, %v9153_v48  ;;  %v7114_v7 = vmul.f32 %v10276_v58, %v6602_v24  ;;  %v4685_v12 = vadd.f32 %v4173_v18, %v3661_v44  ;;  %v6221_v45 = vsel %vm3917_vm3, %v5453_v0, %v5965_v54  ;;  %v12754_v11 = vpop.f32.mrb[61].mxu1 }
 0x2b7   : > { %10283 = vpow2.f32 %v3455_v3  ;;  %v10278_v22 = vpop.eup %10277  ;;  %v4557_v33 = vadd.f32 1.0, %v4301_v9  ;;  %v5325_v60 = vmul.f32 2.0, %v3789_v62  ;;  %v2766_v47 = vand.u32 2147483647, %v12737_v27 }
 0x2b8   : > { %10285 = vrcp.f32 %v6221_v45  ;;  %v10280_v42 = vpop.eup %10279  ;;  %v9281_v28 = vpack.c.bf16 %v7114_v7, %v7114_v7  ;;  %v5837_v20 = vadd.f32 2.0, %v4301_v9  ;;  %v3664_v15 = vmul.f32 %v10278_v22, %v10278_v22 }
 0x2b9   : > { %v4176_v44 = vmul.f32 2.0, %v10278_v22  ;;  %v6991_v18 = vmul.f32 %v10280_v42, %v6479_v51  ;;  %vm4045_vm4 = vcmp.ge.f32.partialorder %v12675_v50, 0.0  ;;  %v5581_v30 = vadd.f32 %v5325_v60, %v4557_v33 }
 0x2ba   : > { %v3195_v37 = vmul.f32 1.442695, %v2894_v56  ;;  %8395 = vst.msk [vmem:[%s11437_s29 + $0x2a4] sm:$0xf] %vm8225_vm9, %v9281_v28  ;;  %v6607_v29 = vmul.f32 %v5071_v36, %v12643_v17  ;;  %v6093_v24 = vadd.f32 %v5837_v20, %v3789_v62  ;;  %vm3920_vm5 = vcmp.ge.f32.partialorder %v12679_v19, 0.0  ;;  %v12783_v20 = vpop.f32.mrb[62].mxu0 }
 0x2bb   : > { %v4432_v0 = vadd.f32 1.0, %v4176_v44  ;;  %v9158_v8 = vpack.c.bf16 %v6991_v18, %v6991_v18  ;;  %v5200_v4 = vmul.f32 2.0, %v3664_v15  ;;  %v5712_v48 = vadd.f32 2.0, %v4176_v44 }
 0x2bc   : > { %10287 = vpow2.f32 %v3195_v37  ;;  %v10282_v51 = vpop.eup %10281  ;;  %v4941_v54 = vsel %vm3917_vm3, %v4429_v57, %v4685_v12  ;;  %v6349_v3 = vsel %vm4045_vm4, %v5581_v30, %v6093_v24  ;;  %v3022_v58 = vsub.f32 0.0, %v2766_v47 }
 0x2bd   : > { %v12766_v56 = vadd.f32 %v12657_v2, %v12389_v1  ;;  %8272 = vst.msk [vmem:[%s11437_s29 + $0xb8] sm:$0xf] %vm8225_vm9, %v9158_v8  ;;  %v7119_v17 = vmul.f32 %v10282_v51, %v6607_v29  ;;  %10289 = vrcp.f32 %v6349_v3  ;;  %v5456_v36 = vadd.f32 %v5200_v4, %v4432_v0 }
 0x2be   : > { %v5968_v7 = vadd.f32 %v5712_v48, %v3664_v15  ;;  %v4813_v45 = vadd.f32 %v4301_v9, %v3789_v62  ;;  %vm4048_vm6 = vcmp.ge.f32.partialorder %v12714_v31, 0.0  ;;  %v3451_v22 = vmul.f32 1.442695, %v3022_v58 }
 0x2bf   : > { %v2643_v57 = vand.u32 2147483647, %v12766_v56  ;;  %v9286_v12 = vpack.c.bf16 %v7119_v17, %v7119_v17  ;;  %v12776_v1 = vadd.f32 %v12657_v2, %v12391_v40  ;;  %v12780_v47 = vadd.f32 %v12657_v2, %v12403_v59 }
 0x2c0   : > { %v6224_v60 = vsel %vm3920_vm5, %v5456_v36, %v5968_v7  ;;  %v6477_v62 = vmul.f32 %v4941_v54, %v12661_v38  ;;  %v4688_v9 = vadd.f32 %v4176_v44, %v3664_v15  ;;  %v5069_v59 = vsel %vm4045_vm4, %v4557_v33, %v4813_v45 }
 0x2c1   : > { %v10284_v42 = vpop.eup %10283  ;;  %10291 = vrcp.f32 %v6224_v60  ;;  %v2899_v28 = vsub.f32 0.0, %v2643_v57  ;;  %8400 = vst.msk [vmem:[%s11437_s29 + $0x2b8] sm:$0xf] %vm8225_vm9, %v9286_v12  ;;  %v2771_v40 = vand.u32 2147483647, %v12776_v1  ;;  %v12793_v4 = vadd.f32 %v12657_v2, %v12405_v49  ;;  %v15195_v57 = vld [vmem:[#allocation4_spill] sm:$0xff] }
 0x2c2   : > { %v10286_v18 = vpop.eup %10285  ;;  %v3792_v30 = vmul.f32 %v10284_v42, %v10284_v42  ;;  %v4304_v37 = vmul.f32 2.0, %v10284_v42  ;;  %10293 = vpow2.f32 %v3451_v22  ;;  %v2641_v38 = vand.u32 2147483647, %v12780_v47 }
 0x2c3   : > { %v6989_v29 = vmul.f32 %v10286_v18, %v6477_v62  ;;  %v3205_v24 = vmul.f32 1.442695, %v2899_v28  ;;  %v3027_v51 = vsub.f32 0.0, %v2771_v40  ;;  %v6605_v58 = vmul.f32 %v5069_v59, %v12675_v50 }
 0x2c4   : > { %v4560_v15 = vadd.f32 1.0, %v4304_v37  ;;  %v5328_v44 = vmul.f32 2.0, %v3792_v30  ;;  %v5840_v8 = vadd.f32 2.0, %v4304_v37  ;;  %v2897_v54 = vsub.f32 0.0, %v2641_v38 }
 0x2c5   : > { %v9156_v48 = vpack.c.bf16 %v6989_v29, %v6989_v29  ;;  %10295 = vpow2.f32 %v3205_v24  ;;  %v4944_v33 = vsel %vm3920_vm5, %v4432_v0, %v4688_v9  ;;  %v3461_v22 = vmul.f32 1.442695, %v3027_v51 }
 0x2c6   : > { %v10288_v3 = vpop.eup %10287  ;;  %v5584_v17 = vadd.f32 %v5328_v44, %v4560_v15  ;;  %v6096_v36 = vadd.f32 %v5840_v8, %v3792_v30  ;;  %v12802_v49 = vadd.f32 %v12657_v2, %v15195_v57  ;;  %vm3918_vm7 = vcmp.ge.f32.partialorder %v12729_v52, 0.0  ;;  %v12810_v44 = vpop.f32.mrb[62].mxu1 }
 0x2c7   : > { %8270 = vst.msk [vmem:[%s11437_s29 + $0xb0] sm:$0xf] %vm8225_vm9, %v9156_v48  ;;  %v3662_v7 = vmul.f32 %v10288_v3, %v10288_v3  ;;  %v4174_v45 = vmul.f32 2.0, %v10288_v3  ;;  %v10290_v12 = vpop.eup %10289  ;;  %v3201_v50 = vmul.f32 1.442695, %v2897_v54  ;;  %v6480_v62 = vmul.f32 %v4944_v33, %v12679_v19 }
 0x2c8   : > { %v6352_v60 = vsel %vm4048_vm6, %v5584_v17, %v6096_v36  ;;  %v2769_v0 = vand.u32 2147483647, %v12793_v4  ;;  %v7117_v42 = vmul.f32 %v10290_v12, %v6605_v58  ;;  %v4816_v24 = vadd.f32 %v4304_v37, %v3792_v30  ;;  %v15196_v36 = vld [vmem:[#allocation5_spill] sm:$0xff] }
 0x2c9   : > { %10297 = vrcp.f32 %v6352_v60  ;;  %v4430_v9 = vadd.f32 1.0, %v4174_v45  ;;  %v5198_v28 = vmul.f32 2.0, %v3662_v7  ;;  %v5710_v18 = vadd.f32 2.0, %v4174_v45 }
 0x2ca   : > { %10299 = vpow2.f32 %v3461_v22  ;;  %v3025_v40 = vsub.f32 0.0, %v2769_v0  ;;  %v9284_v59 = vpack.c.bf16 %v7117_v42, %v7117_v42  ;;  %v2644_v38 = vand.u32 2147483647, %v12802_v49 }
 0x2cb   : > { %v10292_v29 = vpop.eup %10291  ;;  %10301 = vpow2.f32 %v3201_v50  ;;  %v5454_v51 = vadd.f32 %v5198_v28, %v4430_v9  ;;  %v5966_v54 = vadd.f32 %v5710_v18, %v3662_v7  ;;  %vm4046_vm8 = vcmp.ge.f32.partialorder %v12737_v27, 0.0 }
 0x2cc   : > { %v10294_v8 = vpop.eup %10293  ;;  %v6992_v48 = vmul.f32 %v10292_v29, %v6480_v62  ;;  %8398 = vst.msk [vmem:[%s11437_s29 + $0x2b0] sm:$0xf] %vm8225_vm9, %v9284_v59  ;;  %v3457_v58 = vmul.f32 1.442695, %v3025_v40  ;;  %v2900_v33 = vsub.f32 0.0, %v2644_v38  ;;  %v4686_v30 = vadd.f32 %v4174_v45, %v3662_v7 }
 0x2cd   : > { %v3790_v19 = vmul.f32 %v10294_v8, %v10294_v8  ;;  %v4302_v3 = vmul.f32 2.0, %v10294_v8  ;;  %v6222_v37 = vsel %vm3918_vm7, %v5454_v51, %v5966_v54  ;;  %v12819_v22 = vadd.f32 %v12657_v2, %v15196_v36 }
 0x2ce   : > { %v9159_v17 = vpack.c.bf16 %v6992_v48, %v6992_v48  ;;  %v5072_v12 = vsel %vm4048_vm6, %v4560_v15, %v4816_v24  ;;  %10303 = vrcp.f32 %v6222_v37  ;;  %vm3923_vm10 = vcmp.ge.f32.partialorder %v12766_v56, 0.0 }
 0x2cf   : > { %v10296_v57 = vpop.eup %10295  ;;  %v4558_v60 = vadd.f32 1.0, %v4302_v3  ;;  %v5326_v50 = vmul.f32 2.0, %v3790_v19  ;;  %v5838_v0 = vadd.f32 2.0, %v4302_v3  ;;  %10305 = vpow2.f32 %v3457_v58 }
 0x2d0   : > { %8273 = vst.msk [vmem:[%s11437_s29 + $0xbc] sm:$0xf] %vm8225_vm9, %v9159_v17  ;;  %v3667_v42 = vmul.f32 %v10296_v57, %v10296_v57  ;;  %v4179_v62 = vmul.f32 2.0, %v10296_v57  ;;  %v3207_v45 = vmul.f32 1.442695, %v2900_v33  ;;  %v6608_v18 = vmul.f32 %v5072_v12, %v12714_v31  ;;  %v12833_v33 = vpop.f32.mrb[63].mxu0 }
 0x2d1   : > { %v5582_v7 = vadd.f32 %v5326_v50, %v4558_v60  ;;  %v2772_v28 = vand.u32 2147483647, %v12819_v22  ;;  %v4942_v15 = vsel %vm3918_vm7, %v4430_v9, %v4686_v30  ;;  %v6094_v40 = vadd.f32 %v5838_v0, %v3790_v19  ;;  %v12835_v31 = vpop.f32.mrb[63].mxu1 }
 0x2d2   : > { %v4435_v29 = vadd.f32 1.0, %v4179_v62  ;;  %v4814_v24 = vadd.f32 %v4302_v3, %v3790_v19  ;;  %v5203_v38 = vmul.f32 2.0, %v3667_v42  ;;  %v5715_v8 = vadd.f32 2.0, %v4179_v62 }
 0x2d3   : > { %v10298_v59 = vpop.eup %10297  ;;  %10307 = vpow2.f32 %v3207_v45  ;;  %v6350_v54 = vsel %vm4046_vm8, %v5582_v7, %v6094_v40  ;;  %vm4051_vm11 = vcmp.ge.f32.partialorder %v12776_v1, 0.0  ;;  %v3028_v58 = vsub.f32 0.0, %v2772_v28 }
 0x2d4   : > { %v10300_v48 = vpop.eup %10299  ;;  %v7120_v51 = vmul.f32 %v10298_v59, %v6608_v18  ;;  %v6478_v17 = vmul.f32 %v4942_v15, %v12729_v52  ;;  %10309 = vrcp.f32 %v6350_v54  ;;  %v5459_v19 = vadd.f32 %v5203_v38, %v4435_v29 }
 0x2d5   : > { %v10302_v9 = vpop.eup %10301  ;;  %v5971_v3 = vadd.f32 %v5715_v8, %v3667_v42  ;;  %vm3921_vm12 = vcmp.ge.f32.partialorder %v12780_v47, 0.0  ;;  %v3795_v37 = vmul.f32 %v10300_v48, %v10300_v48  ;;  %v4307_v36 = vmul.f32 2.0, %v10300_v48 }
 0x2d6   : > { %v9287_v30 = vpack.c.bf16 %v7120_v51, %v7120_v51  ;;  %v3665_v57 = vmul.f32 %v10302_v9, %v10302_v9  ;;  %v5070_v12 = vsel %vm4046_vm8, %v4558_v60, %v4814_v24  ;;  %v4691_v50 = vadd.f32 %v4179_v62, %v3667_v42 }
 0x2d7   : > { %v6227_v0 = vsel %vm3923_vm10, %v5459_v19, %v5971_v3  ;;  %v4177_v7 = vmul.f32 2.0, %v10302_v9  ;;  %v4563_v52 = vadd.f32 1.0, %v4307_v36  ;;  %v5331_v45 = vmul.f32 2.0, %v3795_v37 }
 0x2d8   : > { %8401 = vst.msk [vmem:[%s11437_s29 + $0x2bc] sm:$0xf] %vm8225_vm9, %v9287_v30  ;;  %10311 = vrcp.f32 %v6227_v0  ;;  %v3463_v28 = vmul.f32 1.442695, %v3028_v58  ;;  %v10304_v18 = vpop.eup %10303  ;;  %v5843_v15 = vadd.f32 2.0, %v4307_v36  ;;  %v5201_v59 = vmul.f32 2.0, %v3665_v57 }
 0x2d9   : > { %v4433_v40 = vadd.f32 1.0, %v4177_v7  ;;  %v12847_v38 = vadd.f32 %v12657_v2, %v12447_v53  ;;  %v10306_v60 = vpop.eup %10305  ;;  %v6990_v42 = vmul.f32 %v10304_v18, %v6478_v17  ;;  %v5587_v62 = vadd.f32 %v5331_v45, %v4563_v52  ;;  %v12860_v18 = vpop.f32.mrb[64].mxu0 }
 0x2da   : > { %v5713_v24 = vadd.f32 2.0, %v4177_v7  ;;  %vm4049_vm13 = vcmp.ge.f32.partialorder %v12793_v4, 0.0  ;;  %v6606_v8 = vmul.f32 %v5070_v12, %v12737_v27  ;;  %v4947_v48 = vsel %vm3923_vm10, %v4435_v29, %v4691_v50 }
 0x2db   : > { %v6099_v51 = vadd.f32 %v5843_v15, %v3795_v37  ;;  %v5457_v54 = vadd.f32 %v5201_v59, %v4433_v40  ;;  %v9157_v58 = vpack.c.bf16 %v6990_v42, %v6990_v42  ;;  %v4819_v9 = vadd.f32 %v4307_v36, %v3795_v37  ;;  %v12862_v15 = vpop.f32.mrb[64].mxu1 }
 0x2dc   : > { %v5969_v19 = vadd.f32 %v5713_v24, %v3665_v57  ;;  %v3793_v3 = vmul.f32 %v10306_v60, %v10306_v60  ;;  %v4305_v30 = vmul.f32 2.0, %v10306_v60  ;;  %10313 = vpow2.f32 %v3463_v28  ;;  %15197 = vst [vmem:[#allocation6_spill] sm:$0xff] %v12862_v15  ;;  %v12869_v15 = vpop.f32.mrb[65].mxu1 }
 0x2dd   : > { %v10308_v53 = vpop.eup %10307  ;;  %v6355_v17 = vsel %vm4051_vm11, %v5587_v62, %v6099_v51  ;;  %v2642_v0 = vand.u32 2147483647, %v12847_v38  ;;  %8271 = vst.msk [vmem:[%s11437_s29 + $0xb4] sm:$0xf] %vm8225_vm9, %v9157_v58  ;;  %v4689_v37 = vadd.f32 %v4177_v7, %v3665_v57  ;;  %v6483_v62 = vmul.f32 %v4947_v48, %v12766_v56  ;;  %v12867_v57 = vpop.f32.mrb[65].mxu0 }
 0x2de   : > { %10315 = vrcp.f32 %v6355_v17  ;;  %v6225_v27 = vsel %vm3921_vm12, %v5457_v54, %v5969_v19  ;;  %v5329_v29 = vmul.f32 2.0, %v3793_v3  ;;  %v3668_v12 = vmul.f32 %v10308_v53, %v10308_v53  ;;  %v10310_v50 = vpop.eup %10309 }
 0x2df   : > { %10317 = vrcp.f32 %v6225_v27  ;;  %v4561_v36 = vadd.f32 1.0, %v4305_v30  ;;  %v5841_v45 = vadd.f32 2.0, %v4305_v30  ;;  %v7118_v28 = vmul.f32 %v10310_v50, %v6606_v8 }
 0x2e0   : > { %v4180_v59 = vmul.f32 2.0, %v10308_v53  ;;  %v5204_v60 = vmul.f32 2.0, %v3668_v12  ;;  %v2898_v42 = vsub.f32 0.0, %v2642_v0  ;;  %v5075_v24 = vsel %vm4051_vm11, %v4563_v52, %v4819_v9 }
 0x2e1   : > { %v5585_v51 = vadd.f32 %v5329_v29, %v4561_v36  ;;  %v6097_v54 = vadd.f32 %v5841_v45, %v3793_v3  ;;  %v9285_v58 = vpack.c.bf16 %v7118_v28, %v7118_v28  ;;  %v4817_v19 = vadd.f32 %v4305_v30, %v3793_v3 }
 0x2e2   : > { %v10312_v7 = vpop.eup %10311  ;;  %v4436_v17 = vadd.f32 1.0, %v4180_v59  ;;  %v4692_v27 = vadd.f32 %v4180_v59, %v3668_v12  ;;  %v5716_v0 = vadd.f32 2.0, %v4180_v59  ;;  %v3203_v56 = vmul.f32 1.442695, %v2898_v42 }
 0x2e3   : > { %v6995_v8 = vmul.f32 %v10312_v7, %v6483_v62  ;;  %v6353_v53 = vsel %vm4049_vm13, %v5585_v51, %v6097_v54  ;;  %8399 = vst.msk [vmem:[%s11437_s29 + $0x2b4] sm:$0xf] %vm8225_vm9, %v9285_v58  ;;  %v4945_v52 = vsel %vm3921_vm12, %v4433_v40, %v4689_v37  ;;  %v12879_v9 = vadd.f32 %v12657_v2, %v12474_v26  ;;  %v12903_v54 = vpop.f32.mrb[66].mxu0 }
 0x2e4   : > { %10319 = vrcp.f32 %v6353_v53  ;;  %v5460_v48 = vadd.f32 %v5204_v60, %v4436_v17  ;;  %vm3924_vm14 = vcmp.ge.f32.partialorder %v12802_v49, 0.0  ;;  %v5972_v30 = vadd.f32 %v5716_v0, %v3668_v12 }
 0x2e5   : > { %v9162_v3 = vpack.c.bf16 %v6995_v8, %v6995_v8  ;;  %10321 = vpow2.f32 %v3203_v56  ;;  %v6611_v29 = vmul.f32 %v5075_v24, %v12776_v1  ;;  %v2770_v50 = vand.u32 2147483647, %v12879_v9 }
 0x2e6   : > { %v12886_v45 = vadd.f32 %v12657_v2, %v12516_v13  ;;  %v12890_v40 = vadd.f32 %v12657_v2, %v12518_v10  ;;  %v10314_v37 = vpop.eup %10313  ;;  %v6481_v26 = vmul.f32 %v4945_v52, %v12780_v47  ;;  %v5073_v12 = vsel %vm4049_vm13, %v4561_v36, %v4817_v19 }
 0x2e7   : > { %8276 = vst.msk [vmem:[%s11437_s29 + $0xc8] sm:$0xf] %vm8225_vm9, %v9162_v3  ;;  %v4948_v28 = vsel %vm3924_vm14, %v4436_v17, %v4692_v27  ;;  %v6228_v1 = vsel %vm3924_vm14, %v5460_v48, %v5972_v30  ;;  %v3796_v60 = vmul.f32 %v10314_v37, %v10314_v37  ;;  %v4308_v42 = vmul.f32 2.0, %v10314_v37 }
 0x2e8   : > { %v10316_v59 = vpop.eup %10315  ;;  %10323 = vrcp.f32 %v6228_v1  ;;  %v3026_v13 = vsub.f32 0.0, %v2770_v50  ;;  %v2647_v10 = vand.u32 2147483647, %v12886_v45  ;;  %v2775_v51 = vand.u32 2147483647, %v12890_v40 }
 0x2e9   : > { %v10318_v62 = vpop.eup %10317  ;;  %v7123_v24 = vmul.f32 %v10316_v59, %v6611_v29  ;;  %v12901_v47 = vadd.f32 %v12657_v2, %v12525_v23  ;;  %v4564_v7 = vadd.f32 1.0, %v4308_v42  ;;  %v5332_v58 = vmul.f32 2.0, %v3796_v60 }
 0x2ea   : > { %v6993_v36 = vmul.f32 %v10318_v62, %v6481_v26  ;;  %v12907_v19 = vadd.f32 %v12657_v2, %v12534_v63  ;;  %v5844_v27 = vadd.f32 2.0, %v4308_v42  ;;  %v3459_v8 = vmul.f32 1.442695, %v3026_v13 }
 0x2eb   : > { %v9290_v17 = vpack.c.bf16 %v7123_v24, %v7123_v24  ;;  %v2903_v53 = vsub.f32 0.0, %v2647_v10  ;;  %vm4052_vm15 = vcmp.ge.f32.partialorder %v12819_v22, 0.0  ;;  %v5588_v56 = vadd.f32 %v5332_v58, %v4564_v7 }
 0x2ec   : > { %v9160_v0 = vpack.c.bf16 %v6993_v36, %v6993_v36  ;;  %v3031_v23 = vsub.f32 0.0, %v2775_v51  ;;  %v6609_v52 = vmul.f32 %v5073_v12, %v12793_v4  ;;  %v6100_v48 = vadd.f32 %v5844_v27, %v3796_v60 }
 0x2ed   : > { %8404 = vst.msk [vmem:[%s11437_s29 + $0x2c8] sm:$0xf] %vm8225_vm9, %v9290_v17  ;;  %10325 = vpow2.f32 %v3459_v8  ;;  %v3213_v3 = vmul.f32 1.442695, %v2903_v53  ;;  %v6484_v63 = vmul.f32 %v4948_v28, %v12802_v49  ;;  %v2645_v50 = vand.u32 2147483647, %v12901_v47 }
 0x2ee   : > { %v10320_v30 = vpop.eup %10319  ;;  %8274 = vst.msk [vmem:[%s11437_s29 + $0xc0] sm:$0xf] %vm8225_vm9, %v9160_v0  ;;  %v3469_v29 = vmul.f32 1.442695, %v3031_v23  ;;  %v12919_v37 = vadd.f32 %v12657_v2, %v12541_v16  ;;  %v6356_v4 = vsel %vm4052_vm15, %v5588_v56, %v6100_v48  ;;  %v2773_v12 = vand.u32 2147483647, %v12907_v19 }
 0x2ef   : > { %v10322_v26 = vpop.eup %10321  ;;  %v7121_v1 = vmul.f32 %v10320_v30, %v6609_v52  ;;  %10327 = vpow2.f32 %v3213_v3  ;;  %v2901_v49 = vsub.f32 0.0, %v2645_v50  ;;  %v4820_v62 = vadd.f32 %v4308_v42, %v3796_v60 }
 0x2f0   : > { %10329 = vrcp.f32 %v6356_v4  ;;  %v3666_v59 = vmul.f32 %v10322_v26, %v10322_v26  ;;  %v4178_v13 = vmul.f32 2.0, %v10322_v26  ;;  %v3029_v24 = vsub.f32 0.0, %v2773_v12  ;;  %v12937_v26 = vpop.f32.mrb[66].mxu1 }
 0x2f1   : > { %v9288_v28 = vpack.c.bf16 %v7121_v1, %v7121_v1  ;;  %10331 = vpow2.f32 %v3469_v29  ;;  %v3209_v27 = vmul.f32 1.442695, %v2901_v49  ;;  %v2648_v53 = vand.u32 2147483647, %v12919_v37 }
 0x2f2   : > { %v10324_v10 = vpop.eup %10323  ;;  %v4434_v16 = vadd.f32 1.0, %v4178_v13  ;;  %v4690_v51 = vadd.f32 %v4178_v13, %v3666_v59  ;;  %v5202_v36 = vmul.f32 2.0, %v3666_v59  ;;  %v5714_v58 = vadd.f32 2.0, %v4178_v13 }
 0x2f3   : > { %8402 = vst.msk [vmem:[%s11437_s29 + $0x2c0] sm:$0xf] %vm8225_vm9, %v9288_v28  ;;  %v6996_v17 = vmul.f32 %v10324_v10, %v6484_v63  ;;  %v3465_v8 = vmul.f32 1.442695, %v3029_v24  ;;  %vm3922_vm0 = vcmp.ge.f32.partialorder %v12847_v38, 0.0  ;;  %10333 = vpow2.f32 %v3209_v27 }
 0x2f4   : > { %v5458_v0 = vadd.f32 %v5202_v36, %v4434_v16  ;;  %v5970_v56 = vadd.f32 %v5714_v58, %v3666_v59  ;;  %v2904_v60 = vsub.f32 0.0, %v2648_v53  ;;  %v5076_v42 = vsel %vm4052_vm15, %v4564_v7, %v4820_v62  ;;  %v12948_v58 = vpop.f32.mrb[67].mxu0 }
 0x2f5   : > { %v9163_v23 = vpack.c.bf16 %v6996_v17, %v6996_v17  ;;  %v4946_v52 = vsel %vm3922_vm0, %v4434_v16, %v4690_v51  ;;  %10335 = vpow2.f32 %v3465_v8  ;;  %v12934_v63 = vadd.f32 %v12657_v2, %v12545_v25 }
 0x2f6   : > { %v6226_v48 = vsel %vm3922_vm0, %v5458_v0, %v5970_v56  ;;  %v3215_v30 = vmul.f32 1.442695, %v2904_v60  ;;  %vm4050_vm1 = vcmp.ge.f32.partialorder %v12879_v9, 0.0  ;;  %v6612_v7 = vmul.f32 %v5076_v42, %v12819_v22 }
 0x2f7   : > { %v10326_v3 = vpop.eup %10325  ;;  %8277 = vst.msk [vmem:[%s11437_s29 + $0xcc] sm:$0xf] %vm8225_vm9, %v9163_v23  ;;  %10337 = vrcp.f32 %v6226_v48  ;;  %v6482_v4 = vmul.f32 %v4946_v52, %v12847_v38  ;;  %vm3927_vm2 = vcmp.ge.f32.partialorder %v12886_v45, 0.0  ;;  %v12944_v25 = vadd.f32 %v12657_v2, %v12582_v55 }
 0x2f8   : > { %v3794_v29 = vmul.f32 %v10326_v3, %v10326_v3  ;;  %v4306_v50 = vmul.f32 2.0, %v10326_v3  ;;  %10339 = vpow2.f32 %v3215_v30  ;;  %v2776_v16 = vand.u32 2147483647, %v12934_v63 }
 0x2f9   : > { %v10328_v1 = vpop.eup %10327  ;;  %vm4055_vm3 = vcmp.ge.f32.partialorder %v12890_v40, 0.0  ;;  %v12952_v55 = vadd.f32 %v12657_v2, %v12592_v14  ;;  %v12956_v8 = vadd.f32 %v12657_v2, %v12617_v32  ;;  %v2646_v48 = vand.u32 2147483647, %v12944_v25  ;;  %v12963_v14 = vpop.f32.mrb[67].mxu1 }
 0x2fa   : > { %v10330_v12 = vpop.eup %10329  ;;  %v4562_v59 = vadd.f32 1.0, %v4306_v50  ;;  %v5330_v13 = vmul.f32 2.0, %v3794_v29  ;;  %v5842_v49 = vadd.f32 2.0, %v4306_v50  ;;  %v3671_v24 = vmul.f32 %v10328_v1, %v10328_v1 }
 0x2fb   : > { %v10332_v28 = vpop.eup %10331  ;;  %v7124_v62 = vmul.f32 %v10330_v12, %v6612_v7  ;;  %v4183_v10 = vmul.f32 2.0, %v10328_v1  ;;  %v4818_v22 = vadd.f32 %v4306_v50, %v3794_v29  ;;  %v3032_v52 = vsub.f32 0.0, %v2776_v16 }
 0x2fc   : > { %v5586_v38 = vadd.f32 %v5330_v13, %v4562_v59  ;;  %v6098_v51 = vadd.f32 %v5842_v49, %v3794_v29  ;;  %v3799_v36 = vmul.f32 %v10332_v28, %v10332_v28  ;;  %v5207_v0 = vmul.f32 2.0, %v3671_v24 }
 0x2fd   : > { %v9291_v17 = vpack.c.bf16 %v7124_v62, %v7124_v62  ;;  %v4439_v27 = vadd.f32 1.0, %v4183_v10  ;;  %v5719_v56 = vadd.f32 2.0, %v4183_v10  ;;  %v4311_v23 = vmul.f32 2.0, %v10332_v28  ;;  %v10334_v60 = vpop.eup %10333 }
 0x2fe   : > { %v6354_v53 = vsel %vm4050_vm1, %v5586_v38, %v6098_v51  ;;  %v5335_v42 = vmul.f32 2.0, %v3799_v36  ;;  %v5074_v32 = vsel %vm4050_vm1, %v4562_v59, %v4818_v22  ;;  %vm3925_vm4 = vcmp.ge.f32.partialorder %v12901_v47, 0.0 }
 0x2ff   : > { %8405 = vst.msk [vmem:[%s11437_s29 + $0x2cc] sm:$0xf] %vm8225_vm9, %v9291_v17  ;;  %10341 = vrcp.f32 %v6354_v53  ;;  %v10336_v3 = vpop.eup %10335  ;;  %v5463_v2 = vadd.f32 %v5207_v0, %v4439_v27  ;;  %v5975_v30 = vadd.f32 %v5719_v56, %v3671_v24  ;;  %v4567_v29 = vadd.f32 1.0, %v4311_v23 }
 0x300   : > { %v4695_v1 = vadd.f32 %v4183_v10, %v3671_v24  ;;  %v5847_v7 = vadd.f32 2.0, %v4311_v23  ;;  %v3669_v12 = vmul.f32 %v10334_v60, %v10334_v60  ;;  %v4181_v13 = vmul.f32 2.0, %v10334_v60 }
 0x301   : > { %v10338_v50 = vpop.eup %10337  ;;  %v6231_v28 = vsel %vm3927_vm2, %v5463_v2, %v5975_v30  ;;  %v5591_v62 = vadd.f32 %v5335_v42, %v4567_v29  ;;  %v3797_v16 = vmul.f32 %v10336_v3, %v10336_v3  ;;  %v4823_v59 = vadd.f32 %v4311_v23, %v3799_v36  ;;  %v12974_v42 = vpop.f32.mrb[68].mxu0 }
 0x302   : > { %v6994_v49 = vmul.f32 %v10338_v50, %v6482_v4  ;;  %v10340_v38 = vpop.eup %10339  ;;  %10343 = vrcp.f32 %v6231_v28  ;;  %v6103_v22 = vadd.f32 %v5847_v7, %v3799_v36  ;;  %v4437_v51 = vadd.f32 1.0, %v4181_v13  ;;  %v12976_v2 = vpop.f32.mrb[68].mxu1 }
 0x303   : > { %vm4053_vm5 = vcmp.ge.f32.partialorder %v12907_v19, 0.0  ;;  %v5205_v53 = vmul.f32 2.0, %v3669_v12  ;;  %v3471_v24 = vmul.f32 1.442695, %v3032_v52  ;;  %v2774_v10 = vand.u32 2147483647, %v12952_v55 }
 0x304   : > { %v9161_v17 = vpack.c.bf16 %v6994_v49, %v6994_v49  ;;  %v6359_v4 = vsel %vm4055_vm3, %v5591_v62, %v6103_v22  ;;  %v5717_v0 = vadd.f32 2.0, %v4181_v13  ;;  %v4309_v56 = vmul.f32 2.0, %v10336_v3  ;;  %15198 = vst [vmem:[#allocation7_spill] sm:$0xff] %v12976_v2 }
 0x305   : > { %v5333_v60 = vmul.f32 2.0, %v3797_v16  ;;  %v6610_v36 = vmul.f32 %v5074_v32, %v12879_v9  ;;  %10345 = vrcp.f32 %v6359_v4  ;;  %v5461_v23 = vadd.f32 %v5205_v53, %v4437_v51  ;;  %v12988_v4 = vpop.f32.mrb[69].mxu0 }
 0x306   : > { %8275 = vst.msk [vmem:[%s11437_s29 + $0xc4] sm:$0xf] %vm8225_vm9, %v9161_v17  ;;  %v3672_v30 = vmul.f32 %v10340_v38, %v10340_v38  ;;  %vm3928_vm6 = vcmp.ge.f32.partialorder %v12919_v37, 0.0  ;;  %v4951_v52 = vsel %vm3927_vm2, %v4439_v27, %v4695_v1  ;;  %v5079_v3 = vsel %vm4055_vm3, %v4567_v29, %v4823_v59 }
 0x307   : > { %v5973_v50 = vadd.f32 %v5717_v0, %v3669_v12  ;;  %v4565_v7 = vadd.f32 1.0, %v4309_v56  ;;  %v4693_v49 = vadd.f32 %v4181_v13, %v3669_v12  ;;  %v5845_v28 = vadd.f32 2.0, %v4309_v56 }
 0x308   : > { %v4184_v62 = vmul.f32 2.0, %v10340_v38  ;;  %10347 = vpow2.f32 %v3471_v24  ;;  %v5208_v17 = vmul.f32 2.0, %v3672_v30  ;;  %v2902_v53 = vsub.f32 0.0, %v2646_v48  ;;  %v12994_v48 = vpop.f32.mrb[69].mxu1 }
 0x309   : > { %v10342_v22 = vpop.eup %10341  ;;  %v6229_v9 = vsel %vm3925_vm4, %v5461_v23, %v5973_v50  ;;  %v5589_v32 = vadd.f32 %v5333_v60, %v4565_v7  ;;  %v4821_v27 = vadd.f32 %v4309_v56, %v3797_v16  ;;  %v6101_v29 = vadd.f32 %v5845_v28, %v3797_v16 }
 0x30a   : > { %v7122_v2 = vmul.f32 %v10342_v22, %v6610_v36  ;;  %10349 = vrcp.f32 %v6229_v9  ;;  %v6487_v1 = vmul.f32 %v4951_v52, %v12886_v45  ;;  %v4440_v12 = vadd.f32 1.0, %v4184_v62 }
 0x30b   : > { %v5720_v13 = vadd.f32 2.0, %v4184_v62  ;;  %v3211_v38 = vmul.f32 1.442695, %v2902_v53  ;;  %v6615_v24 = vmul.f32 %v5079_v3, %v12890_v40  ;;  %v6357_v0 = vsel %vm4053_vm5, %v5589_v32, %v6101_v29  ;;  %v13023_v32 = vpop.f32.mrb[70].mxu0 }
 0x30c   : > { %v9289_v59 = vpack.c.bf16 %v7122_v2, %v7122_v2  ;;  %v3030_v60 = vsub.f32 0.0, %v2774_v10  ;;  %v10344_v23 = vpop.eup %10343  ;;  %v4949_v56 = vsel %vm3925_vm4, %v4437_v51, %v4693_v49  ;;  %10351 = vrcp.f32 %v6357_v0  ;;  %v13008_v51 = vld [vmem:[%s15170_s2] ss:$0 sm:$0xff] }
 0x30d   : > { %v5464_v16 = vadd.f32 %v5208_v17, %v4440_v12  ;;  %v5976_v36 = vadd.f32 %v5720_v13, %v3672_v30  ;;  %v6999_v45 = vmul.f32 %v10344_v23, %v6487_v1  ;;  %v5077_v2 = vsel %vm4053_vm5, %v4565_v7, %v4821_v27 }
 0x30e   : > { %8403 = vst.msk [vmem:[%s11437_s29 + $0x2c4] sm:$0xf] %vm8225_vm9, %v9289_v59  ;;  %10353 = vpow2.f32 %v3211_v38  ;;  %v3467_v40 = vmul.f32 1.442695, %v3030_v60  ;;  %v4696_v52 = vadd.f32 %v4184_v62, %v3672_v30  ;;  %v2651_v3 = vand.u32 2147483647, %v12956_v8 }
 0x30f   : > { %v6232_v10 = vsel %vm3928_vm6, %v5464_v16, %v5976_v36  ;;  %v13012_v50 = vadd.f32 %v13008_v51, %v12619_v6  ;;  %v10346_v49 = vpop.eup %10345  ;;  %v9166_v7 = vpack.c.bf16 %v6999_v45, %v6999_v45  ;;  %v13016_v30 = vadd.f32 %v13008_v51, %v12627_v61 }
 0x310   : > { %10355 = vrcp.f32 %v6232_v10  ;;  %v13020_v28 = vadd.f32 %v13008_v51, %v12646_v43  ;;  %v7127_v62 = vmul.f32 %v10346_v49, %v6615_v24  ;;  %v2907_v22 = vsub.f32 0.0, %v2651_v3 }
 0x311   : > { %10357 = vpow2.f32 %v3467_v40  ;;  %v2779_v9 = vand.u32 2147483647, %v13012_v50  ;;  %8280 = vst.msk [vmem:[%s11437_s29 + $0xd8] sm:$0xf] %vm8225_vm9, %v9166_v7  ;;  %v6485_v17 = vmul.f32 %v4949_v56, %v12901_v47  ;;  %v2649_v61 = vand.u32 2147483647, %v13016_v30 }
 0x312   : > { %v10348_v6 = vpop.eup %10347  ;;  %v2777_v53 = vand.u32 2147483647, %v13020_v28  ;;  %v9294_v27 = vpack.c.bf16 %v7127_v62, %v7127_v62  ;;  %v3221_v1 = vmul.f32 1.442695, %v2907_v22  ;;  %v6613_v38 = vmul.f32 %v5077_v2, %v12907_v19  ;;  %v13035_v40 = vpop.f32.mrb[70].mxu1 }
 0x313   : > { %v3800_v43 = vmul.f32 %v10348_v6, %v10348_v6  ;;  %v4312_v29 = vmul.f32 2.0, %v10348_v6  ;;  %v3035_v59 = vsub.f32 0.0, %v2779_v9  ;;  %v2905_v24 = vsub.f32 0.0, %v2649_v61 }
 0x314   : > { %v10350_v13 = vpop.eup %10349  ;;  %v3033_v0 = vsub.f32 0.0, %v2777_v53  ;;  %8408 = vst.msk [vmem:[%s11437_s29 + $0x2d8] sm:$0xf] %vm8225_vm9, %v9294_v27  ;;  %v4952_v47 = vsel %vm3928_vm6, %v4440_v12, %v4696_v52  ;;  %10359 = vpow2.f32 %v3221_v1  ;;  %vm4056_vm7 = vcmp.ge.f32.partialorder %v12934_v63, 0.0 }
 0x315   : > { %v6997_v60 = vmul.f32 %v10350_v13, %v6485_v17  ;;  %v4568_v23 = vadd.f32 1.0, %v4312_v29  ;;  %v5336_v56 = vmul.f32 2.0, %v3800_v43  ;;  %v5848_v16 = vadd.f32 2.0, %v4312_v29 }
 0x316   : > { %v3477_v36 = vmul.f32 1.442695, %v3035_v59  ;;  %v3217_v45 = vmul.f32 1.442695, %v2905_v24  ;;  %v10352_v10 = vpop.eup %10351  ;;  %v3473_v3 = vmul.f32 1.442695, %v3033_v0  ;;  %v6488_v12 = vmul.f32 %v4952_v47, %v12919_v37 }
 0x317   : > { %v9164_v19 = vpack.c.bf16 %v6997_v60, %v6997_v60  ;;  %v5592_v2 = vadd.f32 %v5336_v56, %v4568_v23  ;;  %v7125_v7 = vmul.f32 %v10352_v10, %v6613_v38  ;;  %v6104_v62 = vadd.f32 %v5848_v16, %v3800_v43 }
 0x318   : > { %v10354_v49 = vpop.eup %10353  ;;  %10361 = vpow2.f32 %v3477_v36  ;;  %v4824_v17 = vadd.f32 %v4312_v29, %v3800_v43  ;;  %v13047_v43 = vadd.f32 %v13008_v51, %v12652_v5  ;;  %vm3926_vm8 = vcmp.ge.f32.partialorder %v12944_v25, 0.0 }
 0x319   : > { %8278 = vst.msk [vmem:[%s11437_s29 + $0xd0] sm:$0xf] %vm8225_vm9, %v9164_v19  ;;  %v3670_v52 = vmul.f32 %v10354_v49, %v10354_v49  ;;  %v4182_v22 = vmul.f32 2.0, %v10354_v49  ;;  %10363 = vpow2.f32 %v3217_v45  ;;  %v9292_v6 = vpack.c.bf16 %v7125_v7, %v7125_v7 }
 0x31a   : > { %v10356_v9 = vpop.eup %10355  ;;  %v6360_v61 = vsel %vm4056_vm7, %v5592_v2, %v6104_v62  ;;  %10365 = vpow2.f32 %v3473_v3  ;;  %v5080_v56 = vsel %vm4056_vm7, %v4568_v23, %v4824_v17  ;;  %vm4054_vm10 = vcmp.ge.f32.partialorder %v12952_v55, 0.0 }
 0x31b   : > { %v10358_v53 = vpop.eup %10357  ;;  %v7000_v27 = vmul.f32 %v10356_v9, %v6488_v12  ;;  %10367 = vrcp.f32 %v6360_v61  ;;  %v4438_v1 = vadd.f32 1.0, %v4182_v22  ;;  %v4694_v13 = vadd.f32 %v4182_v22, %v3670_v52  ;;  %8406 = vst.msk [vmem:[%s11437_s29 + $0x2d0] sm:$0xf] %vm8225_vm9, %v9292_v6 }
 0x31c   : > { %v5206_v38 = vmul.f32 2.0, %v3670_v52  ;;  %v5718_v37 = vadd.f32 2.0, %v4182_v22  ;;  %v3798_v59 = vmul.f32 %v10358_v53, %v10358_v53  ;;  %v4310_v24 = vmul.f32 2.0, %v10358_v53 }
 0x31d   : > { %v9167_v0 = vpack.c.bf16 %v7000_v27, %v7000_v27  ;;  %v4950_v16 = vsel %vm3926_vm8, %v4438_v1, %v4694_v13  ;;  %vm3931_vm11 = vcmp.ge.f32.partialorder %v12956_v8, 0.0  ;;  %v13058_v5 = vadd.f32 %v13008_v51, %v12698_v35 }
 0x31e   : > { %v5462_v29 = vadd.f32 %v5206_v38, %v4438_v1  ;;  %v5974_v60 = vadd.f32 %v5718_v37, %v3670_v52  ;;  %v4566_v47 = vadd.f32 1.0, %v4310_v24  ;;  %v5334_v36 = vmul.f32 2.0, %v3798_v59  ;;  %v10360_v10 = vpop.eup %10359 }
 0x31f   : > { %8281 = vst.msk [vmem:[%s11437_s29 + $0xdc] sm:$0xf] %vm8225_vm9, %v9167_v0  ;;  %v5846_v45 = vadd.f32 2.0, %v4310_v24  ;;  %vm4059_vm12 = vcmp.ge.f32.partialorder %v13012_v50, 0.0  ;;  %v2652_v23 = vand.u32 2147483647, %v13047_v43  ;;  %v6616_v7 = vmul.f32 %v5080_v56, %v12934_v63 }
 0x320   : > { %v6230_v19 = vsel %vm3926_vm8, %v5462_v29, %v5974_v60  ;;  %v5590_v2 = vadd.f32 %v5334_v36, %v4566_v47  ;;  %v6486_v62 = vmul.f32 %v4950_v16, %v12944_v25  ;;  %v3675_v12 = vmul.f32 %v10360_v10, %v10360_v10 }
 0x321   : > { %10369 = vrcp.f32 %v6230_v19  ;;  %v6102_v3 = vadd.f32 %v5846_v45, %v3798_v59  ;;  %v4187_v52 = vmul.f32 2.0, %v10360_v10  ;;  %v4822_v9 = vadd.f32 %v4310_v24, %v3798_v59 }
 0x322   : > { %v10362_v49 = vpop.eup %10361  ;;  %v5211_v27 = vmul.f32 2.0, %v3675_v12  ;;  %v2780_v1 = vand.u32 2147483647, %v13058_v5  ;;  %v2908_v25 = vsub.f32 0.0, %v2652_v23  ;;  %vm3929_vm13 = vcmp.ge.f32.partialorder %v13016_v30, 0.0  ;;  %v13077_v23 = vpop.f32.mrb[71].mxu1 }
 0x323   : > { %v10364_v22 = vpop.eup %10363  ;;  %v6358_v35 = vsel %vm4054_vm10, %v5590_v2, %v6102_v3  ;;  %v3803_v6 = vmul.f32 %v10362_v49, %v10362_v49  ;;  %v4315_v17 = vmul.f32 2.0, %v10362_v49  ;;  %v4443_v53 = vadd.f32 1.0, %v4187_v52  ;;  %v13075_v3 = vpop.f32.mrb[71].mxu0 }
 0x324   : > { %v10366_v61 = vpop.eup %10365  ;;  %10371 = vrcp.f32 %v6358_v35  ;;  %v5723_v38 = vadd.f32 2.0, %v4187_v52  ;;  %v13070_v59 = vadd.f32 %v13008_v51, %v12708_v46  ;;  %v5078_v24 = vsel %vm4054_vm10, %v4566_v47, %v4822_v9 }
 0x325   : > { %v10368_v13 = vpop.eup %10367  ;;  %v4571_v63 = vadd.f32 1.0, %v4315_v17  ;;  %v5339_v37 = vmul.f32 2.0, %v3803_v6  ;;  %v5467_v29 = vadd.f32 %v5211_v27, %v4443_v53  ;;  %v5851_v60 = vadd.f32 2.0, %v4315_v17 }
 0x326   : > { %v7128_v0 = vmul.f32 %v10368_v13, %v6616_v7  ;;  %v4699_v56 = vadd.f32 %v4187_v52, %v3675_v12  ;;  %v5979_v16 = vadd.f32 %v5723_v38, %v3675_v12  ;;  %v3673_v19 = vmul.f32 %v10364_v22, %v10364_v22 }
 0x327   : > { %v5595_v36 = vadd.f32 %v5339_v37, %v4571_v63  ;;  %v6107_v10 = vadd.f32 %v5851_v60, %v3803_v6  ;;  %vm4057_vm14 = vcmp.ge.f32.partialorder %v13020_v28, 0.0  ;;  %v3036_v2 = vsub.f32 0.0, %v2780_v1 }
 0x328   : > { %v9295_v45 = vpack.c.bf16 %v7128_v0, %v7128_v0  ;;  %v6235_v46 = vsel %vm3931_vm11, %v5467_v29, %v5979_v16  ;;  %v4185_v49 = vmul.f32 2.0, %v10364_v22  ;;  %v3801_v7 = vmul.f32 %v10366_v61, %v10366_v61 }
 0x329   : > { %v4313_v35 = vmul.f32 2.0, %v10366_v61  ;;  %10373 = vrcp.f32 %v6235_v46  ;;  %v4827_v47 = vadd.f32 %v4315_v17, %v3803_v6  ;;  %v6363_v12 = vsel %vm4059_vm12, %v5595_v36, %v6107_v10 }
 0x32a   : > { %8409 = vst.msk [vmem:[%s11437_s29 + $0x2dc] sm:$0xf] %vm8225_vm9, %v9295_v45  ;;  %v5209_v52 = vmul.f32 2.0, %v3673_v19  ;;  %v4955_v27 = vsel %vm3931_vm11, %v4443_v53, %v4699_v56  ;;  %10375 = vrcp.f32 %v6363_v12  ;;  %v4441_v1 = vadd.f32 1.0, %v4185_v49 }
 0x32b   : > { %v10370_v9 = vpop.eup %10369  ;;  %v5721_v13 = vadd.f32 2.0, %v4185_v49  ;;  %v6614_v22 = vmul.f32 %v5078_v24, %v12952_v55  ;;  %v4569_v61 = vadd.f32 1.0, %v4313_v35  ;;  %v5337_v37 = vmul.f32 2.0, %v3801_v7 }
 0x32c   : > { %v6998_v38 = vmul.f32 %v10370_v9, %v6486_v62  ;;  %v5465_v0 = vadd.f32 %v5209_v52, %v4441_v1  ;;  %v5849_v6 = vadd.f32 2.0, %v4313_v35  ;;  %v3223_v17 = vmul.f32 1.442695, %v2908_v25  ;;  %v13115_v9 = vpop.f32.mrb[72].mxu0 }
 0x32d   : > { %v5977_v29 = vadd.f32 %v5721_v13, %v3673_v19  ;;  %v6491_v36 = vmul.f32 %v4955_v27, %v12956_v8  ;;  %v5083_v53 = vsel %vm4059_vm12, %v4571_v63, %v4827_v47  ;;  %v5593_v56 = vadd.f32 %v5337_v37, %v4569_v61 }
 0x32e   : > { %v10372_v60 = vpop.eup %10371  ;;  %v9165_v16 = vpack.c.bf16 %v6998_v38, %v6998_v38  ;;  %v6105_v55 = vadd.f32 %v5849_v6, %v3801_v7  ;;  %v3479_v24 = vmul.f32 1.442695, %v3036_v2  ;;  %v4697_v10 = vadd.f32 %v4185_v49, %v3673_v19 }
 0x32f   : > { %v7126_v45 = vmul.f32 %v10372_v60, %v6614_v22  ;;  %v6233_v62 = vsel %vm3929_vm13, %v5465_v0, %v5977_v29  ;;  %v2650_v25 = vand.u32 2147483647, %v13070_v59  ;;  %v13098_v8 = vadd.f32 %v13008_v51, %v12717_v39  ;;  %v13130_v29 = vpop.f32.mrb[73].mxu0 }
 0x330   : > { %8279 = vst.msk [vmem:[%s11437_s29 + $0xd4] sm:$0xf] %vm8225_vm9, %v9165_v16  ;;  %10377 = vrcp.f32 %v6233_v62  ;;  %v6361_v63 = vsel %vm4057_vm14, %v5593_v56, %v6105_v55  ;;  %v13104_v47 = vadd.f32 %v13008_v51, %v12746_v21  ;;  %v6619_v2 = vmul.f32 %v5083_v53, %v13012_v50  ;;  %v13117_v21 = vpop.f32.mrb[72].mxu1 }
 0x331   : > { %v9293_v46 = vpack.c.bf16 %v7126_v45, %v7126_v45  ;;  %10379 = vpow2.f32 %v3223_v17  ;;  %v2906_v19 = vsub.f32 0.0, %v2650_v25  ;;  %v2778_v49 = vand.u32 2147483647, %v13098_v8  ;;  %v13132_v6 = vpop.f32.mrb[73].mxu1 }
 0x332   : > { %10381 = vrcp.f32 %v6361_v63  ;;  %v4825_v12 = vadd.f32 %v4313_v35, %v3801_v7  ;;  %v2655_v39 = vand.u32 2147483647, %v13104_v47  ;;  %v13113_v52 = vadd.f32 %v13008_v51, %v12748_v41 }
 0x333   : > { %8407 = vst.msk [vmem:[%s11437_s29 + $0x2d4] sm:$0xf] %vm8225_vm9, %v9293_v46  ;;  %10383 = vpow2.f32 %v3479_v24  ;;  %v10374_v27 = vpop.eup %10373  ;;  %v3219_v50 = vmul.f32 1.442695, %v2906_v19  ;;  %v3034_v13 = vsub.f32 0.0, %v2778_v49  ;;  %v13121_v38 = vadd.f32 %v13008_v51, %v12752_v34 }
 0x334   : > { %v13125_v7 = vadd.f32 %v13008_v51, %v12754_v11  ;;  %v10376_v35 = vpop.eup %10375  ;;  %v7003_v22 = vmul.f32 %v10374_v27, %v6491_v36  ;;  %v4953_v41 = vsel %vm3929_vm13, %v4441_v1, %v4697_v10  ;;  %v2911_v37 = vsub.f32 0.0, %v2655_v39 }
 0x335   : > { %v2783_v0 = vand.u32 2147483647, %v13113_v52  ;;  %v7131_v17 = vmul.f32 %v10376_v35, %v6619_v2  ;;  %10385 = vpow2.f32 %v3219_v50  ;;  %v3475_v34 = vmul.f32 1.442695, %v3034_v13  ;;  %v13148_v2 = vpop.f32.mrb[74].mxu0 }
 0x336   : > { %v2653_v11 = vand.u32 2147483647, %v13121_v38  ;;  %v9170_v60 = vpack.c.bf16 %v7003_v22, %v7003_v22  ;;  %v5081_v16 = vsel %vm4057_vm14, %v4569_v61, %v4825_v12  ;;  %v3229_v36 = vmul.f32 1.442695, %v2911_v37 }
 0x337   : > { %v3039_v1 = vsub.f32 0.0, %v2783_v0  ;;  %v9298_v53 = vpack.c.bf16 %v7131_v17, %v7131_v17  ;;  %10387 = vpow2.f32 %v3475_v34  ;;  %v2781_v45 = vand.u32 2147483647, %v13125_v7 }
 0x338   : > { %v2909_v56 = vsub.f32 0.0, %v2653_v11  ;;  %8284 = vst.msk [vmem:[%s11437_s29 + $0xe8] sm:$0xf] %vm8225_vm9, %v9170_v60  ;;  %v6489_v62 = vmul.f32 %v4953_v41, %v13016_v30  ;;  %10389 = vpow2.f32 %v3229_v36  ;;  %v13143_v55 = vadd.f32 %v13008_v51, %v12783_v20  ;;  %v13157_v41 = vpop.f32.mrb[74].mxu1 }
 0x339   : > { %8412 = vst.msk [vmem:[%s11437_s29 + $0x2e8] sm:$0xf] %vm8225_vm9, %v9298_v53  ;;  %v3485_v61 = vmul.f32 1.442695, %v3039_v1  ;;  %v6617_v46 = vmul.f32 %v5081_v16, %v13020_v28  ;;  %vm3932_vm15 = vcmp.ge.f32.partialorder %v13047_v43, 0.0  ;;  %v3037_v12 = vsub.f32 0.0, %v2781_v45 }
 0x33a   : > { %v10378_v24 = vpop.eup %10377  ;;  %v3225_v63 = vmul.f32 1.442695, %v2909_v56  ;;  %vm4060_vm0 = vcmp.ge.f32.partialorder %v13058_v5, 0.0  ;;  %v2656_v50 = vand.u32 2147483647, %v13143_v55  ;;  %v13155_v28 = vadd.f32 %v13008_v51, %v12810_v44 }
 0x33b   : > { %v10380_v10 = vpop.eup %10379  ;;  %v7001_v25 = vmul.f32 %v10378_v24, %v6489_v62  ;;  %10391 = vpow2.f32 %v3485_v61  ;;  %vm3930_vm1 = vcmp.ge.f32.partialorder %v13070_v59, 0.0  ;;  %v3481_v44 = vmul.f32 1.442695, %v3037_v12 }
 0x33c   : > { %v10382_v19 = vpop.eup %10381  ;;  %v3676_v49 = vmul.f32 %v10380_v10, %v10380_v10  ;;  %v4188_v30 = vmul.f32 2.0, %v10380_v10  ;;  %10393 = vpow2.f32 %v3225_v63  ;;  %v2912_v53 = vsub.f32 0.0, %v2656_v50 }
 0x33d   : > { %v10384_v20 = vpop.eup %10383  ;;  %v9168_v39 = vpack.c.bf16 %v7001_v25, %v7001_v25  ;;  %v7129_v27 = vmul.f32 %v10382_v19, %v6617_v46  ;;  %v13166_v56 = vadd.f32 %v13008_v51, %v12833_v33  ;;  %v13170_v25 = vpop.f32.mrb[75].mxu0  ;;  %vm4058_vm2 = vcmp.ge.f32.partialorder %v13098_v8, 0.0 }
 0x33e   : > { %v4444_v13 = vadd.f32 1.0, %v4188_v30  ;;  %v5212_v35 = vmul.f32 2.0, %v3676_v49  ;;  %v5724_v22 = vadd.f32 2.0, %v4188_v30  ;;  %v3804_v0 = vmul.f32 %v10384_v20, %v10384_v20 }
 0x33f   : > { %8282 = vst.msk [vmem:[%s11437_s29 + $0xe0] sm:$0xf] %vm8225_vm9, %v9168_v39  ;;  %v9296_v37 = vpack.c.bf16 %v7129_v27, %v7129_v27  ;;  %v4316_v17 = vmul.f32 2.0, %v10384_v20  ;;  %v10386_v34 = vpop.eup %10385  ;;  %v4700_v11 = vadd.f32 %v4188_v30, %v3676_v49  ;;  %vm3935_vm3 = vcmp.ge.f32.partialorder %v13104_v47, 0.0 }
 0x340   : > { %v5468_v60 = vadd.f32 %v5212_v35, %v4444_v13  ;;  %v5980_v16 = vadd.f32 %v5724_v22, %v3676_v49  ;;  %v5340_v1 = vmul.f32 2.0, %v3804_v0  ;;  %v3674_v61 = vmul.f32 %v10386_v34, %v10386_v34 }
 0x341   : > { %8410 = vst.msk [vmem:[%s11437_s29 + $0x2e0] sm:$0xf] %vm8225_vm9, %v9296_v37  ;;  %v4572_v36 = vadd.f32 1.0, %v4316_v17  ;;  %v10388_v45 = vpop.eup %10387  ;;  %v5852_v24 = vadd.f32 2.0, %v4316_v17  ;;  %v4186_v10 = vmul.f32 2.0, %v10386_v34  ;;  %v4956_v33 = vsel %vm3932_vm15, %v4444_v13, %v4700_v11 }
 0x342   : > { %v6236_v62 = vsel %vm3932_vm15, %v5468_v60, %v5980_v16  ;;  %v10390_v46 = vpop.eup %10389  ;;  %v3802_v19 = vmul.f32 %v10388_v45, %v10388_v45  ;;  %v4828_v20 = vadd.f32 %v4316_v17, %v3804_v0  ;;  %v5210_v39 = vmul.f32 2.0, %v3674_v61 }
 0x343   : > { %10395 = vrcp.f32 %v6236_v62  ;;  %v5596_v63 = vadd.f32 %v5340_v1, %v4572_v36  ;;  %v6108_v30 = vadd.f32 %v5852_v24, %v3804_v0  ;;  %v4442_v12 = vadd.f32 1.0, %v4186_v10 }
 0x344   : > { %10397 = vpow2.f32 %v3481_v44  ;;  %v5722_v27 = vadd.f32 2.0, %v4186_v10  ;;  %v4314_v50 = vmul.f32 2.0, %v10388_v45  ;;  %v5338_v22 = vmul.f32 2.0, %v3802_v19 }
 0x345   : > { %v6364_v35 = vsel %vm4060_vm0, %v5596_v63, %v6108_v30  ;;  %v3679_v37 = vmul.f32 %v10390_v46, %v10390_v46  ;;  %v4191_v34 = vmul.f32 2.0, %v10390_v46  ;;  %v4698_v60 = vadd.f32 %v4186_v10, %v3674_v61  ;;  %v10392_v13 = vpop.eup %10391 }
 0x346   : > { %10399 = vrcp.f32 %v6364_v35  ;;  %v5466_v16 = vadd.f32 %v5210_v39, %v4442_v12  ;;  %v5978_v1 = vadd.f32 %v5722_v27, %v3674_v61  ;;  %v4570_v11 = vadd.f32 1.0, %v4314_v50  ;;  %v10394_v44 = vpop.eup %10393 }
 0x347   : > { %v5850_v62 = vadd.f32 2.0, %v4314_v50  ;;  %v4447_v24 = vadd.f32 1.0, %v4191_v34  ;;  %v3231_v49 = vmul.f32 1.442695, %v2912_v53  ;;  %v6492_v0 = vmul.f32 %v4956_v33, %v13047_v43 }
 0x348   : > { %v6234_v17 = vsel %vm3930_vm1, %v5466_v16, %v5978_v1  ;;  %v5215_v45 = vmul.f32 2.0, %v3679_v37  ;;  %v5727_v63 = vadd.f32 2.0, %v4191_v34  ;;  %v5084_v46 = vsel %vm4060_vm0, %v4572_v36, %v4828_v20 }
 0x349   : > { %10401 = vrcp.f32 %v6234_v17  ;;  %v5594_v10 = vadd.f32 %v5338_v22, %v4570_v11  ;;  %v6106_v30 = vadd.f32 %v5850_v62, %v3802_v19  ;;  %vm4063_vm4 = vcmp.ge.f32.partialorder %v13113_v52, 0.0 }
 0x34a   : > { %v4954_v61 = vsel %vm3930_vm1, %v4442_v12, %v4698_v60  ;;  %v4826_v53 = vadd.f32 %v4314_v50, %v3802_v19  ;;  %v5471_v39 = vadd.f32 %v5215_v45, %v4447_v24  ;;  %v5983_v27 = vadd.f32 %v5727_v63, %v3679_v37 }
 0x34b   : > { %vm3933_vm5 = vcmp.ge.f32.partialorder %v13121_v38, 0.0  ;;  %v6362_v43 = vsel %vm4058_vm2, %v5594_v10, %v6106_v30  ;;  %v4703_v33 = vadd.f32 %v4191_v34, %v3679_v37  ;;  %v3807_v35 = vmul.f32 %v10392_v13, %v10392_v13 }
 0x34c   : > { %v4319_v16 = vmul.f32 2.0, %v10392_v13  ;;  %10403 = vrcp.f32 %v6362_v43  ;;  %v6239_v20 = vsel %vm3935_vm3, %v5471_v39, %v5983_v27  ;;  %v3677_v22 = vmul.f32 %v10394_v44, %v10394_v44  ;;  %v13194_v13 = vpop.f32.mrb[75].mxu1 }
 0x34d   : > { %v10396_v36 = vpop.eup %10395  ;;  %v4189_v1 = vmul.f32 2.0, %v10394_v44  ;;  %v6620_v19 = vmul.f32 %v5084_v46, %v13058_v5  ;;  %10405 = vrcp.f32 %v6239_v20  ;;  %v6490_v60 = vmul.f32 %v4954_v61, %v13070_v59 }
 0x34e   : > { %v10398_v62 = vpop.eup %10397  ;;  %v7004_v12 = vmul.f32 %v10396_v36, %v6492_v0  ;;  %v4575_v50 = vadd.f32 1.0, %v4319_v16  ;;  %v5343_v17 = vmul.f32 2.0, %v3807_v35  ;;  %v5855_v37 = vadd.f32 2.0, %v4319_v16 }
 0x34f   : > { %v4445_v34 = vadd.f32 1.0, %v4189_v1  ;;  %v5082_v63 = vsel %vm4058_vm2, %v4570_v11, %v4826_v53  ;;  %v5213_v10 = vmul.f32 2.0, %v3677_v22  ;;  %v5725_v44 = vadd.f32 2.0, %v4189_v1 }
 0x350   : > { %v9171_v45 = vpack.c.bf16 %v7004_v12, %v7004_v12  ;;  %v10400_v30 = vpop.eup %10399  ;;  %v4959_v5 = vsel %vm3935_vm3, %v4447_v24, %v4703_v33  ;;  %v4831_v0 = vadd.f32 %v4319_v16, %v3807_v35  ;;  %v5599_v46 = vadd.f32 %v5343_v17, %v4575_v50 }
 0x351   : > { %v6111_v39 = vadd.f32 %v5855_v37, %v3807_v35  ;;  %v7132_v59 = vmul.f32 %v10400_v30, %v6620_v19  ;;  %v4701_v61 = vadd.f32 %v4189_v1, %v3677_v22  ;;  %v5469_v27 = vadd.f32 %v5213_v10, %v4445_v34 }
 0x352   : > { %8285 = vst.msk [vmem:[%s11437_s29 + $0xec] sm:$0xf] %vm8225_vm9, %v9171_v45  ;;  %v5981_v43 = vadd.f32 %v5725_v44, %v3677_v22  ;;  %v3805_v11 = vmul.f32 %v10398_v62, %v10398_v62  ;;  %v4317_v53 = vmul.f32 2.0, %v10398_v62  ;;  %10407 = vpow2.f32 %v3231_v49 }
 0x353   : > { %v6367_v36 = vsel %vm4063_vm4, %v5599_v46, %v6111_v39  ;;  %v10402_v20 = vpop.eup %10401  ;;  %v9299_v12 = vpack.c.bf16 %v7132_v59, %v7132_v59  ;;  %v15199_v33 = vand.u32 2147483647, %v13155_v28  ;;  %vm4061_vm6 = vcmp.ge.f32.partialorder %v13125_v7, 0.0 }
 0x354   : > { %10409 = vrcp.f32 %v6367_v36  ;;  %v6237_v24 = vsel %vm3933_vm5, %v5469_v27, %v5981_v43  ;;  %v7002_v16 = vmul.f32 %v10402_v20, %v6490_v60  ;;  %v4573_v22 = vadd.f32 1.0, %v4317_v53  ;;  %v13234_v27 = vpop.f32.mrb[76].mxu0  ;;  %v13236_v43 = vpop.f32.mrb[76].mxu1 }
 0x355   : > { %v3040_v35 = vsub.f32 0.0, %v15199_v33  ;;  %10411 = vrcp.f32 %v6237_v24  ;;  %8413 = vst.msk [vmem:[%s11437_s29 + $0x2ec] sm:$0xf] %vm8225_vm9, %v9299_v12  ;;  %v6618_v1 = vmul.f32 %v5082_v63, %v13098_v8  ;;  %v5341_v49 = vmul.f32 2.0, %v3805_v11 }
 0x356   : > { %v5853_v62 = vadd.f32 2.0, %v4317_v53  ;;  %v10404_v17 = vpop.eup %10403  ;;  %v9169_v37 = vpack.c.bf16 %v7002_v16, %v7002_v16  ;;  %v6495_v45 = vmul.f32 %v4959_v5, %v13104_v47  ;;  %v5087_v10 = vsel %vm4063_vm4, %v4575_v50, %v4831_v0  ;;  %v15200_v0 = vld [vmem:[#allocation6_spill] sm:$0xff] }
 0x357   : > { %v3487_v19 = vmul.f32 1.442695, %v3040_v35  ;;  %v2654_v60 = vand.u32 2147483647, %v13166_v56  ;;  %v10406_v44 = vpop.eup %10405  ;;  %v7130_v30 = vmul.f32 %v10404_v17, %v6618_v1  ;;  %v4957_v46 = vsel %vm3933_vm5, %v4445_v34, %v4701_v61 }
 0x358   : > { %v5597_v39 = vadd.f32 %v5341_v49, %v4573_v22  ;;  %v6109_v59 = vadd.f32 %v5853_v62, %v3805_v11  ;;  %8283 = vst.msk [vmem:[%s11437_s29 + $0xe4] sm:$0xf] %vm8225_vm9, %v9169_v37  ;;  %v7007_v8 = vmul.f32 %v10406_v44, %v6495_v45  ;;  %v13222_v47 = vadd.f32 %v13008_v51, %v12835_v31  ;;  %v13251_v62 = vpop.f32.mrb[77].mxu0  ;;  %v13253_v37 = vpop.f32.mrb[77].mxu1 }
 0x359   : > { %10413 = vpow2.f32 %v3487_v19  ;;  %v2910_v63 = vsub.f32 0.0, %v2654_v60  ;;  %v9297_v50 = vpack.c.bf16 %v7130_v30, %v7130_v30  ;;  %v13228_v34 = vadd.f32 %v13008_v51, %v12860_v18 }
 0x35a   : > { %v6365_v5 = vsel %vm4061_vm6, %v5597_v39, %v6109_v59  ;;  %v13232_v61 = vadd.f32 %v13008_v51, %v15200_v0  ;;  %v9174_v36 = vpack.c.bf16 %v7007_v8, %v7007_v8  ;;  %v2782_v20 = vand.u32 2147483647, %v13222_v47 }
 0x35b   : > { %10415 = vrcp.f32 %v6365_v5  ;;  %v3227_v31 = vmul.f32 1.442695, %v2910_v63  ;;  %8411 = vst.msk [vmem:[%s11437_s29 + $0x2e4] sm:$0xf] %vm8225_vm9, %v9297_v50  ;;  %v6623_v12 = vmul.f32 %v5087_v10, %v13113_v52  ;;  %v4829_v24 = vadd.f32 %v4317_v53, %v3805_v11 }
 0x35c   : > { %v2659_v18 = vand.u32 2147483647, %v13228_v34  ;;  %v2787_v33 = vand.u32 2147483647, %v13232_v61  ;;  %v10408_v35 = vpop.eup %10407  ;;  %8288 = vst.msk [vmem:[%s11437_s29 + $0xf8] sm:$0xf] %vm8225_vm9, %v9174_v36  ;;  %v6493_v16 = vmul.f32 %v4957_v46, %v13121_v38  ;;  %v13249_v49 = vadd.f32 %v13008_v51, %v12867_v57 }
 0x35d   : > { %10417 = vpow2.f32 %v3227_v31  ;;  %v3038_v1 = vsub.f32 0.0, %v2782_v20  ;;  %v3680_v52 = vmul.f32 %v10408_v35, %v10408_v35  ;;  %v4192_v11 = vmul.f32 2.0, %v10408_v35  ;;  %v13262_v20 = vpop.f32.mrb[78].mxu0 }
 0x35e   : > { %v10410_v19 = vpop.eup %10409  ;;  %v2915_v53 = vsub.f32 0.0, %v2659_v18  ;;  %v3043_v17 = vsub.f32 0.0, %v2787_v33  ;;  %v2657_v38 = vand.u32 2147483647, %v13249_v49  ;;  %v5085_v57 = vsel %vm4061_vm6, %v4573_v22, %v4829_v24 }
 0x35f   : > { %v10412_v45 = vpop.eup %10411  ;;  %v7135_v10 = vmul.f32 %v10410_v19, %v6623_v12  ;;  %v3483_v60 = vmul.f32 1.442695, %v3038_v1  ;;  %v4448_v30 = vadd.f32 1.0, %v4192_v11  ;;  %v5216_v46 = vmul.f32 2.0, %v3680_v52 }
 0x360   : > { %v7005_v44 = vmul.f32 %v10412_v45, %v6493_v16  ;;  %v5728_v59 = vadd.f32 2.0, %v4192_v11  ;;  %v3237_v8 = vmul.f32 1.442695, %v2915_v53  ;;  %vm3936_vm7 = vcmp.ge.f32.partialorder %v13143_v55, 0.0  ;;  %v13273_v53 = vpop.f32.mrb[78].mxu1 }
 0x361   : > { %v9302_v39 = vpack.c.bf16 %v7135_v10, %v7135_v10  ;;  %10419 = vpow2.f32 %v3483_v60  ;;  %v5472_v50 = vadd.f32 %v5216_v46, %v4448_v30  ;;  %v3493_v5 = vmul.f32 1.442695, %v3043_v17 }
 0x362   : > { %v9172_v63 = vpack.c.bf16 %v7005_v44, %v7005_v44  ;;  %v6621_v36 = vmul.f32 %v5085_v57, %v13125_v7  ;;  %v5984_v31 = vadd.f32 %v5728_v59, %v3680_v52  ;;  %10421 = vpow2.f32 %v3237_v8 }
 0x363   : > { %v10414_v0 = vpop.eup %10413  ;;  %8416 = vst.msk [vmem:[%s11437_s29 + $0x2f8] sm:$0xf] %vm8225_vm9, %v9302_v39  ;;  %v2913_v22 = vsub.f32 0.0, %v2657_v38  ;;  %v4704_v12 = vadd.f32 %v4192_v11, %v3680_v52  ;;  %v13268_v33 = vadd.f32 %v13008_v51, %v12869_v15  ;;  %10423 = vpow2.f32 %v3493_v5 }
 0x364   : > { %8286 = vst.msk [vmem:[%s11437_s29 + $0xf0] sm:$0xf] %vm8225_vm9, %v9172_v63  ;;  %v3808_v24 = vmul.f32 %v10414_v0, %v10414_v0  ;;  %v4320_v18 = vmul.f32 2.0, %v10414_v0  ;;  %v6240_v16 = vsel %vm3936_vm7, %v5472_v50, %v5984_v31  ;;  %vm4064_vm8 = vcmp.ge.f32.partialorder %v13155_v28, 0.0  ;;  %v13281_v50 = vpop.f32.mrb[79].mxu0 }
 0x365   : > { %v10416_v35 = vpop.eup %10415  ;;  %v3233_v7 = vmul.f32 1.442695, %v2913_v22  ;;  %10425 = vrcp.f32 %v6240_v16  ;;  %v2785_v15 = vand.u32 2147483647, %v13268_v33  ;;  %v4960_v10 = vsel %vm3936_vm7, %v4448_v30, %v4704_v12 }
 0x366   : > { %v7133_v1 = vmul.f32 %v10416_v35, %v6621_v36  ;;  %v4576_v19 = vadd.f32 1.0, %v4320_v18  ;;  %v5344_v11 = vmul.f32 2.0, %v3808_v24  ;;  %v5856_v17 = vadd.f32 2.0, %v4320_v18 }
 0x367   : > { %v10418_v52 = vpop.eup %10417  ;;  %10427 = vpow2.f32 %v3233_v7  ;;  %v4832_v44 = vadd.f32 %v4320_v18, %v3808_v24  ;;  %v3041_v39 = vsub.f32 0.0, %v2785_v15  ;;  %vm3934_vm10 = vcmp.ge.f32.partialorder %v13166_v56, 0.0 }
 0x368   : > { %v9300_v45 = vpack.c.bf16 %v7133_v1, %v7133_v1  ;;  %v3678_v60 = vmul.f32 %v10418_v52, %v10418_v52  ;;  %v4190_v38 = vmul.f32 2.0, %v10418_v52  ;;  %v5600_v57 = vadd.f32 %v5344_v11, %v4576_v19 }
 0x369   : > { %v6112_v46 = vadd.f32 %v5856_v17, %v3808_v24  ;;  %vm4062_vm11 = vcmp.ge.f32.partialorder %v13222_v47, 0.0  ;;  %v3489_v30 = vmul.f32 1.442695, %v3041_v39  ;;  %v13288_v36 = vadd.f32 %v13008_v51, %v12903_v54 }
 0x36a   : > { %8414 = vst.msk [vmem:[%s11437_s29 + $0x2f0] sm:$0xf] %vm8225_vm9, %v9300_v45  ;;  %v4446_v59 = vadd.f32 1.0, %v4190_v38  ;;  %v5214_v8 = vmul.f32 2.0, %v3678_v60  ;;  %v5726_v63 = vadd.f32 2.0, %v4190_v38  ;;  %v6496_v31 = vmul.f32 %v4960_v10, %v13143_v55 }
 0x36b   : > { %v10420_v5 = vpop.eup %10419  ;;  %v6368_v0 = vsel %vm4064_vm8, %v5600_v57, %v6112_v46  ;;  %v5088_v18 = vsel %vm4064_vm8, %v4576_v19, %v4832_v44  ;;  %v4702_v35 = vadd.f32 %v4190_v38, %v3678_v60  ;;  %v2660_v15 = vand.u32 2147483647, %v13288_v36 }
 0x36c   : > { %10429 = vrcp.f32 %v6368_v0  ;;  %v5470_v22 = vadd.f32 %v5214_v8, %v4446_v59  ;;  %v5982_v12 = vadd.f32 %v5726_v63, %v3678_v60  ;;  %v10422_v24 = vpop.eup %10421  ;;  %v3806_v16 = vmul.f32 %v10420_v5, %v10420_v5 }
 0x36d   : > { %v4318_v7 = vmul.f32 2.0, %v10420_v5  ;;  %v3683_v52 = vmul.f32 %v10422_v24, %v10422_v24  ;;  %v4195_v11 = vmul.f32 2.0, %v10422_v24  ;;  %10431 = vpow2.f32 %v3489_v30  ;;  %v10424_v54 = vpop.eup %10423 }
 0x36e   : > { %v6238_v1 = vsel %vm3934_vm10, %v5470_v22, %v5982_v12  ;;  %v5342_v55 = vmul.f32 2.0, %v3806_v16  ;;  %vm3939_vm12 = vcmp.ge.f32.partialorder %v13228_v34, 0.0  ;;  %vm4067_vm13 = vcmp.ge.f32.partialorder %v13232_v61, 0.0 }
 0x36f   : > { %10433 = vrcp.f32 %v6238_v1  ;;  %v4574_v17 = vadd.f32 1.0, %v4318_v7  ;;  %v10426_v45 = vpop.eup %10425  ;;  %v5854_v10 = vadd.f32 2.0, %v4318_v7  ;;  %v4451_v19 = vadd.f32 1.0, %v4195_v11 }
 0x370   : > { %v5219_v60 = vmul.f32 2.0, %v3683_v52  ;;  %v7008_v44 = vmul.f32 %v10426_v45, %v6496_v31  ;;  %v5731_v46 = vadd.f32 2.0, %v4195_v11  ;;  %v13300_v39 = vadd.f32 %v13008_v51, %v12937_v26 }
 0x371   : > { %v10428_v38 = vpop.eup %10427  ;;  %v5598_v57 = vadd.f32 %v5342_v55, %v4574_v17  ;;  %v6624_v8 = vmul.f32 %v5088_v18, %v13155_v28  ;;  %v4958_v63 = vsel %vm3934_vm10, %v4446_v59, %v4702_v35  ;;  %v6110_v5 = vadd.f32 %v5854_v10, %v3806_v16 }
 0x372   : > { %v5475_v0 = vadd.f32 %v5219_v60, %v4451_v19  ;;  %v9175_v30 = vpack.c.bf16 %v7008_v44, %v7008_v44  ;;  %v5987_v22 = vadd.f32 %v5731_v46, %v3683_v52  ;;  %v3811_v12 = vmul.f32 %v10424_v54, %v10424_v54 }
 0x373   : > { %vm3937_vm14 = vcmp.ge.f32.partialorder %v13249_v49, 0.0  ;;  %v2916_v31 = vsub.f32 0.0, %v2660_v15  ;;  %v6366_v24 = vsel %vm4062_vm11, %v5598_v57, %v6110_v5  ;;  %v4323_v1 = vmul.f32 2.0, %v10424_v54 }
 0x374   : > { %v3681_v55 = vmul.f32 %v10428_v38, %v10428_v38  ;;  %v4193_v26 = vmul.f32 2.0, %v10428_v38  ;;  %8289 = vst.msk [vmem:[%s11437_s29 + $0xfc] sm:$0xf] %vm8225_vm9, %v9175_v30  ;;  %v4830_v51 = vadd.f32 %v4318_v7, %v3806_v16  ;;  %10435 = vrcp.f32 %v6366_v24  ;;  %v13313_v38 = vpop.f32.mrb[79].mxu1 }
 0x375   : > { %v6243_v28 = vsel %vm3939_vm12, %v5475_v0, %v5987_v22  ;;  %v5347_v59 = vmul.f32 2.0, %v3811_v12  ;;  %v4707_v35 = vadd.f32 %v4195_v11, %v3683_v52  ;;  %v4579_v45 = vadd.f32 1.0, %v4323_v1 }
 0x376   : > { %v10430_v18 = vpop.eup %10429  ;;  %10437 = vrcp.f32 %v6243_v28  ;;  %v5859_v10 = vadd.f32 2.0, %v4323_v1  ;;  %v6494_v60 = vmul.f32 %v4958_v63, %v13166_v56  ;;  %v4449_v44 = vadd.f32 1.0, %v4193_v26 }
 0x377   : > { %v7136_v15 = vmul.f32 %v10430_v18, %v6624_v8  ;;  %v5217_v54 = vmul.f32 2.0, %v3681_v55  ;;  %v10432_v57 = vpop.eup %10431  ;;  %v5603_v16 = vadd.f32 %v5347_v59, %v4579_v45  ;;  %v5729_v46 = vadd.f32 2.0, %v4193_v26 }
 0x378   : > { %v6115_v7 = vadd.f32 %v5859_v10, %v3811_v12  ;;  %v3239_v5 = vmul.f32 1.442695, %v2916_v31  ;;  %v5086_v52 = vsel %vm4062_vm11, %v4574_v17, %v4830_v51  ;;  %vm4065_vm15 = vcmp.ge.f32.partialorder %v13268_v33, 0.0 }
 0x379   : > { %v10434_v0 = vpop.eup %10433  ;;  %v9303_v30 = vpack.c.bf16 %v7136_v15, %v7136_v15  ;;  %v5473_v11 = vadd.f32 %v5217_v54, %v4449_v44  ;;  %v4963_v56 = vsel %vm3939_vm12, %v4451_v19, %v4707_v35  ;;  %v5985_v22 = vadd.f32 %v5729_v46, %v3681_v55 }
 0x37a   : > { %v7006_v8 = vmul.f32 %v10434_v0, %v6494_v60  ;;  %v6371_v63 = vsel %vm4067_vm13, %v5603_v16, %v6115_v7  ;;  %v4835_v31 = vadd.f32 %v4323_v1, %v3811_v12  ;;  %v3809_v24 = vmul.f32 %v10432_v57, %v10432_v57  ;;  %v13333_v1 = vld [vmem:[%s15170_s2] ss:$0 sm:$0xff] }
 0x37b   : > { %8417 = vst.msk [vmem:[%s11437_s29 + $0x2fc] sm:$0xf] %vm8225_vm9, %v9303_v30  ;;  %10439 = vrcp.f32 %v6371_v63  ;;  %v4321_v28 = vmul.f32 2.0, %v10432_v57  ;;  %v6241_v17 = vsel %vm3937_vm14, %v5473_v11, %v5985_v22  ;;  %v2788_v51 = vand.u32 2147483647, %v13300_v39 }
 0x37c   : > { %v9173_v59 = vpack.c.bf16 %v7006_v8, %v7006_v8  ;;  %10441 = vpow2.f32 %v3239_v5  ;;  %v6622_v19 = vmul.f32 %v5086_v52, %v13222_v47  ;;  %v5345_v35 = vmul.f32 2.0, %v3809_v24  ;;  %v13356_v8 = vpop.f32.mrb[80].mxu0 }
 0x37d   : > { %10443 = vrcp.f32 %v6241_v17  ;;  %v4577_v18 = vadd.f32 1.0, %v4321_v28  ;;  %v4705_v10 = vadd.f32 %v4193_v26, %v3681_v55  ;;  %v5857_v15 = vadd.f32 2.0, %v4321_v28 }
 0x37e   : > { %8287 = vst.msk [vmem:[%s11437_s29 + $0xf4] sm:$0xf] %vm8225_vm9, %v9173_v59  ;;  %v3044_v12 = vsub.f32 0.0, %v2788_v51  ;;  %v13337_v60 = vadd.f32 %v13333_v1, %v12948_v58  ;;  %v10436_v54 = vpop.eup %10435  ;;  %v6499_v47 = vmul.f32 %v4963_v56, %v13228_v34  ;;  %v5091_v57 = vsel %vm4067_vm13, %v4579_v45, %v4835_v31  ;;  %v13358_v56 = vpop.f32.mrb[80].mxu1 }
 0x37f   : > { %v5601_v16 = vadd.f32 %v5345_v35, %v4577_v18  ;;  %v13344_v55 = vadd.f32 %v13333_v1, %v12963_v14  ;;  %v7134_v7 = vmul.f32 %v10436_v54, %v6622_v19  ;;  %v6113_v46 = vadd.f32 %v5857_v15, %v3809_v24 }
 0x380   : > { %v10438_v26 = vpop.eup %10437  ;;  %v3495_v5 = vmul.f32 1.442695, %v3044_v12  ;;  %v13348_v58 = vadd.f32 %v13333_v1, %v12974_v42  ;;  %v4833_v30 = vadd.f32 %v4321_v28, %v3809_v24  ;;  %v2658_v34 = vand.u32 2147483647, %v13337_v60  ;;  %v15201_v28 = vld [vmem:[#allocation7_spill] sm:$0xff] }
 0x381   : > { %v7011_v0 = vmul.f32 %v10438_v26, %v6499_v47  ;;  %v2786_v45 = vand.u32 2147483647, %v13344_v55  ;;  %v9301_v52 = vpack.c.bf16 %v7134_v7, %v7134_v7  ;;  %v4961_v14 = vsel %vm3937_vm14, %v4449_v44, %v4705_v10  ;;  %v13377_v10 = vpop.f32.mrb[81].mxu0  ;;  %v13385_v26 = vpop.f32.mrb[81].mxu1 }
 0x382   : > { %v6369_v11 = vsel %vm4065_vm15, %v5601_v16, %v6113_v46  ;;  %10445 = vpow2.f32 %v3495_v5  ;;  %v2914_v63 = vsub.f32 0.0, %v2658_v34  ;;  %v6627_v31 = vmul.f32 %v5091_v57, %v13232_v61 }
 0x383   : > { %v9178_v42 = vpack.c.bf16 %v7011_v0, %v7011_v0  ;;  %10447 = vrcp.f32 %v6369_v11  ;;  %v3042_v22 = vsub.f32 0.0, %v2786_v45  ;;  %8415 = vst.msk [vmem:[%s11437_s29 + $0x2f4] sm:$0xf] %vm8225_vm9, %v9301_v52  ;;  %v2663_v24 = vand.u32 2147483647, %v13348_v58 }
 0x384   : > { %v13366_v44 = vadd.f32 %v13333_v1, %v15201_v28  ;;  %v13370_v59 = vadd.f32 %v13333_v1, %v12988_v4  ;;  %v6497_v51 = vmul.f32 %v4961_v14, %v13249_v49  ;;  %v5089_v19 = vsel %vm4065_vm15, %v4577_v18, %v4833_v30 }
 0x385   : > { %v10440_v17 = vpop.eup %10439  ;;  %8292 = vst.msk [vmem:[%s11437_s29 + $0x108] sm:$0xf] %vm8225_vm9, %v9178_v42  ;;  %v3235_v35 = vmul.f32 1.442695, %v2914_v63  ;;  %v3491_v61 = vmul.f32 1.442695, %v3042_v22  ;;  %v13382_v4 = vadd.f32 %v13333_v1, %v12994_v48  ;;  %v13389_v48 = vadd.f32 %v13333_v1, %v13023_v32 }
 0x386   : > { %v10442_v15 = vpop.eup %10441  ;;  %v7139_v12 = vmul.f32 %v10440_v17, %v6627_v31  ;;  %v2919_v54 = vsub.f32 0.0, %v2663_v24  ;;  %v2791_v47 = vand.u32 2147483647, %v13366_v44  ;;  %v2661_v18 = vand.u32 2147483647, %v13370_v59  ;;  %v13394_v63 = vpop.f32.mrb[82].mxu0 }
 0x387   : > { %v10444_v57 = vpop.eup %10443  ;;  %v3684_v16 = vmul.f32 %v10442_v15, %v10442_v15  ;;  %v4196_v49 = vmul.f32 2.0, %v10442_v15  ;;  %10449 = vpow2.f32 %v3235_v35  ;;  %vm3940_vm0 = vcmp.ge.f32.partialorder %v13288_v36, 0.0 }
 0x388   : > { %v9306_v7 = vpack.c.bf16 %v7139_v12, %v7139_v12  ;;  %v7009_v46 = vmul.f32 %v10444_v57, %v6497_v51  ;;  %10451 = vpow2.f32 %v3491_v61  ;;  %v3245_v5 = vmul.f32 1.442695, %v2919_v54  ;;  %v13403_v57 = vpop.f32.mrb[82].mxu1 }
 0x389   : > { %v4452_v0 = vadd.f32 1.0, %v4196_v49  ;;  %v5220_v30 = vmul.f32 2.0, %v3684_v16  ;;  %v5732_v34 = vadd.f32 2.0, %v4196_v49  ;;  %v3047_v52 = vsub.f32 0.0, %v2791_v47 }
 0x38a   : > { %8420 = vst.msk [vmem:[%s11437_s29 + $0x308] sm:$0xf] %vm8225_vm9, %v9306_v7  ;;  %v9176_v45 = vpack.c.bf16 %v7009_v46, %v7009_v46  ;;  %10453 = vpow2.f32 %v3245_v5  ;;  %v2917_v14 = vsub.f32 0.0, %v2661_v18  ;;  %v6625_v31 = vmul.f32 %v5089_v19, %v13268_v33 }
 0x38b   : > { %v5476_v11 = vadd.f32 %v5220_v30, %v4452_v0  ;;  %v5988_v42 = vadd.f32 %v5732_v34, %v3684_v16  ;;  %v4708_v24 = vadd.f32 %v4196_v49, %v3684_v16  ;;  %v3501_v32 = vmul.f32 1.442695, %v3047_v52 }
 0x38c   : > { %v10446_v22 = vpop.eup %10445  ;;  %8290 = vst.msk [vmem:[%s11437_s29 + $0x100] sm:$0xf] %vm8225_vm9, %v9176_v45  ;;  %v2789_v28 = vand.u32 2147483647, %v13382_v4  ;;  %v3241_v15 = vmul.f32 1.442695, %v2917_v14 }
 0x38d   : > { %v10448_v17 = vpop.eup %10447  ;;  %v6244_v51 = vsel %vm3940_vm0, %v5476_v11, %v5988_v42  ;;  %v3812_v35 = vmul.f32 %v10446_v22, %v10446_v22  ;;  %v4324_v61 = vmul.f32 2.0, %v10446_v22  ;;  %v2664_v47 = vand.u32 2147483647, %v13389_v48  ;;  %v13411_v11 = vpop.f32.mrb[83].mxu0 }
 0x38e   : > { %v7137_v12 = vmul.f32 %v10448_v17, %v6625_v31  ;;  %10455 = vrcp.f32 %v6244_v51  ;;  %v3045_v54 = vsub.f32 0.0, %v2789_v28  ;;  %vm4068_vm1 = vcmp.ge.f32.partialorder %v13300_v39, 0.0 }
 0x38f   : > { %v4580_v33 = vadd.f32 1.0, %v4324_v61  ;;  %v5348_v19 = vmul.f32 2.0, %v3812_v35  ;;  %v5860_v16 = vadd.f32 2.0, %v4324_v61  ;;  %10457 = vpow2.f32 %v3501_v32 }
 0x390   : > { %v9304_v49 = vpack.c.bf16 %v7137_v12, %v7137_v12  ;;  %v3497_v18 = vmul.f32 1.442695, %v3045_v54  ;;  %10459 = vpow2.f32 %v3241_v15  ;;  %v2920_v30 = vsub.f32 0.0, %v2664_v47 }
 0x391   : > { %v10450_v7 = vpop.eup %10449  ;;  %v5604_v46 = vadd.f32 %v5348_v19, %v4580_v33  ;;  %v6116_v5 = vadd.f32 %v5860_v16, %v3812_v35  ;;  %v4964_v45 = vsel %vm3940_vm0, %v4452_v0, %v4708_v24  ;;  %vm3938_vm2 = vcmp.ge.f32.partialorder %v13337_v60, 0.0 }
 0x392   : > { %v10452_v34 = vpop.eup %10451  ;;  %8418 = vst.msk [vmem:[%s11437_s29 + $0x300] sm:$0xf] %vm8225_vm9, %v9304_v49  ;;  %v3682_v52 = vmul.f32 %v10450_v7, %v10450_v7  ;;  %v4194_v14 = vmul.f32 2.0, %v10450_v7  ;;  %10461 = vpow2.f32 %v3497_v18  ;;  %v4836_v28 = vadd.f32 %v4324_v61, %v3812_v35 }
 0x393   : > { %v6372_v42 = vsel %vm4068_vm1, %v5604_v46, %v6116_v5  ;;  %v3810_v22 = vmul.f32 %v10452_v34, %v10452_v34  ;;  %v4322_v31 = vmul.f32 2.0, %v10452_v34  ;;  %v3247_v24 = vmul.f32 1.442695, %v2920_v30 }
 0x394   : > { %v10454_v32 = vpop.eup %10453  ;;  %10463 = vrcp.f32 %v6372_v42  ;;  %v4450_v17 = vadd.f32 1.0, %v4194_v14  ;;  %v5218_v51 = vmul.f32 2.0, %v3682_v52  ;;  %v5730_v15 = vadd.f32 2.0, %v4194_v14 }
 0x395   : > { %v4578_v12 = vadd.f32 1.0, %v4322_v31  ;;  %v5346_v0 = vmul.f32 2.0, %v3810_v22  ;;  %vm4066_vm3 = vcmp.ge.f32.partialorder %v13344_v55, 0.0  ;;  %v5858_v47 = vadd.f32 2.0, %v4322_v31 }
 0x396   : > { %v5474_v54 = vadd.f32 %v5218_v51, %v4450_v17  ;;  %v3687_v19 = vmul.f32 %v10454_v32, %v10454_v32  ;;  %v6500_v16 = vmul.f32 %v4964_v45, %v13288_v36  ;;  %v5986_v49 = vadd.f32 %v5730_v15, %v3682_v52 }
 0x397   : > { %v5602_v7 = vadd.f32 %v5346_v0, %v4578_v12  ;;  %vm3943_vm4 = vcmp.ge.f32.partialorder %v13348_v58, 0.0  ;;  %v5092_v35 = vsel %vm4068_vm1, %v4580_v33, %v4836_v28  ;;  %v6114_v61 = vadd.f32 %v5858_v47, %v3810_v22 }
 0x398   : > { %v10456_v18 = vpop.eup %10455  ;;  %v4199_v46 = vmul.f32 2.0, %v10454_v32  ;;  %v5223_v5 = vmul.f32 2.0, %v3687_v19  ;;  %v4706_v30 = vadd.f32 %v4194_v14, %v3682_v52  ;;  %v6242_v42 = vsel %vm3938_vm2, %v5474_v54, %v5986_v49 }
 0x399   : > { %v7012_v34 = vmul.f32 %v10456_v18, %v6500_v16  ;;  %vm4071_vm5 = vcmp.ge.f32.partialorder %v13366_v44, 0.0  ;;  %10465 = vpow2.f32 %v3247_v24  ;;  %v10458_v36 = vpop.eup %10457  ;;  %v4834_v45 = vadd.f32 %v4322_v31, %v3810_v22 }
 0x39a   : > { %10467 = vrcp.f32 %v6242_v42  ;;  %v6370_v51 = vsel %vm4066_vm3, %v5602_v7, %v6114_v61  ;;  %v4455_v15 = vadd.f32 1.0, %v4199_v46  ;;  %v10460_v33 = vpop.eup %10459  ;;  %v5735_v32 = vadd.f32 2.0, %v4199_v46 }
 0x39b   : > { %v9179_v28 = vpack.c.bf16 %v7012_v34, %v7012_v34  ;;  %10469 = vrcp.f32 %v6370_v51  ;;  %v3815_v0 = vmul.f32 %v10458_v36, %v10458_v36  ;;  %v6628_v52 = vmul.f32 %v5092_v35, %v13300_v39 }
 0x39c   : > { %v5479_v14 = vadd.f32 %v5223_v5, %v4455_v15  ;;  %v4327_v54 = vmul.f32 2.0, %v10458_v36  ;;  %v3685_v47 = vmul.f32 %v10460_v33, %v10460_v33  ;;  %v10462_v16 = vpop.eup %10461  ;;  %v4962_v22 = vsel %vm3938_vm2, %v4450_v17, %v4706_v30 }
 0x39d   : > { %8293 = vst.msk [vmem:[%s11437_s29 + $0x10c] sm:$0xf] %vm8225_vm9, %v9179_v28  ;;  %v5991_v31 = vadd.f32 %v5735_v32, %v3687_v19  ;;  %v5351_v24 = vmul.f32 2.0, %v3815_v0  ;;  %v4197_v49 = vmul.f32 2.0, %v10460_v33  ;;  %v5090_v18 = vsel %vm4066_vm3, %v4578_v12, %v4834_v45 }
 0x39e   : > { %v10464_v7 = vpop.eup %10463  ;;  %v4583_v61 = vadd.f32 1.0, %v4327_v54  ;;  %v5863_v34 = vadd.f32 2.0, %v4327_v54  ;;  %v5221_v42 = vmul.f32 2.0, %v3685_v47  ;;  %v4711_v35 = vadd.f32 %v4199_v46, %v3687_v19 }
 0x39f   : > { %v7140_v39 = vmul.f32 %v10464_v7, %v6628_v52  ;;  %v6247_v5 = vsel %vm3943_vm4, %v5479_v14, %v5991_v31  ;;  %v4453_v36 = vadd.f32 1.0, %v4197_v49  ;;  %vm3941_vm6 = vcmp.ge.f32.partialorder %v13370_v59, 0.0  ;;  %v13440_v52 = vpop.f32.mrb[83].mxu1 }
 0x3a0   : > { %10471 = vrcp.f32 %v6247_v5  ;;  %v5607_v51 = vadd.f32 %v5351_v24, %v4583_v61  ;;  %v6119_v17 = vadd.f32 %v5863_v34, %v3815_v0  ;;  %v6498_v33 = vmul.f32 %v4962_v22, %v13337_v60 }
 0x3a1   : > { %v9307_v30 = vpack.c.bf16 %v7140_v39, %v7140_v39  ;;  %v6626_v12 = vmul.f32 %v5090_v18, %v13344_v55  ;;  %v4839_v45 = vadd.f32 %v4327_v54, %v3815_v0  ;;  %vm4069_vm7 = vcmp.ge.f32.partialorder %v13382_v4, 0.0 }
 0x3a2   : > { %v6375_v19 = vsel %vm4071_vm5, %v5607_v51, %v6119_v17  ;;  %v5477_v46 = vadd.f32 %v5221_v42, %v4453_v36  ;;  %v5733_v28 = vadd.f32 2.0, %v4197_v49  ;;  %v3813_v32 = vmul.f32 %v10462_v16, %v10462_v16 }
 0x3a3   : > { %v10466_v14 = vpop.eup %10465  ;;  %8421 = vst.msk [vmem:[%s11437_s29 + $0x30c] sm:$0xf] %vm8225_vm9, %v9307_v30  ;;  %v4967_v31 = vsel %vm3943_vm4, %v4455_v15, %v4711_v35  ;;  %10473 = vrcp.f32 %v6375_v19  ;;  %v4709_v60 = vadd.f32 %v4197_v49, %v3685_v47  ;;  %v4325_v55 = vmul.f32 2.0, %v10462_v16 }
 0x3a4   : > { %v10468_v0 = vpop.eup %10467  ;;  %v5989_v54 = vadd.f32 %v5733_v28, %v3685_v47  ;;  %v5349_v22 = vmul.f32 2.0, %v3813_v32  ;;  %v4200_v24 = vmul.f32 2.0, %v10466_v14  ;;  %v13448_v7 = vadd.f32 %v13333_v1, %v13035_v40 }
 0x3a5   : > { %v10470_v18 = vpop.eup %10469  ;;  %v7010_v34 = vmul.f32 %v10468_v0, %v6498_v33  ;;  %v4581_v42 = vadd.f32 1.0, %v4325_v55  ;;  %v5861_v39 = vadd.f32 2.0, %v4325_v55  ;;  %v3688_v5 = vmul.f32 %v10466_v14, %v10466_v14  ;;  %v13475_v0 = vpop.f32.mrb[84].mxu1 }
 0x3a6   : > { %v7138_v51 = vmul.f32 %v10470_v18, %v6626_v12  ;;  %v5095_v15 = vsel %vm4071_vm5, %v4583_v61, %v4839_v45  ;;  %v6245_v16 = vsel %vm3941_vm6, %v5477_v46, %v5989_v54  ;;  %v13456_v47 = vadd.f32 %v13333_v1, %v13075_v3 }
 0x3a7   : > { %v9177_v40 = vpack.c.bf16 %v7010_v34, %v7010_v34  ;;  %10475 = vrcp.f32 %v6245_v16  ;;  %v5605_v49 = vadd.f32 %v5349_v22, %v4581_v42  ;;  %v13458_v35 = vadd.f32 1.0, %v4200_v24 }
 0x3a8   : > { %v9305_v17 = vpack.c.bf16 %v7138_v51, %v7138_v51  ;;  %v6503_v30 = vmul.f32 %v4967_v31, %v13348_v58  ;;  %v6117_v33 = vadd.f32 %v5861_v39, %v3813_v32  ;;  %vm3944_vm8 = vcmp.ge.f32.partialorder %v13389_v48, 0.0  ;;  %v13473_v31 = vpop.f32.mrb[84].mxu0 }
 0x3a9   : > { %8291 = vst.msk [vmem:[%s11437_s29 + $0x104] sm:$0xf] %vm8225_vm9, %v9177_v40  ;;  %v6631_v61 = vmul.f32 %v5095_v15, %v13366_v44  ;;  %v5224_v12 = vmul.f32 2.0, %v3688_v5  ;;  %v5736_v45 = vadd.f32 2.0, %v4200_v24  ;;  %v2792_v3 = vand.u32 2147483647, %v13448_v7 }
 0x3aa   : > { %v10472_v19 = vpop.eup %10471  ;;  %8419 = vst.msk [vmem:[%s11437_s29 + $0x304] sm:$0xf] %vm8225_vm9, %v9305_v17  ;;  %v4965_v46 = vsel %vm3941_vm6, %v4453_v36, %v4709_v60  ;;  %v4837_v28 = vadd.f32 %v4325_v55, %v3813_v32  ;;  %v6373_v58 = vsel %vm4069_vm7, %v5605_v49, %v6117_v33  ;;  %v2662_v14 = vand.u32 2147483647, %v13456_v47  ;;  %v13496_v16 = vpop.f32.mrb[85].mxu0 }
 0x3ab   : > { %v7015_v44 = vmul.f32 %v10472_v19, %v6503_v30  ;;  %10477 = vrcp.f32 %v6373_v58  ;;  %v5480_v54 = vadd.f32 %v5224_v12, %v13458_v35  ;;  %v5992_v22 = vadd.f32 %v5736_v45, %v3688_v5  ;;  %v13506_v12 = vpop.f32.mrb[85].mxu1 }
 0x3ac   : > { %v3048_v18 = vsub.f32 0.0, %v2792_v3  ;;  %v2918_v34 = vsub.f32 0.0, %v2662_v14  ;;  %v13480_v36 = vadd.f32 %v13333_v1, %v13077_v23  ;;  %v13484_v32 = vadd.f32 %v13333_v1, %v13115_v9 }
 0x3ad   : > { %v10474_v60 = vpop.eup %10473  ;;  %v9182_v55 = vpack.c.bf16 %v7015_v44, %v7015_v44  ;;  %v6248_v39 = vsel %vm3944_vm8, %v5480_v54, %v5992_v22  ;;  %v13490_v51 = vadd.f32 %v13333_v1, %v13117_v21  ;;  %v13494_v15 = vadd.f32 %v13333_v1, %v13130_v29  ;;  %v13520_v54 = vpop.f32.mrb[86].mxu0 }
 0x3ae   : > { %v7143_v23 = vmul.f32 %v10474_v60, %v6631_v61  ;;  %10479 = vrcp.f32 %v6248_v39  ;;  %v3503_v40 = vmul.f32 1.442695, %v3048_v18  ;;  %v3243_v9 = vmul.f32 1.442695, %v2918_v34  ;;  %15202 = vst [vmem:[#allocation8_spill] sm:$0xff] %v13520_v54 }
 0x3af   : > { %8296 = vst.msk [vmem:[%s11437_s29 + $0x118] sm:$0xf] %vm8225_vm9, %v9182_v55  ;;  %v6501_v49 = vmul.f32 %v4965_v46, %v13370_v59  ;;  %v5093_v17 = vsel %vm4069_vm7, %v4581_v42, %v4837_v28  ;;  %v2790_v21 = vand.u32 2147483647, %v13480_v36  ;;  %v2667_v30 = vand.u32 2147483647, %v13484_v32 }
 0x3b0   : > { %v9310_v29 = vpack.c.bf16 %v7143_v23, %v7143_v23  ;;  %v4712_v33 = vadd.f32 %v4200_v24, %v3688_v5  ;;  %10481 = vpow2.f32 %v3503_v40  ;;  %v2795_v61 = vand.u32 2147483647, %v13490_v51  ;;  %v13533_v23 = vpop.f32.mrb[86].mxu1 }
 0x3b1   : > { %v10476_v45 = vpop.eup %10475  ;;  %10483 = vpow2.f32 %v3243_v9  ;;  %v3046_v3 = vsub.f32 0.0, %v2790_v21  ;;  %v2923_v19 = vsub.f32 0.0, %v2667_v30  ;;  %v2665_v59 = vand.u32 2147483647, %v13494_v15  ;;  %15203 = vst [vmem:[#allocation9_spill] sm:$0xff] %v13533_v23 }
 0x3b2   : > { %8424 = vst.msk [vmem:[%s11437_s29 + $0x318] sm:$0xf] %vm8225_vm9, %v9310_v29  ;;  %v7013_v42 = vmul.f32 %v10476_v45, %v6501_v49  ;;  %v6629_v46 = vmul.f32 %v5093_v17, %v13382_v4  ;;  %v3051_v28 = vsub.f32 0.0, %v2795_v61  ;;  %v13514_v24 = vadd.f32 %v13333_v1, %v13132_v6 }
 0x3b3   : > { %v3499_v5 = vmul.f32 1.442695, %v3046_v3  ;;  %v3253_v58 = vmul.f32 1.442695, %v2923_v19  ;;  %v2921_v14 = vsub.f32 0.0, %v2665_v59  ;;  %v13518_v44 = vadd.f32 %v13333_v1, %v13148_v2 }
 0x3b4   : > { %v9180_v22 = vpack.c.bf16 %v7013_v42, %v7013_v42  ;;  %v4968_v18 = vsel %vm3944_vm8, %v13458_v35, %v4712_v33  ;;  %v3509_v4 = vmul.f32 1.442695, %v3051_v28  ;;  %v2793_v34 = vand.u32 2147483647, %v13514_v24  ;;  %v13545_v33 = vpop.f32.mrb[87].mxu0 }
 0x3b5   : > { %v10478_v60 = vpop.eup %10477  ;;  %10485 = vpow2.f32 %v3499_v5  ;;  %v2668_v6 = vand.u32 2147483647, %v13518_v44  ;;  %v13531_v39 = vadd.f32 %v13333_v1, %v13157_v41  ;;  %v6504_v35 = vmul.f32 %v4968_v18, %v13389_v48  ;;  %15204 = vst [vmem:[#allocation2_spill] sm:$0xff] %v13545_v33 }
 0x3b6   : > { %8294 = vst.msk [vmem:[%s11437_s29 + $0x110] sm:$0xf] %vm8225_vm9, %v9180_v22  ;;  %v7141_v55 = vmul.f32 %v10478_v60, %v6629_v46  ;;  %10487 = vpow2.f32 %v3253_v58  ;;  %v3049_v2 = vsub.f32 0.0, %v2793_v34  ;;  %v3249_v40 = vmul.f32 1.442695, %v2921_v14 }
 0x3b7   : > { %10489 = vpow2.f32 %v3509_v4  ;;  %v2924_v17 = vsub.f32 0.0, %v2668_v6  ;;  %v2796_v21 = vand.u32 2147483647, %v13531_v39  ;;  %vm4072_vm10 = vcmp.ge.f32.partialorder %v13448_v7, 0.0 }
 0x3b8   : > { %v10480_v9 = vpop.eup %10479  ;;  %v9308_v49 = vpack.c.bf16 %v7141_v55, %v7141_v55  ;;  %vm3942_vm11 = vcmp.ge.f32.partialorder %v13456_v47, 0.0  ;;  %v3505_v41 = vmul.f32 1.442695, %v3049_v2  ;;  %v13543_v48 = vadd.f32 %v13333_v1, %v13170_v25 }
 0x3b9   : > { %v7016_v30 = vmul.f32 %v10480_v9, %v6504_v35  ;;  %10491 = vpow2.f32 %v3249_v40  ;;  %v3255_v46 = vmul.f32 1.442695, %v2924_v17  ;;  %v3052_v28 = vsub.f32 0.0, %v2796_v21 }
 0x3ba   : > { %v10482_v29 = vpop.eup %10481  ;;  %8422 = vst.msk [vmem:[%s11437_s29 + $0x310] sm:$0xf] %vm8225_vm9, %v9308_v49  ;;  %v13551_v25 = vadd.f32 %v13333_v1, %v13194_v13  ;;  %10493 = vpow2.f32 %v3505_v41  ;;  %vm4070_vm12 = vcmp.ge.f32.partialorder %v13480_v36, 0.0  ;;  %v2666_v2 = vand.u32 2147483647, %v13543_v48 }
 0x3bb   : > { %v10484_v61 = vpop.eup %10483  ;;  %v9183_v45 = vpack.c.bf16 %v7016_v30, %v7016_v30  ;;  %v3816_v3 = vmul.f32 %v10482_v29, %v10482_v29  ;;  %v4328_v19 = vmul.f32 2.0, %v10482_v29  ;;  %vm3947_vm13 = vcmp.ge.f32.partialorder %v13484_v32, 0.0 }
 0x3bc   : > { %v3686_v59 = vmul.f32 %v10484_v61, %v10484_v61  ;;  %v4198_v42 = vmul.f32 2.0, %v10484_v61  ;;  %10495 = vpow2.f32 %v3255_v46  ;;  %v3511_v13 = vmul.f32 1.442695, %v3052_v28 }
 0x3bd   : > { %8297 = vst.msk [vmem:[%s11437_s29 + $0x11c] sm:$0xf] %vm8225_vm9, %v9183_v45  ;;  %v4584_v5 = vadd.f32 1.0, %v4328_v19  ;;  %v5352_v58 = vmul.f32 2.0, %v3816_v3  ;;  %v5864_v14 = vadd.f32 2.0, %v4328_v19  ;;  %v4840_v60 = vadd.f32 %v4328_v19, %v3816_v3 }
 0x3be   : > { %v4454_v22 = vadd.f32 1.0, %v4198_v42  ;;  %v5222_v18 = vmul.f32 2.0, %v3686_v59  ;;  %v5734_v4 = vadd.f32 2.0, %v4198_v42  ;;  %v4710_v17 = vadd.f32 %v4198_v42, %v3686_v59 }
 0x3bf   : > { %v10486_v34 = vpop.eup %10485  ;;  %v5608_v6 = vadd.f32 %v5352_v58, %v4584_v5  ;;  %v6120_v55 = vadd.f32 %v5864_v14, %v3816_v3  ;;  %v5096_v3 = vsel %vm4072_vm10, %v4584_v5, %v4840_v60  ;;  %vm4075_vm14 = vcmp.ge.f32.partialorder %v13490_v51, 0.0 }
 0x3c0   : > { %v10488_v35 = vpop.eup %10487  ;;  %v5478_v40 = vadd.f32 %v5222_v18, %v4454_v22  ;;  %v5990_v9 = vadd.f32 %v5734_v4, %v3686_v59  ;;  %v3814_v21 = vmul.f32 %v10486_v34, %v10486_v34  ;;  %v4326_v30 = vmul.f32 2.0, %v10486_v34 }
 0x3c1   : > { %v6376_v49 = vsel %vm4072_vm10, %v5608_v6, %v6120_v55  ;;  %v10490_v29 = vpop.eup %10489  ;;  %v3691_v61 = vmul.f32 %v10488_v35, %v10488_v35  ;;  %v4203_v45 = vmul.f32 2.0, %v10488_v35  ;;  %v13563_v6 = vpop.f32.mrb[87].mxu1  ;;  %v6632_v55 = vmul.f32 %v5096_v3, %v13448_v7 }
 0x3c2   : > { %10497 = vrcp.f32 %v6376_v49  ;;  %v6246_v41 = vsel %vm3942_vm11, %v5478_v40, %v5990_v9  ;;  %v4582_v19 = vadd.f32 1.0, %v4326_v30  ;;  %v5350_v46 = vmul.f32 2.0, %v3814_v21  ;;  %15205 = vst [vmem:[#allocation3_spill] sm:$0xff] %v13563_v6 }
 0x3c3   : > { %10499 = vrcp.f32 %v6246_v41  ;;  %v5862_v28 = vadd.f32 2.0, %v4326_v30  ;;  %v4459_v58 = vadd.f32 1.0, %v4203_v45  ;;  %v5227_v14 = vmul.f32 2.0, %v3691_v61  ;;  %v10492_v59 = vpop.eup %10491 }
 0x3c4   : > { %10501 = vpow2.f32 %v3511_v13  ;;  %v4838_v42 = vadd.f32 %v4326_v30, %v3814_v21  ;;  %v5606_v18 = vadd.f32 %v5350_v46, %v4582_v19  ;;  %v5739_v4 = vadd.f32 2.0, %v4203_v45  ;;  %v10494_v30 = vpop.eup %10493 }
 0x3c5   : > { %v3819_v34 = vmul.f32 %v10490_v29, %v10490_v29  ;;  %v6118_v35 = vadd.f32 %v5862_v28, %v3814_v21  ;;  %v5483_v5 = vadd.f32 %v5227_v14, %v4459_v58  ;;  %vm3945_vm15 = vcmp.ge.f32.partialorder %v13494_v15, 0.0 }
 0x3c6   : > { %v13567_v60 = vsub.f32 0.0, %v2666_v2  ;;  %v4966_v40 = vsel %vm3942_vm11, %v4454_v22, %v4710_v17  ;;  %v5995_v9 = vadd.f32 %v5739_v4, %v3691_v61  ;;  %v4331_v13 = vmul.f32 2.0, %v10490_v29  ;;  %v10496_v3 = vpop.eup %10495 }
 0x3c7   : > { %v5355_v49 = vmul.f32 2.0, %v3819_v34  ;;  %v6374_v41 = vsel %vm4070_vm12, %v5606_v18, %v6118_v35  ;;  %v4715_v46 = vadd.f32 %v4203_v45, %v3691_v61  ;;  %v3689_v6 = vmul.f32 %v10492_v59, %v10492_v59 }
 0x3c8   : > { %v4201_v33 = vmul.f32 2.0, %v10492_v59  ;;  %v5094_v7 = vsel %vm4070_vm12, %v4582_v19, %v4838_v42  ;;  %10503 = vrcp.f32 %v6374_v41  ;;  %v6251_v2 = vsel %vm3947_vm13, %v5483_v5, %v5995_v9 }
 0x3c9   : > { %v4587_v21 = vadd.f32 1.0, %v4331_v13  ;;  %v6502_v22 = vmul.f32 %v4966_v40, %v13456_v47  ;;  %10505 = vrcp.f32 %v6251_v2  ;;  %v5867_v17 = vadd.f32 2.0, %v4331_v13 }
 0x3ca   : > { %v4457_v29 = vadd.f32 1.0, %v4201_v33  ;;  %v5225_v14 = vmul.f32 2.0, %v3689_v6  ;;  %v5737_v18 = vadd.f32 2.0, %v4201_v33  ;;  %v3817_v61 = vmul.f32 %v10494_v30, %v10494_v30 }
 0x3cb   : > { %v5611_v28 = vadd.f32 %v5355_v49, %v4587_v21  ;;  %vm4073_vm0 = vcmp.ge.f32.partialorder %v13514_v24, 0.0  ;;  %v6630_v19 = vmul.f32 %v5094_v7, %v13480_v36  ;;  %v4971_v59 = vsel %vm3947_vm13, %v4459_v58, %v4715_v46 }
 0x3cc   : > { %v10498_v45 = vpop.eup %10497  ;;  %v6123_v42 = vadd.f32 %v5867_v17, %v3819_v34  ;;  %v4329_v4 = vmul.f32 2.0, %v10494_v30  ;;  %v4843_v47 = vadd.f32 %v4331_v13, %v3819_v34  ;;  %v5481_v40 = vadd.f32 %v5225_v14, %v4457_v29  ;;  %v13597_v14 = vpop.f32.mrb[88].mxu0 }
 0x3cd   : > { %v10500_v35 = vpop.eup %10499  ;;  %v7144_v5 = vmul.f32 %v10498_v45, %v6632_v55  ;;  %v5993_v9 = vadd.f32 %v5737_v18, %v3689_v6  ;;  %v4713_v23 = vadd.f32 %v4201_v33, %v3689_v6  ;;  %v5353_v30 = vmul.f32 2.0, %v3817_v61  ;;  %v13599_v18 = vpop.f32.mrb[88].mxu1 }
 0x3ce   : > { %v10502_v49 = vpop.eup %10501  ;;  %v7014_v41 = vmul.f32 %v10500_v35, %v6502_v22  ;;  %v6379_v2 = vsel %vm4075_vm14, %v5611_v28, %v6123_v42  ;;  %v4585_v54 = vadd.f32 1.0, %v4329_v4  ;;  %vm3948_vm1 = vcmp.ge.f32.partialorder %v13518_v44, 0.0 }
 0x3cf   : > { %v9311_v36 = vpack.c.bf16 %v7144_v5, %v7144_v5  ;;  %10507 = vrcp.f32 %v6379_v2  ;;  %v6249_v58 = vsel %vm3945_vm15, %v5481_v40, %v5993_v9  ;;  %v6507_v55 = vmul.f32 %v4971_v59, %v13484_v32  ;;  %v13605_v9 = vpop.f32.mrb[89].mxu0 }
 0x3d0   : > { %v9181_v34 = vpack.c.bf16 %v7014_v41, %v7014_v41  ;;  %10509 = vrcp.f32 %v6249_v58  ;;  %v5865_v13 = vadd.f32 2.0, %v4329_v4  ;;  %v5099_v33 = vsel %vm4075_vm14, %v4587_v21, %v4843_v47 }
 0x3d1   : > { %8425 = vst.msk [vmem:[%s11437_s29 + $0x31c] sm:$0xf] %vm8225_vm9, %v9311_v36  ;;  %v5609_v6 = vadd.f32 %v5353_v30, %v4585_v54  ;;  %v3692_v46 = vmul.f32 %v10496_v3, %v10496_v3  ;;  %v4204_v7 = vmul.f32 2.0, %v10496_v3  ;;  %v4969_v22 = vsel %vm3945_vm15, %v4457_v29, %v4713_v23 }
 0x3d2   : > { %8295 = vst.msk [vmem:[%s11437_s29 + $0x114] sm:$0xf] %vm8225_vm9, %v9181_v34  ;;  %v4841_v17 = vadd.f32 %v4329_v4, %v3817_v61  ;;  %v6121_v28 = vadd.f32 %v5865_v13, %v3817_v61  ;;  %vm4076_vm2 = vcmp.ge.f32.partialorder %v13531_v39, 0.0  ;;  %v4332_v32 = vmul.f32 2.0, %v10502_v49  ;;  %v10504_v45 = vpop.eup %10503  ;;  %v13611_v34 = vpop.f32.mrb[89].mxu1 }
 0x3d3   : > { %v4460_v59 = vadd.f32 1.0, %v4204_v7  ;;  %v5228_v21 = vmul.f32 2.0, %v3692_v46  ;;  %v5740_v42 = vadd.f32 2.0, %v4204_v7  ;;  %v3820_v35 = vmul.f32 %v10502_v49, %v10502_v49  ;;  %v10506_v3 = vpop.eup %10505 }
 0x3d4   : > { %v7142_v5 = vmul.f32 %v10504_v45, %v6630_v19  ;;  %v6377_v47 = vsel %vm4073_vm0, %v5609_v6, %v6121_v28  ;;  %v3251_v23 = vmul.f32 1.442695, %v13567_v60  ;;  %v2794_v29 = vand.u32 2147483647, %v13551_v25 }
 0x3d5   : > { %v7019_v61 = vmul.f32 %v10506_v3, %v6507_v55  ;;  %10511 = vrcp.f32 %v6377_v47  ;;  %v5484_v4 = vadd.f32 %v5228_v21, %v4460_v59  ;;  %v4588_v40 = vadd.f32 1.0, %v4332_v32  ;;  %v13637_v47 = vpop.f32.mrb[90].mxu0 }
 0x3d6   : > { %v9309_v41 = vpack.c.bf16 %v7142_v5, %v7142_v5  ;;  %v6635_v49 = vmul.f32 %v5099_v33, %v13490_v51  ;;  %v6505_v19 = vmul.f32 %v4969_v22, %v13494_v15  ;;  %v5996_v2 = vadd.f32 %v5740_v42, %v3692_v46 }
 0x3d7   : > { %v9186_v36 = vpack.c.bf16 %v7019_v61, %v7019_v61  ;;  %v5097_v60 = vsel %vm4073_vm0, %v4585_v54, %v4841_v17  ;;  %v5356_v58 = vmul.f32 2.0, %v3820_v35  ;;  %v5868_v30 = vadd.f32 2.0, %v4332_v32 }
 0x3d8   : > { %8423 = vst.msk [vmem:[%s11437_s29 + $0x314] sm:$0xf] %vm8225_vm9, %v9309_v41  ;;  %v4716_v55 = vadd.f32 %v4204_v7, %v3692_v46  ;;  %v6252_v13 = vsel %vm3948_vm1, %v5484_v4, %v5996_v2  ;;  %10513 = vpow2.f32 %v3251_v23  ;;  %v3050_v6 = vsub.f32 0.0, %v2794_v29  ;;  %v13651_v4 = vpop.f32.mrb[90].mxu1 }
 0x3d9   : > { %v10508_v51 = vpop.eup %10507  ;;  %8300 = vst.msk [vmem:[%s11437_s29 + $0x128] sm:$0xf] %vm8225_vm9, %v9186_v36  ;;  %10515 = vrcp.f32 %v6252_v13  ;;  %v5612_v15 = vadd.f32 %v5356_v58, %v4588_v40  ;;  %v6124_v33 = vadd.f32 %v5868_v30, %v3820_v35  ;;  %v13621_v54 = vadd.f32 %v13333_v1, %v13234_v27 }
 0x3da   : > { %v10510_v22 = vpop.eup %10509  ;;  %v7147_v17 = vmul.f32 %v10508_v51, %v6635_v49  ;;  %v3507_v28 = vmul.f32 1.442695, %v3050_v6  ;;  %v13625_v46 = vadd.f32 %v13333_v1, %v13236_v43  ;;  %v13629_v7 = vadd.f32 %v13333_v1, %v13251_v62  ;;  %v13665_v51 = vpop.f32.mrb[91].mxu0 }
 0x3db   : > { %v7017_v45 = vmul.f32 %v10510_v22, %v6505_v19  ;;  %v4844_v21 = vadd.f32 %v4332_v32, %v3820_v35  ;;  %v6380_v42 = vsel %vm4076_vm2, %v5612_v15, %v6124_v33  ;;  %v2671_v27 = vand.u32 2147483647, %v13621_v54 }
 0x3dc   : > { %v9314_v3 = vpack.c.bf16 %v7147_v17, %v7147_v17  ;;  %v4972_v5 = vsel %vm3948_vm1, %v4460_v59, %v4716_v55  ;;  %10517 = vrcp.f32 %v6380_v42  ;;  %v2799_v43 = vand.u32 2147483647, %v13625_v46 }
 0x3dd   : > { %v9184_v23 = vpack.c.bf16 %v7017_v45, %v7017_v45  ;;  %10519 = vpow2.f32 %v3507_v28  ;;  %v2927_v62 = vsub.f32 0.0, %v2671_v27  ;;  %v2669_v32 = vand.u32 2147483647, %v13629_v7 }
 0x3de   : > { %8428 = vst.msk [vmem:[%s11437_s29 + $0x328] sm:$0xf] %vm8225_vm9, %v9314_v3  ;;  %v6633_v35 = vmul.f32 %v5097_v60, %v13514_v24  ;;  %v3055_v29 = vsub.f32 0.0, %v2799_v43  ;;  %v13645_v61 = vadd.f32 %v13333_v1, %v13253_v37  ;;  %v13649_v59 = vadd.f32 %v13333_v1, %v13262_v20 }
 0x3df   : > { %v10512_v41 = vpop.eup %10511  ;;  %8298 = vst.msk [vmem:[%s11437_s29 + $0x120] sm:$0xf] %vm8225_vm9, %v9184_v23  ;;  %v3261_v49 = vmul.f32 1.442695, %v2927_v62  ;;  %v2925_v19 = vsub.f32 0.0, %v2669_v32  ;;  %v13657_v2 = vadd.f32 %v13333_v1, %v13273_v53  ;;  %v6508_v36 = vmul.f32 %v4972_v5, %v13518_v44 }
 0x3e0   : > { %v7145_v24 = vmul.f32 %v10512_v41, %v6633_v35  ;;  %v3517_v37 = vmul.f32 1.442695, %v3055_v29  ;;  %v2797_v60 = vand.u32 2147483647, %v13645_v61  ;;  %v5100_v20 = vsel %vm4076_vm2, %v4588_v40, %v4844_v21 }
 0x3e1   : > { %10521 = vpow2.f32 %v3261_v49  ;;  %v3257_v58 = vmul.f32 1.442695, %v2925_v19  ;;  %v2672_v30 = vand.u32 2147483647, %v13649_v59  ;;  %v2800_v53 = vand.u32 2147483647, %v13657_v2 }
 0x3e2   : > { %v10514_v55 = vpop.eup %10513  ;;  %v9312_v13 = vpack.c.bf16 %v7145_v24, %v7145_v24  ;;  %10523 = vpow2.f32 %v3517_v37  ;;  %v3053_v6 = vsub.f32 0.0, %v2797_v60  ;;  %v6636_v40 = vmul.f32 %v5100_v20, %v13531_v39 }
 0x3e3   : > { %v10516_v44 = vpop.eup %10515  ;;  %v3690_v15 = vmul.f32 %v10514_v55, %v10514_v55  ;;  %v4202_v33 = vmul.f32 2.0, %v10514_v55  ;;  %v2928_v22 = vsub.f32 0.0, %v2672_v30  ;;  %v3056_v45 = vsub.f32 0.0, %v2800_v53  ;;  %v13682_v53 = vpop.f32.mrb[91].mxu1 }
 0x3e4   : > { %8426 = vst.msk [vmem:[%s11437_s29 + $0x320] sm:$0xf] %vm8225_vm9, %v9312_v13  ;;  %v7020_v17 = vmul.f32 %v10516_v44, %v6508_v36  ;;  %v3513_v28 = vmul.f32 1.442695, %v3053_v6  ;;  %10525 = vpow2.f32 %v3257_v58  ;;  %vm3946_vm3 = vcmp.ge.f32.partialorder %v13543_v48, 0.0 }
 0x3e5   : > { %v4458_v21 = vadd.f32 1.0, %v4202_v33  ;;  %v5226_v42 = vmul.f32 2.0, %v3690_v15  ;;  %v5738_v27 = vadd.f32 2.0, %v4202_v33  ;;  %v4714_v43 = vadd.f32 %v4202_v33, %v3690_v15 }
 0x3e6   : > { %v10518_v3 = vpop.eup %10517  ;;  %v9187_v5 = vpack.c.bf16 %v7020_v17, %v7020_v17  ;;  %10527 = vpow2.f32 %v3513_v28  ;;  %v3263_v23 = vmul.f32 1.442695, %v2928_v22  ;;  %v3519_v41 = vmul.f32 1.442695, %v3056_v45 }
 0x3e7   : > { %v10520_v62 = vpop.eup %10519  ;;  %v7148_v32 = vmul.f32 %v10518_v3, %v6636_v40  ;;  %v5482_v35 = vadd.f32 %v5226_v42, %v4458_v21  ;;  %v5994_v29 = vadd.f32 %v5738_v27, %v3690_v15  ;;  %v13675_v19 = vadd.f32 %v13333_v1, %v13281_v50 }
 0x3e8   : > { %8301 = vst.msk [vmem:[%s11437_s29 + $0x12c] sm:$0xf] %vm8225_vm9, %v9187_v5  ;;  %v3818_v39 = vmul.f32 %v10520_v62, %v10520_v62  ;;  %v4330_v49 = vmul.f32 2.0, %v10520_v62  ;;  %10529 = vpow2.f32 %v3263_v23  ;;  %vm4074_vm4 = vcmp.ge.f32.partialorder %v13551_v25, 0.0 }
 0x3e9   : > { %v9315_v24 = vpack.c.bf16 %v7148_v32, %v7148_v32  ;;  %v6250_v36 = vsel %vm3946_vm3, %v5482_v35, %v5994_v29  ;;  %v4970_v58 = vsel %vm3946_vm3, %v4458_v21, %v4714_v43  ;;  %vm3951_vm5 = vcmp.ge.f32.partialorder %v13621_v54, 0.0 }
 0x3ea   : > { %10531 = vrcp.f32 %v6250_v36  ;;  %v4586_v37 = vadd.f32 1.0, %v4330_v49  ;;  %v5354_v60 = vmul.f32 2.0, %v3818_v39  ;;  %v5866_v30 = vadd.f32 2.0, %v4330_v49 }
 0x3eb   : > { %v10522_v20 = vpop.eup %10521  ;;  %8429 = vst.msk [vmem:[%s11437_s29 + $0x32c] sm:$0xf] %vm8225_vm9, %v9315_v24  ;;  %10533 = vpow2.f32 %v3519_v41  ;;  %v2670_v6 = vand.u32 2147483647, %v13675_v19  ;;  %v4842_v44 = vadd.f32 %v4330_v49, %v3818_v39  ;;  %vm4079_vm6 = vcmp.ge.f32.partialorder %v13625_v46, 0.0 }
 0x3ec   : > { %v10524_v55 = vpop.eup %10523  ;;  %v5610_v13 = vadd.f32 %v5354_v60, %v4586_v37  ;;  %v3695_v50 = vmul.f32 %v10522_v20, %v10522_v20  ;;  %v4207_v1 = vmul.f32 2.0, %v10522_v20  ;;  %v6122_v15 = vadd.f32 %v5866_v30, %v3818_v39 }
 0x3ed   : > { %v3823_v33 = vmul.f32 %v10524_v55, %v10524_v55  ;;  %v4335_v22 = vmul.f32 2.0, %v10524_v55  ;;  %v6506_v21 = vmul.f32 %v4970_v58, %v13543_v48  ;;  %vm3949_vm7 = vcmp.ge.f32.partialorder %v13629_v7, 0.0 }
 0x3ee   : > { %v4463_v17 = vadd.f32 1.0, %v4207_v1  ;;  %v5231_v40 = vmul.f32 2.0, %v3695_v50  ;;  %v5743_v28 = vadd.f32 2.0, %v4207_v1  ;;  %v10526_v45 = vpop.eup %10525  ;;  %v6378_v42 = vsel %vm4074_vm4, %v5610_v13, %v6122_v15 }
 0x3ef   : > { %v4591_v27 = vadd.f32 1.0, %v4335_v22  ;;  %v5359_v3 = vmul.f32 2.0, %v3823_v33  ;;  %10535 = vrcp.f32 %v6378_v42  ;;  %v4719_v43 = vadd.f32 %v4207_v1, %v3695_v50 }
 0x3f0   : > { %v10528_v5 = vpop.eup %10527  ;;  %v5487_v23 = vadd.f32 %v5231_v40, %v4463_v17  ;;  %v5999_v62 = vadd.f32 %v5743_v28, %v3695_v50  ;;  %v5098_v32 = vsel %vm4074_vm4, %v4586_v37, %v4842_v44  ;;  %v5871_v29 = vadd.f32 2.0, %v4335_v22 }
 0x3f1   : > { %v5615_v35 = vadd.f32 %v5359_v3, %v4591_v27  ;;  %v2926_v41 = vsub.f32 0.0, %v2670_v6  ;;  %v4847_v39 = vadd.f32 %v4335_v22, %v3823_v33  ;;  %v3693_v49 = vmul.f32 %v10526_v45, %v10526_v45 }
 0x3f2   : > { %v6255_v48 = vsel %vm3951_vm5, %v5487_v23, %v5999_v62  ;;  %v4205_v24 = vmul.f32 2.0, %v10526_v45  ;;  %v10530_v36 = vpop.eup %10529  ;;  %v6127_v60 = vadd.f32 %v5871_v29, %v3823_v33  ;;  %v3821_v20 = vmul.f32 %v10528_v5, %v10528_v5  ;;  %v13701_v33 = vld [vmem:[%s15170_s2] ss:$0 sm:$0xff] }
 0x3f3   : > { %10537 = vrcp.f32 %v6255_v48  ;;  %vm4077_vm8 = vcmp.ge.f32.partialorder %v13645_v61, 0.0  ;;  %v4333_v58 = vmul.f32 2.0, %v10528_v5  ;;  %v4975_v37 = vsel %vm3951_vm5, %v4463_v17, %v4719_v43 }
 0x3f4   : > { %v10532_v30 = vpop.eup %10531  ;;  %v4461_v55 = vadd.f32 1.0, %v4205_v24  ;;  %v5229_v13 = vmul.f32 2.0, %v3693_v49  ;;  %v5741_v50 = vadd.f32 2.0, %v4205_v24  ;;  %v6383_v44 = vsel %vm4079_vm6, %v5615_v35, %v6127_v60 }
 0x3f5   : > { %v10534_v1 = vpop.eup %10533  ;;  %v7018_v6 = vmul.f32 %v10532_v30, %v6506_v21  ;;  %v4589_v15 = vadd.f32 1.0, %v4333_v58  ;;  %v13705_v22 = vadd.f32 %v13701_v33, %v13313_v38  ;;  %10539 = vrcp.f32 %v6383_v44 }
 0x3f6   : > { %v4717_v17 = vadd.f32 %v4205_v24, %v3693_v49  ;;  %v5485_v40 = vadd.f32 %v5229_v13, %v4461_v55  ;;  %v5997_v28 = vadd.f32 %v5741_v50, %v3693_v49  ;;  %v6634_v21 = vmul.f32 %v5098_v32, %v13551_v25  ;;  %v13718_v24 = vpop.f32.mrb[92].mxu0 }
 0x3f7   : > { %v9185_v45 = vpack.c.bf16 %v7018_v6, %v7018_v6  ;;  %v6511_v42 = vmul.f32 %v4975_v37, %v13621_v54  ;;  %v5357_v3 = vmul.f32 2.0, %v3821_v20  ;;  %vm3952_vm10 = vcmp.ge.f32.partialorder %v13649_v59, 0.0 }
 0x3f8   : > { %v5103_v5 = vsel %vm4079_vm6, %v4591_v27, %v4847_v39  ;;  %v6253_v43 = vsel %vm3949_vm7, %v5485_v40, %v5997_v28  ;;  %v5869_v38 = vadd.f32 2.0, %v4333_v58  ;;  %v3696_v23 = vmul.f32 %v10530_v36, %v10530_v36  ;;  %v13720_v27 = vpop.f32.mrb[92].mxu1 }
 0x3f9   : > { %8299 = vst.msk [vmem:[%s11437_s29 + $0x124] sm:$0xf] %vm8225_vm9, %v9185_v45  ;;  %10541 = vrcp.f32 %v6253_v43  ;;  %v5613_v62 = vadd.f32 %v5357_v3, %v4589_v15  ;;  %v4208_v35 = vmul.f32 2.0, %v10530_v36  ;;  %v3824_v29 = vmul.f32 %v10534_v1, %v10534_v1  ;;  %v10536_v25 = vpop.eup %10535  ;;  %v13734_v3 = vpop.f32.mrb[93].mxu1 }
 0x3fa   : > { %v4973_v54 = vsel %vm3949_vm7, %v4461_v55, %v4717_v17  ;;  %v6125_v32 = vadd.f32 %v5869_v38, %v3821_v20  ;;  %v5232_v48 = vmul.f32 2.0, %v3696_v23  ;;  %v4336_v49 = vmul.f32 2.0, %v10534_v1  ;;  %v13726_v55 = vpop.f32.mrb[93].mxu0 }
 0x3fb   : > { %v7146_v39 = vmul.f32 %v10536_v25, %v6634_v21  ;;  %v4464_v60 = vadd.f32 1.0, %v4208_v35  ;;  %v5744_v30 = vadd.f32 2.0, %v4208_v35  ;;  %v3259_v37 = vmul.f32 1.442695, %v2926_v41 }
 0x3fc   : > { %v4845_v13 = vadd.f32 %v4333_v58, %v3821_v20  ;;  %v6381_v36 = vsel %vm4077_vm8, %v5613_v62, %v6125_v32  ;;  %v13724_v50 = vadd.f32 1.0, %v4336_v49  ;;  %v5360_v6 = vmul.f32 2.0, %v3824_v29 }
 0x3fd   : > { %v10538_v44 = vpop.eup %10537  ;;  %v9313_v1 = vpack.c.bf16 %v7146_v39, %v7146_v39  ;;  %10543 = vrcp.f32 %v6381_v36  ;;  %v5488_v17 = vadd.f32 %v5232_v48, %v4464_v60  ;;  %vm4080_vm11 = vcmp.ge.f32.partialorder %v13657_v2, 0.0 }
 0x3fe   : > { %v7023_v40 = vmul.f32 %v10538_v44, %v6511_v42  ;;  %v6639_v28 = vmul.f32 %v5103_v5, %v13625_v46  ;;  %v6509_v41 = vmul.f32 %v4973_v54, %v13629_v7  ;;  %v6000_v20 = vadd.f32 %v5744_v30, %v3696_v23 }
 0x3ff   : > { %8427 = vst.msk [vmem:[%s11437_s29 + $0x324] sm:$0xf] %vm8225_vm9, %v9313_v1  ;;  %v4720_v58 = vadd.f32 %v4208_v35, %v3696_v23  ;;  %v5616_v45 = vadd.f32 %v5360_v6, %v13724_v50  ;;  %v5872_v21 = vadd.f32 2.0, %v4336_v49  ;;  %10545 = vpow2.f32 %v3259_v37  ;;  %v10540_v43 = vpop.eup %10539 }
 0x400   : > { %v9190_v38 = vpack.c.bf16 %v7023_v40, %v7023_v40  ;;  %v5101_v42 = vsel %vm4077_vm8, %v4589_v15, %v4845_v13  ;;  %v6256_v46 = vsel %vm3952_vm10, %v5488_v17, %v6000_v20  ;;  %v2798_v7 = vand.u32 2147483647, %v13705_v22  ;;  %v13765_v13 = vpop.f32.mrb[94].mxu0  ;;  %v13772_v40 = vpop.f32.mrb[94].mxu1 }
 0x401   : > { %v7151_v5 = vmul.f32 %v10540_v43, %v6639_v28  ;;  %10547 = vrcp.f32 %v6256_v46  ;;  %v6128_v62 = vadd.f32 %v5872_v21, %v3824_v29  ;;  %v13743_v23 = vadd.f32 %v13701_v33, %v13356_v8 }
 0x402   : > { %8304 = vst.msk [vmem:[%s11437_s29 + $0x138] sm:$0xf] %vm8225_vm9, %v9190_v38  ;;  %v3054_v35 = vsub.f32 0.0, %v2798_v7  ;;  %v13749_v25 = vadd.f32 %v13701_v33, %v13358_v56  ;;  %v13753_v15 = vadd.f32 %v13701_v33, %v13377_v10  ;;  %v13757_v54 = vadd.f32 %v13701_v33, %v13385_v26 }
 0x403   : > { %v10542_v32 = vpop.eup %10541  ;;  %v9318_v48 = vpack.c.bf16 %v7151_v5, %v7151_v5  ;;  %v4976_v8 = vsel %vm3952_vm10, %v4464_v60, %v4720_v58  ;;  %v6384_v39 = vsel %vm4080_vm11, %v5616_v45, %v6128_v62  ;;  %v2675_v30 = vand.u32 2147483647, %v13743_v23 }
 0x404   : > { %v7021_v56 = vmul.f32 %v10542_v32, %v6509_v41  ;;  %10549 = vrcp.f32 %v6384_v39  ;;  %v3515_v37 = vmul.f32 1.442695, %v3054_v35  ;;  %v2803_v10 = vand.u32 2147483647, %v13749_v25 }
 0x405   : > { %8432 = vst.msk [vmem:[%s11437_s29 + $0x338] sm:$0xf] %vm8225_vm9, %v9318_v48  ;;  %v6637_v26 = vmul.f32 %v5101_v42, %v13645_v61  ;;  %v4848_v36 = vadd.f32 %v4336_v49, %v3824_v29  ;;  %v2931_v6 = vsub.f32 0.0, %v2675_v30  ;;  %v2673_v60 = vand.u32 2147483647, %v13753_v15 }
 0x406   : > { %v9188_v44 = vpack.c.bf16 %v7021_v56, %v7021_v56  ;;  %10551 = vpow2.f32 %v3515_v37  ;;  %v3059_v1 = vsub.f32 0.0, %v2803_v10  ;;  %v2801_v17 = vand.u32 2147483647, %v13757_v54 }
 0x407   : > { %v10544_v28 = vpop.eup %10543  ;;  %v6512_v41 = vmul.f32 %v4976_v8, %v13649_v59  ;;  %v3269_v20 = vmul.f32 1.442695, %v2931_v6  ;;  %v2929_v58 = vsub.f32 0.0, %v2673_v60  ;;  %v13777_v45 = vadd.f32 %v13701_v33, %v13394_v63 }
 0x408   : > { %8302 = vst.msk [vmem:[%s11437_s29 + $0x130] sm:$0xf] %vm8225_vm9, %v9188_v44  ;;  %v7149_v61 = vmul.f32 %v10544_v28, %v6637_v26  ;;  %v3525_v29 = vmul.f32 1.442695, %v3059_v1  ;;  %v3057_v49 = vsub.f32 0.0, %v2801_v17  ;;  %v13783_v21 = vadd.f32 %v13701_v33, %v13403_v57 }
 0x409   : > { %v10546_v43 = vpop.eup %10545  ;;  %v5104_v59 = vsel %vm4080_vm11, %v13724_v50, %v4848_v36  ;;  %10553 = vpow2.f32 %v3269_v20  ;;  %v3265_v38 = vmul.f32 1.442695, %v2929_v58  ;;  %v2676_v63 = vand.u32 2147483647, %v13777_v45 }
 0x40a   : > { %v9316_v42 = vpack.c.bf16 %v7149_v61, %v7149_v61  ;;  %v3694_v46 = vmul.f32 %v10546_v43, %v10546_v43  ;;  %v4206_v7 = vmul.f32 2.0, %v10546_v43  ;;  %10555 = vpow2.f32 %v3525_v29 }
 0x40b   : > { %v10548_v5 = vpop.eup %10547  ;;  %10557 = vpow2.f32 %v3265_v38  ;;  %v3521_v62 = vmul.f32 1.442695, %v3057_v49  ;;  %v2932_v35 = vsub.f32 0.0, %v2676_v63  ;;  %v2804_v57 = vand.u32 2147483647, %v13783_v21 }
 0x40c   : > { %8430 = vst.msk [vmem:[%s11437_s29 + $0x330] sm:$0xf] %vm8225_vm9, %v9316_v42  ;;  %v7024_v32 = vmul.f32 %v10548_v5, %v6512_v41  ;;  %v6640_v50 = vmul.f32 %v5104_v59, %v13657_v2  ;;  %v4462_v48 = vadd.f32 1.0, %v4206_v7  ;;  %v5230_v8 = vmul.f32 2.0, %v3694_v46 }
 0x40d   : > { %v5742_v39 = vadd.f32 2.0, %v4206_v7  ;;  %10559 = vpow2.f32 %v3521_v62  ;;  %v3271_v30 = vmul.f32 1.442695, %v2932_v35  ;;  %v3060_v56 = vsub.f32 0.0, %v2804_v57  ;;  %v13809_v57 = vpop.f32.mrb[95].mxu0 }
 0x40e   : > { %v10550_v37 = vpop.eup %10549  ;;  %v9191_v10 = vpack.c.bf16 %v7024_v32, %v7024_v32  ;;  %v4718_v26 = vadd.f32 %v4206_v7, %v3694_v46  ;;  %v5486_v36 = vadd.f32 %v5230_v8, %v4462_v48  ;;  %vm3950_vm12 = vcmp.ge.f32.partialorder %v13675_v19, 0.0  ;;  %v13811_v32 = vpop.f32.mrb[95].mxu1 }
 0x40f   : > { %v7152_v6 = vmul.f32 %v10550_v37, %v6640_v50  ;;  %v5998_v60 = vadd.f32 %v5742_v39, %v3694_v46  ;;  %10561 = vpow2.f32 %v3271_v30  ;;  %v3527_v2 = vmul.f32 1.442695, %v3060_v56 }
 0x410   : > { %v10552_v44 = vpop.eup %10551  ;;  %8305 = vst.msk [vmem:[%s11437_s29 + $0x13c] sm:$0xf] %vm8225_vm9, %v9191_v10  ;;  %v4974_v20 = vsel %vm3950_vm12, %v4462_v48, %v4718_v26  ;;  %vm4078_vm13 = vcmp.ge.f32.partialorder %v13705_v22, 0.0  ;;  %vm3955_vm14 = vcmp.ge.f32.partialorder %v13743_v23, 0.0  ;;  %v13802_v43 = vadd.f32 %v13701_v33, %v13411_v11 }
 0x411   : > { %v9319_v1 = vpack.c.bf16 %v7152_v6, %v7152_v6  ;;  %v6254_v17 = vsel %vm3950_vm12, %v5486_v36, %v5998_v60  ;;  %v3822_v28 = vmul.f32 %v10552_v44, %v10552_v44  ;;  %v4334_v41 = vmul.f32 2.0, %v10552_v44 }
 0x412   : > { %10563 = vrcp.f32 %v6254_v17  ;;  %v13806_v46 = vadd.f32 %v13701_v33, %v13440_v52  ;;  %vm4083_vm15 = vcmp.ge.f32.partialorder %v13749_v25, 0.0  ;;  %v6510_v11 = vmul.f32 %v4974_v20, %v13675_v19 }
 0x413   : > { %v10554_v58 = vpop.eup %10553  ;;  %8433 = vst.msk [vmem:[%s11437_s29 + $0x33c] sm:$0xf] %vm8225_vm9, %v9319_v1  ;;  %v4590_v61 = vadd.f32 1.0, %v4334_v41  ;;  %v5358_v29 = vmul.f32 2.0, %v3822_v28  ;;  %v5870_v49 = vadd.f32 2.0, %v4334_v41  ;;  %v4846_v38 = vadd.f32 %v4334_v41, %v3822_v28 }
 0x414   : > { %v10556_v59 = vpop.eup %10555  ;;  %v3699_v63 = vmul.f32 %v10554_v58, %v10554_v58  ;;  %v4211_v42 = vmul.f32 2.0, %v10554_v58  ;;  %10565 = vpow2.f32 %v3527_v2  ;;  %v13816_v8 = vadd.f32 %v13701_v33, %v13473_v31 }
 0x415   : > { %v10558_v7 = vpop.eup %10557  ;;  %v5614_v5 = vadd.f32 %v5358_v29, %v4590_v61  ;;  %v6126_v62 = vadd.f32 %v5870_v49, %v3822_v28  ;;  %v3827_v35 = vmul.f32 %v10556_v59, %v10556_v59  ;;  %v4339_v56 = vmul.f32 2.0, %v10556_v59 }
 0x416   : > { %v4467_v50 = vadd.f32 1.0, %v4211_v42  ;;  %v5235_v48 = vmul.f32 2.0, %v3699_v63  ;;  %v5747_v30 = vadd.f32 2.0, %v4211_v42  ;;  %v3697_v26 = vmul.f32 %v10558_v7, %v10558_v7 }
 0x417   : > { %v10560_v52 = vpop.eup %10559  ;;  %v6382_v39 = vsel %vm4078_vm13, %v5614_v5, %v6126_v62  ;;  %v5363_v37 = vmul.f32 2.0, %v3827_v35  ;;  %vm3953_vm0 = vcmp.ge.f32.partialorder %v13753_v15, 0.0  ;;  %v2674_v19 = vand.u32 2147483647, %v13802_v43 }
 0x418   : > { %10567 = vrcp.f32 %v6382_v39  ;;  %v5491_v10 = vadd.f32 %v5235_v48, %v4467_v50  ;;  %v5102_v36 = vsel %vm4078_vm13, %v4590_v61, %v4846_v38  ;;  %v6003_v6 = vadd.f32 %v5747_v30, %v3699_v63 }
 0x419   : > { %v4595_v31 = vadd.f32 1.0, %v4339_v56  ;;  %v2802_v60 = vand.u32 2147483647, %v13806_v46  ;;  %v10562_v44 = vpop.eup %10561  ;;  %v5875_v2 = vadd.f32 2.0, %v4339_v56  ;;  %v4209_v1 = vmul.f32 2.0, %v10558_v7 }
 0x41a   : > { %v5233_v17 = vmul.f32 2.0, %v3697_v26  ;;  %v3825_v28 = vmul.f32 %v10560_v52, %v10560_v52  ;;  %v4723_v41 = vadd.f32 %v4211_v42, %v3699_v63  ;;  %v6259_v20 = vsel %vm3955_vm14, %v5491_v10, %v6003_v6 }
 0x41b   : > { %v5619_v58 = vadd.f32 %v5363_v37, %v4595_v31  ;;  %vm4081_vm1 = vcmp.ge.f32.partialorder %v13757_v54, 0.0  ;;  %v4337_v29 = vmul.f32 2.0, %v10560_v52  ;;  %10569 = vrcp.f32 %v6259_v20 }
 0x41c   : > { %v10564_v49 = vpop.eup %10563  ;;  %v4851_v61 = vadd.f32 %v4339_v56, %v3827_v35  ;;  %v6131_v59 = vadd.f32 %v5875_v2, %v3827_v35  ;;  %v4465_v38 = vadd.f32 1.0, %v4209_v1  ;;  %v5745_v62 = vadd.f32 2.0, %v4209_v1  ;;  %v13832_v35 = vpop.f32.mrb[96].mxu0 }
 0x41d   : > { %v7022_v5 = vmul.f32 %v10564_v49, %v6510_v11  ;;  %v4593_v48 = vadd.f32 1.0, %v4337_v29  ;;  %v2930_v39 = vsub.f32 0.0, %v2674_v19  ;;  %v6638_v7 = vmul.f32 %v5102_v36, %v13705_v22  ;;  %v13834_v11 = vpop.f32.mrb[96].mxu1 }
 0x41e   : > { %v6387_v63 = vsel %vm4083_vm15, %v5619_v58, %v6131_v59  ;;  %v5489_v42 = vadd.f32 %v5233_v17, %v4465_v38  ;;  %v5361_v30 = vmul.f32 2.0, %v3825_v28  ;;  %v10566_v37 = vpop.eup %10565  ;;  %v4721_v52 = vadd.f32 %v4209_v1, %v3697_v26 }
 0x41f   : > { %v9189_v10 = vpack.c.bf16 %v7022_v5, %v7022_v5  ;;  %10571 = vrcp.f32 %v6387_v63  ;;  %v6001_v6 = vadd.f32 %v5745_v62, %v3697_v26  ;;  %vm3956_vm2 = vcmp.ge.f32.partialorder %v13777_v45, 0.0  ;;  %v13852_v63 = vpop.f32.mrb[97].mxu1 }
 0x420   : > { %v4979_v22 = vsel %vm3955_vm14, %v4467_v50, %v4723_v41  ;;  %v5107_v56 = vsel %vm4083_vm15, %v4595_v31, %v4851_v61  ;;  %v5617_v19 = vadd.f32 %v5361_v30, %v4593_v48  ;;  %v5873_v36 = vadd.f32 2.0, %v4337_v29  ;;  %v13845_v41 = vpop.f32.mrb[97].mxu0 }
 0x421   : > { %8303 = vst.msk [vmem:[%s11437_s29 + $0x134] sm:$0xf] %vm8225_vm9, %v9189_v10  ;;  %v6257_v2 = vsel %vm3953_vm0, %v5489_v42, %v6001_v6  ;;  %v4849_v26 = vadd.f32 %v4337_v29, %v3825_v28  ;;  %v3700_v1 = vmul.f32 %v10562_v44, %v10562_v44  ;;  %v4212_v17 = vmul.f32 2.0, %v10562_v44 }
 0x422   : > { %v10568_v20 = vpop.eup %10567  ;;  %10573 = vrcp.f32 %v6257_v2  ;;  %v6129_v58 = vadd.f32 %v5873_v36, %v3825_v28  ;;  %v3828_v49 = vmul.f32 %v10566_v37, %v10566_v37  ;;  %vm4084_vm3 = vcmp.ge.f32.partialorder %v13783_v21, 0.0 }
 0x423   : > { %v4340_v50 = vmul.f32 2.0, %v10566_v37  ;;  %v7150_v31 = vmul.f32 %v10568_v20, %v6638_v7  ;;  %v4977_v61 = vsel %vm3953_vm0, %v4465_v38, %v4721_v52  ;;  %v4468_v59 = vadd.f32 1.0, %v4212_v17 }
 0x424   : > { %v5236_v5 = vmul.f32 2.0, %v3700_v1  ;;  %v6515_v29 = vmul.f32 %v4979_v22, %v13743_v23  ;;  %v6385_v44 = vsel %vm4081_vm1, %v5617_v19, %v6129_v58  ;;  %v5748_v62 = vadd.f32 2.0, %v4212_v17 }
 0x425   : > { %v4596_v28 = vadd.f32 1.0, %v4340_v50  ;;  %v9317_v42 = vpack.c.bf16 %v7150_v31, %v7150_v31  ;;  %v6643_v30 = vmul.f32 %v5107_v56, %v13749_v25  ;;  %10575 = vrcp.f32 %v6385_v44  ;;  %v10570_v37 = vpop.eup %10569  ;;  %v13865_v31 = vpop.f32.mrb[98].mxu0  ;;  %v15206_v44 = vld [vmem:[#allocation8_spill] sm:$0xff] }
 0x426   : > { %v5492_v7 = vadd.f32 %v5236_v5, %v4468_v59  ;;  %v6513_v38 = vmul.f32 %v4977_v61, %v13753_v15  ;;  %v4724_v10 = vadd.f32 %v4212_v17, %v3700_v1  ;;  %v6004_v52 = vadd.f32 %v5748_v62, %v3700_v1 }
 0x427   : > { %v5364_v6 = vmul.f32 2.0, %v3828_v49  ;;  %8431 = vst.msk [vmem:[%s11437_s29 + $0x334] sm:$0xf] %vm8225_vm9, %v9317_v42  ;;  %v7027_v23 = vmul.f32 %v10570_v37, %v6515_v29  ;;  %v5105_v22 = vsel %vm4081_vm1, %v4593_v48, %v4849_v26  ;;  %v5876_v19 = vadd.f32 2.0, %v4340_v50 }
 0x428   : > { %v3267_v36 = vmul.f32 1.442695, %v2930_v39  ;;  %v6260_v25 = vsel %vm3956_vm2, %v5492_v7, %v6004_v52  ;;  %v4852_v56 = vadd.f32 %v4340_v50, %v3828_v49  ;;  %v3058_v15 = vsub.f32 0.0, %v2802_v60 }
 0x429   : > { %v5620_v2 = vadd.f32 %v5364_v6, %v4596_v28  ;;  %v10572_v17 = vpop.eup %10571  ;;  %v9194_v1 = vpack.c.bf16 %v7027_v23, %v7027_v23  ;;  %10577 = vrcp.f32 %v6260_v25  ;;  %v6132_v20 = vadd.f32 %v5876_v19, %v3828_v49 }
 0x42a   : > { %v2679_v58 = vand.u32 2147483647, %v13816_v8  ;;  %v7155_v48 = vmul.f32 %v10572_v17, %v6643_v30  ;;  %v4980_v39 = vsel %vm3956_vm2, %v4468_v59, %v4724_v10  ;;  %10579 = vpow2.f32 %v3267_v36 }
 0x42b   : > { %v3523_v26 = vmul.f32 1.442695, %v3058_v15  ;;  %8308 = vst.msk [vmem:[%s11437_s29 + $0x148] sm:$0xf] %vm8225_vm9, %v9194_v1  ;;  %v6388_v60 = vsel %vm4084_vm3, %v5620_v2, %v6132_v20  ;;  %v13875_v49 = vadd.f32 %v13701_v33, %v13475_v0  ;;  %v13879_v61 = vadd.f32 %v13701_v33, %v13496_v16  ;;  %v15207_v2 = vld [vmem:[#allocation9_spill] sm:$0xff] }
 0x42c   : > { %v2935_v50 = vsub.f32 0.0, %v2679_v58  ;;  %v10574_v5 = vpop.eup %10573  ;;  %v9322_v29 = vpack.c.bf16 %v7155_v48, %v7155_v48  ;;  %10581 = vrcp.f32 %v6388_v60  ;;  %v13883_v59 = vadd.f32 %v13701_v33, %v13506_v12 }
 0x42d   : > { %v13887_v62 = vadd.f32 %v13701_v33, %v15206_v44  ;;  %v7025_v42 = vmul.f32 %v10574_v5, %v6513_v38  ;;  %10583 = vpow2.f32 %v3523_v26  ;;  %v2807_v0 = vand.u32 2147483647, %v13875_v49  ;;  %v13896_v38 = vpop.f32.mrb[98].mxu1 }
 0x42e   : > { %v3277_v30 = vmul.f32 1.442695, %v2935_v50  ;;  %8436 = vst.msk [vmem:[%s11437_s29 + $0x348] sm:$0xf] %vm8225_vm9, %v9322_v29  ;;  %v6641_v16 = vmul.f32 %v5105_v22, %v13757_v54  ;;  %v2677_v7 = vand.u32 2147483647, %v13879_v61  ;;  %v6516_v52 = vmul.f32 %v4980_v39, %v13777_v45 }
 0x42f   : > { %v2805_v37 = vand.u32 2147483647, %v13883_v59  ;;  %v10576_v12 = vpop.eup %10575  ;;  %v9192_v10 = vpack.c.bf16 %v7025_v42, %v7025_v42  ;;  %v3063_v6 = vsub.f32 0.0, %v2807_v0  ;;  %v2680_v25 = vand.u32 2147483647, %v13887_v62  ;;  %v15208_v45 = vld [vmem:[#allocation2_spill] sm:$0xff] }
 0x430   : > { %10585 = vpow2.f32 %v3277_v30  ;;  %v7153_v23 = vmul.f32 %v10576_v12, %v6641_v16  ;;  %v2933_v19 = vsub.f32 0.0, %v2677_v7  ;;  %v5108_v54 = vsel %vm4084_vm3, %v4596_v28, %v4852_v56 }
 0x431   : > { %v3061_v36 = vsub.f32 0.0, %v2805_v37  ;;  %8306 = vst.msk [vmem:[%s11437_s29 + $0x140] sm:$0xf] %vm8225_vm9, %v9192_v10  ;;  %v3533_v22 = vmul.f32 1.442695, %v3063_v6  ;;  %v13905_v15 = vadd.f32 %v13701_v33, %v15207_v2  ;;  %v13909_v17 = vadd.f32 %v13701_v33, %v15208_v45 }
 0x432   : > { %v9320_v1 = vpack.c.bf16 %v7153_v23, %v7153_v23  ;;  %v3273_v20 = vmul.f32 1.442695, %v2933_v19  ;;  %v2936_v48 = vsub.f32 0.0, %v2680_v25  ;;  %v6644_v50 = vmul.f32 %v5108_v54, %v13783_v21 }
 0x433   : > { %v3529_v58 = vmul.f32 1.442695, %v3061_v36  ;;  %v10578_v39 = vpop.eup %10577  ;;  %10587 = vpow2.f32 %v3533_v22  ;;  %v2808_v26 = vand.u32 2147483647, %v13905_v15  ;;  %v2678_v0 = vand.u32 2147483647, %v13909_v17 }
 0x434   : > { %v10580_v60 = vpop.eup %10579  ;;  %8434 = vst.msk [vmem:[%s11437_s29 + $0x340] sm:$0xf] %vm8225_vm9, %v9320_v1  ;;  %v7028_v28 = vmul.f32 %v10578_v39, %v6516_v52  ;;  %10589 = vpow2.f32 %v3273_v20  ;;  %v3279_v56 = vmul.f32 1.442695, %v2936_v48  ;;  %vm3954_vm4 = vcmp.ge.f32.partialorder %v13802_v43, 0.0 }
 0x435   : > { %v3698_v5 = vmul.f32 %v10580_v60, %v10580_v60  ;;  %v4210_v29 = vmul.f32 2.0, %v10580_v60  ;;  %10591 = vpow2.f32 %v3529_v58  ;;  %v3064_v30 = vsub.f32 0.0, %v2808_v26 }
 0x436   : > { %v10582_v44 = vpop.eup %10581  ;;  %v9195_v42 = vpack.c.bf16 %v7028_v28, %v7028_v28  ;;  %10593 = vpow2.f32 %v3279_v56  ;;  %vm4082_vm5 = vcmp.ge.f32.partialorder %v13806_v46, 0.0  ;;  %vm3959_vm6 = vcmp.ge.f32.partialorder %v13816_v8, 0.0 }
 0x437   : > { %v10584_v16 = vpop.eup %10583  ;;  %v7156_v7 = vmul.f32 %v10582_v44, %v6644_v50  ;;  %v4466_v37 = vadd.f32 1.0, %v4210_v29  ;;  %v5234_v12 = vmul.f32 2.0, %v3698_v5  ;;  %v4722_v10 = vadd.f32 %v4210_v29, %v3698_v5  ;;  %v13924_v50 = vpop.f32.mrb[99].mxu0 }
 0x438   : > { %8309 = vst.msk [vmem:[%s11437_s29 + $0x14c] sm:$0xf] %vm8225_vm9, %v9195_v42  ;;  %v5746_v52 = vadd.f32 2.0, %v4210_v29  ;;  %v3826_v6 = vmul.f32 %v10584_v16, %v10584_v16  ;;  %v4338_v21 = vmul.f32 2.0, %v10584_v16  ;;  %v3535_v22 = vmul.f32 1.442695, %v3064_v30 }
 0x439   : > { %v9323_v19 = vpack.c.bf16 %v7156_v7, %v7156_v7  ;;  %v5490_v36 = vadd.f32 %v5234_v12, %v4466_v37  ;;  %v4978_v58 = vsel %vm3954_vm4, %v4466_v37, %v4722_v10  ;;  %v2934_v39 = vsub.f32 0.0, %v2678_v0  ;;  %15209 = vst [vmem:[#allocation4_spill] sm:$0xff] %v13924_v50 }
 0x43a   : > { %v10586_v23 = vpop.eup %10585  ;;  %v6002_v25 = vadd.f32 %v5746_v52, %v3698_v5  ;;  %v4594_v54 = vadd.f32 1.0, %v4338_v21  ;;  %v5362_v2 = vmul.f32 2.0, %v3826_v6  ;;  %v5874_v45 = vadd.f32 2.0, %v4338_v21 }
 0x43b   : > { %8437 = vst.msk [vmem:[%s11437_s29 + $0x34c] sm:$0xf] %vm8225_vm9, %v9323_v19  ;;  %v3703_v1 = vmul.f32 %v10586_v23, %v10586_v23  ;;  %v4215_v20 = vmul.f32 2.0, %v10586_v23  ;;  %v4850_v60 = vadd.f32 %v4338_v21, %v3826_v6  ;;  %vm4087_vm7 = vcmp.ge.f32.partialorder %v13875_v49, 0.0 }
 0x43c   : > { %v6258_v48 = vsel %vm3954_vm4, %v5490_v36, %v6002_v25  ;;  %v5618_v28 = vadd.f32 %v5362_v2, %v4594_v54  ;;  %v6130_v56 = vadd.f32 %v5874_v45, %v3826_v6  ;;  %vm3957_vm8 = vcmp.ge.f32.partialorder %v13879_v61, 0.0  ;;  %v15210_v36 = vld [vmem:[#allocation3_spill] sm:$0xff] }
 0x43d   : > { %v10588_v26 = vpop.eup %10587  ;;  %10595 = vrcp.f32 %v6258_v48  ;;  %v4471_v29 = vadd.f32 1.0, %v4215_v20  ;;  %v5239_v44 = vmul.f32 2.0, %v3703_v1  ;;  %v5751_v42 = vadd.f32 2.0, %v4215_v20 }
 0x43e   : > { %v10590_v5 = vpop.eup %10589  ;;  %10597 = vpow2.f32 %v3535_v22  ;;  %v6386_v30 = vsel %vm4082_vm5, %v5618_v28, %v6130_v56  ;;  %v3831_v16 = vmul.f32 %v10588_v26, %v10588_v26  ;;  %v4343_v7 = vmul.f32 2.0, %v10588_v26 }
 0x43f   : > { %v3701_v0 = vmul.f32 %v10590_v5, %v10590_v5  ;;  %v10592_v37 = vpop.eup %10591  ;;  %10599 = vrcp.f32 %v6386_v30  ;;  %v4727_v12 = vadd.f32 %v4215_v20, %v3703_v1  ;;  %v5495_v10 = vadd.f32 %v5239_v44, %v4471_v29  ;;  %v13937_v20 = vpop.f32.mrb[99].mxu1 }
 0x440   : > { %v6007_v52 = vadd.f32 %v5751_v42, %v3703_v1  ;;  %v10594_v6 = vpop.eup %10593  ;;  %v4599_v21 = vadd.f32 1.0, %v4343_v7  ;;  %v5367_v23 = vmul.f32 2.0, %v3831_v16  ;;  %v13929_v19 = vmul.f32 1.442695, %v2934_v39  ;;  %15211 = vst [vmem:[#allocation5_spill] sm:$0xff] %v13937_v20 }
 0x441   : > { %v13933_v25 = vadd.f32 %v13701_v33, %v15210_v36  ;;  %v5879_v2 = vadd.f32 2.0, %v4343_v7  ;;  %v4213_v45 = vmul.f32 2.0, %v10590_v5  ;;  %v5237_v48 = vmul.f32 2.0, %v3701_v0 }
 0x442   : > { %v6263_v22 = vsel %vm3959_vm6, %v5495_v10, %v6007_v52  ;;  %v6514_v1 = vmul.f32 %v4978_v58, %v13802_v43  ;;  %v5623_v26 = vadd.f32 %v5367_v23, %v4599_v21  ;;  %v3829_v28 = vmul.f32 %v10592_v37, %v10592_v37 }
 0x443   : > { %10601 = vrcp.f32 %v6263_v22  ;;  %vm4085_vm10 = vcmp.ge.f32.partialorder %v13883_v59, 0.0  ;;  %v5106_v39 = vsel %vm4082_vm5, %v4594_v54, %v4850_v60  ;;  %v4983_v56 = vsel %vm3959_vm6, %v4471_v29, %v4727_v12 }
 0x444   : > { %v6135_v44 = vadd.f32 %v5879_v2, %v3831_v16  ;;  %v4469_v42 = vadd.f32 1.0, %v4213_v45  ;;  %v5749_v30 = vadd.f32 2.0, %v4213_v45  ;;  %v4341_v5 = vmul.f32 2.0, %v10592_v37 }
 0x445   : > { %v5365_v10 = vmul.f32 2.0, %v3829_v28  ;;  %v3704_v52 = vmul.f32 %v10594_v6, %v10594_v6  ;;  %v4855_v36 = vadd.f32 %v4343_v7, %v3831_v16  ;;  %v4216_v23 = vmul.f32 2.0, %v10594_v6 }
 0x446   : > { %v6391_v43 = vsel %vm4087_vm7, %v5623_v26, %v6135_v44  ;;  %v5493_v58 = vadd.f32 %v5237_v48, %v4469_v42  ;;  %v4725_v20 = vadd.f32 %v4213_v45, %v3701_v0  ;;  %v6005_v50 = vadd.f32 %v5749_v30, %v3701_v0  ;;  %v13954_v45 = vpop.f32.mrb[100].mxu0  ;;  %v13956_v0 = vpop.f32.mrb[100].mxu1 }
 0x447   : > { %v10596_v22 = vpop.eup %10595  ;;  %10603 = vrcp.f32 %v6391_v43  ;;  %v4597_v54 = vadd.f32 1.0, %v4341_v5  ;;  %vm3960_vm11 = vcmp.ge.f32.partialorder %v13887_v62, 0.0  ;;  %v5877_v12 = vadd.f32 2.0, %v4341_v5 }
 0x448   : > { %v10598_v60 = vpop.eup %10597  ;;  %v7026_v29 = vmul.f32 %v10596_v22, %v6514_v1  ;;  %v13948_v2 = vadd.f32 1.0, %v4216_v23  ;;  %v2806_v37 = vand.u32 2147483647, %v13933_v25  ;;  %v6642_v16 = vmul.f32 %v5106_v39, %v13806_v46  ;;  %v13969_v22 = vpop.f32.mrb[101].mxu0 }
 0x449   : > { %v6261_v7 = vsel %vm3957_vm8, %v5493_v58, %v6005_v50  ;;  %v5621_v6 = vadd.f32 %v5365_v10, %v4597_v54  ;;  %v5240_v48 = vmul.f32 2.0, %v3704_v52  ;;  %v10600_v26 = vpop.eup %10599  ;;  %v6519_v1 = vmul.f32 %v4983_v56, %v13816_v8 }
 0x44a   : > { %v9193_v44 = vpack.c.bf16 %v7026_v29, %v7026_v29  ;;  %10605 = vrcp.f32 %v6261_v7  ;;  %v6133_v30 = vadd.f32 %v5877_v12, %v3829_v28  ;;  %vm4088_vm12 = vcmp.ge.f32.partialorder %v13905_v15, 0.0  ;;  %v13971_v29 = vpop.f32.mrb[101].mxu1 }
 0x44b   : > { %v7154_v43 = vmul.f32 %v10600_v26, %v6642_v16  ;;  %v5111_v46 = vsel %vm4087_vm7, %v4599_v21, %v4855_v36  ;;  %v4981_v50 = vsel %vm3957_vm8, %v4469_v42, %v4725_v20  ;;  %v4853_v39 = vadd.f32 %v4341_v5, %v3829_v28 }
 0x44c   : > { %8307 = vst.msk [vmem:[%s11437_s29 + $0x144] sm:$0xf] %vm8225_vm9, %v9193_v44  ;;  %v6389_v10 = vsel %vm4085_vm10, %v5621_v6, %v6133_v30  ;;  %v5496_v8 = vadd.f32 %v5240_v48, %v13948_v2  ;;  %v5752_v56 = vadd.f32 2.0, %v4216_v23  ;;  %v3832_v58 = vmul.f32 %v10598_v60, %v10598_v60 }
 0x44d   : > { %v10602_v12 = vpop.eup %10601  ;;  %v9321_v21 = vpack.c.bf16 %v7154_v43, %v7154_v43  ;;  %10607 = vrcp.f32 %v6389_v10  ;;  %v4344_v36 = vmul.f32 2.0, %v10598_v60  ;;  %v3062_v20 = vsub.f32 0.0, %v2806_v37 }
 0x44e   : > { %v7031_v28 = vmul.f32 %v10602_v12, %v6519_v1  ;;  %v6008_v42 = vadd.f32 %v5752_v56, %v3704_v52  ;;  %v5368_v5 = vmul.f32 2.0, %v3832_v58  ;;  %10609 = vpow2.f32 %v13929_v19 }
 0x44f   : > { %8435 = vst.msk [vmem:[%s11437_s29 + $0x344] sm:$0xf] %vm8225_vm9, %v9321_v21  ;;  %v6647_v16 = vmul.f32 %v5111_v46, %v13875_v49  ;;  %v4600_v7 = vadd.f32 1.0, %v4344_v36  ;;  %v5880_v6 = vadd.f32 2.0, %v4344_v36  ;;  %v3531_v48 = vmul.f32 1.442695, %v3062_v20 }
 0x450   : > { %v9198_v26 = vpack.c.bf16 %v7031_v28, %v7031_v28  ;;  %v6517_v44 = vmul.f32 %v4981_v50, %v13879_v61  ;;  %v6264_v60 = vsel %vm3960_vm11, %v5496_v8, %v6008_v42  ;;  %v13982_v37 = vadd.f32 %v13701_v33, %v13597_v14  ;;  %v13989_v50 = vpop.f32.mrb[102].mxu0  ;;  %v14001_v8 = vpop.f32.mrb[102].mxu1 }
 0x451   : > { %v10604_v1 = vpop.eup %10603  ;;  %v4728_v30 = vadd.f32 %v4216_v23, %v3704_v52  ;;  %10611 = vrcp.f32 %v6264_v60  ;;  %v5624_v19 = vadd.f32 %v5368_v5, %v4600_v7  ;;  %v6136_v43 = vadd.f32 %v5880_v6, %v3832_v58 }
 0x452   : > { %8312 = vst.msk [vmem:[%s11437_s29 + $0x158] sm:$0xf] %vm8225_vm9, %v9198_v26  ;;  %v7159_v49 = vmul.f32 %v10604_v1, %v6647_v16  ;;  %v5109_v46 = vsel %vm4085_vm10, %v4597_v54, %v4853_v39  ;;  %10613 = vpow2.f32 %v3531_v48  ;;  %v2683_v61 = vand.u32 2147483647, %v13982_v37 }
 0x453   : > { %v4856_v10 = vadd.f32 %v4344_v36, %v3832_v58  ;;  %v6392_v14 = vsel %vm4088_vm12, %v5624_v19, %v6136_v43  ;;  %v13995_v52 = vadd.f32 %v13701_v33, %v13599_v18  ;;  %v13999_v23 = vadd.f32 %v13701_v33, %v13605_v9 }
 0x454   : > { %v10606_v54 = vpop.eup %10605  ;;  %v9326_v39 = vpack.c.bf16 %v7159_v49, %v7159_v49  ;;  %10615 = vrcp.f32 %v6392_v14  ;;  %v2939_v56 = vsub.f32 0.0, %v2683_v61  ;;  %v14005_v58 = vadd.f32 %v13701_v33, %v13611_v34 }
 0x455   : > { %v7029_v12 = vmul.f32 %v10606_v54, %v6517_v44  ;;  %v2811_v21 = vand.u32 2147483647, %v13995_v52  ;;  %v2681_v18 = vand.u32 2147483647, %v13999_v23  ;;  %v6645_v9 = vmul.f32 %v5109_v46, %v13883_v59 }
 0x456   : > { %8440 = vst.msk [vmem:[%s11437_s29 + $0x358] sm:$0xf] %vm8225_vm9, %v9326_v39  ;;  %v4984_v36 = vsel %vm3960_vm11, %v13948_v2, %v4728_v30  ;;  %v3285_v20 = vmul.f32 1.442695, %v2939_v56  ;;  %v2809_v28 = vand.u32 2147483647, %v14005_v58  ;;  %v14018_v6 = vadd.f32 %v13701_v33, %v13637_v47 }
 0x457   : > { %v10608_v42 = vpop.eup %10607  ;;  %v9196_v34 = vpack.c.bf16 %v7029_v12, %v7029_v12  ;;  %v3067_v5 = vsub.f32 0.0, %v2811_v21  ;;  %v2937_v16 = vsub.f32 0.0, %v2681_v18  ;;  %v5112_v59 = vsel %vm4088_vm12, %v4600_v7, %v4856_v10 }
 0x458   : > { %v10610_v48 = vpop.eup %10609  ;;  %v7157_v26 = vmul.f32 %v10608_v42, %v6645_v9  ;;  %10617 = vpow2.f32 %v3285_v20  ;;  %v3065_v44 = vsub.f32 0.0, %v2809_v28  ;;  %v14026_v30 = vadd.f32 %v13701_v33, %v13651_v4 }
 0x459   : > { %8310 = vst.msk [vmem:[%s11437_s29 + $0x150] sm:$0xf] %vm8225_vm9, %v9196_v34  ;;  %v3702_v2 = vmul.f32 %v10610_v48, %v10610_v48  ;;  %v4214_v60 = vmul.f32 2.0, %v10610_v48  ;;  %v3541_v1 = vmul.f32 1.442695, %v3067_v5  ;;  %v6520_v47 = vmul.f32 %v4984_v36, %v13887_v62 }
 0x45a   : > { %v9324_v19 = vpack.c.bf16 %v7157_v26, %v7157_v26  ;;  %v3281_v43 = vmul.f32 1.442695, %v2937_v16  ;;  %v2684_v49 = vand.u32 2147483647, %v14018_v6  ;;  %v3537_v14 = vmul.f32 1.442695, %v3065_v44 }
 0x45b   : > { %v10612_v46 = vpop.eup %10611  ;;  %v4470_v7 = vadd.f32 1.0, %v4214_v60  ;;  %v5238_v61 = vmul.f32 2.0, %v3702_v2  ;;  %v5750_v10 = vadd.f32 2.0, %v4214_v60  ;;  %v6648_v56 = vmul.f32 %v5112_v59, %v13905_v15 }
 0x45c   : > { %v10614_v54 = vpop.eup %10613  ;;  %8438 = vst.msk [vmem:[%s11437_s29 + $0x350] sm:$0xf] %vm8225_vm9, %v9324_v19  ;;  %v7032_v39 = vmul.f32 %v10612_v46, %v6520_v47  ;;  %10619 = vpow2.f32 %v3541_v1  ;;  %v2940_v4 = vsub.f32 0.0, %v2684_v49  ;;  %v2812_v21 = vand.u32 2147483647, %v14026_v30  ;;  %v14051_v49 = vpop.f32.mrb[103].mxu0 }
 0x45d   : > { %v5494_v33 = vadd.f32 %v5238_v61, %v4470_v7  ;;  %v6006_v12 = vadd.f32 %v5750_v10, %v3702_v2  ;;  %v3830_v62 = vmul.f32 %v10614_v54, %v10614_v54  ;;  %vm3958_vm13 = vcmp.ge.f32.partialorder %v13909_v17, 0.0  ;;  %v14042_v47 = vld [vmem:[%s15170_s2] ss:$0 sm:$0xff] }
 0x45e   : > { %v10616_v18 = vpop.eup %10615  ;;  %v9199_v9 = vpack.c.bf16 %v7032_v39, %v7032_v39  ;;  %v4342_v36 = vmul.f32 2.0, %v10614_v54  ;;  %10621 = vpow2.f32 %v3281_v43  ;;  %v4726_v16 = vadd.f32 %v4214_v60, %v3702_v2 }
 0x45f   : > { %v7160_v20 = vmul.f32 %v10616_v18, %v6648_v56  ;;  %v6262_v28 = vsel %vm3958_vm13, %v5494_v33, %v6006_v12  ;;  %v5366_v42 = vmul.f32 2.0, %v3830_v62  ;;  %10623 = vpow2.f32 %v3537_v14 }
 0x460   : > { %8313 = vst.msk [vmem:[%s11437_s29 + $0x15c] sm:$0xf] %vm8225_vm9, %v9199_v9  ;;  %10625 = vrcp.f32 %v6262_v28  ;;  %v4598_v15 = vadd.f32 1.0, %v4342_v36  ;;  %v5878_v34 = vadd.f32 2.0, %v4342_v36  ;;  %v3287_v48 = vmul.f32 1.442695, %v2940_v4 }
 0x461   : > { %v9327_v5 = vpack.c.bf16 %v7160_v20, %v7160_v20  ;;  %v3068_v26 = vsub.f32 0.0, %v2812_v21  ;;  %v4854_v44 = vadd.f32 %v4342_v36, %v3830_v62  ;;  %v14046_v43 = vadd.f32 %v14042_v47, %v13665_v51 }
 0x462   : > { %v10618_v59 = vpop.eup %10617  ;;  %v5622_v1 = vadd.f32 %v5366_v42, %v4598_v15  ;;  %v6134_v19 = vadd.f32 %v5878_v34, %v3830_v62  ;;  %vm4086_vm14 = vcmp.ge.f32.partialorder %v13933_v25, 0.0  ;;  %10627 = vpow2.f32 %v3287_v48 }
 0x463   : > { %8441 = vst.msk [vmem:[%s11437_s29 + $0x35c] sm:$0xf] %vm8225_vm9, %v9327_v5  ;;  %v3707_v2 = vmul.f32 %v10618_v59, %v10618_v59  ;;  %v4219_v60 = vmul.f32 2.0, %v10618_v59  ;;  %v3543_v61 = vmul.f32 1.442695, %v3068_v26  ;;  %v4982_v14 = vsel %vm3958_vm13, %v4470_v7, %v4726_v16  ;;  %v14061_v5 = vpop.f32.mrb[103].mxu1 }
 0x464   : > { %v6390_v46 = vsel %vm4086_vm14, %v5622_v1, %v6134_v19  ;;  %v2682_v10 = vand.u32 2147483647, %v14046_v43  ;;  %v5110_v56 = vsel %vm4086_vm14, %v4598_v15, %v4854_v44  ;;  %vm3963_vm15 = vcmp.ge.f32.partialorder %v13982_v37, 0.0 }
 0x465   : > { %10629 = vrcp.f32 %v6390_v46  ;;  %v4475_v54 = vadd.f32 1.0, %v4219_v60  ;;  %v5243_v51 = vmul.f32 2.0, %v3707_v2  ;;  %v5755_v4 = vadd.f32 2.0, %v4219_v60 }
 0x466   : > { %v10620_v39 = vpop.eup %10619  ;;  %10631 = vpow2.f32 %v3543_v61  ;;  %vm4091_vm0 = vcmp.ge.f32.partialorder %v13995_v52, 0.0  ;;  %v6518_v18 = vmul.f32 %v4982_v14, %v13909_v17  ;;  %v4731_v9 = vadd.f32 %v4219_v60, %v3707_v2 }
 0x467   : > { %v5499_v33 = vadd.f32 %v5243_v51, %v4475_v54  ;;  %v3835_v12 = vmul.f32 %v10620_v39, %v10620_v39  ;;  %v4347_v62 = vmul.f32 2.0, %v10620_v39  ;;  %v6011_v36 = vadd.f32 %v5755_v4, %v3707_v2 }
 0x468   : > { %v10622_v21 = vpop.eup %10621  ;;  %vm3961_vm1 = vcmp.ge.f32.partialorder %v13999_v23, 0.0  ;;  %v2938_v7 = vsub.f32 0.0, %v2682_v10  ;;  %v6646_v28 = vmul.f32 %v5110_v56, %v13933_v25  ;;  %v14067_v19 = vadd.f32 %v14042_v47, %v13682_v53 }
 0x469   : > { %v10624_v20 = vpop.eup %10623  ;;  %v4603_v42 = vadd.f32 1.0, %v4347_v62  ;;  %v5371_v15 = vmul.f32 2.0, %v3835_v12  ;;  %v5883_v34 = vadd.f32 2.0, %v4347_v62  ;;  %v6267_v48 = vsel %vm3963_vm15, %v5499_v33, %v6011_v36 }
 0x46a   : > { %v10626_v16 = vpop.eup %10625  ;;  %v3705_v26 = vmul.f32 %v10622_v21, %v10622_v21  ;;  %v4217_v59 = vmul.f32 2.0, %v10622_v21  ;;  %v3833_v17 = vmul.f32 %v10624_v20, %v10624_v20  ;;  %10633 = vrcp.f32 %v6267_v48 }
 0x46b   : > { %v7030_v44 = vmul.f32 %v10626_v16, %v6518_v18  ;;  %v5627_v1 = vadd.f32 %v5371_v15, %v4603_v42  ;;  %v4987_v25 = vsel %vm3963_vm15, %v4475_v54, %v4731_v9  ;;  %v6139_v2 = vadd.f32 %v5883_v34, %v3835_v12 }
 0x46c   : > { %v4473_v60 = vadd.f32 1.0, %v4217_v59  ;;  %vm4089_vm2 = vcmp.ge.f32.partialorder %v14005_v58, 0.0  ;;  %v3283_v46 = vmul.f32 1.442695, %v2938_v7  ;;  %v10628_v61 = vpop.eup %10627  ;;  %v5241_v14 = vmul.f32 2.0, %v3705_v26 }
 0x46d   : > { %v9197_v10 = vpack.c.bf16 %v7030_v44, %v7030_v44  ;;  %v5753_v51 = vadd.f32 2.0, %v4217_v59  ;;  %v4345_v39 = vmul.f32 2.0, %v10624_v20  ;;  %v4859_v56 = vadd.f32 %v4347_v62, %v3835_v12 }
 0x46e   : > { %v6395_v4 = vsel %vm4091_vm0, %v5627_v1, %v6139_v2  ;;  %v5369_v53 = vmul.f32 2.0, %v3833_v17  ;;  %v3708_v33 = vmul.f32 %v10628_v61, %v10628_v61  ;;  %v4729_v54 = vadd.f32 %v4217_v59, %v3705_v26  ;;  %v14081_v1 = vpop.f32.mrb[104].mxu0  ;;  %v14083_v2 = vpop.f32.mrb[104].mxu1 }
 0x46f   : > { %v10630_v21 = vpop.eup %10629  ;;  %8311 = vst.msk [vmem:[%s11437_s29 + $0x154] sm:$0xf] %vm8225_vm9, %v9197_v10  ;;  %10635 = vrcp.f32 %v6395_v4  ;;  %v5497_v18 = vadd.f32 %v5241_v14, %v4473_v60  ;;  %v6009_v9 = vadd.f32 %v5753_v51, %v3705_v26  ;;  %vm3964_vm3 = vcmp.ge.f32.partialorder %v14018_v6, 0.0 }
 0x470   : > { %v10632_v36 = vpop.eup %10631  ;;  %v7158_v7 = vmul.f32 %v10630_v21, %v6646_v28  ;;  %v4601_v15 = vadd.f32 1.0, %v4345_v39  ;;  %v5881_v34 = vadd.f32 2.0, %v4345_v39  ;;  %v2810_v12 = vand.u32 2147483647, %v14067_v19 }
 0x471   : > { %v6265_v62 = vsel %vm3961_vm1, %v5497_v18, %v6009_v9  ;;  %v4220_v20 = vmul.f32 2.0, %v10628_v61  ;;  %v5244_v16 = vmul.f32 2.0, %v3708_v33  ;;  %v3836_v48 = vmul.f32 %v10632_v36, %v10632_v36 }
 0x472   : > { %v9325_v44 = vpack.c.bf16 %v7158_v7, %v7158_v7  ;;  %v6523_v59 = vmul.f32 %v4987_v25, %v13982_v37  ;;  %10637 = vrcp.f32 %v6265_v62  ;;  %v5625_v26 = vadd.f32 %v5369_v53, %v4601_v15  ;;  %v14091_v37 = vpop.f32.mrb[105].mxu0 }
 0x473   : > { %v5115_v28 = vsel %vm4091_vm0, %v4603_v42, %v4859_v56  ;;  %v4985_v10 = vsel %vm3961_vm1, %v4473_v60, %v4729_v54  ;;  %v6137_v14 = vadd.f32 %v5881_v34, %v3833_v17  ;;  %v4476_v51 = vadd.f32 1.0, %v4220_v20  ;;  %v14095_v56 = vpop.f32.mrb[105].mxu1 }
 0x474   : > { %8439 = vst.msk [vmem:[%s11437_s29 + $0x354] sm:$0xf] %vm8225_vm9, %v9325_v44  ;;  %v4857_v61 = vadd.f32 %v4345_v39, %v3833_v17  ;;  %v5756_v4 = vadd.f32 2.0, %v4220_v20  ;;  %v4348_v21 = vmul.f32 2.0, %v10632_v36  ;;  %10639 = vpow2.f32 %v3283_v46  ;;  %v10634_v25 = vpop.eup %10633 }
 0x475   : > { %v6393_v53 = vsel %vm4089_vm2, %v5625_v26, %v6137_v14  ;;  %v5500_v18 = vadd.f32 %v5244_v16, %v4476_v51  ;;  %v5372_v9 = vmul.f32 2.0, %v3836_v48  ;;  %v3066_v42 = vsub.f32 0.0, %v2810_v12  ;;  %v14108_v26 = vpop.f32.mrb[106].mxu0 }
 0x476   : > { %v7035_v60 = vmul.f32 %v10634_v25, %v6523_v59  ;;  %10641 = vrcp.f32 %v6393_v53  ;;  %v6012_v54 = vadd.f32 %v5756_v4, %v3708_v33  ;;  %vm4092_vm4 = vcmp.ge.f32.partialorder %v14026_v30, 0.0 }
 0x477   : > { %v6651_v17 = vmul.f32 %v5115_v28, %v13995_v52  ;;  %v4604_v46 = vadd.f32 1.0, %v4348_v21  ;;  %v5884_v39 = vadd.f32 2.0, %v4348_v21  ;;  %v3539_v36 = vmul.f32 1.442695, %v3066_v42 }
 0x478   : > { %v9202_v7 = vpack.c.bf16 %v7035_v60, %v7035_v60  ;;  %v6521_v34 = vmul.f32 %v4985_v10, %v13999_v23  ;;  %v6268_v62 = vsel %vm3964_vm3, %v5500_v18, %v6012_v54  ;;  %v14104_v12 = vadd.f32 %v14042_v47, %v13718_v24 }
 0x479   : > { %v10636_v16 = vpop.eup %10635  ;;  %v5113_v44 = vsel %vm4089_vm2, %v4601_v15, %v4857_v61  ;;  %10643 = vrcp.f32 %v6268_v62  ;;  %v5628_v59 = vadd.f32 %v5372_v9, %v4604_v46  ;;  %v6140_v52 = vadd.f32 %v5884_v39, %v3836_v48 }
 0x47a   : > { %8316 = vst.msk [vmem:[%s11437_s29 + $0x168] sm:$0xf] %vm8225_vm9, %v9202_v7  ;;  %v7163_v28 = vmul.f32 %v10636_v16, %v6651_v17  ;;  %v4732_v23 = vadd.f32 %v4220_v20, %v3708_v33  ;;  %10645 = vpow2.f32 %v3539_v36  ;;  %v2687_v10 = vand.u32 2147483647, %v14104_v12 }
 0x47b   : > { %v4860_v14 = vadd.f32 %v4348_v21, %v3836_v48  ;;  %v6396_v24 = vsel %vm4092_vm4, %v5628_v59, %v6140_v52  ;;  %v14117_v15 = vadd.f32 %v14042_v47, %v13720_v27  ;;  %v14121_v61 = vadd.f32 %v14042_v47, %v13726_v55  ;;  %v14127_v48 = vpop.f32.mrb[106].mxu1 }
 0x47c   : > { %v10638_v4 = vpop.eup %10637  ;;  %v9330_v25 = vpack.c.bf16 %v7163_v28, %v7163_v28  ;;  %10647 = vrcp.f32 %v6396_v24  ;;  %v2943_v33 = vsub.f32 0.0, %v2687_v10  ;;  %v14125_v20 = vadd.f32 %v14042_v47, %v13734_v3 }
 0x47d   : > { %v7033_v21 = vmul.f32 %v10638_v4, %v6521_v34  ;;  %v2815_v53 = vand.u32 2147483647, %v14117_v15  ;;  %v2685_v27 = vand.u32 2147483647, %v14121_v61  ;;  %v6649_v55 = vmul.f32 %v5113_v44, %v14005_v58 }
 0x47e   : > { %v10640_v18 = vpop.eup %10639  ;;  %8444 = vst.msk [vmem:[%s11437_s29 + $0x368] sm:$0xf] %vm8225_vm9, %v9330_v25  ;;  %v4988_v9 = vsel %vm3964_vm3, %v4476_v51, %v4732_v23  ;;  %v3293_v42 = vmul.f32 1.442695, %v2943_v33  ;;  %v2813_v3 = vand.u32 2147483647, %v14125_v20  ;;  %v5116_v7 = vsel %vm4092_vm4, %v4604_v46, %v4860_v14 }
 0x47f   : > { %v9200_v60 = vpack.c.bf16 %v7033_v21, %v7033_v21  ;;  %v3706_v54 = vmul.f32 %v10640_v18, %v10640_v18  ;;  %v4218_v17 = vmul.f32 2.0, %v10640_v18  ;;  %v3071_v39 = vsub.f32 0.0, %v2815_v53 }
 0x480   : > { %v10642_v36 = vpop.eup %10641  ;;  %10649 = vpow2.f32 %v3293_v42  ;;  %v2941_v34 = vsub.f32 0.0, %v2685_v27  ;;  %v3069_v62 = vsub.f32 0.0, %v2813_v3  ;;  %v14143_v51 = vadd.f32 %v14042_v47, %v13765_v13 }
 0x481   : > { %8314 = vst.msk [vmem:[%s11437_s29 + $0x160] sm:$0xf] %vm8225_vm9, %v9200_v60  ;;  %v7161_v58 = vmul.f32 %v10642_v36, %v6649_v55  ;;  %v4474_v16 = vadd.f32 1.0, %v4218_v17  ;;  %v5242_v44 = vmul.f32 2.0, %v3706_v54  ;;  %v6524_v59 = vmul.f32 %v4988_v9, %v14018_v6 }
 0x482   : > { %v5754_v52 = vadd.f32 2.0, %v4218_v17  ;;  %v3549_v28 = vmul.f32 1.442695, %v3071_v39  ;;  %v3289_v23 = vmul.f32 1.442695, %v2941_v34  ;;  %v6652_v14 = vmul.f32 %v5116_v7, %v14026_v30 }
 0x483   : > { %v10644_v10 = vpop.eup %10643  ;;  %v9328_v46 = vpack.c.bf16 %v7161_v58, %v7161_v58  ;;  %vm3962_vm5 = vcmp.ge.f32.partialorder %v14046_v43, 0.0  ;;  %v5498_v24 = vadd.f32 %v5242_v44, %v4474_v16  ;;  %v3545_v21 = vmul.f32 1.442695, %v3069_v62  ;;  %v14162_v44 = vpop.f32.mrb[107].mxu0 }
 0x484   : > { %v10646_v4 = vpop.eup %10645  ;;  %v7036_v25 = vmul.f32 %v10644_v10, %v6524_v59  ;;  %v6010_v33 = vadd.f32 %v5754_v52, %v3706_v54  ;;  %10651 = vpow2.f32 %v3549_v28  ;;  %v2688_v53 = vand.u32 2147483647, %v14143_v51 }
 0x485   : > { %8442 = vst.msk [vmem:[%s11437_s29 + $0x360] sm:$0xf] %vm8225_vm9, %v9328_v46  ;;  %v3834_v13 = vmul.f32 %v10646_v4, %v10646_v4  ;;  %v4346_v6 = vmul.f32 2.0, %v10646_v4  ;;  %10653 = vpow2.f32 %v3289_v23  ;;  %v4730_v55 = vadd.f32 %v4218_v17, %v3706_v54 }
 0x486   : > { %v10648_v27 = vpop.eup %10647  ;;  %v9203_v18 = vpack.c.bf16 %v7036_v25, %v7036_v25  ;;  %v6266_v30 = vsel %vm3962_vm5, %v5498_v24, %v6010_v33  ;;  %v14155_v9 = vadd.f32 %v14042_v47, %v13772_v40  ;;  %v2944_v7 = vsub.f32 0.0, %v2688_v53 }
 0x487   : > { %v7164_v42 = vmul.f32 %v10648_v27, %v6652_v14  ;;  %10655 = vrcp.f32 %v6266_v30  ;;  %v4602_v3 = vadd.f32 1.0, %v4346_v6  ;;  %v4858_v60 = vadd.f32 %v4346_v6, %v3834_v13 }
 0x488   : > { %8317 = vst.msk [vmem:[%s11437_s29 + $0x16c] sm:$0xf] %vm8225_vm9, %v9203_v18  ;;  %v5370_v39 = vmul.f32 2.0, %v3834_v13  ;;  %v5882_v36 = vadd.f32 2.0, %v4346_v6  ;;  %10657 = vpow2.f32 %v3545_v21  ;;  %vm4090_vm6 = vcmp.ge.f32.partialorder %v14067_v19, 0.0 }
 0x489   : > { %v9331_v34 = vpack.c.bf16 %v7164_v42, %v7164_v42  ;;  %v4986_v17 = vsel %vm3962_vm5, %v4474_v16, %v4730_v55  ;;  %v3295_v58 = vmul.f32 1.442695, %v2944_v7  ;;  %v5114_v59 = vsel %vm4090_vm6, %v4602_v3, %v4858_v60 }
 0x48a   : > { %v10650_v54 = vpop.eup %10649  ;;  %v5626_v40 = vadd.f32 %v5370_v39, %v4602_v3  ;;  %v6138_v62 = vadd.f32 %v5882_v36, %v3834_v13  ;;  %v2816_v23 = vand.u32 2147483647, %v14155_v9  ;;  %v14169_v46 = vadd.f32 %v14042_v47, %v13809_v57 }
 0x48b   : > { %8445 = vst.msk [vmem:[%s11437_s29 + $0x36c] sm:$0xf] %vm8225_vm9, %v9331_v34  ;;  %v3711_v52 = vmul.f32 %v10650_v54, %v10650_v54  ;;  %v4223_v28 = vmul.f32 2.0, %v10650_v54  ;;  %10659 = vpow2.f32 %v3295_v58  ;;  %vm3967_vm7 = vcmp.ge.f32.partialorder %v14104_v12, 0.0 }
 0x48c   : > { %v6394_v10 = vsel %vm4090_vm6, %v5626_v40, %v6138_v62  ;;  %v6522_v4 = vmul.f32 %v4986_v17, %v14046_v43  ;;  %v6650_v25 = vmul.f32 %v5114_v59, %v14067_v19  ;;  %vm4095_vm8 = vcmp.ge.f32.partialorder %v14117_v15, 0.0  ;;  %v14183_v17 = vpop.f32.mrb[107].mxu1 }
 0x48d   : > { %10661 = vrcp.f32 %v6394_v10  ;;  %v4479_v16 = vadd.f32 1.0, %v4223_v28  ;;  %v5247_v14 = vmul.f32 2.0, %v3711_v52  ;;  %v5759_v33 = vadd.f32 2.0, %v4223_v28 }
 0x48e   : > { %v10652_v24 = vpop.eup %10651  ;;  %v3072_v27 = vsub.f32 0.0, %v2816_v23  ;;  %vm3965_vm10 = vcmp.ge.f32.partialorder %v14121_v61, 0.0  ;;  %v2686_v30 = vand.u32 2147483647, %v14169_v46  ;;  %v14179_v19 = vadd.f32 %v14042_v47, %v13811_v32 }
 0x48f   : > { %v10654_v21 = vpop.eup %10653  ;;  %v5503_v13 = vadd.f32 %v5247_v14, %v4479_v16  ;;  %v3839_v6 = vmul.f32 %v10652_v24, %v10652_v24  ;;  %v4351_v53 = vmul.f32 2.0, %v10652_v24  ;;  %v6015_v57 = vadd.f32 %v5759_v33, %v3711_v52 }
 0x490   : > { %v3709_v18 = vmul.f32 %v10654_v21, %v10654_v21  ;;  %v4221_v55 = vmul.f32 2.0, %v10654_v21  ;;  %v4735_v7 = vadd.f32 %v4223_v28, %v3711_v52  ;;  %v3551_v58 = vmul.f32 1.442695, %v3072_v27 }
 0x491   : > { %v10656_v42 = vpop.eup %10655  ;;  %v4607_v3 = vadd.f32 1.0, %v4351_v53  ;;  %v5375_v43 = vmul.f32 2.0, %v3839_v6  ;;  %v5887_v60 = vadd.f32 2.0, %v4351_v53  ;;  %v6271_v34 = vsel %vm3967_vm7, %v5503_v13, %v6015_v57 }
 0x492   : > { %v10658_v39 = vpop.eup %10657  ;;  %v7034_v36 = vmul.f32 %v10656_v42, %v6522_v4  ;;  %v4477_v54 = vadd.f32 1.0, %v4221_v55  ;;  %10663 = vrcp.f32 %v6271_v34  ;;  %v4863_v23 = vadd.f32 %v4351_v53, %v3839_v6  ;;  %v14193_v42 = vpop.f32.mrb[108].mxu0 }
 0x493   : > { %v5631_v40 = vadd.f32 %v5375_v43, %v4607_v3  ;;  %v6143_v62 = vadd.f32 %v5887_v60, %v3839_v6  ;;  %v5245_v10 = vmul.f32 2.0, %v3709_v18  ;;  %vm4093_vm11 = vcmp.ge.f32.partialorder %v14125_v20, 0.0  ;;  %v14195_v43 = vpop.f32.mrb[108].mxu1 }
 0x494   : > { %v9201_v59 = vpack.c.bf16 %v7034_v36, %v7034_v36  ;;  %v2942_v32 = vsub.f32 0.0, %v2686_v30  ;;  %v5757_v28 = vadd.f32 2.0, %v4221_v55  ;;  %v3837_v14 = vmul.f32 %v10658_v39, %v10658_v39 }
 0x495   : > { %v6399_v52 = vsel %vm4095_vm8, %v5631_v40, %v6143_v62  ;;  %v2814_v24 = vand.u32 2147483647, %v14179_v19  ;;  %v10660_v4 = vpop.eup %10659  ;;  %v4991_v33 = vsel %vm3967_vm7, %v4479_v16, %v4735_v7  ;;  %v5501_v21 = vadd.f32 %v5245_v10, %v4477_v54 }
 0x496   : > { %8315 = vst.msk [vmem:[%s11437_s29 + $0x164] sm:$0xf] %vm8225_vm9, %v9201_v59  ;;  %10665 = vrcp.f32 %v6399_v52  ;;  %v4349_v13 = vmul.f32 2.0, %v10658_v39  ;;  %v6013_v53 = vadd.f32 %v5757_v28, %v3709_v18  ;;  %v5373_v27 = vmul.f32 2.0, %v3837_v14  ;;  %v14202_v52 = vpop.f32.mrb[109].mxu0 }
 0x497   : > { %v10662_v6 = vpop.eup %10661  ;;  %v3712_v57 = vmul.f32 %v10660_v4, %v10660_v4  ;;  %v4224_v30 = vmul.f32 2.0, %v10660_v4  ;;  %v5119_v36 = vsel %vm4095_vm8, %v4607_v3, %v4863_v23  ;;  %v3291_v62 = vmul.f32 1.442695, %v2942_v32  ;;  %v14208_v32 = vpop.f32.mrb[109].mxu1 }
 0x498   : > { %v7162_v60 = vmul.f32 %v10662_v6, %v6650_v25  ;;  %v4605_v34 = vadd.f32 1.0, %v4349_v13  ;;  %v5885_v40 = vadd.f32 2.0, %v4349_v13  ;;  %v6269_v16 = vsel %vm3965_vm10, %v5501_v21, %v6013_v53 }
 0x499   : > { %v4480_v39 = vadd.f32 1.0, %v4224_v30  ;;  %v5248_v7 = vmul.f32 2.0, %v3712_v57  ;;  %10667 = vrcp.f32 %v6269_v16  ;;  %vm3968_vm12 = vcmp.ge.f32.partialorder %v14143_v51, 0.0 }
 0x49a   : > { %v9329_v59 = vpack.c.bf16 %v7162_v60, %v7162_v60  ;;  %v5629_v10 = vadd.f32 %v5373_v27, %v4605_v34  ;;  %v6527_v25 = vmul.f32 %v4991_v33, %v14104_v12  ;;  %v6655_v3 = vmul.f32 %v5119_v36, %v14117_v15 }
 0x49b   : > { %v4733_v23 = vadd.f32 %v4221_v55, %v3709_v18  ;;  %v6141_v28 = vadd.f32 %v5885_v40, %v3837_v14  ;;  %v5504_v4 = vadd.f32 %v5248_v7, %v4480_v39  ;;  %v5760_v21 = vadd.f32 2.0, %v4224_v30  ;;  %v14234_v7 = vpop.f32.mrb[110].mxu0 }
 0x49c   : > { %8443 = vst.msk [vmem:[%s11437_s29 + $0x364] sm:$0xf] %vm8225_vm9, %v9329_v59  ;;  %10669 = vpow2.f32 %v3551_v58  ;;  %v3070_v6 = vsub.f32 0.0, %v2814_v24  ;;  %v10664_v53 = vpop.eup %10663  ;;  %v4861_v27 = vadd.f32 %v4349_v13, %v3837_v14  ;;  %v14214_v12 = vadd.f32 %v14042_v47, %v13832_v35 }
 0x49d   : > { %v6397_v60 = vsel %vm4093_vm11, %v5629_v10, %v6141_v28  ;;  %10671 = vpow2.f32 %v3291_v62  ;;  %v7039_v15 = vmul.f32 %v10664_v53, %v6527_v25  ;;  %v6016_v18 = vadd.f32 %v5760_v21, %v3712_v57  ;;  %v14243_v28 = vpop.f32.mrb[110].mxu1 }
 0x49e   : > { %10673 = vrcp.f32 %v6397_v60  ;;  %v3547_v55 = vmul.f32 1.442695, %v3070_v6  ;;  %v4989_v58 = vsel %vm3965_vm10, %v4477_v54, %v4733_v23  ;;  %v2691_v24 = vand.u32 2147483647, %v14214_v12 }
 0x49f   : > { %v14221_v14 = vadd.f32 %v14042_v47, %v13834_v11  ;;  %v14225_v33 = vadd.f32 %v14042_v47, %v13845_v41  ;;  %v9206_v13 = vpack.c.bf16 %v7039_v15, %v7039_v15  ;;  %v6272_v36 = vsel %vm3968_vm12, %v5504_v4, %v6016_v18 }
 0x4a0   : > { %v10666_v35 = vpop.eup %10665  ;;  %10675 = vpow2.f32 %v3547_v55  ;;  %v14231_v40 = vadd.f32 %v14042_v47, %v13852_v63  ;;  %v2947_v16 = vsub.f32 0.0, %v2691_v24  ;;  %v5117_v41 = vsel %vm4093_vm11, %v4605_v34, %v4861_v27 }
 0x4a1   : > { %v7167_v54 = vmul.f32 %v10666_v35, %v6655_v3  ;;  %10677 = vrcp.f32 %v6272_v36  ;;  %v2819_v11 = vand.u32 2147483647, %v14221_v14  ;;  %8320 = vst.msk [vmem:[%s11437_s29 + $0x178] sm:$0xf] %vm8225_vm9, %v9206_v13  ;;  %v4736_v62 = vadd.f32 %v4224_v30, %v3712_v57 }
 0x4a2   : > { %v2689_v59 = vand.u32 2147483647, %v14225_v33  ;;  %v2817_v10 = vand.u32 2147483647, %v14231_v40  ;;  %v6525_v25 = vmul.f32 %v4989_v58, %v14121_v61  ;;  %v3301_v3 = vmul.f32 1.442695, %v2947_v16 }
 0x4a3   : > { %v9334_v63 = vpack.c.bf16 %v7167_v54, %v7167_v54  ;;  %v3075_v23 = vsub.f32 0.0, %v2819_v11  ;;  %v10668_v4 = vpop.eup %10667  ;;  %v14247_v6 = vadd.f32 %v14042_v47, %v13865_v31  ;;  %v6653_v30 = vmul.f32 %v5117_v41, %v14125_v20 }
 0x4a4   : > { %v2945_v21 = vsub.f32 0.0, %v2689_v59  ;;  %v7037_v57 = vmul.f32 %v10668_v4, %v6525_v25  ;;  %vm4096_vm13 = vcmp.ge.f32.partialorder %v14155_v9, 0.0  ;;  %10679 = vpow2.f32 %v3301_v3 }
 0x4a5   : > { %8448 = vst.msk [vmem:[%s11437_s29 + $0x378] sm:$0xf] %vm8225_vm9, %v9334_v63  ;;  %v3557_v34 = vmul.f32 1.442695, %v3075_v23  ;;  %v4992_v53 = vsel %vm3968_vm12, %v4480_v39, %v4736_v62  ;;  %v3073_v60 = vsub.f32 0.0, %v2817_v10  ;;  %vm3966_vm14 = vcmp.ge.f32.partialorder %v14169_v46, 0.0 }
 0x4a6   : > { %v10670_v61 = vpop.eup %10669  ;;  %v3297_v27 = vmul.f32 1.442695, %v2945_v21  ;;  %v2692_v15 = vand.u32 2147483647, %v14247_v6  ;;  %v9204_v18 = vpack.c.bf16 %v7037_v57, %v7037_v57  ;;  %v6528_v39 = vmul.f32 %v4992_v53, %v14143_v51 }
 0x4a7   : > { %v10672_v31 = vpop.eup %10671  ;;  %v3840_v55 = vmul.f32 %v10670_v61, %v10670_v61  ;;  %v4352_v58 = vmul.f32 2.0, %v10670_v61  ;;  %10681 = vpow2.f32 %v3557_v34  ;;  %v3553_v59 = vmul.f32 1.442695, %v3073_v60 }
 0x4a8   : > { %v10674_v24 = vpop.eup %10673  ;;  %v3710_v20 = vmul.f32 %v10672_v31, %v10672_v31  ;;  %v4222_v35 = vmul.f32 2.0, %v10672_v31  ;;  %10683 = vpow2.f32 %v3297_v27  ;;  %8318 = vst.msk [vmem:[%s11437_s29 + $0x170] sm:$0xf] %vm8225_vm9, %v9204_v18  ;;  %v2948_v23 = vsub.f32 0.0, %v2692_v15 }
 0x4a9   : > { %v7165_v13 = vmul.f32 %v10674_v24, %v6653_v30  ;;  %v4608_v36 = vadd.f32 1.0, %v4352_v58  ;;  %v5376_v54 = vmul.f32 2.0, %v3840_v55  ;;  %v5888_v11 = vadd.f32 2.0, %v4352_v58 }
 0x4aa   : > { %v10676_v16 = vpop.eup %10675  ;;  %v4478_v41 = vadd.f32 1.0, %v4222_v35  ;;  %v5246_v62 = vmul.f32 2.0, %v3710_v20  ;;  %v5758_v3 = vadd.f32 2.0, %v4222_v35  ;;  %v4864_v21 = vadd.f32 %v4352_v58, %v3840_v55 }
 0x4ab   : > { %v10678_v10 = vpop.eup %10677  ;;  %v9332_v63 = vpack.c.bf16 %v7165_v13, %v7165_v13  ;;  %v5632_v25 = vadd.f32 %v5376_v54, %v4608_v36  ;;  %v6144_v57 = vadd.f32 %v5888_v11, %v3840_v55  ;;  %vm4094_vm15 = vcmp.ge.f32.partialorder %v14179_v19, 0.0 }
 0x4ac   : > { %v7040_v4 = vmul.f32 %v10678_v10, %v6528_v39  ;;  %v4734_v51 = vadd.f32 %v4222_v35, %v3710_v20  ;;  %v5502_v30 = vadd.f32 %v5246_v62, %v4478_v41  ;;  %v6014_v34 = vadd.f32 %v5758_v3, %v3710_v20 }
 0x4ad   : > { %8446 = vst.msk [vmem:[%s11437_s29 + $0x370] sm:$0xf] %vm8225_vm9, %v9332_v63  ;;  %v3838_v61 = vmul.f32 %v10676_v16, %v10676_v16  ;;  %v6400_v27 = vsel %vm4096_vm13, %v5632_v25, %v6144_v57  ;;  %v4350_v60 = vmul.f32 2.0, %v10676_v16  ;;  %10685 = vpow2.f32 %v3553_v59 }
 0x4ae   : > { %v9207_v53 = vpack.c.bf16 %v7040_v4, %v7040_v4  ;;  %v10680_v31 = vpop.eup %10679  ;;  %10687 = vrcp.f32 %v6400_v27  ;;  %v6270_v15 = vsel %vm3966_vm14, %v5502_v30, %v6014_v34  ;;  %vm3971_vm0 = vcmp.ge.f32.partialorder %v14214_v12, 0.0  ;;  %v15213_v27 = vld [vmem:[#allocation5_spill] sm:$0xff] }
 0x4af   : > { %v5374_v18 = vmul.f32 2.0, %v3838_v61  ;;  %v3303_v55 = vmul.f32 1.442695, %v2948_v23  ;;  %10689 = vrcp.f32 %v6270_v15  ;;  %v4606_v58 = vadd.f32 1.0, %v4350_v60 }
 0x4b0   : > { %8321 = vst.msk [vmem:[%s11437_s29 + $0x17c] sm:$0xf] %vm8225_vm9, %v9207_v53  ;;  %v5886_v24 = vadd.f32 2.0, %v4350_v60  ;;  %v14272_v20 = vadd.f32 %v14042_v47, %v13896_v38  ;;  %v5120_v13 = vsel %vm4096_vm13, %v4608_v36, %v4864_v21  ;;  %v3715_v39 = vmul.f32 %v10680_v31, %v10680_v31 }
 0x4b1   : > { %v10682_v35 = vpop.eup %10681  ;;  %v4227_v54 = vmul.f32 2.0, %v10680_v31  ;;  %10691 = vpow2.f32 %v3303_v55  ;;  %v4990_v11 = vsel %vm3966_vm14, %v4478_v41, %v4734_v51  ;;  %v5630_v62 = vadd.f32 %v5374_v18, %v4606_v58  ;;  %v15212_v41 = vld [vmem:[#allocation4_spill] sm:$0xff] }
 0x4b2   : > { %v10684_v16 = vpop.eup %10683  ;;  %v6142_v59 = vadd.f32 %v5886_v24, %v3838_v61  ;;  %v3843_v10 = vmul.f32 %v10682_v35, %v10682_v35  ;;  %vm4099_vm1 = vcmp.ge.f32.partialorder %v14221_v14, 0.0  ;;  %v4862_v63 = vadd.f32 %v4350_v60, %v3838_v61  ;;  %v14292_v24 = vpop.f32.mrb[111].mxu0 }
 0x4b3   : > { %v4483_v25 = vadd.f32 1.0, %v4227_v54  ;;  %v4739_v38 = vadd.f32 %v4227_v54, %v3715_v39  ;;  %v5251_v3 = vmul.f32 2.0, %v3715_v39  ;;  %v5763_v36 = vadd.f32 2.0, %v4227_v54 }
 0x4b4   : > { %v6398_v23 = vsel %vm4094_vm15, %v5630_v62, %v6142_v59  ;;  %v4355_v4 = vmul.f32 2.0, %v10682_v35  ;;  %v5379_v21 = vmul.f32 2.0, %v3843_v10  ;;  %v3713_v30 = vmul.f32 %v10684_v16, %v10684_v16  ;;  %v14300_v62 = vpop.f32.mrb[111].mxu1 }
 0x4b5   : > { %10693 = vrcp.f32 %v6398_v23  ;;  %v5507_v57 = vadd.f32 %v5251_v3, %v4483_v25  ;;  %vm3969_vm2 = vcmp.ge.f32.partialorder %v14225_v33, 0.0  ;;  %v14284_v51 = vadd.f32 %v14042_v47, %v15212_v41 }
 0x4b6   : > { %v6656_v34 = vmul.f32 %v5120_v13, %v14155_v9  ;;  %v6019_v61 = vadd.f32 %v5763_v36, %v3715_v39  ;;  %v4611_v53 = vadd.f32 1.0, %v4355_v4  ;;  %v14289_v60 = vadd.f32 %v14042_v47, %v15213_v27 }
 0x4b7   : > { %v6526_v31 = vmul.f32 %v4990_v11, %v14169_v46  ;;  %v5891_v15 = vadd.f32 2.0, %v4355_v4  ;;  %v4225_v18 = vmul.f32 2.0, %v10684_v16  ;;  %v5249_v55 = vmul.f32 2.0, %v3713_v30  ;;  %v10686_v35 = vpop.eup %10685 }
 0x4b8   : > { %v5118_v54 = vsel %vm4094_vm15, %v4606_v58, %v4862_v63  ;;  %v4995_v9 = vsel %vm3971_vm0, %v4483_v25, %v4739_v38  ;;  %v6275_v13 = vsel %vm3971_vm0, %v5507_v57, %v6019_v61  ;;  %v5635_v39 = vadd.f32 %v5379_v21, %v4611_v53  ;;  %v10688_v59 = vpop.eup %10687 }
 0x4b9   : > { %10695 = vrcp.f32 %v6275_v13  ;;  %v4867_v46 = vadd.f32 %v4355_v4, %v3843_v10  ;;  %v6147_v16 = vadd.f32 %v5891_v15, %v3843_v10  ;;  %v4481_v11 = vadd.f32 1.0, %v4225_v18  ;;  %v10690_v3 = vpop.eup %10689 }
 0x4ba   : > { %vm4097_vm3 = vcmp.ge.f32.partialorder %v14231_v40, 0.0  ;;  %v7168_v23 = vmul.f32 %v10688_v59, %v6656_v34  ;;  %v5761_v36 = vadd.f32 2.0, %v4225_v18  ;;  %v3841_v58 = vmul.f32 %v10686_v35, %v10686_v35 }
 0x4bb   : > { %v2820_v63 = vand.u32 2147483647, %v14272_v20  ;;  %v10692_v25 = vpop.eup %10691  ;;  %v7038_v38 = vmul.f32 %v10690_v3, %v6526_v31  ;;  %v6403_v21 = vsel %vm4099_vm1, %v5635_v39, %v6147_v16  ;;  %v5505_v57 = vadd.f32 %v5249_v55, %v4481_v11 }
 0x4bc   : > { %v4353_v41 = vmul.f32 2.0, %v10686_v35  ;;  %v9335_v4 = vpack.c.bf16 %v7168_v23, %v7168_v23  ;;  %10697 = vrcp.f32 %v6403_v21  ;;  %v6017_v10 = vadd.f32 %v5761_v36, %v3713_v30 }
 0x4bd   : > { %vm3972_vm4 = vcmp.ge.f32.partialorder %v14247_v6, 0.0  ;;  %v9205_v61 = vpack.c.bf16 %v7038_v38, %v7038_v38  ;;  %v6654_v34 = vmul.f32 %v5118_v54, %v14179_v19  ;;  %v6531_v27 = vmul.f32 %v4995_v9, %v14214_v12 }
 0x4be   : > { %v4609_v15 = vadd.f32 1.0, %v4353_v41  ;;  %8449 = vst.msk [vmem:[%s11437_s29 + $0x37c] sm:$0xf] %vm8225_vm9, %v9335_v4  ;;  %v6273_v31 = vsel %vm3969_vm2, %v5505_v57, %v6017_v10  ;;  %v5377_v13 = vmul.f32 2.0, %v3841_v58  ;;  %v5889_v55 = vadd.f32 2.0, %v4353_v41 }
 0x4bf   : > { %v3716_v39 = vmul.f32 %v10692_v25, %v10692_v25  ;;  %v10694_v35 = vpop.eup %10693  ;;  %8319 = vst.msk [vmem:[%s11437_s29 + $0x174] sm:$0xf] %vm8225_vm9, %v9205_v61  ;;  %v5123_v59 = vsel %vm4099_vm1, %v4611_v53, %v4867_v46  ;;  %10699 = vrcp.f32 %v6273_v31  ;;  %v4228_v16 = vmul.f32 2.0, %v10692_v25  ;;  %v14320_v53 = vpop.f32.mrb[112].mxu0 }
 0x4c0   : > { %v3076_v19 = vsub.f32 0.0, %v2820_v63  ;;  %v7166_v54 = vmul.f32 %v10694_v35, %v6654_v34  ;;  %v4737_v12 = vadd.f32 %v4225_v18, %v3713_v30  ;;  %v5633_v9 = vadd.f32 %v5377_v13, %v4609_v15  ;;  %v14322_v46 = vpop.f32.mrb[112].mxu1  ;;  %v14325_v25 = vpop.f32.mrb[113].mxu0 }
 0x4c1   : > { %v6145_v3 = vadd.f32 %v5889_v55, %v3841_v58  ;;  %v4865_v23 = vadd.f32 %v4353_v41, %v3841_v58  ;;  %v4484_v36 = vadd.f32 1.0, %v4228_v16  ;;  %v5252_v38 = vmul.f32 2.0, %v3716_v39 }
 0x4c2   : > { %v5764_v21 = vadd.f32 2.0, %v4228_v16  ;;  %v9333_v57 = vpack.c.bf16 %v7166_v54, %v7166_v54  ;;  %v3559_v10 = vmul.f32 1.442695, %v3076_v19  ;;  %v2690_v61 = vand.u32 2147483647, %v14284_v51 }
 0x4c3   : > { %v6401_v4 = vsel %vm4097_vm3, %v5633_v9, %v6145_v3  ;;  %v10696_v63 = vpop.eup %10695  ;;  %v6659_v30 = vmul.f32 %v5123_v59, %v14221_v14  ;;  %v5508_v18 = vadd.f32 %v5252_v38, %v4484_v36  ;;  %v4993_v34 = vsel %vm3969_vm2, %v4481_v11, %v4737_v12  ;;  %v14336_v59 = vpop.f32.mrb[113].mxu1 }
 0x4c4   : > { %10701 = vrcp.f32 %v6401_v4  ;;  %v6020_v58 = vadd.f32 %v5764_v21, %v3716_v39  ;;  %8447 = vst.msk [vmem:[%s11437_s29 + $0x374] sm:$0xf] %vm8225_vm9, %v9333_v57  ;;  %v7043_v41 = vmul.f32 %v10696_v63, %v6531_v27  ;;  %v2946_v31 = vsub.f32 0.0, %v2690_v61 }
 0x4c5   : > { %10703 = vpow2.f32 %v3559_v10  ;;  %v5121_v13 = vsel %vm4097_vm3, %v4609_v15, %v4865_v23  ;;  %v4740_v55 = vadd.f32 %v4228_v16, %v3716_v39  ;;  %v2818_v35 = vand.u32 2147483647, %v14289_v60 }
 0x4c6   : > { %v6276_v14 = vsel %vm3972_vm4, %v5508_v18, %v6020_v58  ;;  %v10698_v19 = vpop.eup %10697  ;;  %v9210_v54 = vpack.c.bf16 %v7043_v41, %v7043_v41  ;;  %v3299_v27 = vmul.f32 1.442695, %v2946_v31  ;;  %v14340_v11 = vadd.f32 %v14042_v47, %v13954_v45  ;;  %v14372_v41 = vpop.f32.mrb[114].mxu1 }
 0x4c7   : > { %10705 = vrcp.f32 %v6276_v14  ;;  %v7171_v12 = vmul.f32 %v10698_v19, %v6659_v30  ;;  %v3074_v9 = vsub.f32 0.0, %v2818_v35  ;;  %v14344_v15 = vadd.f32 %v14042_v47, %v13956_v0  ;;  %15215 = vst [vmem:[#allocation7_spill] sm:$0xff] %v14372_v41 }
 0x4c8   : > { %v14348_v39 = vadd.f32 %v14042_v47, %v13969_v22  ;;  %8324 = vst.msk [vmem:[%s11437_s29 + $0x188] sm:$0xf] %vm8225_vm9, %v9210_v54  ;;  %v6529_v16 = vmul.f32 %v4993_v34, %v14225_v33  ;;  %10707 = vpow2.f32 %v3299_v27  ;;  %v2695_v3 = vand.u32 2147483647, %v14340_v11  ;;  %v14361_v33 = vpop.f32.mrb[114].mxu0 }
 0x4c9   : > { %v14356_v45 = vadd.f32 %v14042_v47, %v13971_v29  ;;  %v10700_v23 = vpop.eup %10699  ;;  %v9338_v38 = vpack.c.bf16 %v7171_v12, %v7171_v12  ;;  %v3555_v0 = vmul.f32 1.442695, %v3074_v9  ;;  %v2823_v21 = vand.u32 2147483647, %v14344_v15  ;;  %15214 = vst [vmem:[#allocation6_spill] sm:$0xff] %v14361_v33 }
 0x4ca   : > { %v7041_v57 = vmul.f32 %v10700_v23, %v6529_v16  ;;  %v6657_v22 = vmul.f32 %v5121_v13, %v14231_v40  ;;  %v2951_v4 = vsub.f32 0.0, %v2695_v3  ;;  %v2693_v10 = vand.u32 2147483647, %v14348_v39 }
 0x4cb   : > { %8452 = vst.msk [vmem:[%s11437_s29 + $0x388] sm:$0xf] %vm8225_vm9, %v9338_v38  ;;  %v4996_v29 = vsel %vm3972_vm4, %v4484_v36, %v4740_v55  ;;  %10709 = vpow2.f32 %v3555_v0  ;;  %v3079_v61 = vsub.f32 0.0, %v2823_v21  ;;  %v2821_v63 = vand.u32 2147483647, %v14356_v45 }
 0x4cc   : > { %v9208_v30 = vpack.c.bf16 %v7041_v57, %v7041_v57  ;;  %v3309_v18 = vmul.f32 1.442695, %v2951_v4  ;;  %v2949_v58 = vsub.f32 0.0, %v2693_v10  ;;  %v14370_v40 = vadd.f32 %v14042_v47, %v13989_v50  ;;  %v14384_v4 = vld [vmem:[%s15170_s2] ss:$0 sm:$0xff] }
 0x4cd   : > { %v3565_v31 = vmul.f32 1.442695, %v3079_v61  ;;  %v3077_v13 = vsub.f32 0.0, %v2821_v63  ;;  %v6532_v19 = vmul.f32 %v4996_v29, %v14247_v6  ;;  %vm4100_vm5 = vcmp.ge.f32.partialorder %v14272_v20, 0.0 }
 0x4ce   : > { %v10702_v34 = vpop.eup %10701  ;;  %8322 = vst.msk [vmem:[%s11437_s29 + $0x180] sm:$0xf] %vm8225_vm9, %v9208_v30  ;;  %10711 = vpow2.f32 %v3309_v18  ;;  %v3305_v55 = vmul.f32 1.442695, %v2949_v58  ;;  %v2696_v35 = vand.u32 2147483647, %v14370_v40  ;;  %v14388_v10 = vadd.f32 %v14384_v4, %v14001_v8 }
 0x4cf   : > { %v10704_v14 = vpop.eup %10703  ;;  %v7169_v36 = vmul.f32 %v10702_v34, %v6657_v22  ;;  %10713 = vpow2.f32 %v3565_v31  ;;  %v3561_v12 = vmul.f32 1.442695, %v3077_v13  ;;  %vm3970_vm6 = vcmp.ge.f32.partialorder %v14284_v51, 0.0 }
 0x4d0   : > { %v3844_v54 = vmul.f32 %v10704_v14, %v10704_v14  ;;  %v4356_v27 = vmul.f32 2.0, %v10704_v14  ;;  %v2952_v9 = vsub.f32 0.0, %v2696_v35  ;;  %10715 = vpow2.f32 %v3305_v55 }
 0x4d1   : > { %v10706_v50 = vpop.eup %10705  ;;  %v9336_v47 = vpack.c.bf16 %v7169_v36, %v7169_v36  ;;  %vm4098_vm7 = vcmp.ge.f32.partialorder %v14289_v60, 0.0  ;;  %10717 = vpow2.f32 %v3561_v12  ;;  %v14396_v58 = vadd.f32 %v14384_v4, %v14051_v49 }
 0x4d2   : > { %v7044_v16 = vmul.f32 %v10706_v50, %v6532_v19  ;;  %v4612_v3 = vadd.f32 1.0, %v4356_v27  ;;  %v5380_v23 = vmul.f32 2.0, %v3844_v54  ;;  %v10708_v38 = vpop.eup %10707  ;;  %v4868_v0 = vadd.f32 %v4356_v27, %v3844_v54 }
 0x4d3   : > { %8450 = vst.msk [vmem:[%s11437_s29 + $0x380] sm:$0xf] %vm8225_vm9, %v9336_v47  ;;  %v5892_v21 = vadd.f32 2.0, %v4356_v27  ;;  %v3714_v22 = vmul.f32 %v10708_v38, %v10708_v38  ;;  %v4226_v61 = vmul.f32 2.0, %v10708_v38  ;;  %v3311_v63 = vmul.f32 1.442695, %v2952_v9 }
 0x4d4   : > { %v9211_v6 = vpack.c.bf16 %v7044_v16, %v7044_v16  ;;  %v5636_v57 = vadd.f32 %v5380_v23, %v4612_v3  ;;  %v5124_v8 = vsel %vm4100_vm5, %v4612_v3, %v4868_v0  ;;  %v2824_v55 = vand.u32 2147483647, %v14388_v10 }
 0x4d5   : > { %v6148_v29 = vadd.f32 %v5892_v21, %v3844_v54  ;;  %v10710_v30 = vpop.eup %10709  ;;  %v5250_v18 = vmul.f32 2.0, %v3714_v22  ;;  %v4482_v31 = vadd.f32 1.0, %v4226_v61  ;;  %v5762_v13 = vadd.f32 2.0, %v4226_v61 }
 0x4d6   : > { %8325 = vst.msk [vmem:[%s11437_s29 + $0x18c] sm:$0xf] %vm8225_vm9, %v9211_v6  ;;  %v3842_v14 = vmul.f32 %v10710_v30, %v10710_v30  ;;  %v4354_v36 = vmul.f32 2.0, %v10710_v30  ;;  %v4738_v19 = vadd.f32 %v4226_v61, %v3714_v22  ;;  %v6660_v50 = vmul.f32 %v5124_v8, %v14272_v20 }
 0x4d7   : > { %v6404_v34 = vsel %vm4100_vm5, %v5636_v57, %v6148_v29  ;;  %v5506_v54 = vadd.f32 %v5250_v18, %v4482_v31  ;;  %v6018_v27 = vadd.f32 %v5762_v13, %v3714_v22  ;;  %vm3975_vm8 = vcmp.ge.f32.partialorder %v14340_v11, 0.0  ;;  %v14407_v57 = vpop.f32.mrb[115].mxu0 }
 0x4d8   : > { %10719 = vrcp.f32 %v6404_v34  ;;  %v10712_v35 = vpop.eup %10711  ;;  %v4610_v47 = vadd.f32 1.0, %v4354_v36  ;;  %v5378_v12 = vmul.f32 2.0, %v3842_v14  ;;  %v5890_v16 = vadd.f32 2.0, %v4354_v36  ;;  %15216 = vst [vmem:[#allocation8_spill] sm:$0xff] %v14407_v57 }
 0x4d9   : > { %10721 = vpow2.f32 %v3311_v63  ;;  %v10714_v49 = vpop.eup %10713  ;;  %v6274_v9 = vsel %vm3970_vm6, %v5506_v54, %v6018_v27  ;;  %v3719_v3 = vmul.f32 %v10712_v35, %v10712_v35  ;;  %v4231_v23 = vmul.f32 2.0, %v10712_v35 }
 0x4da   : > { %v10716_v38 = vpop.eup %10715  ;;  %10723 = vrcp.f32 %v6274_v9  ;;  %v5634_v0 = vadd.f32 %v5378_v12, %v4610_v47  ;;  %v3847_v21 = vmul.f32 %v10714_v49, %v10714_v49  ;;  %v3080_v6 = vsub.f32 0.0, %v2824_v55 }
 0x4db   : > { %v4994_v20 = vsel %vm3970_vm6, %v4482_v31, %v4738_v19  ;;  %v6146_v22 = vadd.f32 %v5890_v16, %v3842_v14  ;;  %v4487_v29 = vadd.f32 1.0, %v4231_v23  ;;  %vm4103_vm10 = vcmp.ge.f32.partialorder %v14344_v15, 0.0  ;;  %v10718_v54 = vpop.eup %10717 }
 0x4dc   : > { %v2694_v61 = vand.u32 2147483647, %v14396_v58  ;;  %v4866_v63 = vadd.f32 %v4354_v36, %v3842_v14  ;;  %v5255_v30 = vmul.f32 2.0, %v3719_v3  ;;  %v5767_v18 = vadd.f32 2.0, %v4231_v23  ;;  %v14416_v36 = vpop.f32.mrb[115].mxu1 }
 0x4dd   : > { %v4359_v8 = vmul.f32 2.0, %v10714_v49  ;;  %vm3973_vm11 = vcmp.ge.f32.partialorder %v14348_v39, 0.0  ;;  %v6402_v34 = vsel %vm4098_vm7, %v5634_v0, %v6146_v22  ;;  %v5383_v13 = vmul.f32 2.0, %v3847_v21 }
 0x4de   : > { %v3717_v55 = vmul.f32 %v10716_v38, %v10716_v38  ;;  %v4229_v35 = vmul.f32 2.0, %v10716_v38  ;;  %10725 = vrcp.f32 %v6402_v34  ;;  %v4743_v31 = vadd.f32 %v4231_v23, %v3719_v3 }
 0x4df   : > { %v5511_v19 = vadd.f32 %v5255_v30, %v4487_v29  ;;  %v6023_v27 = vadd.f32 %v5767_v18, %v3719_v3  ;;  %v4615_v12 = vadd.f32 1.0, %v4359_v8  ;;  %v5895_v9 = vadd.f32 2.0, %v4359_v8 }
 0x4e0   : > { %v4485_v16 = vadd.f32 1.0, %v4229_v35  ;;  %v3567_v14 = vmul.f32 1.442695, %v3080_v6  ;;  %v6530_v57 = vmul.f32 %v4994_v20, %v14284_v51  ;;  %v5253_v22 = vmul.f32 2.0, %v3717_v55 }
 0x4e1   : > { %v6279_v0 = vsel %vm3975_vm8, %v5511_v19, %v6023_v27  ;;  %v5765_v41 = vadd.f32 2.0, %v4229_v35  ;;  %v5122_v23 = vsel %vm4098_vm7, %v4610_v47, %v4866_v63  ;;  %v5639_v3 = vadd.f32 %v5383_v13, %v4615_v12 }
 0x4e2   : > { %v10720_v49 = vpop.eup %10719  ;;  %10727 = vrcp.f32 %v6279_v0  ;;  %vm4101_vm12 = vcmp.ge.f32.partialorder %v14356_v45, 0.0  ;;  %v4999_v6 = vsel %vm3975_vm8, %v4487_v29, %v4743_v31  ;;  %v4871_v30 = vadd.f32 %v4359_v8, %v3847_v21 }
 0x4e3   : > { %v10722_v38 = vpop.eup %10721  ;;  %v7172_v33 = vmul.f32 %v10720_v49, %v6660_v50  ;;  %v6151_v51 = vadd.f32 %v5895_v9, %v3847_v21  ;;  %v5509_v20 = vadd.f32 %v5253_v22, %v4485_v16  ;;  %v4741_v34 = vadd.f32 %v4229_v35, %v3717_v55  ;;  %v14434_v9 = vpop.f32.mrb[116].mxu0 }
 0x4e4   : > { %v6021_v19 = vadd.f32 %v5765_v41, %v3717_v55  ;;  %v3845_v27 = vmul.f32 %v10718_v54, %v10718_v54  ;;  %vm3976_vm13 = vcmp.ge.f32.partialorder %v14370_v40, 0.0  ;;  %v10724_v50 = vpop.eup %10723  ;;  %v4357_v63 = vmul.f32 2.0, %v10718_v54  ;;  %v14436_v22 = vpop.f32.mrb[116].mxu1 }
 0x4e5   : > { %v9339_v18 = vpack.c.bf16 %v7172_v33, %v7172_v33  ;;  %v6407_v47 = vsel %vm4103_vm10, %v5639_v3, %v6151_v51  ;;  %v3720_v13 = vmul.f32 %v10722_v38, %v10722_v38  ;;  %v4232_v49 = vmul.f32 2.0, %v10722_v38 }
 0x4e6   : > { %v7042_v0 = vmul.f32 %v10724_v50, %v6530_v57  ;;  %10729 = vrcp.f32 %v6407_v47  ;;  %v6277_v21 = vsel %vm3973_vm11, %v5509_v20, %v6021_v19  ;;  %v5381_v33 = vmul.f32 2.0, %v3845_v27  ;;  %v14445_v19 = vpop.f32.mrb[117].mxu0 }
 0x4e7   : > { %8453 = vst.msk [vmem:[%s11437_s29 + $0x38c] sm:$0xf] %vm8225_vm9, %v9339_v18  ;;  %10731 = vrcp.f32 %v6277_v21  ;;  %v4613_v41 = vadd.f32 1.0, %v4357_v63  ;;  %v5893_v29 = vadd.f32 2.0, %v4357_v63  ;;  %v2950_v8 = vsub.f32 0.0, %v2694_v61 }
 0x4e8   : > { %v9209_v55 = vpack.c.bf16 %v7042_v0, %v7042_v0  ;;  %v6658_v35 = vmul.f32 %v5122_v23, %v14289_v60  ;;  %v4488_v31 = vadd.f32 1.0, %v4232_v49  ;;  %v5256_v54 = vmul.f32 2.0, %v3720_v13  ;;  %v10726_v57 = vpop.eup %10725 }
 0x4e9   : > { %v6535_v38 = vmul.f32 %v4999_v6, %v14340_v11  ;;  %v5637_v3 = vadd.f32 %v5381_v33, %v4613_v41  ;;  %v6149_v51 = vadd.f32 %v5893_v29, %v3845_v27  ;;  %v5768_v20 = vadd.f32 2.0, %v4232_v49 }
 0x4ea   : > { %8323 = vst.msk [vmem:[%s11437_s29 + $0x184] sm:$0xf] %vm8225_vm9, %v9209_v55  ;;  %v7170_v18 = vmul.f32 %v10726_v57, %v6658_v35  ;;  %v5127_v61 = vsel %vm4103_vm10, %v4615_v12, %v4871_v30  ;;  %v4997_v60 = vsel %vm3973_vm11, %v4485_v16, %v4741_v34  ;;  %v5512_v23 = vadd.f32 %v5256_v54, %v4488_v31  ;;  %v14459_v34 = vpop.f32.mrb[117].mxu1 }
 0x4eb   : > { %v4869_v50 = vadd.f32 %v4357_v63, %v3845_v27  ;;  %v6405_v11 = vsel %vm4101_vm12, %v5637_v3, %v6149_v51  ;;  %v6024_v6 = vadd.f32 %v5768_v20, %v3720_v13  ;;  %10733 = vpow2.f32 %v3567_v14  ;;  %v14488_v51 = vpop.f32.mrb[118].mxu0 }
 0x4ec   : > { %v10728_v47 = vpop.eup %10727  ;;  %v9337_v0 = vpack.c.bf16 %v7170_v18, %v7170_v18  ;;  %10735 = vrcp.f32 %v6405_v11  ;;  %v4744_v21 = vadd.f32 %v4232_v49, %v3720_v13  ;;  %v3307_v33 = vmul.f32 1.442695, %v2950_v8 }
 0x4ed   : > { %v7047_v29 = vmul.f32 %v10728_v47, %v6535_v38  ;;  %v6280_v12 = vsel %vm3976_vm13, %v5512_v23, %v6024_v6  ;;  %v14453_v16 = vadd.f32 %v14384_v4, %v14061_v5  ;;  %v14457_v30 = vadd.f32 %v14384_v4, %v14081_v1 }
 0x4ee   : > { %8451 = vst.msk [vmem:[%s11437_s29 + $0x384] sm:$0xf] %vm8225_vm9, %v9337_v0  ;;  %10737 = vrcp.f32 %v6280_v12  ;;  %v14465_v14 = vadd.f32 %v14384_v4, %v14083_v2  ;;  %v14469_v27 = vadd.f32 %v14384_v4, %v14091_v37  ;;  %v14473_v5 = vadd.f32 %v14384_v4, %v14095_v56 }
 0x4ef   : > { %v9214_v1 = vpack.c.bf16 %v7047_v29, %v7047_v29  ;;  %v6663_v63 = vmul.f32 %v5127_v61, %v14344_v15  ;;  %10739 = vpow2.f32 %v3307_v33  ;;  %v2822_v13 = vand.u32 2147483647, %v14453_v16 }
 0x4f0   : > { %v10730_v49 = vpop.eup %10729  ;;  %v6533_v8 = vmul.f32 %v4997_v60, %v14348_v39  ;;  %v5125_v2 = vsel %vm4101_vm12, %v4613_v41, %v4869_v50  ;;  %v2699_v55 = vand.u32 2147483647, %v14457_v30  ;;  %v2827_v37 = vand.u32 2147483647, %v14465_v14 }
 0x4f1   : > { %v10732_v35 = vpop.eup %10731  ;;  %8328 = vst.msk [vmem:[%s11437_s29 + $0x198] sm:$0xf] %vm8225_vm9, %v9214_v1  ;;  %v7175_v56 = vmul.f32 %v10730_v49, %v6663_v63  ;;  %v5000_v15 = vsel %vm3976_vm13, %v4488_v31, %v4744_v21  ;;  %v3078_v54 = vsub.f32 0.0, %v2822_v13  ;;  %v2697_v57 = vand.u32 2147483647, %v14469_v27  ;;  %v14490_v31 = vpop.f32.mrb[118].mxu1 }
 0x4f2   : > { %v7045_v38 = vmul.f32 %v10732_v35, %v6533_v8  ;;  %v2955_v39 = vsub.f32 0.0, %v2699_v55  ;;  %v3083_v3 = vsub.f32 0.0, %v2827_v37  ;;  %v2825_v41 = vand.u32 2147483647, %v14473_v5 }
 0x4f3   : > { %v9342_v20 = vpack.c.bf16 %v7175_v56, %v7175_v56  ;;  %v3563_v18 = vmul.f32 1.442695, %v3078_v54  ;;  %v2953_v61 = vsub.f32 0.0, %v2697_v57  ;;  %v6661_v47 = vmul.f32 %v5125_v2, %v14356_v45 }
 0x4f4   : > { %v9212_v60 = vpack.c.bf16 %v7045_v38, %v7045_v38  ;;  %v3317_v23 = vmul.f32 1.442695, %v2955_v39  ;;  %v3573_v50 = vmul.f32 1.442695, %v3083_v3  ;;  %v3081_v11 = vsub.f32 0.0, %v2825_v41 }
 0x4f5   : > { %v10734_v6 = vpop.eup %10733  ;;  %8456 = vst.msk [vmem:[%s11437_s29 + $0x398] sm:$0xf] %vm8225_vm9, %v9342_v20  ;;  %v6536_v0 = vmul.f32 %v5000_v15, %v14370_v40  ;;  %10741 = vpow2.f32 %v3563_v18  ;;  %v14498_v21 = vadd.f32 %v14384_v4, %v14108_v26  ;;  %v3313_v1 = vmul.f32 1.442695, %v2953_v61 }
 0x4f6   : > { %v10736_v33 = vpop.eup %10735  ;;  %8326 = vst.msk [vmem:[%s11437_s29 + $0x190] sm:$0xf] %vm8225_vm9, %v9212_v60  ;;  %v3848_v29 = vmul.f32 %v10734_v6, %v10734_v6  ;;  %v4360_v12 = vmul.f32 2.0, %v10734_v6  ;;  %10743 = vpow2.f32 %v3317_v23  ;;  %v3569_v13 = vmul.f32 1.442695, %v3081_v11 }
 0x4f7   : > { %v7173_v63 = vmul.f32 %v10736_v33, %v6661_v47  ;;  %10745 = vpow2.f32 %v3573_v50  ;;  %v2700_v45 = vand.u32 2147483647, %v14498_v21  ;;  %v14505_v15 = vadd.f32 %v14384_v4, %v14127_v48 }
 0x4f8   : > { %v10738_v49 = vpop.eup %10737  ;;  %v4616_v40 = vadd.f32 1.0, %v4360_v12  ;;  %v4872_v8 = vadd.f32 %v4360_v12, %v3848_v29  ;;  %v5384_v2 = vmul.f32 2.0, %v3848_v29  ;;  %v5896_v55 = vadd.f32 2.0, %v4360_v12 }
 0x4f9   : > { %v10740_v26 = vpop.eup %10739  ;;  %v9340_v37 = vpack.c.bf16 %v7173_v63, %v7173_v63  ;;  %v7048_v35 = vmul.f32 %v10738_v49, %v6536_v0  ;;  %v2956_v56 = vsub.f32 0.0, %v2700_v45  ;;  %10747 = vpow2.f32 %v3313_v1 }
 0x4fa   : > { %v5640_v54 = vadd.f32 %v5384_v2, %v4616_v40  ;;  %v6152_v57 = vadd.f32 %v5896_v55, %v3848_v29  ;;  %v3718_v38 = vmul.f32 %v10740_v26, %v10740_v26  ;;  %vm4104_vm14 = vcmp.ge.f32.partialorder %v14388_v10, 0.0 }
 0x4fb   : > { %8454 = vst.msk [vmem:[%s11437_s29 + $0x390] sm:$0xf] %vm8225_vm9, %v9340_v37  ;;  %v9215_v39 = vpack.c.bf16 %v7048_v35, %v7048_v35  ;;  %v4230_v3 = vmul.f32 2.0, %v10740_v26  ;;  %10749 = vpow2.f32 %v3569_v13  ;;  %v5128_v41 = vsel %vm4104_vm14, %v4616_v40, %v4872_v8 }
 0x4fc   : > { %v6408_v20 = vsel %vm4104_vm14, %v5640_v54, %v6152_v57  ;;  %v5254_v18 = vmul.f32 2.0, %v3718_v38  ;;  %v3319_v61 = vmul.f32 1.442695, %v2956_v56  ;;  %v2828_v23 = vand.u32 2147483647, %v14505_v15 }
 0x4fd   : > { %8329 = vst.msk [vmem:[%s11437_s29 + $0x19c] sm:$0xf] %vm8225_vm9, %v9215_v39  ;;  %10751 = vrcp.f32 %v6408_v20  ;;  %v4486_v48 = vadd.f32 1.0, %v4230_v3  ;;  %v5766_v60 = vadd.f32 2.0, %v4230_v3  ;;  %vm3974_vm15 = vcmp.ge.f32.partialorder %v14396_v58, 0.0 }
 0x4fe   : > { %v4742_v50 = vadd.f32 %v4230_v3, %v3718_v38  ;;  %vm4102_vm0 = vcmp.ge.f32.partialorder %v14453_v16, 0.0  ;;  %vm3979_vm1 = vcmp.ge.f32.partialorder %v14457_v30, 0.0  ;;  %v6664_v33 = vmul.f32 %v5128_v41, %v14388_v10 }
 0x4ff   : > { %v10742_v11 = vpop.eup %10741  ;;  %v5510_v6 = vadd.f32 %v5254_v18, %v4486_v48  ;;  %v6022_v47 = vadd.f32 %v5766_v60, %v3718_v38  ;;  %10753 = vpow2.f32 %v3319_v61  ;;  %v3084_v49 = vsub.f32 0.0, %v2828_v23  ;;  %v14532_v23 = vpop.f32.mrb[119].mxu0 }
 0x500   : > { %v10744_v0 = vpop.eup %10743  ;;  %v3846_v29 = vmul.f32 %v10742_v11, %v10742_v11  ;;  %v4358_v12 = vmul.f32 2.0, %v10742_v11  ;;  %v4998_v40 = vsel %vm3974_vm15, %v4486_v48, %v4742_v50  ;;  %v14523_v10 = vadd.f32 %v14384_v4, %v14162_v44 }
 0x501   : > { %v10746_v1 = vpop.eup %10745  ;;  %v6278_v63 = vsel %vm3974_vm15, %v5510_v6, %v6022_v47  ;;  %v3723_v13 = vmul.f32 %v10744_v0, %v10744_v0  ;;  %v4235_v45 = vmul.f32 2.0, %v10744_v0  ;;  %vm4107_vm2 = vcmp.ge.f32.partialorder %v14465_v14, 0.0 }
 0x502   : > { %10755 = vrcp.f32 %v6278_v63  ;;  %v4614_v8 = vadd.f32 1.0, %v4358_v12  ;;  %v5382_v2 = vmul.f32 2.0, %v3846_v29  ;;  %v5894_v55 = vadd.f32 2.0, %v4358_v12 }
 0x503   : > { %v4491_v26 = vadd.f32 1.0, %v4235_v45  ;;  %v5259_v37 = vmul.f32 2.0, %v3723_v13  ;;  %v10748_v35 = vpop.eup %10747  ;;  %v5771_v54 = vadd.f32 2.0, %v4235_v45  ;;  %v3851_v57 = vmul.f32 %v10746_v1, %v10746_v1 }
 0x504   : > { %v5638_v56 = vadd.f32 %v5382_v2, %v4614_v8  ;;  %v14528_v38 = vadd.f32 %v14384_v4, %v14183_v17  ;;  %v6534_v3 = vmul.f32 %v4998_v40, %v14396_v58  ;;  %v4870_v41 = vadd.f32 %v4358_v12, %v3846_v29  ;;  %v14538_v12 = vpop.f32.mrb[119].mxu1 }
 0x505   : > { %v10750_v39 = vpop.eup %10749  ;;  %v6150_v20 = vadd.f32 %v5894_v55, %v3846_v29  ;;  %v5515_v18 = vadd.f32 %v5259_v37, %v4491_v26  ;;  %v4747_v61 = vadd.f32 %v4235_v45, %v3723_v13  ;;  %v6027_v48 = vadd.f32 %v5771_v54, %v3723_v13 }
 0x506   : > { %v4363_v44 = vmul.f32 2.0, %v10746_v1  ;;  %v5387_v60 = vmul.f32 2.0, %v3851_v57  ;;  %vm3977_vm3 = vcmp.ge.f32.partialorder %v14469_v27, 0.0  ;;  %v3721_v17 = vmul.f32 %v10748_v35, %v10748_v35 }
 0x507   : > { %v10752_v50 = vpop.eup %10751  ;;  %v6406_v11 = vsel %vm4102_vm0, %v5638_v56, %v6150_v20  ;;  %v4233_v6 = vmul.f32 2.0, %v10748_v35  ;;  %v3849_v47 = vmul.f32 %v10750_v39, %v10750_v39  ;;  %v6283_v58 = vsel %vm3979_vm1, %v5515_v18, %v6027_v48 }
 0x508   : > { %v7176_v0 = vmul.f32 %v10752_v50, %v6664_v33  ;;  %10757 = vrcp.f32 %v6406_v11  ;;  %v4619_v29 = vadd.f32 1.0, %v4363_v44  ;;  %v5126_v1 = vsel %vm4102_vm0, %v4614_v8, %v4870_v41 }
 0x509   : > { %10759 = vrcp.f32 %v6283_v58  ;;  %v5899_v63 = vadd.f32 2.0, %v4363_v44  ;;  %v4489_v13 = vadd.f32 1.0, %v4233_v6  ;;  %vm4105_vm4 = vcmp.ge.f32.partialorder %v14473_v5, 0.0  ;;  %v10754_v45 = vpop.eup %10753 }
 0x50a   : > { %v9343_v40 = vpack.c.bf16 %v7176_v0, %v7176_v0  ;;  %v5643_v2 = vadd.f32 %v5387_v60, %v4619_v29  ;;  %v5257_v33 = vmul.f32 2.0, %v3721_v17  ;;  %v3575_v55 = vmul.f32 1.442695, %v3084_v49 }
 0x50b   : > { %v6155_v37 = vadd.f32 %v5899_v63, %v3851_v57  ;;  %v5769_v35 = vadd.f32 2.0, %v4233_v6  ;;  %v4361_v56 = vmul.f32 2.0, %v10750_v39  ;;  %v2698_v54 = vand.u32 2147483647, %v14523_v10 }
 0x50c   : > { %v10756_v20 = vpop.eup %10755  ;;  %8457 = vst.msk [vmem:[%s11437_s29 + $0x39c] sm:$0xf] %vm8225_vm9, %v9343_v40  ;;  %v6662_v8 = vmul.f32 %v5126_v1, %v14453_v16  ;;  %v4875_v41 = vadd.f32 %v4363_v44, %v3851_v57  ;;  %v5513_v18 = vadd.f32 %v5257_v33, %v4489_v13  ;;  %v5385_v48 = vmul.f32 2.0, %v3849_v47  ;;  %v14556_v1 = vpop.f32.mrb[120].mxu0 }
 0x50d   : > { %v7046_v50 = vmul.f32 %v10756_v20, %v6534_v3  ;;  %v5003_v11 = vsel %vm3979_vm1, %v4491_v26, %v4747_v61  ;;  %v6411_v49 = vsel %vm4107_vm2, %v5643_v2, %v6155_v37  ;;  %v6025_v60 = vadd.f32 %v5769_v35, %v3721_v17  ;;  %v14558_v40 = vpop.f32.mrb[120].mxu1 }
 0x50e   : > { %vm3980_vm5 = vcmp.ge.f32.partialorder %v14498_v21, 0.0  ;;  %10761 = vrcp.f32 %v6411_v49  ;;  %v4745_v39 = vadd.f32 %v4233_v6, %v3721_v17  ;;  %v4617_v0 = vadd.f32 1.0, %v4361_v56 }
 0x50f   : > { %v5897_v58 = vadd.f32 2.0, %v4361_v56  ;;  %v9213_v63 = vpack.c.bf16 %v7046_v50, %v7046_v50  ;;  %v6281_v16 = vsel %vm3977_vm3, %v5513_v18, %v6025_v60  ;;  %v3724_v57 = vmul.f32 %v10754_v45, %v10754_v45  ;;  %v14566_v50 = vpop.f32.mrb[121].mxu0 }
 0x510   : > { %v4236_v3 = vmul.f32 2.0, %v10754_v45  ;;  %v5131_v26 = vsel %vm4107_vm2, %v4619_v29, %v4875_v41  ;;  %10763 = vrcp.f32 %v6281_v16  ;;  %v5641_v61 = vadd.f32 %v5385_v48, %v4617_v0 }
 0x511   : > { %v6153_v44 = vadd.f32 %v5897_v58, %v3849_v47  ;;  %8327 = vst.msk [vmem:[%s11437_s29 + $0x194] sm:$0xf] %vm8225_vm9, %v9213_v63  ;;  %v6539_v17 = vmul.f32 %v5003_v11, %v14457_v30  ;;  %v4873_v6 = vadd.f32 %v4361_v56, %v3849_v47  ;;  %v5260_v33 = vmul.f32 2.0, %v3724_v57 }
 0x512   : > { %v4492_v2 = vadd.f32 1.0, %v4236_v3  ;;  %v10758_v37 = vpop.eup %10757  ;;  %v5772_v35 = vadd.f32 2.0, %v4236_v3  ;;  %10765 = vpow2.f32 %v3575_v55  ;;  %v2954_v29 = vsub.f32 0.0, %v2698_v54 }
 0x513   : > { %v6409_v45 = vsel %vm4105_vm4, %v5641_v61, %v6153_v44  ;;  %v10760_v20 = vpop.eup %10759  ;;  %v7174_v41 = vmul.f32 %v10758_v37, %v6662_v8  ;;  %v6667_v18 = vmul.f32 %v5131_v26, %v14465_v14  ;;  %v5001_v47 = vsel %vm3977_vm3, %v4489_v13, %v4745_v39  ;;  %v14573_v14 = vpop.f32.mrb[121].mxu1 }
 0x514   : > { %10767 = vrcp.f32 %v6409_v45  ;;  %v5516_v48 = vadd.f32 %v5260_v33, %v4492_v2  ;;  %v7051_v30 = vmul.f32 %v10760_v20, %v6539_v17  ;;  %v6028_v56 = vadd.f32 %v5772_v35, %v3724_v57  ;;  %v14605_v35 = vpop.f32.mrb[122].mxu0 }
 0x515   : > { %v3315_v11 = vmul.f32 1.442695, %v2954_v29  ;;  %v9341_v49 = vpack.c.bf16 %v7174_v41, %v7174_v41  ;;  %v5129_v55 = vsel %vm4105_vm4, %v4617_v0, %v4873_v6  ;;  %v4748_v54 = vadd.f32 %v4236_v3, %v3724_v57 }
 0x516   : > { %v2826_v8 = vand.u32 2147483647, %v14528_v38  ;;  %v9218_v60 = vpack.c.bf16 %v7051_v30, %v7051_v30  ;;  %v6284_v58 = vsel %vm3980_vm5, %v5516_v48, %v6028_v56  ;;  %v14579_v13 = vadd.f32 %v14384_v4, %v14193_v42 }
 0x517   : > { %10769 = vpow2.f32 %v3315_v11  ;;  %8455 = vst.msk [vmem:[%s11437_s29 + $0x394] sm:$0xf] %vm8225_vm9, %v9341_v49  ;;  %v14585_v0 = vadd.f32 %v14384_v4, %v14195_v43  ;;  %v14589_v63 = vadd.f32 %v14384_v4, %v14202_v52  ;;  %v6537_v57 = vmul.f32 %v5001_v47, %v14469_v27 }
 0x518   : > { %10771 = vrcp.f32 %v6284_v58  ;;  %v3082_v39 = vsub.f32 0.0, %v2826_v8  ;;  %v10762_v16 = vpop.eup %10761  ;;  %8332 = vst.msk [vmem:[%s11437_s29 + $0x1a8] sm:$0xf] %vm8225_vm9, %v9218_v60  ;;  %v2703_v42 = vand.u32 2147483647, %v14579_v13  ;;  %v14597_v3 = vadd.f32 %v14384_v4, %v14208_v32 }
 0x519   : > { %v7179_v26 = vmul.f32 %v10762_v16, %v6667_v18  ;;  %v6665_v61 = vmul.f32 %v5129_v55, %v14473_v5  ;;  %v2831_v44 = vand.u32 2147483647, %v14585_v0  ;;  %v5004_v52 = vsel %vm3980_vm5, %v4492_v2, %v4748_v54  ;;  %v14611_v18 = vpop.f32.mrb[122].mxu1 }
 0x51a   : > { %v3571_v43 = vmul.f32 1.442695, %v3082_v39  ;;  %v10764_v17 = vpop.eup %10763  ;;  %v2959_v6 = vsub.f32 0.0, %v2703_v42  ;;  %v2701_v27 = vand.u32 2147483647, %v14589_v63  ;;  %v14609_v2 = vadd.f32 %v14384_v4, %v14234_v7 }
 0x51b   : > { %v2829_v33 = vand.u32 2147483647, %v14597_v3  ;;  %v9346_v37 = vpack.c.bf16 %v7179_v26, %v7179_v26  ;;  %v7049_v45 = vmul.f32 %v10764_v17, %v6537_v57  ;;  %v3087_v32 = vsub.f32 0.0, %v2831_v44 }
 0x51c   : > { %10773 = vpow2.f32 %v3571_v43  ;;  %v10766_v5 = vpop.eup %10765  ;;  %v3325_v29 = vmul.f32 1.442695, %v2959_v6  ;;  %v2957_v20 = vsub.f32 0.0, %v2701_v27  ;;  %v6540_v16 = vmul.f32 %v5004_v52, %v14498_v21 }
 0x51d   : > { %v3085_v41 = vsub.f32 0.0, %v2829_v33  ;;  %8460 = vst.msk [vmem:[%s11437_s29 + $0x3a8] sm:$0xf] %vm8225_vm9, %v9346_v37  ;;  %v9216_v30 = vpack.c.bf16 %v7049_v45, %v7049_v45  ;;  %v3852_v47 = vmul.f32 %v10766_v5, %v10766_v5  ;;  %v4364_v56 = vmul.f32 2.0, %v10766_v5 }
 0x51e   : > { %v10768_v48 = vpop.eup %10767  ;;  %v3581_v11 = vmul.f32 1.442695, %v3087_v32  ;;  %10775 = vpow2.f32 %v3325_v29  ;;  %v3321_v55 = vmul.f32 1.442695, %v2957_v20  ;;  %v2704_v57 = vand.u32 2147483647, %v14609_v2 }
 0x51f   : > { %v7177_v49 = vmul.f32 %v10768_v48, %v6665_v61  ;;  %8330 = vst.msk [vmem:[%s11437_s29 + $0x1a0] sm:$0xf] %vm8225_vm9, %v9216_v30  ;;  %v4620_v54 = vadd.f32 1.0, %v4364_v56  ;;  %v5388_v8 = vmul.f32 2.0, %v3852_v47  ;;  %v5900_v60 = vadd.f32 2.0, %v4364_v56 }
 0x520   : > { %v3577_v7 = vmul.f32 1.442695, %v3085_v41  ;;  %10777 = vpow2.f32 %v3581_v11  ;;  %v4876_v26 = vadd.f32 %v4364_v56, %v3852_v47  ;;  %vm4108_vm6 = vcmp.ge.f32.partialorder %v14505_v15, 0.0 }
 0x521   : > { %v10770_v58 = vpop.eup %10769  ;;  %v9344_v39 = vpack.c.bf16 %v7177_v49, %v7177_v49  ;;  %v5644_v43 = vadd.f32 %v5388_v8, %v4620_v54  ;;  %v6156_v61 = vadd.f32 %v5900_v60, %v3852_v47  ;;  %10779 = vpow2.f32 %v3321_v55 }
 0x522   : > { %v10772_v42 = vpop.eup %10771  ;;  %v3722_v44 = vmul.f32 %v10770_v58, %v10770_v58  ;;  %v4234_v6 = vmul.f32 2.0, %v10770_v58  ;;  %10781 = vpow2.f32 %v3577_v7  ;;  %v2960_v21 = vsub.f32 0.0, %v2704_v57 }
 0x523   : > { %8458 = vst.msk [vmem:[%s11437_s29 + $0x3a0] sm:$0xf] %vm8225_vm9, %v9344_v39  ;;  %v7052_v17 = vmul.f32 %v10772_v42, %v6540_v16  ;;  %v6412_v27 = vsel %vm4108_vm6, %v5644_v43, %v6156_v61  ;;  %v5132_v32 = vsel %vm4108_vm6, %v4620_v54, %v4876_v26  ;;  %vm3978_vm7 = vcmp.ge.f32.partialorder %v14523_v10, 0.0  ;;  %v14634_v39 = vpop.f32.mrb[123].mxu0 }
 0x524   : > { %v5258_v33 = vmul.f32 2.0, %v3722_v44  ;;  %10783 = vrcp.f32 %v6412_v27  ;;  %v4490_v37 = vadd.f32 1.0, %v4234_v6  ;;  %v5770_v5 = vadd.f32 2.0, %v4234_v6 }
 0x525   : > { %v9219_v52 = vpack.c.bf16 %v7052_v17, %v7052_v17  ;;  %v3327_v29 = vmul.f32 1.442695, %v2960_v21  ;;  %vm4106_vm8 = vcmp.ge.f32.partialorder %v14528_v38, 0.0  ;;  %v4746_v30 = vadd.f32 %v4234_v6, %v3722_v44 }
 0x526   : > { %v10774_v45 = vpop.eup %10773  ;;  %v5514_v20 = vadd.f32 %v5258_v33, %v4490_v37  ;;  %v6026_v47 = vadd.f32 %v5770_v5, %v3722_v44  ;;  %vm3983_vm10 = vcmp.ge.f32.partialorder %v14579_v13, 0.0  ;;  %v6668_v11 = vmul.f32 %v5132_v32, %v14505_v15 }
 0x527   : > { %8333 = vst.msk [vmem:[%s11437_s29 + $0x1ac] sm:$0xf] %vm8225_vm9, %v9219_v52  ;;  %v3850_v41 = vmul.f32 %v10774_v45, %v10774_v45  ;;  %v4362_v48 = vmul.f32 2.0, %v10774_v45  ;;  %10785 = vpow2.f32 %v3327_v29  ;;  %v14632_v58 = vadd.f32 %v14384_v4, %v14243_v28 }
 0x528   : > { %v10776_v56 = vpop.eup %10775  ;;  %v6282_v8 = vsel %vm3978_vm7, %v5514_v20, %v6026_v47  ;;  %vm4111_vm11 = vcmp.ge.f32.partialorder %v14585_v0, 0.0  ;;  %v5002_v15 = vsel %vm3978_vm7, %v4490_v37, %v4746_v30  ;;  %v14641_v44 = vadd.f32 %v14384_v4, %v14292_v24 }
 0x529   : > { %v4618_v49 = vadd.f32 1.0, %v4362_v48  ;;  %v5386_v55 = vmul.f32 2.0, %v3850_v41  ;;  %v5898_v54 = vadd.f32 2.0, %v4362_v48  ;;  %v3727_v60 = vmul.f32 %v10776_v56, %v10776_v56 }
 0x52a   : > { %v4239_v7 = vmul.f32 2.0, %v10776_v56  ;;  %v10778_v16 = vpop.eup %10777  ;;  %10787 = vrcp.f32 %v6282_v8  ;;  %v4874_v57 = vadd.f32 %v4362_v48, %v3850_v41  ;;  %vm3981_vm12 = vcmp.ge.f32.partialorder %v14589_v63, 0.0 }
 0x52b   : > { %v5642_v42 = vadd.f32 %v5386_v55, %v4618_v49  ;;  %v6154_v26 = vadd.f32 %v5898_v54, %v3850_v41  ;;  %v5263_v61 = vmul.f32 2.0, %v3727_v60  ;;  %v10780_v28 = vpop.eup %10779  ;;  %v3855_v27 = vmul.f32 %v10778_v16, %v10778_v16 }
 0x52c   : > { %v4495_v43 = vadd.f32 1.0, %v4239_v7  ;;  %v5775_v6 = vadd.f32 2.0, %v4239_v7  ;;  %v4367_v33 = vmul.f32 2.0, %v10778_v16  ;;  %v10782_v21 = vpop.eup %10781  ;;  %v3725_v45 = vmul.f32 %v10780_v28, %v10780_v28  ;;  %v14651_v16 = vpop.f32.mrb[123].mxu1 }
 0x52d   : > { %v6410_v17 = vsel %vm4106_vm8, %v5642_v42, %v6154_v26  ;;  %v2832_v37 = vand.u32 2147483647, %v14632_v58  ;;  %v5130_v24 = vsel %vm4106_vm8, %v4618_v49, %v4874_v57  ;;  %v4751_v5 = vadd.f32 %v4239_v7, %v3727_v60 }
 0x52e   : > { %10789 = vrcp.f32 %v6410_v17  ;;  %v5519_v52 = vadd.f32 %v5263_v61, %v4495_v43  ;;  %v10784_v32 = vpop.eup %10783  ;;  %v6031_v29 = vadd.f32 %v5775_v6, %v3727_v60  ;;  %v4623_v20 = vadd.f32 1.0, %v4367_v33 }
 0x52f   : > { %v7180_v41 = vmul.f32 %v10784_v32, %v6668_v11  ;;  %v5391_v48 = vmul.f32 2.0, %v3855_v27  ;;  %v5903_v30 = vadd.f32 2.0, %v4367_v33  ;;  %v4237_v47 = vmul.f32 2.0, %v10780_v28 }
 0x530   : > { %v6287_v56 = vsel %vm3983_vm10, %v5519_v52, %v6031_v29  ;;  %v4879_v55 = vadd.f32 %v4367_v33, %v3855_v27  ;;  %v5261_v54 = vmul.f32 2.0, %v3725_v45  ;;  %v3853_v8 = vmul.f32 %v10782_v21, %v10782_v21 }
 0x531   : > { %v10786_v42 = vpop.eup %10785  ;;  %v9347_v26 = vpack.c.bf16 %v7180_v41, %v7180_v41  ;;  %10791 = vrcp.f32 %v6287_v56  ;;  %v5647_v49 = vadd.f32 %v5391_v48, %v4623_v20  ;;  %v6159_v7 = vadd.f32 %v5903_v30, %v3855_v27 }
 0x532   : > { %vm4109_vm13 = vcmp.ge.f32.partialorder %v14597_v3, 0.0  ;;  %v6538_v11 = vmul.f32 %v5002_v15, %v14523_v10  ;;  %v4493_v60 = vadd.f32 1.0, %v4237_v47  ;;  %v5773_v57 = vadd.f32 2.0, %v4237_v47 }
 0x533   : > { %v3088_v61 = vsub.f32 0.0, %v2832_v37  ;;  %8461 = vst.msk [vmem:[%s11437_s29 + $0x3ac] sm:$0xf] %vm8225_vm9, %v9347_v26  ;;  %v6415_v28 = vsel %vm4111_vm11, %v5647_v49, %v6159_v7  ;;  %v4365_v17 = vmul.f32 2.0, %v10782_v21  ;;  %v5389_v6 = vmul.f32 2.0, %v3853_v8 }
 0x534   : > { %v3728_v33 = vmul.f32 %v10786_v42, %v10786_v42  ;;  %v10788_v52 = vpop.eup %10787  ;;  %v6666_v32 = vmul.f32 %v5130_v24, %v14528_v38  ;;  %10793 = vrcp.f32 %v6415_v28  ;;  %v5517_v27 = vadd.f32 %v5261_v54, %v4493_v60 }
 0x535   : > { %v6029_v29 = vadd.f32 %v5773_v57, %v3725_v45  ;;  %v7050_v41 = vmul.f32 %v10788_v52, %v6538_v11  ;;  %v5007_v10 = vsel %vm3983_vm10, %v4495_v43, %v4751_v5  ;;  %v5135_v15 = vsel %vm4111_vm11, %v4623_v20, %v4879_v55  ;;  %v14667_v5 = vpop.f32.mrb[124].mxu0  ;;  %v14669_v20 = vpop.f32.mrb[124].mxu1 }
 0x536   : > { %v4621_v37 = vadd.f32 1.0, %v4365_v17  ;;  %v5901_v48 = vadd.f32 2.0, %v4365_v17  ;;  %v4240_v30 = vmul.f32 2.0, %v10786_v42  ;;  %v5264_v56 = vmul.f32 2.0, %v3728_v33 }
 0x537   : > { %v6285_v21 = vsel %vm3981_vm12, %v5517_v27, %v6029_v29  ;;  %v9217_v38 = vpack.c.bf16 %v7050_v41, %v7050_v41  ;;  %v4749_v24 = vadd.f32 %v4237_v47, %v3725_v45  ;;  %vm3984_vm14 = vcmp.ge.f32.partialorder %v14609_v2, 0.0  ;;  %v14680_v41 = vpop.f32.mrb[125].mxu0 }
 0x538   : > { %v10790_v26 = vpop.eup %10789  ;;  %10795 = vrcp.f32 %v6285_v21  ;;  %v5645_v54 = vadd.f32 %v5389_v6, %v4621_v37  ;;  %v6157_v7 = vadd.f32 %v5901_v48, %v3853_v8  ;;  %v4496_v43 = vadd.f32 1.0, %v4240_v30 }
 0x539   : > { %v7178_v49 = vmul.f32 %v10790_v26, %v6666_v32  ;;  %8331 = vst.msk [vmem:[%s11437_s29 + $0x1a4] sm:$0xf] %vm8225_vm9, %v9217_v38  ;;  %v6543_v55 = vmul.f32 %v5007_v10, %v14579_v13  ;;  %v6671_v42 = vmul.f32 %v5135_v15, %v14585_v0  ;;  %v5776_v11 = vadd.f32 2.0, %v4240_v30 }
 0x53a   : > { %v3583_v45 = vmul.f32 1.442695, %v3088_v61  ;;  %v6413_v57 = vsel %vm4109_vm13, %v5645_v54, %v6157_v7  ;;  %v5520_v28 = vadd.f32 %v5264_v56, %v4496_v43  ;;  %v2702_v6 = vand.u32 2147483647, %v14641_v44 }
 0x53b   : > { %v9345_v47 = vpack.c.bf16 %v7178_v49, %v7178_v49  ;;  %v10792_v52 = vpop.eup %10791  ;;  %v5005_v32 = vsel %vm3981_vm12, %v4493_v60, %v4749_v24  ;;  %v4877_v27 = vadd.f32 %v4365_v17, %v3853_v8  ;;  %10797 = vrcp.f32 %v6413_v57  ;;  %v14697_v60 = vld [vmem:[%s15170_s2] ss:$0 sm:$0xff] }
 0x53c   : > { %v6032_v29 = vadd.f32 %v5776_v11, %v3728_v33  ;;  %v7055_v13 = vmul.f32 %v10792_v52, %v6543_v55  ;;  %v4752_v0 = vadd.f32 %v4240_v30, %v3728_v33  ;;  %10799 = vpow2.f32 %v3583_v45  ;;  %v14707_v30 = vpop.f32.mrb[125].mxu1  ;;  %v14724_v45 = vpop.f32.mrb[126].mxu0 }
 0x53d   : > { %8459 = vst.msk [vmem:[%s11437_s29 + $0x3a4] sm:$0xf] %vm8225_vm9, %v9345_v47  ;;  %v2958_v61 = vsub.f32 0.0, %v2702_v6  ;;  %v14688_v15 = vadd.f32 %v14384_v4, %v14300_v62  ;;  %v14692_v8 = vadd.f32 %v14384_v4, %v14320_v53  ;;  %v14701_v17 = vadd.f32 %v14697_v60, %v14322_v46 }
 0x53e   : > { %v6288_v10 = vsel %vm3984_vm14, %v5520_v28, %v6032_v29  ;;  %v10794_v33 = vpop.eup %10793  ;;  %v9222_v21 = vpack.c.bf16 %v7055_v13, %v7055_v13  ;;  %v14705_v62 = vadd.f32 %v14697_v60, %v14325_v25  ;;  %v6541_v46 = vmul.f32 %v5005_v32, %v14589_v63  ;;  %v15217_v28 = vld [vmem:[#allocation6_spill] sm:$0xff] }
 0x53f   : > { %10801 = vrcp.f32 %v6288_v10  ;;  %v3323_v48 = vmul.f32 1.442695, %v2958_v61  ;;  %v7183_v53 = vmul.f32 %v10794_v33, %v6671_v42  ;;  %v2830_v4 = vand.u32 2147483647, %v14688_v15 }
 0x540   : > { %v2707_v56 = vand.u32 2147483647, %v14692_v8  ;;  %8336 = vst.msk [vmem:[%s11437_s29 + $0x1b8] sm:$0xf] %vm8225_vm9, %v9222_v21  ;;  %v5133_v26 = vsel %vm4109_vm13, %v4621_v37, %v4877_v27  ;;  %v2835_v38 = vand.u32 2147483647, %v14701_v17  ;;  %v5008_v42 = vsel %vm3984_vm14, %v4496_v43, %v4752_v0 }
 0x541   : > { %10803 = vpow2.f32 %v3323_v48  ;;  %v9350_v24 = vpack.c.bf16 %v7183_v53, %v7183_v53  ;;  %v3086_v54 = vsub.f32 0.0, %v2830_v4  ;;  %v2705_v7 = vand.u32 2147483647, %v14705_v62 }
 0x542   : > { %v10796_v25 = vpop.eup %10795  ;;  %v2963_v49 = vsub.f32 0.0, %v2707_v56  ;;  %v3091_v11 = vsub.f32 0.0, %v2835_v38  ;;  %v14722_v63 = vadd.f32 %v14697_v60, %v14336_v59  ;;  %v14730_v6 = vadd.f32 %v14697_v60, %v15217_v28  ;;  %v14734_v59 = vpop.f32.mrb[126].mxu1 }
 0x543   : > { %v7053_v55 = vmul.f32 %v10796_v25, %v6541_v46  ;;  %8464 = vst.msk [vmem:[%s11437_s29 + $0x3b8] sm:$0xf] %vm8225_vm9, %v9350_v24  ;;  %v3579_v37 = vmul.f32 1.442695, %v3086_v54  ;;  %v2961_v57 = vsub.f32 0.0, %v2705_v7  ;;  %v6669_v43 = vmul.f32 %v5133_v26, %v14597_v3  ;;  %v15218_v3 = vld [vmem:[#allocation7_spill] sm:$0xff] }
 0x544   : > { %v3333_v47 = vmul.f32 1.442695, %v2963_v49  ;;  %v3589_v32 = vmul.f32 1.442695, %v3091_v11  ;;  %v2833_v27 = vand.u32 2147483647, %v14722_v63  ;;  %v6544_v13 = vmul.f32 %v5008_v42, %v14609_v2 }
 0x545   : > { %v9220_v52 = vpack.c.bf16 %v7053_v55, %v7053_v55  ;;  %v10798_v29 = vpop.eup %10797  ;;  %10805 = vpow2.f32 %v3579_v37  ;;  %v3329_v0 = vmul.f32 1.442695, %v2961_v57  ;;  %v2708_v61 = vand.u32 2147483647, %v14730_v6 }
 0x546   : > { %v10800_v10 = vpop.eup %10799  ;;  %v7181_v33 = vmul.f32 %v10798_v29, %v6669_v43  ;;  %10807 = vpow2.f32 %v3333_v47  ;;  %v3089_v21 = vsub.f32 0.0, %v2833_v27  ;;  %v14742_v48 = vadd.f32 %v14697_v60, %v15218_v3 }
 0x547   : > { %8334 = vst.msk [vmem:[%s11437_s29 + $0x1b0] sm:$0xf] %vm8225_vm9, %v9220_v52  ;;  %v3856_v53 = vmul.f32 %v10800_v10, %v10800_v10  ;;  %v4368_v4 = vmul.f32 2.0, %v10800_v10  ;;  %10809 = vpow2.f32 %v3589_v32  ;;  %v2964_v56 = vsub.f32 0.0, %v2708_v61 }
 0x548   : > { %v9348_v46 = vpack.c.bf16 %v7181_v33, %v7181_v33  ;;  %v3585_v26 = vmul.f32 1.442695, %v3089_v21  ;;  %10811 = vpow2.f32 %v3329_v0  ;;  %v2836_v47 = vand.u32 2147483647, %v14742_v48 }
 0x549   : > { %v10802_v2 = vpop.eup %10801  ;;  %v4624_v25 = vadd.f32 1.0, %v4368_v4  ;;  %v4880_v24 = vadd.f32 %v4368_v4, %v3856_v53  ;;  %v5392_v54 = vmul.f32 2.0, %v3856_v53  ;;  %v5904_v7 = vadd.f32 2.0, %v4368_v4 }
 0x54a   : > { %v7056_v38 = vmul.f32 %v10802_v2, %v6544_v13  ;;  %8462 = vst.msk [vmem:[%s11437_s29 + $0x3b0] sm:$0xf] %vm8225_vm9, %v9348_v46  ;;  %v3335_v55 = vmul.f32 1.442695, %v2964_v56  ;;  %vm4112_vm15 = vcmp.ge.f32.partialorder %v14632_v58, 0.0  ;;  %vm3982_vm0 = vcmp.ge.f32.partialorder %v14641_v44, 0.0 }
 0x54b   : > { %v10804_v49 = vpop.eup %10803  ;;  %v5648_v11 = vadd.f32 %v5392_v54, %v4624_v25  ;;  %v6160_v57 = vadd.f32 %v5904_v7, %v3856_v53  ;;  %v5136_v52 = vsel %vm4112_vm15, %v4624_v25, %v4880_v24  ;;  %10813 = vpow2.f32 %v3585_v26  ;;  %v14754_v53 = vpop.f32.mrb[127].mxu0  ;;  %v15220_v26 = vld [vmem:[#allocation8_spill] sm:$0xff] }
 0x54c   : > { %v9223_v42 = vpack.c.bf16 %v7056_v38, %v7056_v38  ;;  %v3726_v37 = vmul.f32 %v10804_v49, %v10804_v49  ;;  %v4238_v28 = vmul.f32 2.0, %v10804_v49  ;;  %10815 = vpow2.f32 %v3335_v55  ;;  %15219 = vst [vmem:[#allocation9_spill] sm:$0xff] %v14754_v53 }
 0x54d   : > { %v6416_v32 = vsel %vm4112_vm15, %v5648_v11, %v6160_v57  ;;  %vm4110_vm1 = vcmp.ge.f32.partialorder %v14688_v15, 0.0  ;;  %vm3987_vm2 = vcmp.ge.f32.partialorder %v14692_v8, 0.0  ;;  %v3092_v0 = vsub.f32 0.0, %v2836_v47 }
 0x54e   : > { %8337 = vst.msk [vmem:[%s11437_s29 + $0x1bc] sm:$0xf] %vm8225_vm9, %v9223_v42  ;;  %v5262_v43 = vmul.f32 2.0, %v3726_v37  ;;  %v4494_v27 = vadd.f32 1.0, %v4238_v28  ;;  %v5774_v29 = vadd.f32 2.0, %v4238_v28  ;;  %10817 = vrcp.f32 %v6416_v32 }
 0x54f   : > { %v10806_v13 = vpop.eup %10805  ;;  %v6672_v10 = vmul.f32 %v5136_v52, %v14632_v58  ;;  %v14758_v38 = vadd.f32 %v14697_v60, %v15220_v26  ;;  %v4750_v25 = vadd.f32 %v4238_v28, %v3726_v37  ;;  %vm4115_vm3 = vcmp.ge.f32.partialorder %v14701_v17, 0.0 }
 0x550   : > { %v10808_v61 = vpop.eup %10807  ;;  %v5518_v33 = vadd.f32 %v5262_v43, %v4494_v27  ;;  %v6030_v21 = vadd.f32 %v5774_v29, %v3726_v37  ;;  %v3854_v3 = vmul.f32 %v10806_v13, %v10806_v13  ;;  %v4366_v56 = vmul.f32 2.0, %v10806_v13 }
 0x551   : > { %v10810_v4 = vpop.eup %10809  ;;  %v3731_v2 = vmul.f32 %v10808_v61, %v10808_v61  ;;  %v4243_v46 = vmul.f32 2.0, %v10808_v61  ;;  %v14763_v52 = vmul.f32 1.442695, %v3092_v0  ;;  %v2706_v28 = vand.u32 2147483647, %v14758_v38 }
 0x552   : > { %v6286_v24 = vsel %vm3982_vm0, %v5518_v33, %v6030_v21  ;;  %v5390_v54 = vmul.f32 2.0, %v3854_v3  ;;  %v4371_v49 = vmul.f32 2.0, %v10810_v4  ;;  %v4622_v58 = vadd.f32 1.0, %v4366_v56  ;;  %v10812_v42 = vpop.eup %10811 }
 0x553   : > { %10819 = vrcp.f32 %v6286_v24  ;;  %v5902_v7 = vadd.f32 2.0, %v4366_v56  ;;  %v3859_v55 = vmul.f32 %v10810_v4, %v10810_v4  ;;  %v4499_v11 = vadd.f32 1.0, %v4243_v46 }
 0x554   : > { %v5267_v47 = vmul.f32 2.0, %v3731_v2  ;;  %v5779_v57 = vadd.f32 2.0, %v4243_v46  ;;  %v5646_v43 = vadd.f32 %v5390_v54, %v4622_v58  ;;  %v4627_v37 = vadd.f32 1.0, %v4371_v49 }
 0x555   : > { %v6158_v32 = vadd.f32 %v5902_v7, %v3854_v3  ;;  %v5006_v29 = vsel %vm3982_vm0, %v4494_v27, %v4750_v25  ;;  %v4878_v13 = vadd.f32 %v4366_v56, %v3854_v3  ;;  %vm3985_vm4 = vcmp.ge.f32.partialorder %v14705_v62, 0.0  ;;  %v10814_v21 = vpop.eup %10813  ;;  %v14777_v25 = vpop.f32.mrb[127].mxu1 }
 0x556   : > { %v5523_v61 = vadd.f32 %v5267_v47, %v4499_v11  ;;  %v6035_v33 = vadd.f32 %v5779_v57, %v3731_v2  ;;  %v4755_v26 = vadd.f32 %v4243_v46, %v3731_v2  ;;  %v5395_v0 = vmul.f32 2.0, %v3859_v55  ;;  %v10816_v54 = vpop.eup %10815  ;;  %15221 = vst [vmem:[#allocation2_spill] sm:$0xff] %v14777_v25 }
 0x557   : > { %v6414_v4 = vsel %vm4110_vm1, %v5646_v43, %v6158_v32  ;;  %v14773_v24 = vadd.f32 %v14697_v60, %v14416_v36  ;;  %v5907_v3 = vadd.f32 2.0, %v4371_v49  ;;  %v3729_v56 = vmul.f32 %v10812_v42, %v10812_v42 }
 0x558   : > { %10821 = vrcp.f32 %v6414_v4  ;;  %v6291_v27 = vsel %vm3987_vm2, %v5523_v61, %v6035_v33  ;;  %v10818_v7 = vpop.eup %10817  ;;  %v6542_v47 = vmul.f32 %v5006_v29, %v14641_v44  ;;  %v5651_v57 = vadd.f32 %v5395_v0, %v4627_v37 }
 0x559   : > { %10823 = vrcp.f32 %v6291_v27  ;;  %v4241_v2 = vmul.f32 2.0, %v10812_v42  ;;  %v7184_v46 = vmul.f32 %v10818_v7, %v6672_v10  ;;  %v5134_v36 = vsel %vm4110_vm1, %v4622_v58, %v4878_v13 }
 0x55a   : > { %v6163_v43 = vadd.f32 %v5907_v3, %v3859_v55  ;;  %v5265_v32 = vmul.f32 2.0, %v3729_v56  ;;  %vm4113_vm5 = vcmp.ge.f32.partialorder %v14722_v63, 0.0  ;;  %v5011_v61 = vsel %vm3987_vm2, %v4499_v11, %v4755_v26 }
 0x55b   : > { %v4497_v33 = vadd.f32 1.0, %v4241_v2  ;;  %v5777_v4 = vadd.f32 2.0, %v4241_v2  ;;  %v3857_v25 = vmul.f32 %v10814_v21, %v10814_v21  ;;  %v9351_v53 = vpack.c.bf16 %v7184_v46, %v7184_v46 }
 0x55c   : > { %v6419_v44 = vsel %vm4115_vm3, %v5651_v57, %v6163_v43  ;;  %v4369_v42 = vmul.f32 2.0, %v10814_v21  ;;  %v3732_v10 = vmul.f32 %v10816_v54, %v10816_v54  ;;  %v4883_v0 = vadd.f32 %v4371_v49, %v3859_v55 }
 0x55d   : > { %v10820_v29 = vpop.eup %10819  ;;  %10825 = vrcp.f32 %v6419_v44  ;;  %v5521_v58 = vadd.f32 %v5265_v32, %v4497_v33  ;;  %v6033_v13 = vadd.f32 %v5777_v4, %v3729_v56  ;;  %vm3988_vm6 = vcmp.ge.f32.partialorder %v14730_v6, 0.0  ;;  %8465 = vst.msk [vmem:[%s11437_s29 + $0x3bc] sm:$0xf] %vm8225_vm9, %v9351_v53 }
 0x55e   : > { %v7054_v27 = vmul.f32 %v10820_v29, %v6542_v47  ;;  %v6670_v11 = vmul.f32 %v5134_v36, %v14688_v15  ;;  %v4753_v26 = vadd.f32 %v4241_v2, %v3729_v56  ;;  %v4625_v3 = vadd.f32 1.0, %v4369_v42 }
 0x55f   : > { %v6289_v7 = vsel %vm3985_vm4, %v5521_v58, %v6033_v13  ;;  %v5393_v21 = vmul.f32 2.0, %v3857_v25  ;;  %v5905_v57 = vadd.f32 2.0, %v4369_v42  ;;  %v4244_v46 = vmul.f32 2.0, %v10816_v54 }
 0x560   : > { %v9221_v49 = vpack.c.bf16 %v7054_v27, %v7054_v27  ;;  %v6547_v55 = vmul.f32 %v5011_v61, %v14692_v8  ;;  %10827 = vrcp.f32 %v6289_v7  ;;  %v5268_v43 = vmul.f32 2.0, %v3732_v10 }
 0x561   : > { %v5139_v53 = vsel %vm4115_vm3, %v4627_v37, %v4883_v0  ;;  %v5649_v47 = vadd.f32 %v5393_v21, %v4625_v3  ;;  %v6161_v32 = vadd.f32 %v5905_v57, %v3857_v25  ;;  %v4500_v15 = vadd.f32 1.0, %v4244_v46 }
 0x562   : > { %v10822_v36 = vpop.eup %10821  ;;  %8335 = vst.msk [vmem:[%s11437_s29 + $0x1b4] sm:$0xf] %vm8225_vm9, %v9221_v49  ;;  %v5009_v56 = vsel %vm3985_vm4, %v4497_v33, %v4753_v26  ;;  %v5780_v2 = vadd.f32 2.0, %v4244_v46  ;;  %10829 = vpow2.f32 %v14763_v52  ;;  %v2962_v54 = vsub.f32 0.0, %v2706_v28 }
 0x563   : > { %v10824_v4 = vpop.eup %10823  ;;  %v7182_v8 = vmul.f32 %v10822_v36, %v6670_v11  ;;  %v6417_v61 = vsel %vm4113_vm5, %v5649_v47, %v6161_v32  ;;  %v5524_v37 = vadd.f32 %v5268_v43, %v4500_v15  ;;  %v2834_v44 = vand.u32 2147483647, %v14773_v24 }
 0x564   : > { %v7059_v29 = vmul.f32 %v10824_v4, %v6547_v55  ;;  %v6675_v0 = vmul.f32 %v5139_v53, %v14701_v17  ;;  %10831 = vrcp.f32 %v6417_v61  ;;  %v6036_v58 = vadd.f32 %v5780_v2, %v3732_v10 }
 0x565   : > { %v9349_v33 = vpack.c.bf16 %v7182_v8, %v7182_v8  ;;  %v4881_v13 = vadd.f32 %v4369_v42, %v3857_v25  ;;  %v3331_v27 = vmul.f32 1.442695, %v2962_v54  ;;  %v3090_v52 = vsub.f32 0.0, %v2834_v44 }
 0x566   : > { %v9226_v28 = vpack.c.bf16 %v7059_v29, %v7059_v29  ;;  %v6545_v11 = vmul.f32 %v5009_v56, %v14705_v62  ;;  %v6292_v26 = vsel %vm3988_vm6, %v5524_v37, %v6036_v58  ;;  %v14810_v7 = vadd.f32 %v14697_v60, %v14434_v9 }
 0x567   : > { %v10826_v21 = vpop.eup %10825  ;;  %8463 = vst.msk [vmem:[%s11437_s29 + $0x3b4] sm:$0xf] %vm8225_vm9, %v9349_v33  ;;  %10833 = vrcp.f32 %v6292_v26  ;;  %v3587_v17 = vmul.f32 1.442695, %v3090_v52  ;;  %v14816_v25 = vadd.f32 %v14697_v60, %v14436_v22  ;;  %v14820_v42 = vadd.f32 %v14697_v60, %v14445_v19 }
 0x568   : > { %8340 = vst.msk [vmem:[%s11437_s29 + $0x1c8] sm:$0xf] %vm8225_vm9, %v9226_v28  ;;  %v7187_v62 = vmul.f32 %v10826_v21, %v6675_v0  ;;  %v4756_v57 = vadd.f32 %v4244_v46, %v3732_v10  ;;  %10835 = vpow2.f32 %v3331_v27  ;;  %v2711_v9 = vand.u32 2147483647, %v14810_v7 }
 0x569   : > { %v5137_v49 = vsel %vm4113_vm5, %v4625_v3, %v4881_v13  ;;  %10837 = vpow2.f32 %v3587_v17  ;;  %v2839_v55 = vand.u32 2147483647, %v14816_v25  ;;  %v2709_v22 = vand.u32 2147483647, %v14820_v42 }
 0x56a   : > { %v10828_v43 = vpop.eup %10827  ;;  %v9354_v53 = vpack.c.bf16 %v7187_v62, %v7187_v62  ;;  %v2967_v19 = vsub.f32 0.0, %v2711_v9  ;;  %v14831_v47 = vadd.f32 %v14697_v60, %v14459_v34  ;;  %v14835_v36 = vadd.f32 %v14697_v60, %v14488_v51 }
 0x56b   : > { %v7057_v10 = vmul.f32 %v10828_v43, %v6545_v11  ;;  %v3095_v46 = vsub.f32 0.0, %v2839_v55  ;;  %v2965_v32 = vsub.f32 0.0, %v2709_v22  ;;  %v6673_v56 = vmul.f32 %v5137_v49, %v14722_v63 }
 0x56c   : > { %v10830_v3 = vpop.eup %10829  ;;  %8468 = vst.msk [vmem:[%s11437_s29 + $0x3c8] sm:$0xf] %vm8225_vm9, %v9354_v53  ;;  %v5012_v2 = vsel %vm3988_vm6, %v4500_v15, %v4756_v57  ;;  %v3341_v54 = vmul.f32 1.442695, %v2967_v19  ;;  %v2837_v34 = vand.u32 2147483647, %v14831_v47 }
 0x56d   : > { %v9224_v4 = vpack.c.bf16 %v7057_v10, %v7057_v10  ;;  %v3860_v8 = vmul.f32 %v10830_v3, %v10830_v3  ;;  %v4372_v61 = vmul.f32 2.0, %v10830_v3  ;;  %v3597_v37 = vmul.f32 1.442695, %v3095_v46 }
 0x56e   : > { %v10832_v44 = vpop.eup %10831  ;;  %10839 = vpow2.f32 %v3341_v54  ;;  %v3337_v51 = vmul.f32 1.442695, %v2965_v32  ;;  %v3093_v29 = vsub.f32 0.0, %v2837_v34  ;;  %v2712_v0 = vand.u32 2147483647, %v14835_v36 }
 0x56f   : > { %8338 = vst.msk [vmem:[%s11437_s29 + $0x1c0] sm:$0xf] %vm8225_vm9, %v9224_v4  ;;  %v7185_v58 = vmul.f32 %v10832_v44, %v6673_v56  ;;  %v4628_v63 = vadd.f32 1.0, %v4372_v61  ;;  %v5396_v33 = vmul.f32 2.0, %v3860_v8  ;;  %v6548_v15 = vmul.f32 %v5012_v2, %v14730_v6 }
 0x570   : > { %v5908_v13 = vadd.f32 2.0, %v4372_v61  ;;  %10841 = vpow2.f32 %v3597_v37  ;;  %v2968_v27 = vsub.f32 0.0, %v2712_v0  ;;  %v3593_v62 = vmul.f32 1.442695, %v3093_v29 }
 0x571   : > { %v10834_v52 = vpop.eup %10833  ;;  %v9352_v28 = vpack.c.bf16 %v7185_v58, %v7185_v58  ;;  %v5652_v11 = vadd.f32 %v5396_v33, %v4628_v63  ;;  %10843 = vpow2.f32 %v3337_v51  ;;  %vm4116_vm7 = vcmp.ge.f32.partialorder %v14742_v48, 0.0 }
 0x572   : > { %v10836_v26 = vpop.eup %10835  ;;  %v7060_v21 = vmul.f32 %v10834_v52, %v6548_v15  ;;  %v6164_v17 = vadd.f32 %v5908_v13, %v3860_v8  ;;  %v3343_v6 = vmul.f32 1.442695, %v2968_v27  ;;  %v4884_v19 = vadd.f32 %v4372_v61, %v3860_v8 }
 0x573   : > { %v10838_v57 = vpop.eup %10837  ;;  %8466 = vst.msk [vmem:[%s11437_s29 + $0x3c0] sm:$0xf] %vm8225_vm9, %v9352_v28  ;;  %v3730_v9 = vmul.f32 %v10836_v26, %v10836_v26  ;;  %v4242_v49 = vmul.f32 2.0, %v10836_v26  ;;  %vm3986_vm8 = vcmp.ge.f32.partialorder %v14758_v38, 0.0  ;;  %vm4114_vm10 = vcmp.ge.f32.partialorder %v14773_v24, 0.0 }
 0x574   : > { %v9227_v55 = vpack.c.bf16 %v7060_v21, %v7060_v21  ;;  %v6420_v22 = vsel %vm4116_vm7, %v5652_v11, %v6164_v17  ;;  %v3858_v43 = vmul.f32 %v10838_v57, %v10838_v57  ;;  %v4370_v53 = vmul.f32 2.0, %v10838_v57 }
 0x575   : > { %10845 = vrcp.f32 %v6420_v22  ;;  %v4498_v10 = vadd.f32 1.0, %v4242_v49  ;;  %v5266_v46 = vmul.f32 2.0, %v3730_v9  ;;  %v5778_v32 = vadd.f32 2.0, %v4242_v49 }
 0x576   : > { %8341 = vst.msk [vmem:[%s11437_s29 + $0x1cc] sm:$0xf] %vm8225_vm9, %v9227_v55  ;;  %v4626_v3 = vadd.f32 1.0, %v4370_v53  ;;  %v5394_v56 = vmul.f32 2.0, %v3858_v43  ;;  %10847 = vpow2.f32 %v3593_v62  ;;  %v4754_v2 = vadd.f32 %v4242_v49, %v3730_v9 }
 0x577   : > { %v5522_v54 = vadd.f32 %v5266_v46, %v4498_v10  ;;  %v5906_v34 = vadd.f32 2.0, %v4370_v53  ;;  %10849 = vpow2.f32 %v3343_v6  ;;  %v6034_v37 = vadd.f32 %v5778_v32, %v3730_v9 }
 0x578   : > { %v10840_v4 = vpop.eup %10839  ;;  %v5650_v8 = vadd.f32 %v5394_v56, %v4626_v3  ;;  %vm3991_vm11 = vcmp.ge.f32.partialorder %v14810_v7, 0.0  ;;  %v5140_v0 = vsel %vm4116_vm7, %v4628_v63, %v4884_v19  ;;  %v4882_v33 = vadd.f32 %v4370_v53, %v3858_v43 }
 0x579   : > { %v6162_v61 = vadd.f32 %v5906_v34, %v3858_v43  ;;  %v3735_v44 = vmul.f32 %v10840_v4, %v10840_v4  ;;  %v4247_v51 = vmul.f32 2.0, %v10840_v4  ;;  %v6290_v58 = vsel %vm3986_vm8, %v5522_v54, %v6034_v37 }
 0x57a   : > { %v10842_v29 = vpop.eup %10841  ;;  %vm4119_vm12 = vcmp.ge.f32.partialorder %v14816_v25, 0.0  ;;  %v14862_v15 = vadd.f32 %v14697_v60, %v14490_v31  ;;  %v5010_v27 = vsel %vm3986_vm8, %v4498_v10, %v4754_v2  ;;  %10851 = vrcp.f32 %v6290_v58 }
 0x57b   : > { %v10844_v13 = vpop.eup %10843  ;;  %v6418_v52 = vsel %vm4114_vm10, %v5650_v8, %v6162_v61  ;;  %v4503_v28 = vadd.f32 1.0, %v4247_v51  ;;  %v5271_v11 = vmul.f32 2.0, %v3735_v44  ;;  %v5783_v26 = vadd.f32 2.0, %v4247_v51 }
 0x57c   : > { %10853 = vrcp.f32 %v6418_v52  ;;  %v3863_v21 = vmul.f32 %v10842_v29, %v10842_v29  ;;  %v6676_v63 = vmul.f32 %v5140_v0, %v14742_v48  ;;  %v4375_v17 = vmul.f32 2.0, %v10842_v29 }
 0x57d   : > { %v3733_v62 = vmul.f32 %v10844_v13, %v10844_v13  ;;  %v4245_v57 = vmul.f32 2.0, %v10844_v13  ;;  %v5138_v31 = vsel %vm4114_vm10, %v4626_v3, %v4882_v33  ;;  %v5527_v9 = vadd.f32 %v5271_v11, %v4503_v28 }
 0x57e   : > { %v6039_v49 = vadd.f32 %v5783_v26, %v3735_v44  ;;  %v5399_v6 = vmul.f32 2.0, %v3863_v21  ;;  %vm3989_vm13 = vcmp.ge.f32.partialorder %v14820_v42, 0.0  ;;  %v6546_v22 = vmul.f32 %v5010_v27, %v14758_v38 }
 0x57f   : > { %v10846_v55 = vpop.eup %10845  ;;  %v4631_v43 = vadd.f32 1.0, %v4375_v17  ;;  %v5911_v53 = vadd.f32 2.0, %v4375_v17  ;;  %v4501_v19 = vadd.f32 1.0, %v4245_v57  ;;  %v4759_v48 = vadd.f32 %v4247_v51, %v3735_v44 }
 0x580   : > { %v10848_v10 = vpop.eup %10847  ;;  %v7188_v46 = vmul.f32 %v10846_v55, %v6676_v63  ;;  %v6295_v32 = vsel %vm3991_vm11, %v5527_v9, %v6039_v49  ;;  %v5269_v56 = vmul.f32 2.0, %v3733_v62  ;;  %v6674_v2 = vmul.f32 %v5138_v31, %v14773_v24 }
 0x581   : > { %v10850_v3 = vpop.eup %10849  ;;  %10855 = vrcp.f32 %v6295_v32  ;;  %v5655_v54 = vadd.f32 %v5399_v6, %v4631_v43  ;;  %v6167_v34 = vadd.f32 %v5911_v53, %v3863_v21  ;;  %v4887_v37 = vadd.f32 %v4375_v17, %v3863_v21 }
 0x582   : > { %v9355_v4 = vpack.c.bf16 %v7188_v46, %v7188_v46  ;;  %vm4117_vm14 = vcmp.ge.f32.partialorder %v14831_v47, 0.0  ;;  %v2840_v38 = vand.u32 2147483647, %v14862_v15  ;;  %v14878_v8 = vadd.f32 %v14697_v60, %v14532_v23 }
 0x583   : > { %v6423_v61 = vsel %vm4119_vm12, %v5655_v54, %v6167_v34  ;;  %v5525_v44 = vadd.f32 %v5269_v56, %v4501_v19  ;;  %v5781_v51 = vadd.f32 2.0, %v4245_v57  ;;  %v3861_v29 = vmul.f32 %v10848_v10, %v10848_v10 }
 0x584   : > { %8469 = vst.msk [vmem:[%s11437_s29 + $0x3cc] sm:$0xf] %vm8225_vm9, %v9355_v4  ;;  %v5015_v24 = vsel %vm3991_vm11, %v4503_v28, %v4759_v48  ;;  %10857 = vrcp.f32 %v6423_v61  ;;  %v4373_v0 = vmul.f32 2.0, %v10848_v10  ;;  %v4248_v58 = vmul.f32 2.0, %v10850_v3  ;;  %v10852_v33 = vpop.eup %10851 }
 0x585   : > { %v4757_v13 = vadd.f32 %v4245_v57, %v3733_v62  ;;  %v6037_v27 = vadd.f32 %v5781_v51, %v3733_v62  ;;  %v5397_v52 = vmul.f32 2.0, %v3861_v29  ;;  %v3736_v23 = vmul.f32 %v10850_v3, %v10850_v3 }
 0x586   : > { %vm3992_vm15 = vcmp.ge.f32.partialorder %v14835_v36, 0.0  ;;  %v10854_v11 = vpop.eup %10853  ;;  %v7058_v26 = vmul.f32 %v10852_v33, %v6546_v22  ;;  %v4629_v21 = vadd.f32 1.0, %v4373_v0  ;;  %v5909_v63 = vadd.f32 2.0, %v4373_v0 }
 0x587   : > { %v3096_v17 = vsub.f32 0.0, %v2840_v38  ;;  %v7186_v31 = vmul.f32 %v10854_v11, %v6674_v2  ;;  %v5143_v28 = vsel %vm4119_vm12, %v4631_v43, %v4887_v37  ;;  %v6293_v9 = vsel %vm3989_vm13, %v5525_v44, %v6037_v27 }
 0x588   : > { %v2710_v62 = vand.u32 2147483647, %v14878_v8  ;;  %v9225_v57 = vpack.c.bf16 %v7058_v26, %v7058_v26  ;;  %10859 = vrcp.f32 %v6293_v9  ;;  %v5653_v49 = vadd.f32 %v5397_v52, %v4629_v21 }
 0x589   : > { %v4504_v6 = vadd.f32 1.0, %v4248_v58  ;;  %v9353_v55 = vpack.c.bf16 %v7186_v31, %v7186_v31  ;;  %v6551_v22 = vmul.f32 %v5015_v24, %v14810_v7  ;;  %v4885_v53 = vadd.f32 %v4373_v0, %v3861_v29 }
 0x58a   : > { %v6165_v10 = vadd.f32 %v5909_v63, %v3861_v29  ;;  %8339 = vst.msk [vmem:[%s11437_s29 + $0x1c4] sm:$0xf] %vm8225_vm9, %v9225_v57  ;;  %v6679_v46 = vmul.f32 %v5143_v28, %v14816_v25  ;;  %v5272_v43 = vmul.f32 2.0, %v3736_v23  ;;  %v5784_v48 = vadd.f32 2.0, %v4248_v58 }
 0x58b   : > { %v3599_v32 = vmul.f32 1.442695, %v3096_v17  ;;  %v10856_v56 = vpop.eup %10855  ;;  %8467 = vst.msk [vmem:[%s11437_s29 + $0x3c4] sm:$0xf] %vm8225_vm9, %v9353_v55  ;;  %v5013_v3 = vsel %vm3989_vm13, %v4501_v19, %v4757_v13  ;;  %v2966_v54 = vsub.f32 0.0, %v2710_v62  ;;  %v14904_v7 = vadd.f32 %v14697_v60, %v14538_v12 }
 0x58c   : > { %v6421_v2 = vsel %vm4117_vm14, %v5653_v49, %v6165_v10  ;;  %v7063_v34 = vmul.f32 %v10856_v56, %v6551_v22  ;;  %v5528_v25 = vadd.f32 %v5272_v43, %v4504_v6  ;;  %v6040_v4 = vadd.f32 %v5784_v48, %v3736_v23 }
 0x58d   : > { %10861 = vrcp.f32 %v6421_v2  ;;  %v5141_v37 = vsel %vm4117_vm14, %v4629_v21, %v4885_v53  ;;  %v3339_v38 = vmul.f32 1.442695, %v2966_v54  ;;  %v2838_v19 = vand.u32 2147483647, %v14904_v7 }
 0x58e   : > { %10863 = vpow2.f32 %v3599_v32  ;;  %v10858_v61 = vpop.eup %10857  ;;  %v9230_v44 = vpack.c.bf16 %v7063_v34, %v7063_v34  ;;  %v6296_v51 = vsel %vm3992_vm15, %v5528_v25, %v6040_v4  ;;  %v14913_v12 = vadd.f32 %v14697_v60, %v14556_v1 }
 0x58f   : > { %v14917_v29 = vadd.f32 %v14697_v60, %v14558_v40  ;;  %v7191_v24 = vmul.f32 %v10858_v61, %v6679_v46  ;;  %10865 = vrcp.f32 %v6296_v51  ;;  %v3094_v0 = vsub.f32 0.0, %v2838_v19 }
 0x590   : > { %v14921_v33 = vadd.f32 %v14697_v60, %v14566_v50  ;;  %8344 = vst.msk [vmem:[%s11437_s29 + $0x1d8] sm:$0xf] %vm8225_vm9, %v9230_v44  ;;  %v4760_v13 = vadd.f32 %v4248_v58, %v3736_v23  ;;  %10867 = vpow2.f32 %v3339_v38  ;;  %v2715_v27 = vand.u32 2147483647, %v14913_v12 }
 0x591   : > { %v2843_v1 = vand.u32 2147483647, %v14917_v29  ;;  %v9358_v52 = vpack.c.bf16 %v7191_v24, %v7191_v24  ;;  %v6549_v40 = vmul.f32 %v5013_v3, %v14820_v42  ;;  %v3595_v11 = vmul.f32 1.442695, %v3094_v0 }
 0x592   : > { %v2713_v26 = vand.u32 2147483647, %v14921_v33  ;;  %v10860_v21 = vpop.eup %10859  ;;  %v6677_v63 = vmul.f32 %v5141_v37, %v14831_v47  ;;  %v2971_v17 = vsub.f32 0.0, %v2715_v27  ;;  %v14932_v31 = vadd.f32 %v14697_v60, %v14573_v14 }
 0x593   : > { %v3099_v50 = vsub.f32 0.0, %v2843_v1  ;;  %8472 = vst.msk [vmem:[%s11437_s29 + $0x3d8] sm:$0xf] %vm8225_vm9, %v9358_v52  ;;  %v7061_v58 = vmul.f32 %v10860_v21, %v6549_v40  ;;  %10869 = vpow2.f32 %v3595_v11  ;;  %v14938_v42 = vadd.f32 %v14697_v60, %v14605_v35 }
 0x594   : > { %v2969_v23 = vsub.f32 0.0, %v2713_v26  ;;  %v5016_v28 = vsel %vm3992_vm15, %v4504_v6, %v4760_v13  ;;  %v3349_v47 = vmul.f32 1.442695, %v2971_v17  ;;  %v2841_v62 = vand.u32 2147483647, %v14932_v31 }
 0x595   : > { %v3605_v9 = vmul.f32 1.442695, %v3099_v50  ;;  %v9228_v57 = vpack.c.bf16 %v7061_v58, %v7061_v58  ;;  %v2716_v49 = vand.u32 2147483647, %v14938_v42  ;;  %v14946_v55 = vadd.f32 %v14697_v60, %v14611_v18 }
 0x596   : > { %v3345_v14 = vmul.f32 1.442695, %v2969_v23  ;;  %10871 = vpow2.f32 %v3349_v47  ;;  %v3097_v53 = vsub.f32 0.0, %v2841_v62  ;;  %v6552_v46 = vmul.f32 %v5016_v28, %v14835_v36 }
 0x597   : > { %v10862_v22 = vpop.eup %10861  ;;  %8342 = vst.msk [vmem:[%s11437_s29 + $0x1d0] sm:$0xf] %vm8225_vm9, %v9228_v57  ;;  %10873 = vpow2.f32 %v3605_v9  ;;  %v2972_v6 = vsub.f32 0.0, %v2716_v49  ;;  %v2844_v18 = vand.u32 2147483647, %v14946_v55  ;;  %vm4120_vm0 = vcmp.ge.f32.partialorder %v14862_v15, 0.0 }
 0x598   : > { %v10864_v35 = vpop.eup %10863  ;;  %v7189_v10 = vmul.f32 %v10862_v22, %v6677_v63  ;;  %v3601_v32 = vmul.f32 1.442695, %v3097_v53  ;;  %10875 = vpow2.f32 %v3345_v14  ;;  %vm3990_vm1 = vcmp.ge.f32.partialorder %v14878_v8, 0.0 }
 0x599   : > { %v3864_v43 = vmul.f32 %v10864_v35, %v10864_v35  ;;  %v4376_v48 = vmul.f32 2.0, %v10864_v35  ;;  %v10866_v56 = vpop.eup %10865  ;;  %v3351_v4 = vmul.f32 1.442695, %v2972_v6  ;;  %vm4118_vm2 = vcmp.ge.f32.partialorder %v14904_v7, 0.0 }
 0x59a   : > { %v9356_v3 = vpack.c.bf16 %v7189_v10, %v7189_v10  ;;  %v10868_v2 = vpop.eup %10867  ;;  %v7064_v54 = vmul.f32 %v10866_v56, %v6552_v46  ;;  %10877 = vpow2.f32 %v3601_v32  ;;  %v3100_v11 = vsub.f32 0.0, %v2844_v18 }
 0x59b   : > { %v4632_v34 = vadd.f32 1.0, %v4376_v48  ;;  %v5400_v25 = vmul.f32 2.0, %v3864_v43  ;;  %v5912_v37 = vadd.f32 2.0, %v4376_v48  ;;  %v3734_v38 = vmul.f32 %v10868_v2, %v10868_v2 }
 0x59c   : > { %8470 = vst.msk [vmem:[%s11437_s29 + $0x3d0] sm:$0xf] %vm8225_vm9, %v9356_v3  ;;  %v4246_v19 = vmul.f32 2.0, %v10868_v2  ;;  %v9231_v36 = vpack.c.bf16 %v7064_v54, %v7064_v54  ;;  %v4888_v61 = vadd.f32 %v4376_v48, %v3864_v43  ;;  %10879 = vpow2.f32 %v3351_v4 }
 0x59d   : > { %v5656_v44 = vadd.f32 %v5400_v25, %v4632_v34  ;;  %v10870_v51 = vpop.eup %10869  ;;  %v6168_v24 = vadd.f32 %v5912_v37, %v3864_v43  ;;  %v5270_v13 = vmul.f32 2.0, %v3734_v38  ;;  %vm3995_vm3 = vcmp.ge.f32.partialorder %v14913_v12, 0.0 }
 0x59e   : > { %v4502_v0 = vadd.f32 1.0, %v4246_v19  ;;  %8345 = vst.msk [vmem:[%s11437_s29 + $0x1dc] sm:$0xf] %vm8225_vm9, %v9231_v36  ;;  %v5782_v27 = vadd.f32 2.0, %v4246_v19  ;;  %v3862_v1 = vmul.f32 %v10870_v51, %v10870_v51  ;;  %v4374_v52 = vmul.f32 2.0, %v10870_v51 }
 0x59f   : > { %v6424_v40 = vsel %vm4120_vm0, %v5656_v44, %v6168_v24  ;;  %v5144_v21 = vsel %vm4120_vm0, %v4632_v34, %v4888_v61  ;;  %v4758_v58 = vadd.f32 %v4246_v19, %v3734_v38  ;;  %vm4123_vm4 = vcmp.ge.f32.partialorder %v14917_v29, 0.0 }
 0x5a0   : > { %v10872_v26 = vpop.eup %10871  ;;  %10881 = vrcp.f32 %v6424_v40  ;;  %v5526_v63 = vadd.f32 %v5270_v13, %v4502_v0  ;;  %v6038_v17 = vadd.f32 %v5782_v27, %v3734_v38  ;;  %v4630_v23 = vadd.f32 1.0, %v4374_v52 }
 0x5a1   : > { %v10874_v50 = vpop.eup %10873  ;;  %v5398_v28 = vmul.f32 2.0, %v3862_v1  ;;  %v5910_v47 = vadd.f32 2.0, %v4374_v52  ;;  %v3739_v62 = vmul.f32 %v10872_v26, %v10872_v26  ;;  %v4251_v57 = vmul.f32 2.0, %v10872_v26 }
 0x5a2   : > { %v6294_v9 = vsel %vm3990_vm1, %v5526_v63, %v6038_v17  ;;  %v3867_v14 = vmul.f32 %v10874_v50, %v10874_v50  ;;  %v10876_v49 = vpop.eup %10875  ;;  %v4886_v22 = vadd.f32 %v4374_v52, %v3862_v1  ;;  %v6680_v10 = vmul.f32 %v5144_v21, %v14862_v15 }
 0x5a3   : > { %10883 = vrcp.f32 %v6294_v9  ;;  %v5654_v53 = vadd.f32 %v5398_v28, %v4630_v23  ;;  %v6166_v35 = vadd.f32 %v5910_v47, %v3862_v1  ;;  %v4507_v6 = vadd.f32 1.0, %v4251_v57 }
 0x5a4   : > { %v5275_v46 = vmul.f32 2.0, %v3739_v62  ;;  %v14966_v43 = vadd.f32 %v14697_v60, %v14634_v39  ;;  %v10878_v48 = vpop.eup %10877  ;;  %v5787_v56 = vadd.f32 2.0, %v4251_v57  ;;  %v4379_v3 = vmul.f32 2.0, %v10874_v50 }
 0x5a5   : > { %v6422_v32 = vsel %vm4118_vm2, %v5654_v53, %v6166_v35  ;;  %v5403_v18 = vmul.f32 2.0, %v3867_v14  ;;  %v5014_v2 = vsel %vm3990_vm1, %v4502_v0, %v4758_v58  ;;  %v3737_v34 = vmul.f32 %v10876_v49, %v10876_v49 }
 0x5a6   : > { %10885 = vrcp.f32 %v6422_v32  ;;  %v5531_v54 = vadd.f32 %v5275_v46, %v4507_v6  ;;  %vm3993_vm5 = vcmp.ge.f32.partialorder %v14921_v33, 0.0  ;;  %v5142_v15 = vsel %vm4118_vm2, %v4630_v23, %v4886_v22  ;;  %v10880_v36 = vpop.eup %10879 }
 0x5a7   : > { %v6043_v39 = vadd.f32 %v5787_v56, %v3739_v62  ;;  %v4635_v60 = vadd.f32 1.0, %v4379_v3  ;;  %v3607_v25 = vmul.f32 1.442695, %v3100_v11  ;;  %v5915_v4 = vadd.f32 2.0, %v4379_v3 }
 0x5a8   : > { %v4249_v37 = vmul.f32 2.0, %v10876_v49  ;;  %v5273_v38 = vmul.f32 2.0, %v3737_v34  ;;  %v3865_v19 = vmul.f32 %v10878_v48, %v10878_v48  ;;  %v4763_v61 = vadd.f32 %v4251_v57, %v3739_v62 }
 0x5a9   : > { %v6299_v44 = vsel %vm3995_vm3, %v5531_v54, %v6043_v39  ;;  %v5659_v51 = vadd.f32 %v5403_v18, %v4635_v60  ;;  %v4377_v24 = vmul.f32 2.0, %v10878_v48  ;;  %v4891_v13 = vadd.f32 %v4379_v3, %v3867_v14  ;;  %v15004_v39 = vld [vmem:[%s15170_s2] ss:$0 sm:$0xff] }
 0x5aa   : > { %v10882_v0 = vpop.eup %10881  ;;  %10887 = vrcp.f32 %v6299_v44  ;;  %v6171_v27 = vadd.f32 %v5915_v4, %v3867_v14  ;;  %v4505_v1 = vadd.f32 1.0, %v4249_v37  ;;  %vm4121_vm6 = vcmp.ge.f32.partialorder %v14932_v31, 0.0 }
 0x5ab   : > { %v7192_v52 = vmul.f32 %v10882_v0, %v6680_v10  ;;  %v5785_v40 = vadd.f32 2.0, %v4249_v37  ;;  %v14978_v11 = vadd.f32 1.0, %v4377_v24  ;;  %v2714_v26 = vand.u32 2147483647, %v14966_v43 }
 0x5ac   : > { %v6550_v21 = vmul.f32 %v5014_v2, %v14878_v8  ;;  %v6427_v63 = vsel %vm4123_vm4, %v5659_v51, %v6171_v27  ;;  %v5529_v17 = vadd.f32 %v5273_v38, %v4505_v1  ;;  %v5401_v50 = vmul.f32 2.0, %v3865_v19 }
 0x5ad   : > { %v10884_v58 = vpop.eup %10883  ;;  %v9359_v23 = vpack.c.bf16 %v7192_v52, %v7192_v52  ;;  %v6678_v28 = vmul.f32 %v5142_v15, %v14904_v7  ;;  %10889 = vrcp.f32 %v6427_v63  ;;  %v6041_v47 = vadd.f32 %v5785_v40, %v3737_v34 }
 0x5ae   : > { %vm3996_vm7 = vcmp.ge.f32.partialorder %v14938_v42, 0.0  ;;  %v7062_v9 = vmul.f32 %v10884_v58, %v6550_v21  ;;  %v5019_v62 = vsel %vm3995_vm3, %v4507_v6, %v4763_v61  ;;  %v5147_v8 = vsel %vm4123_vm4, %v4635_v60, %v4891_v13 }
 0x5af   : > { %v4761_v57 = vadd.f32 %v4249_v37, %v3737_v34  ;;  %8473 = vst.msk [vmem:[%s11437_s29 + $0x3dc] sm:$0xf] %vm8225_vm9, %v9359_v23  ;;  %v6297_v14 = vsel %vm3993_vm5, %v5529_v17, %v6041_v47  ;;  %v5657_v7 = vadd.f32 %v5401_v50, %v14978_v11  ;;  %v5913_v49 = vadd.f32 2.0, %v4377_v24 }
 0x5b0   : > { %v3740_v22 = vmul.f32 %v10880_v36, %v10880_v36  ;;  %v10886_v53 = vpop.eup %10885  ;;  %v9229_v35 = vpack.c.bf16 %v7062_v9, %v7062_v9  ;;  %10891 = vrcp.f32 %v6297_v14  ;;  %v4252_v10 = vmul.f32 2.0, %v10880_v36 }
 0x5b1   : > { %v2970_v46 = vsub.f32 0.0, %v2714_v26  ;;  %v7190_v6 = vmul.f32 %v10886_v53, %v6678_v28  ;;  %v6169_v48 = vadd.f32 %v5913_v49, %v3865_v19  ;;  %10893 = vpow2.f32 %v3607_v25 }
 0x5b2   : > { %v5276_v32 = vmul.f32 2.0, %v3740_v22  ;;  %8343 = vst.msk [vmem:[%s11437_s29 + $0x1d4] sm:$0xf] %vm8225_vm9, %v9229_v35  ;;  %v6555_v56 = vmul.f32 %v5019_v62, %v14913_v12  ;;  %v4508_v3 = vadd.f32 1.0, %v4252_v10  ;;  %v5788_v18 = vadd.f32 2.0, %v4252_v10 }
 0x5b3   : > { %v3347_v2 = vmul.f32 1.442695, %v2970_v46  ;;  %v9357_v54 = vpack.c.bf16 %v7190_v6, %v7190_v6  ;;  %v6683_v34 = vmul.f32 %v5147_v8, %v14917_v29  ;;  %v6425_v15 = vsel %vm4121_vm6, %v5657_v7, %v6169_v48 }
 0x5b4   : > { %v15008_v60 = vadd.f32 %v15004_v39, %v14651_v16  ;;  %v10888_v25 = vpop.eup %10887  ;;  %v4889_v12 = vadd.f32 %v4377_v24, %v3865_v19  ;;  %10895 = vrcp.f32 %v6425_v15  ;;  %v5532_v4 = vadd.f32 %v5276_v32, %v4508_v3 }
 0x5b5   : > { %v6044_v37 = vadd.f32 %v5788_v18, %v3740_v22  ;;  %8471 = vst.msk [vmem:[%s11437_s29 + $0x3d4] sm:$0xf] %vm8225_vm9, %v9357_v54  ;;  %v7067_v29 = vmul.f32 %v10888_v25, %v6555_v56  ;;  %v5017_v38 = vsel %vm3993_vm5, %v4505_v1, %v4761_v57  ;;  %10897 = vpow2.f32 %v3347_v2 }
 0x5b6   : > { %v2842_v36 = vand.u32 2147483647, %v15008_v60  ;;  %v4764_v61 = vadd.f32 %v4252_v10, %v3740_v22  ;;  %v15019_v19 = vadd.f32 %v15004_v39, %v14667_v5  ;;  %v15023_v44 = vadd.f32 %v15004_v39, %v14669_v20 }
 0x5b7   : > { %v6300_v16 = vsel %vm3996_vm7, %v5532_v4, %v6044_v37  ;;  %v10890_v51 = vpop.eup %10889  ;;  %v9234_v24 = vpack.c.bf16 %v7067_v29, %v7067_v29  ;;  %v15027_v13 = vadd.f32 %v15004_v39, %v14680_v41  ;;  %v6553_v5 = vmul.f32 %v5017_v38, %v14921_v33 }
 0x5b8   : > { %10899 = vrcp.f32 %v6300_v16  ;;  %v3098_v0 = vsub.f32 0.0, %v2842_v36  ;;  %v7195_v27 = vmul.f32 %v10890_v51, %v6683_v34  ;;  %v2719_v1 = vand.u32 2147483647, %v15019_v19 }
 0x5b9   : > { %v2847_v52 = vand.u32 2147483647, %v15023_v44  ;;  %8348 = vst.msk [vmem:[%s11437_s29 + $0x1e8] sm:$0xf] %vm8225_vm9, %v9234_v24  ;;  %v5145_v20 = vsel %vm4121_vm6, %v14978_v11, %v4889_v12  ;;  %v2717_v26 = vand.u32 2147483647, %v15027_v13  ;;  %v15040_v50 = vadd.f32 %v15004_v39, %v14707_v30 }
 0x5ba   : > { %v3603_v40 = vmul.f32 1.442695, %v3098_v0  ;;  %v10892_v21 = vpop.eup %10891  ;;  %v9362_v41 = vpack.c.bf16 %v7195_v27, %v7195_v27  ;;  %v2975_v63 = vsub.f32 0.0, %v2719_v1  ;;  %v5020_v33 = vsel %vm3996_vm7, %v4508_v3, %v4764_v61 }
 0x5bb   : > { %v3103_v17 = vsub.f32 0.0, %v2847_v52  ;;  %v10894_v58 = vpop.eup %10893  ;;  %v7065_v23 = vmul.f32 %v10892_v21, %v6553_v5  ;;  %v2973_v28 = vsub.f32 0.0, %v2717_v26  ;;  %v15048_v62 = vadd.f32 %v15004_v39, %v14724_v45 }
 0x5bc   : > { %10901 = vpow2.f32 %v3603_v40  ;;  %8476 = vst.msk [vmem:[%s11437_s29 + $0x3e8] sm:$0xf] %vm8225_vm9, %v9362_v41  ;;  %v3868_v11 = vmul.f32 %v10894_v58, %v10894_v58  ;;  %v4380_v47 = vmul.f32 2.0, %v10894_v58  ;;  %v3357_v9 = vmul.f32 1.442695, %v2975_v63 }
 0x5bd   : > { %v9232_v8 = vpack.c.bf16 %v7065_v23, %v7065_v23  ;;  %v6681_v30 = vmul.f32 %v5145_v20, %v14932_v31  ;;  %v3613_v57 = vmul.f32 1.442695, %v3103_v17  ;;  %v2845_v14 = vand.u32 2147483647, %v15040_v50 }
 0x5be   : > { %v10896_v7 = vpop.eup %10895  ;;  %v4636_v49 = vadd.f32 1.0, %v4380_v47  ;;  %v5404_v22 = vmul.f32 2.0, %v3868_v11  ;;  %v5916_v53 = vadd.f32 2.0, %v4380_v47  ;;  %v3353_v35 = vmul.f32 1.442695, %v2973_v28 }
 0x5bf   : > { %v10898_v10 = vpop.eup %10897  ;;  %8346 = vst.msk [vmem:[%s11437_s29 + $0x1e0] sm:$0xf] %vm8225_vm9, %v9232_v8  ;;  %v7193_v46 = vmul.f32 %v10896_v7, %v6681_v30  ;;  %v6556_v6 = vmul.f32 %v5020_v33, %v14938_v42  ;;  %10903 = vpow2.f32 %v3357_v9  ;;  %v3101_v45 = vsub.f32 0.0, %v2845_v14 }
 0x5c0   : > { %v5660_v48 = vadd.f32 %v5404_v22, %v4636_v49  ;;  %v6172_v32 = vadd.f32 %v5916_v53, %v3868_v11  ;;  %v3738_v31 = vmul.f32 %v10898_v10, %v10898_v10  ;;  %v2720_v56 = vand.u32 2147483647, %v15048_v62 }
 0x5c1   : > { %v9360_v18 = vpack.c.bf16 %v7193_v46, %v7193_v46  ;;  %vm4124_vm8 = vcmp.ge.f32.partialorder %v14946_v55, 0.0  ;;  %v4250_v2 = vmul.f32 2.0, %v10898_v10  ;;  %10905 = vpow2.f32 %v3613_v57 }
 0x5c2   : > { %v10900_v3 = vpop.eup %10899  ;;  %v6428_v34 = vsel %vm4124_vm8, %v5660_v48, %v6172_v32  ;;  %v5274_v42 = vmul.f32 2.0, %v3738_v31  ;;  %10907 = vpow2.f32 %v3353_v35  ;;  %v4892_v15 = vadd.f32 %v4380_v47, %v3868_v11 }
 0x5c3   : > { %v7068_v54 = vmul.f32 %v10900_v3, %v6556_v6  ;;  %8474 = vst.msk [vmem:[%s11437_s29 + $0x3e0] sm:$0xf] %vm8225_vm9, %v9360_v18  ;;  %10909 = vrcp.f32 %v6428_v34  ;;  %v4506_v25 = vadd.f32 1.0, %v4250_v2  ;;  %v5786_v12 = vadd.f32 2.0, %v4250_v2 }
 0x5c4   : > { %v3609_v37 = vmul.f32 1.442695, %v3101_v45  ;;  %v2976_v29 = vsub.f32 0.0, %v2720_v56  ;;  %v15063_v16 = vadd.f32 %v15004_v39, %v14734_v59  ;;  %vm3994_vm10 = vcmp.ge.f32.partialorder %v14966_v43, 0.0  ;;  %v15222_v45 = vld [vmem:[#allocation9_spill] sm:$0xff] }
 0x5c5   : > { %v9235_v4 = vpack.c.bf16 %v7068_v54, %v7068_v54  ;;  %v5530_v36 = vadd.f32 %v5274_v42, %v4506_v25  ;;  %v6042_v61 = vadd.f32 %v5786_v12, %v3738_v31  ;;  %v5148_v0 = vsel %vm4124_vm8, %v4636_v49, %v4892_v15 }
 0x5c6   : > { %v10902_v38 = vpop.eup %10901  ;;  %10911 = vpow2.f32 %v3609_v37  ;;  %v4762_v27 = vadd.f32 %v4250_v2, %v3738_v31  ;;  %v3359_v52 = vmul.f32 1.442695, %v2976_v29  ;;  %v2848_v59 = vand.u32 2147483647, %v15063_v16 }
 0x5c7   : > { %8349 = vst.msk [vmem:[%s11437_s29 + $0x1ec] sm:$0xf] %vm8225_vm9, %v9235_v4  ;;  %v3866_v51 = vmul.f32 %v10902_v38, %v10902_v38  ;;  %v4378_v24 = vmul.f32 2.0, %v10902_v38  ;;  %v6298_v1 = vsel %vm3994_vm10, %v5530_v36, %v6042_v61  ;;  %vm4122_vm11 = vcmp.ge.f32.partialorder %v15008_v60, 0.0 }
 0x5c8   : > { %10913 = vrcp.f32 %v6298_v1  ;;  %vm3999_vm12 = vcmp.ge.f32.partialorder %v15019_v19, 0.0  ;;  %v6684_v58 = vmul.f32 %v5148_v0, %v14946_v55  ;;  %v5018_v23 = vsel %vm3994_vm10, %v4506_v25, %v4762_v27 }
 0x5c9   : > { %v4634_v5 = vadd.f32 1.0, %v4378_v24  ;;  %v5402_v20 = vmul.f32 2.0, %v3866_v51  ;;  %v10904_v40 = vpop.eup %10903  ;;  %v5914_v26 = vadd.f32 2.0, %v4378_v24  ;;  %10915 = vpow2.f32 %v3359_v52 }
 0x5ca   : > { %v3743_v41 = vmul.f32 %v10904_v40, %v10904_v40  ;;  %v4255_v63 = vmul.f32 2.0, %v10904_v40  ;;  %v4890_v33 = vadd.f32 %v4378_v24, %v3866_v51  ;;  %vm4127_vm13 = vcmp.ge.f32.partialorder %v15023_v44, 0.0 }
 0x5cb   : > { %v5658_v21 = vadd.f32 %v5402_v20, %v4634_v5  ;;  %v10906_v17 = vpop.eup %10905  ;;  %v6170_v28 = vadd.f32 %v5914_v26, %v3866_v51  ;;  %v3104_v30 = vsub.f32 0.0, %v2848_v59  ;;  %v6554_v53 = vmul.f32 %v5018_v23, %v14966_v43 }
 0x5cc   : > { %v10908_v11 = vpop.eup %10907  ;;  %v4511_v47 = vadd.f32 1.0, %v4255_v63  ;;  %v5279_v9 = vmul.f32 2.0, %v3743_v41  ;;  %v5791_v8 = vadd.f32 2.0, %v4255_v63  ;;  %v3871_v7 = vmul.f32 %v10906_v17, %v10906_v17 }
 0x5cd   : > { %v10910_v57 = vpop.eup %10909  ;;  %v6426_v14 = vsel %vm4122_vm11, %v5658_v21, %v6170_v28  ;;  %v4383_v49 = vmul.f32 2.0, %v10906_v17  ;;  %v3741_v22 = vmul.f32 %v10908_v11, %v10908_v11  ;;  %v5146_v10 = vsel %vm4122_vm11, %v4634_v5, %v4890_v33 }
 0x5ce   : > { %v7196_v55 = vmul.f32 %v10910_v57, %v6684_v58  ;;  %10917 = vrcp.f32 %v6426_v14  ;;  %v5535_v35 = vadd.f32 %v5279_v9, %v4511_v47  ;;  %v6047_v46 = vadd.f32 %v5791_v8, %v3743_v41 }
 0x5cf   : > { %v4639_v6 = vadd.f32 1.0, %v4383_v49  ;;  %vm3997_vm14 = vcmp.ge.f32.partialorder %v15027_v13, 0.0  ;;  %v15087_v48 = vadd.f32 %v15004_v39, %v15222_v45  ;;  %v5407_v56 = vmul.f32 2.0, %v3871_v7 }
 0x5d0   : > { %v10912_v32 = vpop.eup %10911  ;;  %v9363_v31 = vpack.c.bf16 %v7196_v55, %v7196_v55  ;;  %v5919_v3 = vadd.f32 2.0, %v4383_v49  ;;  %v4253_v18 = vmul.f32 2.0, %v10908_v11  ;;  %v6303_v43 = vsel %vm3999_vm12, %v5535_v35, %v6047_v46 }
 0x5d1   : > { %v5277_v2 = vmul.f32 2.0, %v3741_v22  ;;  %v3869_v54 = vmul.f32 %v10912_v32, %v10912_v32  ;;  %v3615_v34 = vmul.f32 1.442695, %v3104_v30  ;;  %v4767_v15 = vadd.f32 %v4255_v63, %v3743_v41 }
 0x5d2   : > { %v10914_v42 = vpop.eup %10913  ;;  %8477 = vst.msk [vmem:[%s11437_s29 + $0x3ec] sm:$0xf] %vm8225_vm9, %v9363_v31  ;;  %10919 = vrcp.f32 %v6303_v43  ;;  %v5663_v25 = vadd.f32 %v5407_v56, %v4639_v6  ;;  %v6175_v12 = vadd.f32 %v5919_v3, %v3871_v7  ;;  %v4509_v29 = vadd.f32 1.0, %v4253_v18 }
 0x5d3   : > { %v10916_v4 = vpop.eup %10915  ;;  %v7066_v37 = vmul.f32 %v10914_v42, %v6554_v53  ;;  %v5789_v38 = vadd.f32 2.0, %v4253_v18  ;;  %v2718_v36 = vand.u32 2147483647, %v15087_v48  ;;  %v4381_v51 = vmul.f32 2.0, %v10912_v32 }
 0x5d4   : > { %v6431_v61 = vsel %vm4127_vm13, %v5663_v25, %v6175_v12  ;;  %v5405_v24 = vmul.f32 2.0, %v3869_v54  ;;  %v3744_v0 = vmul.f32 %v10916_v4, %v10916_v4  ;;  %v5533_v1 = vadd.f32 %v5277_v2, %v4509_v29 }
 0x5d5   : > { %v9233_v27 = vpack.c.bf16 %v7066_v37, %v7066_v37  ;;  %10921 = vrcp.f32 %v6431_v61  ;;  %vm4125_vm15 = vcmp.ge.f32.partialorder %v15040_v50, 0.0  ;;  %v6682_v52 = vmul.f32 %v5146_v10, %v15008_v60 }
 0x5d6   : > { %v5023_v5 = vsel %vm3999_vm12, %v4511_v47, %v4767_v15  ;;  %v6045_v20 = vadd.f32 %v5789_v38, %v3741_v22  ;;  %v4637_v59 = vadd.f32 1.0, %v4381_v51  ;;  %v4895_v40 = vadd.f32 %v4383_v49, %v3871_v7  ;;  %v15223_v7 = vld [vmem:[#allocation2_spill] sm:$0xff] }
 0x5d7   : > { %8347 = vst.msk [vmem:[%s11437_s29 + $0x1e4] sm:$0xf] %vm8225_vm9, %v9233_v27  ;;  %v5917_v26 = vadd.f32 2.0, %v4381_v51  ;;  %v4256_v21 = vmul.f32 2.0, %v10916_v4  ;;  %10923 = vpow2.f32 %v3615_v34  ;;  %v5280_v58 = vmul.f32 2.0, %v3744_v0 }
 0x5d8   : > { %v10918_v41 = vpop.eup %10917  ;;  %v6301_v63 = vsel %vm3997_vm14, %v5533_v1, %v6045_v20  ;;  %v5661_v17 = vadd.f32 %v5405_v24, %v4637_v59  ;;  %v2974_v23 = vsub.f32 0.0, %v2718_v36  ;;  %v6559_v60 = vmul.f32 %v5023_v5, %v15019_v19 }
 0x5d9   : > { %v7194_v33 = vmul.f32 %v10918_v41, %v6682_v52  ;;  %10925 = vrcp.f32 %v6301_v63  ;;  %v6173_v28 = vadd.f32 %v5917_v26, %v3869_v54  ;;  %v4765_v11 = vadd.f32 %v4253_v18, %v3741_v22 }
 0x5da   : > { %v4512_v47 = vadd.f32 1.0, %v4256_v21  ;;  %v5792_v9 = vadd.f32 2.0, %v4256_v21  ;;  %v3355_v8 = vmul.f32 1.442695, %v2974_v23  ;;  %v5151_v57 = vsel %vm4127_vm13, %v4639_v6, %v4895_v40 }
 0x5db   : > { %v9361_v30 = vpack.c.bf16 %v7194_v33, %v7194_v33  ;;  %v6429_v14 = vsel %vm4125_vm15, %v5661_v17, %v6173_v28  ;;  %v15111_v49 = vadd.f32 %v15004_v39, %v15223_v7  ;;  %vm4000_vm0 = vcmp.ge.f32.partialorder %v15048_v62, 0.0 }
 0x5dc   : > { %v10920_v55 = vpop.eup %10919  ;;  %10927 = vrcp.f32 %v6429_v14  ;;  %v5536_v19 = vadd.f32 %v5280_v58, %v4512_v47  ;;  %v6048_v53 = vadd.f32 %v5792_v9, %v3744_v0  ;;  %v6687_v10 = vmul.f32 %v5151_v57, %v15023_v44 }
 0x5dd   : > { %8475 = vst.msk [vmem:[%s11437_s29 + $0x3e4] sm:$0xf] %vm8225_vm9, %v9361_v30  ;;  %v7071_v22 = vmul.f32 %v10920_v55, %v6559_v60  ;;  %10929 = vpow2.f32 %v3355_v8  ;;  %v2846_v35 = vand.u32 2147483647, %v15111_v49  ;;  %v5021_v46 = vsel %vm3997_vm14, %v4509_v29, %v4765_v11 }
 0x5de   : > { %v4893_v39 = vadd.f32 %v4381_v51, %v3869_v54  ;;  %v6304_v6 = vsel %vm4000_vm0, %v5536_v19, %v6048_v53  ;;  %v6557_v18 = vmul.f32 %v5021_v46, %v15027_v13  ;;  %v4768_v43 = vadd.f32 %v4256_v21, %v3744_v0 }
 0x5df   : > { %v10922_v45 = vpop.eup %10921  ;;  %v9238_v32 = vpack.c.bf16 %v7071_v22, %v7071_v22  ;;  %10931 = vrcp.f32 %v6304_v6  ;;  %v3102_v31 = vsub.f32 0.0, %v2846_v35  ;;  %vm4128_vm1 = vcmp.ge.f32.partialorder %v15063_v16, 0.0 }
 0x5e0   : > { %v7199_v56 = vmul.f32 %v10922_v45, %v6687_v10  ;;  %v5149_v54 = vsel %vm4125_vm15, %v4637_v59, %v4893_v39  ;;  %v5024_v13 = vsel %vm4000_vm0, %v4512_v47, %v4768_v43  ;;  %vm3998_vm2 = vcmp.ge.f32.partialorder %v15087_v48, 0.0 }
 0x5e1   : > { %v10924_v3 = vpop.eup %10923  ;;  %8352 = vst.msk [vmem:[%s11437_s29 + $0x1f8] sm:$0xf] %vm8225_vm9, %v9238_v32  ;;  %v3611_v44 = vmul.f32 1.442695, %v3102_v31  ;;  %v6685_v37 = vmul.f32 %v5149_v54, %v15040_v50  ;;  %v6560_v27 = vmul.f32 %v5024_v13, %v15048_v62  ;;  %vm4126_vm3 = vcmp.ge.f32.partialorder %v15111_v49, 0.0 }
 0x5e2   : > { %v9366_v2 = vpack.c.bf16 %v7199_v56, %v7199_v56  ;;  %v3872_v34 = vmul.f32 %v10924_v3, %v10924_v3  ;;  %v4384_v42 = vmul.f32 2.0, %v10924_v3 }
 0x5e3   : > { %v10926_v15 = vpop.eup %10925  ;;  %10933 = vpow2.f32 %v3611_v44 }
 0x5e4   : > { %8480 = vst.msk [vmem:[%s11437_s29 + $0x3f8] sm:$0xf] %vm8225_vm9, %v9366_v2  ;;  %v7069_v25 = vmul.f32 %v10926_v15, %v6557_v18  ;;  %v4640_v12 = vadd.f32 1.0, %v4384_v42  ;;  %v5408_v4 = vmul.f32 2.0, %v3872_v34  ;;  %v5920_v29 = vadd.f32 2.0, %v4384_v42 }
 0x5e5   : > { %v4896_v63 = vadd.f32 %v4384_v42, %v3872_v34 }
 0x5e6   : > { %v10928_v38 = vpop.eup %10927  ;;  %v9236_v36 = vpack.c.bf16 %v7069_v25, %v7069_v25  ;;  %v5664_v61 = vadd.f32 %v5408_v4, %v4640_v12  ;;  %v6176_v0 = vadd.f32 %v5920_v29, %v3872_v34 }
 0x5e7   : > { %v10930_v51 = vpop.eup %10929  ;;  %v7197_v24 = vmul.f32 %v10928_v38, %v6685_v37  ;;  %v5152_v28 = vsel %vm4128_vm1, %v4640_v12, %v4896_v63 }
 0x5e8   : > { %8350 = vst.msk [vmem:[%s11437_s29 + $0x1f0] sm:$0xf] %vm8225_vm9, %v9236_v36  ;;  %v3742_v1 = vmul.f32 %v10930_v51, %v10930_v51  ;;  %v4254_v50 = vmul.f32 2.0, %v10930_v51  ;;  %v6432_v20 = vsel %vm4128_vm1, %v5664_v61, %v6176_v0  ;;  %v6688_v57 = vmul.f32 %v5152_v28, %v15063_v16 }
 0x5e9   : > { %v10932_v52 = vpop.eup %10931  ;;  %v9364_v5 = vpack.c.bf16 %v7197_v24, %v7197_v24  ;;  %10935 = vrcp.f32 %v6432_v20 }
 0x5ea   : > { %v7072_v59 = vmul.f32 %v10932_v52, %v6560_v27  ;;  %v4510_v40 = vadd.f32 1.0, %v4254_v50  ;;  %v5278_v26 = vmul.f32 2.0, %v3742_v1  ;;  %v5790_v21 = vadd.f32 2.0, %v4254_v50 }
 0x5eb   : > { %8478 = vst.msk [vmem:[%s11437_s29 + $0x3f0] sm:$0xf] %vm8225_vm9, %v9364_v5  ;;  %v4766_v8 = vadd.f32 %v4254_v50, %v3742_v1 }
 0x5ec   : > { %v9239_v41 = vpack.c.bf16 %v7072_v59, %v7072_v59  ;;  %v5534_v17 = vadd.f32 %v5278_v26, %v4510_v40  ;;  %v6046_v58 = vadd.f32 %v5790_v21, %v3742_v1 }
 0x5ed   : > { %v10934_v62 = vpop.eup %10933  ;;  %v5022_v53 = vsel %vm3998_vm2, %v4510_v40, %v4766_v8 }
 0x5ee   : > { %8353 = vst.msk [vmem:[%s11437_s29 + $0x1fc] sm:$0xf] %vm8225_vm9, %v9239_v41  ;;  %v3870_v23 = vmul.f32 %v10934_v62, %v10934_v62  ;;  %v4382_v33 = vmul.f32 2.0, %v10934_v62  ;;  %v6302_v60 = vsel %vm3998_vm2, %v5534_v17, %v6046_v58  ;;  %v6558_v10 = vmul.f32 %v5022_v53, %v15087_v48 }
 0x5ef   : > { %10937 = vrcp.f32 %v6302_v60 }
 0x5f0   : > { %v4638_v11 = vadd.f32 1.0, %v4382_v33  ;;  %v5406_v47 = vmul.f32 2.0, %v3870_v23  ;;  %v5918_v9 = vadd.f32 2.0, %v4382_v33  ;;  %v4894_v35 = vadd.f32 %v4382_v33, %v3870_v23 }
 0x5f2   : > { %v5662_v30 = vadd.f32 %v5406_v47, %v4638_v11  ;;  %v6174_v14 = vadd.f32 %v5918_v9, %v3870_v23  ;;  %v5150_v39 = vsel %vm4126_vm3, %v4638_v11, %v4894_v35 }
 0x5f3   : > { %v10936_v7 = vpop.eup %10935  ;;  %v6686_v45 = vmul.f32 %v5150_v39, %v15111_v49 }
 0x5f4   : > { %v7200_v55 = vmul.f32 %v10936_v7, %v6688_v57  ;;  %v6430_v19 = vsel %vm4126_vm3, %v5662_v30, %v6174_v14 }
 0x5f5   : > { %10939 = vrcp.f32 %v6430_v19 }
 0x5f6   : > { %v9367_v22 = vpack.c.bf16 %v7200_v55, %v7200_v55 }
 0x5f8   : > { %8481 = vst.msk [vmem:[%s11437_s29 + $0x3fc] sm:$0xf] %vm8225_vm9, %v9367_v22 }
 0x5f9   : > { %v10938_v46 = vpop.eup %10937 }
 0x5fa   : > { %v7070_v16 = vmul.f32 %v10938_v46, %v6558_v10 }
 0x5fc   : > { %v9237_v6 = vpack.c.bf16 %v7070_v16, %v7070_v16 }
 0x5fe   : > { %8351 = vst.msk [vmem:[%s11437_s29 + $0x1f4] sm:$0xf] %vm8225_vm9, %v9237_v6 }
 0x5ff   : > { %v10940_v32 = vpop.eup %10939 }
 0x600   : > { %v7198_v31 = vmul.f32 %v10940_v32, %v6686_v45 }
 0x602   : > { %v9365_v56 = vpack.c.bf16 %v7198_v31, %v7198_v31 }
 0x604   : > { %8479 = vst.msk [vmem:[%s11437_s29 + $0x3f4] sm:$0xf] %vm8225_vm9, %v9365_v56 }
 0x605 PF: > { %s13_s14 = sadd.s32 1, %s10974_s14   ;;  %s15224_s12 = smov %s10970_s13 }
 0x606   : > { %p10_p5 = scmp.ge.s32.totalorder %s13_s14, 6   ;;  %s15225_s13 = smov %s15227_s15 }
 0x608   :  { %12 = sbr.rel (!%p10_p5) target bundleno = 2 (0x2), region = 68 }

</bundles_post_ra>
